<compile_context>
chip_gen: v7x
topology: tpu7x:2x2x1
jax: 0.10.0
libtpu: 0.0.40
codegen_flags: <defaults>
</compile_context>

<pallas_src>
import numpy as np
import jax
import jax.numpy as jnp
from jax.experimental import pallas as pl
from jax.experimental.pallas import tpu as pltpu

# ----- model hyper-parameters (small, consistent with the module) -----
Y_DIM = 4
X_DIM = 4
HIDDEN = 32
N_BLOCKS = 4
CLAMP = 2.0
D1 = Y_DIM // 2          # split_len1
D2 = Y_DIM - D1          # split_len2

# sublane fold factor: each channel of the state is an (F, TB/F) row group.
F = 8
LANE = 128
UNIT = F * LANE          # minimum batch granularity of one tile (= 1024)
MAX_TB = 8192            # largest batch tile (amortizes per-grid-step overhead)
FH = F * HIDDEN

_TAN3PI8 = 2.414213562373095
_TANPI8 = 0.4142135623730951
_K = CLAMP * 0.636                      # folded into atan constants
_KP2 = _K * (np.pi / 2)
_KP4 = _K * (np.pi / 4)

# PermuteRandom(seed=i): fixed, known at trace time -> folded into static
# row-group relabeling (no data movement in the kernel).
PERMS = [np.random.RandomState(i).permutation(Y_DIM) for i in range(N_BLOCKS)]


def _atan_scaled(x):
    """Computes K*atan(x) (K = CLAMP*0.636) via Cephes-style range reduction +
    odd minimax polynomial.  K is folded into the offsets and polynomial
    coefficients; the divides use EUP approximate reciprocals (free slot)."""
    ax = jnp.abs(x)
    big = ax > _TAN3PI8
    med = ax > _TANPI8                      # only consulted where not big
    inv_ax = pl.reciprocal(ax, approx=True)          # selected only when big
    inv_ax1 = pl.reciprocal(ax + 1.0, approx=True)
    xr = jnp.where(big, -inv_ax, jnp.where(med, (ax - 1.0) * inv_ax1, ax))
    off = jnp.where(big, _KP2, jnp.where(med, _KP4, 0.0))
    z = xr * xr
    p = (((_K * 8.05374449538e-2) * z - (_K * 1.38776856032e-1)) * z
         + (_K * 1.99777106478e-1)) * z - (_K * 3.33329491539e-1)
    r = off + xr * (_K + z * p)
    return jnp.where(x < 0.0, -r, r)


def _channel_sum(s, n_ch):
    """Sum the per-channel 8-row groups of s -> (F, TBc) per-fold jac rows."""
    acc = s[:F, :]
    for j in range(1, n_ch):
        acc = acc + s[j * F:(j + 1) * F, :]
    return acc


def cinn_kernel(y_ref, c_ref, wc_ref,
                w2ax_ref, w2b_ref, b2b_ref,
                w1ay_ref, w1b_ref, b1b_ref,
                z_ref, jac_ref):
    y = y_ref[...]                     # (Y_DIM*F, TBc): channel c at rows c*F..
    c = c_ref[...]                     # (X_DIM*F + 1, TBc): last row = ones

    # Loop-invariant condition projections for ALL 2*N_BLOCKS subnet calls as
    # one wide, lane-dense matmul; the trailing ones row of `c` carries the
    # first-layer biases (no VALU bias add).
    cproj = jnp.dot(wc_ref[...], c, preferred_element_type=jnp.float32)

    x1 = y[:D1 * F, :]                 # (D1*F, TBc)
    x2 = y[D1 * F:, :]                 # (D2*F, TBc)
    jac = jnp.zeros((F, y.shape[1]), jnp.float32)

    for i in range(N_BLOCKS):          # unrolled: n_blocks is static
        cp2 = cproj[(2 * i) * FH:(2 * i + 1) * FH, :]        # (F*HIDDEN, TBc)
        cp1 = cproj[(2 * i + 1) * FH:(2 * i + 2) * FH, :]

        # --- coupling 1: transform x1 with subnet2(cat(x2, cond)) ---
        h = jnp.maximum(
            jnp.dot(w2ax_ref[i], x2, preferred_element_type=jnp.float32) + cp2, 0.0)
        # TODO(synk): nn.Dropout(p=0.1) is implemented as eval-mode identity.
        r = jnp.dot(w2b_ref[i], h, preferred_element_type=jnp.float32) + b2b_ref[i]
        s2 = _atan_scaled(r[:D1 * F, :])        # (D1*F, TBc), full sublanes
        y1 = jnp.exp(s2) * x1 + r[D1 * F:, :]

        # --- coupling 2: transform x2 with subnet1(cat(y1, cond)) ---
        h = jnp.maximum(
            jnp.dot(w1ay_ref[i], y1, preferred_element_type=jnp.float32) + cp1, 0.0)
        r = jnp.dot(w1b_ref[i], h, preferred_element_type=jnp.float32) + b1b_ref[i]
        s1 = _atan_scaled(r[:D2 * F, :])
        y2 = jnp.exp(s1) * x2 + r[D2 * F:, :]

        # per-fold jac rows (one row per folded sub-batch; already per-sample)
        jac = jac + _channel_sum(s2, D1) + _channel_sum(s1, D2)

        # PermuteRandom(seed=i): static channel relabeling.  Every channel is
        # an 8-row group, so these slices/concats are pure vreg regrouping.
        ch = [y1[j * F:(j + 1) * F, :] for j in range(D1)] + \
             [y2[j * F:(j + 1) * F, :] for j in range(D2)]
        p = PERMS[i]
        x1 = jnp.concatenate([ch[int(p[j])] for j in range(D1)], axis=0)
        x2 = jnp.concatenate([ch[int(p[j])] for j in range(D1, Y_DIM)], axis=0)

    z_ref[...] = jnp.concatenate([x1, x2], axis=0)
    jac_ref[...] = jac


def cinn_forward(y, x, packed):
    """y: (B, Y_DIM) f32, x: (B, X_DIM) f32 -> (z (B, Y_DIM), log_jac (B,))."""
    B = y.shape[0]
    units_total = -(-B // UNIT)                       # ceil(B / 1024)
    max_units = MAX_TB // UNIT
    if units_total >= 2:
        # at least 2 grid tiles so the "parallel" axis shards across both
        # TensorCores on v7x (no effect on single-TC v5e/v6e).
        tb_units = min(max_units, -(-units_total // 2))
    else:
        tb_units = 1
    TB = tb_units * UNIT
    n_tiles = -(-units_total // tb_units)
    B_pad = n_tiles * TB
    TBc = TB // F                                     # lanes per tile (mult. of 128)
    NC = n_tiles * TBc

    def fold(a, dim):
        # (B, dim) -> (dim*F, n_tiles*TBc); sample i*TB + f*TBc + col lands at
        # row c*F + f, column i*TBc + col.  Zero padding is safe (results of
        # padded columns are sliced off).
        a = jnp.pad(a.astype(jnp.float32), ((0, B_pad - B), (0, 0)))
        a = a.reshape(n_tiles, F, TBc, dim)
        return a.transpose(3, 1, 0, 2).reshape(dim * F, NC)

    yF = fold(y, Y_DIM)
    cF = fold(x, X_DIM)
    # trailing ones row -> folds the fused first-layer biases into the wc matmul
    cF = jnp.concatenate([cF, jnp.ones((1, NC), jnp.float32)], axis=0)

    def tile_spec(rows):
        return pl.BlockSpec((rows, TBc), lambda i: (0, i))

    def const_spec(arr):
        nd = arr.ndim
        return pl.BlockSpec(arr.shape, lambda i, _nd=nd: (0,) * _nd)

    zF, jacF = pl.pallas_call(
        cinn_kernel,
        out_shape=(jax.ShapeDtypeStruct((Y_DIM * F, NC), jnp.float32),
                   jax.ShapeDtypeStruct((F, NC), jnp.float32)),
        grid=(n_tiles,),
        in_specs=[
            tile_spec(Y_DIM * F),              # yF
            tile_spec(X_DIM * F + 1),          # cF (+ ones row)
            const_spec(packed["wc"]),
            const_spec(packed["w2ax"]),
            const_spec(packed["w2b"]),
            const_spec(packed["b2b"]),
            const_spec(packed["w1ay"]),
            const_spec(packed["w1b"]),
            const_spec(packed["b1b"]),
        ],
        out_specs=(tile_spec(Y_DIM * F), tile_spec(F)),
        compiler_params=pltpu.CompilerParams(
            dimension_semantics=("parallel",),
            vmem_limit_bytes=40 * 1024 * 1024),   # covers v5e's 16 MiB default
    )(yF, cF,
      packed["wc"],
      packed["w2ax"], packed["w2b"], packed["b2b"],
      packed["w1ay"], packed["w1b"], packed["b1b"])

    z = zF.reshape(Y_DIM, F, n_tiles, TBc).transpose(2, 1, 3, 0).reshape(B_pad, Y_DIM)[:B]
    log_jac = jacF.reshape(F, n_tiles, TBc).transpose(1, 0, 2).reshape(B_pad)[:B]
    return z, log_jac


# ----------------- deterministic parameter init (synthetic) -----------------
def init_params(key):
    def linear(k, fan_in, fan_out):
        kw, kb = jax.random.split(k)
        bound = 1.0 / float(np.sqrt(fan_in))
        w = jax.random.uniform(kw, (fan_in, fan_out), jnp.float32, -bound, bound)
        b = jax.random.uniform(kb, (1, fan_out), jnp.float32, -bound, bound)
        return w, b

    keys = jax.random.split(key, 4 * N_BLOCKS)
    w1a, b1a, w1b, b1b = [], [], [], []
    w2a, b2a, w2b, b2b = [], [], [], []
    for i in range(N_BLOCKS):
        k0, k1, k2, k3 = keys[4 * i:4 * i + 4]
        # subnet1: Linear(D1 + X_DIM -> HIDDEN), ReLU, Dropout, Linear(HIDDEN -> 2*D2)
        w, b = linear(k0, D1 + X_DIM, HIDDEN); w1a.append(w); b1a.append(b)
        w, b = linear(k1, HIDDEN, 2 * D2);     w1b.append(w); b1b.append(b)
        # subnet2: Linear(D2 + X_DIM -> HIDDEN), ReLU, Dropout, Linear(HIDDEN -> 2*D1)
        w, b = linear(k2, D2 + X_DIM, HIDDEN); w2a.append(w); b2a.append(b)
        w, b = linear(k3, HIDDEN, 2 * D1);     w2b.append(w); b2b.append(b)

    return dict(
        w1a=jnp.stack(w1a), b1a=jnp.stack(b1a), w1b=jnp.stack(w1b), b1b=jnp.stack(b1b),
        w2a=jnp.stack(w2a), b2a=jnp.stack(b2a), w2b=jnp.stack(w2b), b2b=jnp.stack(b2b),
    )


def pack_params(p):
    """Kernel-layout weights for the F-fold, channel-separate layout.

    Each weight is expanded block-diagonally over the F sublane folds so every
    subnet layer stays a single MXU matmul; the condition-weight slices of all
    blocks are fused into one wide matrix whose last column carries the
    first-layer biases (driven by the ones row of the condition block)."""
    w1a = np.asarray(p["w1a"]); b1a = np.asarray(p["b1a"])
    w1b = np.asarray(p["w1b"]); b1b = np.asarray(p["b1b"])
    w2a = np.asarray(p["w2a"]); b2a = np.asarray(p["b2a"])
    w2b = np.asarray(p["w2b"]); b2b = np.asarray(p["b2b"])

    def fold_first_layer_x(w_x):
        # w_x: (n_ch, HIDDEN) -> (F*HIDDEN, n_ch*F); fold f consumes input
        # rows c*F + f and produces hidden rows f*HIDDEN + k.
        n_ch = w_x.shape[0]
        out = np.zeros((FH, n_ch * F), np.float32)
        for f in range(F):
            for c in range(n_ch):
                out[f * HIDDEN:(f + 1) * HIDDEN, c * F + f] = w_x[c]
        return out

    def fold_second_layer(w, b):
        # w: (HIDDEN, n_out), b: (1, n_out) -> ((n_out*F, F*HIDDEN), (n_out*F, 1));
        # output index j of fold f lands at row j*F + f (channel-separate groups).
        n_out = w.shape[1]
        wf = np.zeros((n_out * F, FH), np.float32)
        bf = np.zeros((n_out * F, 1), np.float32)
        for j in range(n_out):
            for f in range(F):
                wf[j * F + f, f * HIDDEN:(f + 1) * HIDDEN] = w[:, j]
                bf[j * F + f, 0] = b[0, j]
        return wf, bf

    # fused condition projections for all 2*N_BLOCKS subnet calls
    wc = np.zeros((2 * N_BLOCKS * FH, X_DIM * F + 1), np.float32)
    for i in range(N_BLOCKS):
        for s, (wa, ba, n_x) in enumerate(
                ((w2a[i], b2a[i], D2), (w1a[i], b1a[i], D1))):
            base = (2 * i + s) * FH
            w_c = wa[n_x:, :]                                # (X_DIM, HIDDEN)
            for f in range(F):
                rows = slice(base + f * HIDDEN, base + (f + 1) * HIDDEN)
                for xc in range(X_DIM):
                    wc[rows, xc * F + f] = w_c[xc]
                wc[rows, X_DIM * F] = ba[0]                  # bias column

    w2ax = np.stack([fold_first_layer_x(w2a[i][:D2]) for i in range(N_BLOCKS)])
    w1ay = np.stack([fold_first_layer_x(w1a[i][:D1]) for i in range(N_BLOCKS)])
    w2bf, b2bf = zip(*[fold_second_layer(w2b[i], b2b[i]) for i in range(N_BLOCKS)])
    w1bf, b1bf = zip(*[fold_second_layer(w1b[i], b1b[i]) for i in range(N_BLOCKS)])

    return dict(
        wc=jnp.asarray(wc),
        w2ax=jnp.asarray(w2ax), w2b=jnp.asarray(np.stack(w2bf)), b2b=jnp.asarray(np.stack(b2bf)),
        w1ay=jnp.asarray(w1ay), w1b=jnp.asarray(np.stack(w1bf)), b1b=jnp.asarray(np.stack(b1bf)),
    )


# ----------------- pure-JAX reference (mirrors PyTorch semantics) -----------------
def reference_forward(y, x, p):
    jac = jnp.zeros((y.shape[0],), jnp.float32)
    for i in range(N_BLOCKS):
        x1, x2 = y[:, :D1], y[:, D1:]
        u2 = jnp.concatenate([x2, x], axis=1)
        h = jax.nn.relu(u2 @ p["w2a"][i] + p["b2a"][i])
        r2 = h @ p["w2b"][i] + p["b2b"][i]
        s2 = CLAMP * 0.636 * jnp.arctan(r2[:, :D1]); t2 = r2[:, D1:]
        y1 = jnp.exp(s2) * x1 + t2
        u1 = jnp.concatenate([y1, x], axis=1)
        h = jax.nn.relu(u1 @ p["w1a"][i] + p["b1a"][i])
        r1 = h @ p["w1b"][i] + p["b1b"][i]
        s1 = CLAMP * 0.636 * jnp.arctan(r1[:, :D2]); t1 = r1[:, D1:] if False else r1[:, D2:]
        y2 = jnp.exp(s1) * x2 + t1
        jac = jac + jnp.sum(s2, axis=1) + jnp.sum(s1, axis=1)
        y = jnp.concatenate([y1, y2], axis=1)[:, PERMS[i]]   # PermuteRandom(seed=i)
    return y, jac


if __name__ == "__main__":
    key = jax.random.PRNGKey(0)
    ky, kx, kp, ky2, kx2 = jax.random.split(key, 5)
    params = init_params(kp)
    packed = pack_params(params)

    # --- small main test (single tile) ---
    B = 8
    y = jax.random.normal(ky, (B, Y_DIM), jnp.float32)
    x = jax.random.normal(kx, (B, X_DIM), jnp.float32)
    z, log_jac = cinn_forward(y, x, packed)
    jax.block_until_ready((z, log_jac))

    z_ref, lj_ref = reference_forward(y, x, params)
    np.testing.assert_allclose(np.asarray(z), np.asarray(z_ref), rtol=1e-2, atol=1e-2)
    np.testing.assert_allclose(np.asarray(log_jac), np.asarray(lj_ref), rtol=1e-2, atol=1e-2)
    assert z.shape == (B, Y_DIM) and log_jac.shape == (B,)

    # --- multi-tile + padding path (2 grid tiles, exercises fold/unfold) ---
    B2 = 1300
    y2 = jax.random.normal(ky2, (B2, Y_DIM), jnp.float32)
    x2 = jax.random.normal(kx2, (B2, X_DIM), jnp.float32)
    z2, lj2 = cinn_forward(y2, x2, packed)
    jax.block_until_ready((z2, lj2))

    z2_ref, lj2_ref = reference_forward(y2, x2, params)
    np.testing.assert_allclose(np.asarray(z2), np.asarray(z2_ref), rtol=1e-2, atol=1e-2)
    np.testing.assert_allclose(np.asarray(lj2), np.asarray(lj2_ref), rtol=1e-2, atol=1e-2)

    print("KERNEL_OK")
</pallas_src>

<mosaic_0001>
module attributes {stable_mosaic.version = 11 : i64} {
  func.func @cinn_kernel(%arg0: i32, %arg1: memref<32x128xf32, #tpu.memory_space<vmem>>, %arg2: memref<33x128xf32, #tpu.memory_space<vmem>>, %arg3: memref<2048x33xf32, #tpu.memory_space<vmem>>, %arg4: memref<4x256x16xf32, #tpu.memory_space<vmem>>, %arg5: memref<4x32x256xf32, #tpu.memory_space<vmem>>, %arg6: memref<4x32x1xf32, #tpu.memory_space<vmem>>, %arg7: memref<4x256x16xf32, #tpu.memory_space<vmem>>, %arg8: memref<4x32x256xf32, #tpu.memory_space<vmem>>, %arg9: memref<4x32x1xf32, #tpu.memory_space<vmem>>, %arg10: memref<32x128xf32, #tpu.memory_space<vmem>>, %arg11: memref<8x128xf32, #tpu.memory_space<vmem>>) attributes {dimension_semantics = [#tpu.dimension_semantics<parallel>], iteration_bounds = array<i64: 1>, scalar_prefetch = 0 : i64, scratch_operands = 0 : i64, tpu.core_type = #tpu.core_type<tc>, window_params = [{transform_indices = @transform_0, window_bounds = array<i64: 32, 128>}, {transform_indices = @transform_1, window_bounds = array<i64: 33, 128>}, {pipeline_mode = #tpu.pipeline_mode<synchronous>, transform_indices = @transform_2, window_bounds = array<i64: 2048, 33>}, {pipeline_mode = #tpu.pipeline_mode<synchronous>, transform_indices = @transform_3, window_bounds = array<i64: 4, 256, 16>}, {pipeline_mode = #tpu.pipeline_mode<synchronous>, transform_indices = @transform_4, window_bounds = array<i64: 4, 32, 256>}, {pipeline_mode = #tpu.pipeline_mode<synchronous>, transform_indices = @transform_5, window_bounds = array<i64: 4, 32, 1>}, {pipeline_mode = #tpu.pipeline_mode<synchronous>, transform_indices = @transform_6, window_bounds = array<i64: 4, 256, 16>}, {pipeline_mode = #tpu.pipeline_mode<synchronous>, transform_indices = @transform_7, window_bounds = array<i64: 4, 32, 256>}, {pipeline_mode = #tpu.pipeline_mode<synchronous>, transform_indices = @transform_8, window_bounds = array<i64: 4, 32, 1>}, {transform_indices = @transform_9, window_bounds = array<i64: 32, 128>}, {transform_indices = @transform_10, window_bounds = array<i64: 8, 128>}]} {
    %c0 = arith.constant 0 : index
    %c0_0 = arith.constant 0 : index
    %0 = vector.load %arg1[%c0, %c0_0] : memref<32x128xf32, #tpu.memory_space<vmem>>, vector<32x128xf32>
    %c0_1 = arith.constant 0 : index
    %c0_2 = arith.constant 0 : index
    %1 = vector.load %arg2[%c0_1, %c0_2] : memref<33x128xf32, #tpu.memory_space<vmem>>, vector<33x128xf32>
    %c0_3 = arith.constant 0 : index
    %c0_4 = arith.constant 0 : index
    %2 = vector.load %arg3[%c0_3, %c0_4] : memref<2048x33xf32, #tpu.memory_space<vmem>>, vector<2048x33xf32>
    %cst = arith.constant dense<0.000000e+00> : vector<2048x128xf32>
    %3 = tpu.matmul %2, %1, %cst {dimension_numbers = #tpu.dot_dimension_numbers<[1], [0], [0], [1], [0, 0, 1, 1], [], []>} : vector<2048x33xf32>, vector<33x128xf32>, vector<2048x128xf32> -> vector<2048x128xf32>
    %4 = vector.extract_strided_slice %0 {offsets = [0, 0], sizes = [16, 128], strides = [1, 1]} : vector<32x128xf32> to vector<16x128xf32>
    %5 = vector.extract_strided_slice %0 {offsets = [16, 0], sizes = [16, 128], strides = [1, 1]} : vector<32x128xf32> to vector<16x128xf32>
    %cst_5 = arith.constant 0.000000e+00 : f32
    %6 = vector.broadcast %cst_5 : f32 to vector<8x128xf32>
    %7 = vector.extract_strided_slice %3 {offsets = [0, 0], sizes = [256, 128], strides = [1, 1]} : vector<2048x128xf32> to vector<256x128xf32>
    %8 = vector.extract_strided_slice %3 {offsets = [256, 0], sizes = [256, 128], strides = [1, 1]} : vector<2048x128xf32> to vector<256x128xf32>
    %c0_6 = arith.constant 0 : index
    %c0_7 = arith.constant 0 : index
    %c0_8 = arith.constant 0 : index
    %9 = vector.load %arg4[%c0_6, %c0_7, %c0_8] : memref<4x256x16xf32, #tpu.memory_space<vmem>>, vector<1x256x16xf32>
    %10 = vector.shape_cast %9 : vector<1x256x16xf32> to vector<256x16xf32>
    %cst_9 = arith.constant dense<0.000000e+00> : vector<256x128xf32>
    %11 = tpu.matmul %10, %5, %cst_9 {dimension_numbers = #tpu.dot_dimension_numbers<[1], [0], [0], [1], [0, 0, 1, 1], [], []>} : vector<256x16xf32>, vector<16x128xf32>, vector<256x128xf32> -> vector<256x128xf32>
    %12 = arith.addf %11, %7 : vector<256x128xf32>
    %cst_10 = arith.constant 0.000000e+00 : f32
    %13 = vector.broadcast %cst_10 : f32 to vector<256x128xf32>
    %14 = arith.maximumf %12, %13 : vector<256x128xf32>
    %c0_11 = arith.constant 0 : index
    %c0_12 = arith.constant 0 : index
    %c0_13 = arith.constant 0 : index
    %15 = vector.load %arg5[%c0_11, %c0_12, %c0_13] : memref<4x32x256xf32, #tpu.memory_space<vmem>>, vector<1x32x256xf32>
    %16 = vector.shape_cast %15 : vector<1x32x256xf32> to vector<32x256xf32>
    %cst_14 = arith.constant dense<0.000000e+00> : vector<32x128xf32>
    %17 = tpu.matmul %16, %14, %cst_14 {dimension_numbers = #tpu.dot_dimension_numbers<[1], [0], [0], [1], [0, 0, 1, 1], [], []>} : vector<32x256xf32>, vector<256x128xf32>, vector<32x128xf32> -> vector<32x128xf32>
    %c0_15 = arith.constant 0 : index
    %c0_16 = arith.constant 0 : index
    %c0_17 = arith.constant 0 : index
    %18 = vector.load %arg6[%c0_15, %c0_16, %c0_17] : memref<4x32x1xf32, #tpu.memory_space<vmem>>, vector<1x32x1xf32>
    %19 = vector.shape_cast %18 : vector<1x32x1xf32> to vector<32x1xf32>
    %20 = vector.broadcast %19 : vector<32x1xf32> to vector<32x128xf32>
    %21 = arith.addf %17, %20 : vector<32x128xf32>
    %22 = vector.extract_strided_slice %21 {offsets = [0, 0], sizes = [16, 128], strides = [1, 1]} : vector<32x128xf32> to vector<16x128xf32>
    %23 = math.absf %22 : vector<16x128xf32>
    %cst_18 = arith.constant 2.41421366 : f32
    %24 = vector.broadcast %cst_18 : f32 to vector<16x128xf32>
    %25 = arith.cmpf ogt, %23, %24 : vector<16x128xf32>
    %cst_19 = arith.constant 0.414213568 : f32
    %26 = vector.broadcast %cst_19 : f32 to vector<16x128xf32>
    %27 = arith.cmpf ogt, %23, %26 : vector<16x128xf32>
    %28 = tpu.reciprocal %23 {approx = true} : vector<16x128xf32> -> vector<16x128xf32>
    %cst_20 = arith.constant 1.000000e+00 : f32
    %29 = vector.broadcast %cst_20 : f32 to vector<16x128xf32>
    %30 = arith.addf %23, %29 : vector<16x128xf32>
    %31 = tpu.reciprocal %30 {approx = true} : vector<16x128xf32> -> vector<16x128xf32>
    %cst_21 = arith.constant 0.000000e+00 : f32
    %32 = vector.broadcast %cst_21 : f32 to vector<16x128xf32>
    %33 = arith.subf %32, %28 : vector<16x128xf32>
    %cst_22 = arith.constant 1.000000e+00 : f32
    %34 = vector.broadcast %cst_22 : f32 to vector<16x128xf32>
    %35 = arith.subf %23, %34 : vector<16x128xf32>
    %36 = arith.mulf %35, %31 : vector<16x128xf32>
    %37 = arith.select %27, %36, %23 : vector<16x128xi1>, vector<16x128xf32>
    %38 = arith.select %25, %33, %37 : vector<16x128xi1>, vector<16x128xf32>
    %cst_23 = arith.constant 0.999026477 : f32
    %cst_24 = arith.constant 0.000000e+00 : f32
    %39 = vector.broadcast %cst_23 : f32 to vector<16x128xf32>
    %40 = vector.broadcast %cst_24 : f32 to vector<16x128xf32>
    %41 = arith.select %27, %39, %40 : vector<16x128xi1>, vector<16x128xf32>
    %cst_25 = arith.constant 1.99805295 : f32
    %42 = vector.broadcast %cst_25 : f32 to vector<16x128xf32>
    %43 = arith.select %25, %42, %41 : vector<16x128xi1>, vector<16x128xf32>
    %44 = arith.mulf %38, %38 : vector<16x128xf32>
    %cst_26 = arith.constant 0.102443628 : f32
    %45 = vector.broadcast %cst_26 : f32 to vector<16x128xf32>
    %46 = arith.mulf %45, %44 : vector<16x128xf32>
    %cst_27 = arith.constant 0.176524162 : f32
    %47 = vector.broadcast %cst_27 : f32 to vector<16x128xf32>
    %48 = arith.subf %46, %47 : vector<16x128xf32>
    %49 = arith.mulf %48, %44 : vector<16x128xf32>
    %cst_28 = arith.constant 0.254116476 : f32
    %50 = vector.broadcast %cst_28 : f32 to vector<16x128xf32>
    %51 = arith.addf %49, %50 : vector<16x128xf32>
    %52 = arith.mulf %51, %44 : vector<16x128xf32>
    %cst_29 = arith.constant 0.423995107 : f32
    %53 = vector.broadcast %cst_29 : f32 to vector<16x128xf32>
    %54 = arith.subf %52, %53 : vector<16x128xf32>
    %55 = arith.mulf %44, %54 : vector<16x128xf32>
    %cst_30 = arith.constant 1.272000e+00 : f32
    %56 = vector.broadcast %cst_30 : f32 to vector<16x128xf32>
    %57 = arith.addf %56, %55 : vector<16x128xf32>
    %58 = arith.mulf %38, %57 : vector<16x128xf32>
    %59 = arith.addf %43, %58 : vector<16x128xf32>
    %cst_31 = arith.constant 0.000000e+00 : f32
    %60 = vector.broadcast %cst_31 : f32 to vector<16x128xf32>
    %61 = arith.cmpf olt, %22, %60 : vector<16x128xf32>
    %cst_32 = arith.constant 0.000000e+00 : f32
    %62 = vector.broadcast %cst_32 : f32 to vector<16x128xf32>
    %63 = arith.subf %62, %59 : vector<16x128xf32>
    %64 = arith.select %61, %63, %59 : vector<16x128xi1>, vector<16x128xf32>
    %65 = math.exp %64 : vector<16x128xf32>
    %66 = arith.mulf %65, %4 : vector<16x128xf32>
    %67 = vector.extract_strided_slice %21 {offsets = [16, 0], sizes = [16, 128], strides = [1, 1]} : vector<32x128xf32> to vector<16x128xf32>
    %68 = arith.addf %66, %67 : vector<16x128xf32>
    %c0_33 = arith.constant 0 : index
    %c0_34 = arith.constant 0 : index
    %c0_35 = arith.constant 0 : index
    %69 = vector.load %arg7[%c0_33, %c0_34, %c0_35] : memref<4x256x16xf32, #tpu.memory_space<vmem>>, vector<1x256x16xf32>
    %70 = vector.shape_cast %69 : vector<1x256x16xf32> to vector<256x16xf32>
    %cst_36 = arith.constant dense<0.000000e+00> : vector<256x128xf32>
    %71 = tpu.matmul %70, %68, %cst_36 {dimension_numbers = #tpu.dot_dimension_numbers<[1], [0], [0], [1], [0, 0, 1, 1], [], []>} : vector<256x16xf32>, vector<16x128xf32>, vector<256x128xf32> -> vector<256x128xf32>
    %72 = arith.addf %71, %8 : vector<256x128xf32>
    %cst_37 = arith.constant 0.000000e+00 : f32
    %73 = vector.broadcast %cst_37 : f32 to vector<256x128xf32>
    %74 = arith.maximumf %72, %73 : vector<256x128xf32>
    %c0_38 = arith.constant 0 : index
    %c0_39 = arith.constant 0 : index
    %c0_40 = arith.constant 0 : index
    %75 = vector.load %arg8[%c0_38, %c0_39, %c0_40] : memref<4x32x256xf32, #tpu.memory_space<vmem>>, vector<1x32x256xf32>
    %76 = vector.shape_cast %75 : vector<1x32x256xf32> to vector<32x256xf32>
    %cst_41 = arith.constant dense<0.000000e+00> : vector<32x128xf32>
    %77 = tpu.matmul %76, %74, %cst_41 {dimension_numbers = #tpu.dot_dimension_numbers<[1], [0], [0], [1], [0, 0, 1, 1], [], []>} : vector<32x256xf32>, vector<256x128xf32>, vector<32x128xf32> -> vector<32x128xf32>
    %c0_42 = arith.constant 0 : index
    %c0_43 = arith.constant 0 : index
    %c0_44 = arith.constant 0 : index
    %78 = vector.load %arg9[%c0_42, %c0_43, %c0_44] : memref<4x32x1xf32, #tpu.memory_space<vmem>>, vector<1x32x1xf32>
    %79 = vector.shape_cast %78 : vector<1x32x1xf32> to vector<32x1xf32>
    %80 = vector.broadcast %79 : vector<32x1xf32> to vector<32x128xf32>
    %81 = arith.addf %77, %80 : vector<32x128xf32>
    %82 = vector.extract_strided_slice %81 {offsets = [0, 0], sizes = [16, 128], strides = [1, 1]} : vector<32x128xf32> to vector<16x128xf32>
    %83 = math.absf %82 : vector<16x128xf32>
    %cst_45 = arith.constant 2.41421366 : f32
    %84 = vector.broadcast %cst_45 : f32 to vector<16x128xf32>
    %85 = arith.cmpf ogt, %83, %84 : vector<16x128xf32>
    %cst_46 = arith.constant 0.414213568 : f32
    %86 = vector.broadcast %cst_46 : f32 to vector<16x128xf32>
    %87 = arith.cmpf ogt, %83, %86 : vector<16x128xf32>
    %88 = tpu.reciprocal %83 {approx = true} : vector<16x128xf32> -> vector<16x128xf32>
    %cst_47 = arith.constant 1.000000e+00 : f32
    %89 = vector.broadcast %cst_47 : f32 to vector<16x128xf32>
    %90 = arith.addf %83, %89 : vector<16x128xf32>
    %91 = tpu.reciprocal %90 {approx = true} : vector<16x128xf32> -> vector<16x128xf32>
    %cst_48 = arith.constant 0.000000e+00 : f32
    %92 = vector.broadcast %cst_48 : f32 to vector<16x128xf32>
    %93 = arith.subf %92, %88 : vector<16x128xf32>
    %cst_49 = arith.constant 1.000000e+00 : f32
    %94 = vector.broadcast %cst_49 : f32 to vector<16x128xf32>
    %95 = arith.subf %83, %94 : vector<16x128xf32>
    %96 = arith.mulf %95, %91 : vector<16x128xf32>
    %97 = arith.select %87, %96, %83 : vector<16x128xi1>, vector<16x128xf32>
    %98 = arith.select %85, %93, %97 : vector<16x128xi1>, vector<16x128xf32>
    %cst_50 = arith.constant 0.999026477 : f32
    %cst_51 = arith.constant 0.000000e+00 : f32
    %99 = vector.broadcast %cst_50 : f32 to vector<16x128xf32>
    %100 = vector.broadcast %cst_51 : f32 to vector<16x128xf32>
    %101 = arith.select %87, %99, %100 : vector<16x128xi1>, vector<16x128xf32>
    %cst_52 = arith.constant 1.99805295 : f32
    %102 = vector.broadcast %cst_52 : f32 to vector<16x128xf32>
    %103 = arith.select %85, %102, %101 : vector<16x128xi1>, vector<16x128xf32>
    %104 = arith.mulf %98, %98 : vector<16x128xf32>
    %cst_53 = arith.constant 0.102443628 : f32
    %105 = vector.broadcast %cst_53 : f32 to vector<16x128xf32>
    %106 = arith.mulf %105, %104 : vector<16x128xf32>
    %cst_54 = arith.constant 0.176524162 : f32
    %107 = vector.broadcast %cst_54 : f32 to vector<16x128xf32>
    %108 = arith.subf %106, %107 : vector<16x128xf32>
    %109 = arith.mulf %108, %104 : vector<16x128xf32>
    %cst_55 = arith.constant 0.254116476 : f32
    %110 = vector.broadcast %cst_55 : f32 to vector<16x128xf32>
    %111 = arith.addf %109, %110 : vector<16x128xf32>
    %112 = arith.mulf %111, %104 : vector<16x128xf32>
    %cst_56 = arith.constant 0.423995107 : f32
    %113 = vector.broadcast %cst_56 : f32 to vector<16x128xf32>
    %114 = arith.subf %112, %113 : vector<16x128xf32>
    %115 = arith.mulf %104, %114 : vector<16x128xf32>
    %cst_57 = arith.constant 1.272000e+00 : f32
    %116 = vector.broadcast %cst_57 : f32 to vector<16x128xf32>
    %117 = arith.addf %116, %115 : vector<16x128xf32>
    %118 = arith.mulf %98, %117 : vector<16x128xf32>
    %119 = arith.addf %103, %118 : vector<16x128xf32>
    %cst_58 = arith.constant 0.000000e+00 : f32
    %120 = vector.broadcast %cst_58 : f32 to vector<16x128xf32>
    %121 = arith.cmpf olt, %82, %120 : vector<16x128xf32>
    %cst_59 = arith.constant 0.000000e+00 : f32
    %122 = vector.broadcast %cst_59 : f32 to vector<16x128xf32>
    %123 = arith.subf %122, %119 : vector<16x128xf32>
    %124 = arith.select %121, %123, %119 : vector<16x128xi1>, vector<16x128xf32>
    %125 = math.exp %124 : vector<16x128xf32>
    %126 = arith.mulf %125, %5 : vector<16x128xf32>
    %127 = vector.extract_strided_slice %81 {offsets = [16, 0], sizes = [16, 128], strides = [1, 1]} : vector<32x128xf32> to vector<16x128xf32>
    %128 = arith.addf %126, %127 : vector<16x128xf32>
    %129 = vector.extract_strided_slice %64 {offsets = [0, 0], sizes = [8, 128], strides = [1, 1]} : vector<16x128xf32> to vector<8x128xf32>
    %130 = vector.extract_strided_slice %64 {offsets = [8, 0], sizes = [8, 128], strides = [1, 1]} : vector<16x128xf32> to vector<8x128xf32>
    %131 = arith.addf %129, %130 : vector<8x128xf32>
    %132 = arith.addf %6, %131 : vector<8x128xf32>
    %133 = vector.extract_strided_slice %124 {offsets = [0, 0], sizes = [8, 128], strides = [1, 1]} : vector<16x128xf32> to vector<8x128xf32>
    %134 = vector.extract_strided_slice %124 {offsets = [8, 0], sizes = [8, 128], strides = [1, 1]} : vector<16x128xf32> to vector<8x128xf32>
    %135 = arith.addf %133, %134 : vector<8x128xf32>
    %136 = arith.addf %132, %135 : vector<8x128xf32>
    %137 = vector.extract_strided_slice %68 {offsets = [0, 0], sizes = [8, 128], strides = [1, 1]} : vector<16x128xf32> to vector<8x128xf32>
    %138 = vector.extract_strided_slice %68 {offsets = [8, 0], sizes = [8, 128], strides = [1, 1]} : vector<16x128xf32> to vector<8x128xf32>
    %139 = vector.extract_strided_slice %128 {offsets = [0, 0], sizes = [8, 128], strides = [1, 1]} : vector<16x128xf32> to vector<8x128xf32>
    %140 = vector.extract_strided_slice %128 {offsets = [8, 0], sizes = [8, 128], strides = [1, 1]} : vector<16x128xf32> to vector<8x128xf32>
    %141 = tpu.concatenate %139, %140 in 0 : vector<8x128xf32>, vector<8x128xf32> -> vector<16x128xf32>
    %142 = tpu.concatenate %138, %137 in 0 : vector<8x128xf32>, vector<8x128xf32> -> vector<16x128xf32>
    %143 = vector.extract_strided_slice %3 {offsets = [512, 0], sizes = [256, 128], strides = [1, 1]} : vector<2048x128xf32> to vector<256x128xf32>
    %144 = vector.extract_strided_slice %3 {offsets = [768, 0], sizes = [256, 128], strides = [1, 1]} : vector<2048x128xf32> to vector<256x128xf32>
    %c1 = arith.constant 1 : index
    %c0_60 = arith.constant 0 : index
    %c0_61 = arith.constant 0 : index
    %145 = vector.load %arg4[%c1, %c0_60, %c0_61] : memref<4x256x16xf32, #tpu.memory_space<vmem>>, vector<1x256x16xf32>
    %146 = vector.shape_cast %145 : vector<1x256x16xf32> to vector<256x16xf32>
    %cst_62 = arith.constant dense<0.000000e+00> : vector<256x128xf32>
    %147 = tpu.matmul %146, %142, %cst_62 {dimension_numbers = #tpu.dot_dimension_numbers<[1], [0], [0], [1], [0, 0, 1, 1], [], []>} : vector<256x16xf32>, vector<16x128xf32>, vector<256x128xf32> -> vector<256x128xf32>
    %148 = arith.addf %147, %143 : vector<256x128xf32>
    %cst_63 = arith.constant 0.000000e+00 : f32
    %149 = vector.broadcast %cst_63 : f32 to vector<256x128xf32>
    %150 = arith.maximumf %148, %149 : vector<256x128xf32>
    %c1_64 = arith.constant 1 : index
    %c0_65 = arith.constant 0 : index
    %c0_66 = arith.constant 0 : index
    %151 = vector.load %arg5[%c1_64, %c0_65, %c0_66] : memref<4x32x256xf32, #tpu.memory_space<vmem>>, vector<1x32x256xf32>
    %152 = vector.shape_cast %151 : vector<1x32x256xf32> to vector<32x256xf32>
    %cst_67 = arith.constant dense<0.000000e+00> : vector<32x128xf32>
    %153 = tpu.matmul %152, %150, %cst_67 {dimension_numbers = #tpu.dot_dimension_numbers<[1], [0], [0], [1], [0, 0, 1, 1], [], []>} : vector<32x256xf32>, vector<256x128xf32>, vector<32x128xf32> -> vector<32x128xf32>
    %c1_68 = arith.constant 1 : index
    %c0_69 = arith.constant 0 : index
    %c0_70 = arith.constant 0 : index
    %154 = vector.load %arg6[%c1_68, %c0_69, %c0_70] : memref<4x32x1xf32, #tpu.memory_space<vmem>>, vector<1x32x1xf32>
    %155 = vector.shape_cast %154 : vector<1x32x1xf32> to vector<32x1xf32>
    %156 = vector.broadcast %155 : vector<32x1xf32> to vector<32x128xf32>
    %157 = arith.addf %153, %156 : vector<32x128xf32>
    %158 = vector.extract_strided_slice %157 {offsets = [0, 0], sizes = [16, 128], strides = [1, 1]} : vector<32x128xf32> to vector<16x128xf32>
    %159 = math.absf %158 : vector<16x128xf32>
    %cst_71 = arith.constant 2.41421366 : f32
    %160 = vector.broadcast %cst_71 : f32 to vector<16x128xf32>
    %161 = arith.cmpf ogt, %159, %160 : vector<16x128xf32>
    %cst_72 = arith.constant 0.414213568 : f32
    %162 = vector.broadcast %cst_72 : f32 to vector<16x128xf32>
    %163 = arith.cmpf ogt, %159, %162 : vector<16x128xf32>
    %164 = tpu.reciprocal %159 {approx = true} : vector<16x128xf32> -> vector<16x128xf32>
    %cst_73 = arith.constant 1.000000e+00 : f32
    %165 = vector.broadcast %cst_73 : f32 to vector<16x128xf32>
    %166 = arith.addf %159, %165 : vector<16x128xf32>
    %167 = tpu.reciprocal %166 {approx = true} : vector<16x128xf32> -> vector<16x128xf32>
    %cst_74 = arith.constant 0.000000e+00 : f32
    %168 = vector.broadcast %cst_74 : f32 to vector<16x128xf32>
    %169 = arith.subf %168, %164 : vector<16x128xf32>
    %cst_75 = arith.constant 1.000000e+00 : f32
    %170 = vector.broadcast %cst_75 : f32 to vector<16x128xf32>
    %171 = arith.subf %159, %170 : vector<16x128xf32>
    %172 = arith.mulf %171, %167 : vector<16x128xf32>
    %173 = arith.select %163, %172, %159 : vector<16x128xi1>, vector<16x128xf32>
    %174 = arith.select %161, %169, %173 : vector<16x128xi1>, vector<16x128xf32>
    %cst_76 = arith.constant 0.999026477 : f32
    %cst_77 = arith.constant 0.000000e+00 : f32
    %175 = vector.broadcast %cst_76 : f32 to vector<16x128xf32>
    %176 = vector.broadcast %cst_77 : f32 to vector<16x128xf32>
    %177 = arith.select %163, %175, %176 : vector<16x128xi1>, vector<16x128xf32>
    %cst_78 = arith.constant 1.99805295 : f32
    %178 = vector.broadcast %cst_78 : f32 to vector<16x128xf32>
    %179 = arith.select %161, %178, %177 : vector<16x128xi1>, vector<16x128xf32>
    %180 = arith.mulf %174, %174 : vector<16x128xf32>
    %cst_79 = arith.constant 0.102443628 : f32
    %181 = vector.broadcast %cst_79 : f32 to vector<16x128xf32>
    %182 = arith.mulf %181, %180 : vector<16x128xf32>
    %cst_80 = arith.constant 0.176524162 : f32
    %183 = vector.broadcast %cst_80 : f32 to vector<16x128xf32>
    %184 = arith.subf %182, %183 : vector<16x128xf32>
    %185 = arith.mulf %184, %180 : vector<16x128xf32>
    %cst_81 = arith.constant 0.254116476 : f32
    %186 = vector.broadcast %cst_81 : f32 to vector<16x128xf32>
    %187 = arith.addf %185, %186 : vector<16x128xf32>
    %188 = arith.mulf %187, %180 : vector<16x128xf32>
    %cst_82 = arith.constant 0.423995107 : f32
    %189 = vector.broadcast %cst_82 : f32 to vector<16x128xf32>
    %190 = arith.subf %188, %189 : vector<16x128xf32>
    %191 = arith.mulf %180, %190 : vector<16x128xf32>
    %cst_83 = arith.constant 1.272000e+00 : f32
    %192 = vector.broadcast %cst_83 : f32 to vector<16x128xf32>
    %193 = arith.addf %192, %191 : vector<16x128xf32>
    %194 = arith.mulf %174, %193 : vector<16x128xf32>
    %195 = arith.addf %179, %194 : vector<16x128xf32>
    %cst_84 = arith.constant 0.000000e+00 : f32
    %196 = vector.broadcast %cst_84 : f32 to vector<16x128xf32>
    %197 = arith.cmpf olt, %158, %196 : vector<16x128xf32>
    %cst_85 = arith.constant 0.000000e+00 : f32
    %198 = vector.broadcast %cst_85 : f32 to vector<16x128xf32>
    %199 = arith.subf %198, %195 : vector<16x128xf32>
    %200 = arith.select %197, %199, %195 : vector<16x128xi1>, vector<16x128xf32>
    %201 = math.exp %200 : vector<16x128xf32>
    %202 = arith.mulf %201, %141 : vector<16x128xf32>
    %203 = vector.extract_strided_slice %157 {offsets = [16, 0], sizes = [16, 128], strides = [1, 1]} : vector<32x128xf32> to vector<16x128xf32>
    %204 = arith.addf %202, %203 : vector<16x128xf32>
    %c1_86 = arith.constant 1 : index
    %c0_87 = arith.constant 0 : index
    %c0_88 = arith.constant 0 : index
    %205 = vector.load %arg7[%c1_86, %c0_87, %c0_88] : memref<4x256x16xf32, #tpu.memory_space<vmem>>, vector<1x256x16xf32>
    %206 = vector.shape_cast %205 : vector<1x256x16xf32> to vector<256x16xf32>
    %cst_89 = arith.constant dense<0.000000e+00> : vector<256x128xf32>
    %207 = tpu.matmul %206, %204, %cst_89 {dimension_numbers = #tpu.dot_dimension_numbers<[1], [0], [0], [1], [0, 0, 1, 1], [], []>} : vector<256x16xf32>, vector<16x128xf32>, vector<256x128xf32> -> vector<256x128xf32>
    %208 = arith.addf %207, %144 : vector<256x128xf32>
    %cst_90 = arith.constant 0.000000e+00 : f32
    %209 = vector.broadcast %cst_90 : f32 to vector<256x128xf32>
    %210 = arith.maximumf %208, %209 : vector<256x128xf32>
    %c1_91 = arith.constant 1 : index
    %c0_92 = arith.constant 0 : index
    %c0_93 = arith.constant 0 : index
    %211 = vector.load %arg8[%c1_91, %c0_92, %c0_93] : memref<4x32x256xf32, #tpu.memory_space<vmem>>, vector<1x32x256xf32>
    %212 = vector.shape_cast %211 : vector<1x32x256xf32> to vector<32x256xf32>
    %cst_94 = arith.constant dense<0.000000e+00> : vector<32x128xf32>
    %213 = tpu.matmul %212, %210, %cst_94 {dimension_numbers = #tpu.dot_dimension_numbers<[1], [0], [0], [1], [0, 0, 1, 1], [], []>} : vector<32x256xf32>, vector<256x128xf32>, vector<32x128xf32> -> vector<32x128xf32>
    %c1_95 = arith.constant 1 : index
    %c0_96 = arith.constant 0 : index
    %c0_97 = arith.constant 0 : index
    %214 = vector.load %arg9[%c1_95, %c0_96, %c0_97] : memref<4x32x1xf32, #tpu.memory_space<vmem>>, vector<1x32x1xf32>
    %215 = vector.shape_cast %214 : vector<1x32x1xf32> to vector<32x1xf32>
    %216 = vector.broadcast %215 : vector<32x1xf32> to vector<32x128xf32>
    %217 = arith.addf %213, %216 : vector<32x128xf32>
    %218 = vector.extract_strided_slice %217 {offsets = [0, 0], sizes = [16, 128], strides = [1, 1]} : vector<32x128xf32> to vector<16x128xf32>
    %219 = math.absf %218 : vector<16x128xf32>
    %cst_98 = arith.constant 2.41421366 : f32
    %220 = vector.broadcast %cst_98 : f32 to vector<16x128xf32>
    %221 = arith.cmpf ogt, %219, %220 : vector<16x128xf32>
    %cst_99 = arith.constant 0.414213568 : f32
    %222 = vector.broadcast %cst_99 : f32 to vector<16x128xf32>
    %223 = arith.cmpf ogt, %219, %222 : vector<16x128xf32>
    %224 = tpu.reciprocal %219 {approx = true} : vector<16x128xf32> -> vector<16x128xf32>
    %cst_100 = arith.constant 1.000000e+00 : f32
    %225 = vector.broadcast %cst_100 : f32 to vector<16x128xf32>
    %226 = arith.addf %219, %225 : vector<16x128xf32>
    %227 = tpu.reciprocal %226 {approx = true} : vector<16x128xf32> -> vector<16x128xf32>
    %cst_101 = arith.constant 0.000000e+00 : f32
    %228 = vector.broadcast %cst_101 : f32 to vector<16x128xf32>
    %229 = arith.subf %228, %224 : vector<16x128xf32>
    %cst_102 = arith.constant 1.000000e+00 : f32
    %230 = vector.broadcast %cst_102 : f32 to vector<16x128xf32>
    %231 = arith.subf %219, %230 : vector<16x128xf32>
    %232 = arith.mulf %231, %227 : vector<16x128xf32>
    %233 = arith.select %223, %232, %219 : vector<16x128xi1>, vector<16x128xf32>
    %234 = arith.select %221, %229, %233 : vector<16x128xi1>, vector<16x128xf32>
    %cst_103 = arith.constant 0.999026477 : f32
    %cst_104 = arith.constant 0.000000e+00 : f32
    %235 = vector.broadcast %cst_103 : f32 to vector<16x128xf32>
    %236 = vector.broadcast %cst_104 : f32 to vector<16x128xf32>
    %237 = arith.select %223, %235, %236 : vector<16x128xi1>, vector<16x128xf32>
    %cst_105 = arith.constant 1.99805295 : f32
    %238 = vector.broadcast %cst_105 : f32 to vector<16x128xf32>
    %239 = arith.select %221, %238, %237 : vector<16x128xi1>, vector<16x128xf32>
    %240 = arith.mulf %234, %234 : vector<16x128xf32>
    %cst_106 = arith.constant 0.102443628 : f32
    %241 = vector.broadcast %cst_106 : f32 to vector<16x128xf32>
    %242 = arith.mulf %241, %240 : vector<16x128xf32>
    %cst_107 = arith.constant 0.176524162 : f32
    %243 = vector.broadcast %cst_107 : f32 to vector<16x128xf32>
    %244 = arith.subf %242, %243 : vector<16x128xf32>
    %245 = arith.mulf %244, %240 : vector<16x128xf32>
    %cst_108 = arith.constant 0.254116476 : f32
    %246 = vector.broadcast %cst_108 : f32 to vector<16x128xf32>
    %247 = arith.addf %245, %246 : vector<16x128xf32>
    %248 = arith.mulf %247, %240 : vector<16x128xf32>
    %cst_109 = arith.constant 0.423995107 : f32
    %249 = vector.broadcast %cst_109 : f32 to vector<16x128xf32>
    %250 = arith.subf %248, %249 : vector<16x128xf32>
    %251 = arith.mulf %240, %250 : vector<16x128xf32>
    %cst_110 = arith.constant 1.272000e+00 : f32
    %252 = vector.broadcast %cst_110 : f32 to vector<16x128xf32>
    %253 = arith.addf %252, %251 : vector<16x128xf32>
    %254 = arith.mulf %234, %253 : vector<16x128xf32>
    %255 = arith.addf %239, %254 : vector<16x128xf32>
    %cst_111 = arith.constant 0.000000e+00 : f32
    %256 = vector.broadcast %cst_111 : f32 to vector<16x128xf32>
    %257 = arith.cmpf olt, %218, %256 : vector<16x128xf32>
    %cst_112 = arith.constant 0.000000e+00 : f32
    %258 = vector.broadcast %cst_112 : f32 to vector<16x128xf32>
    %259 = arith.subf %258, %255 : vector<16x128xf32>
    %260 = arith.select %257, %259, %255 : vector<16x128xi1>, vector<16x128xf32>
    %261 = math.exp %260 : vector<16x128xf32>
    %262 = arith.mulf %261, %142 : vector<16x128xf32>
    %263 = vector.extract_strided_slice %217 {offsets = [16, 0], sizes = [16, 128], strides = [1, 1]} : vector<32x128xf32> to vector<16x128xf32>
    %264 = arith.addf %262, %263 : vector<16x128xf32>
    %265 = vector.extract_strided_slice %200 {offsets = [0, 0], sizes = [8, 128], strides = [1, 1]} : vector<16x128xf32> to vector<8x128xf32>
    %266 = vector.extract_strided_slice %200 {offsets = [8, 0], sizes = [8, 128], strides = [1, 1]} : vector<16x128xf32> to vector<8x128xf32>
    %267 = arith.addf %265, %266 : vector<8x128xf32>
    %268 = arith.addf %136, %267 : vector<8x128xf32>
    %269 = vector.extract_strided_slice %260 {offsets = [0, 0], sizes = [8, 128], strides = [1, 1]} : vector<16x128xf32> to vector<8x128xf32>
    %270 = vector.extract_strided_slice %260 {offsets = [8, 0], sizes = [8, 128], strides = [1, 1]} : vector<16x128xf32> to vector<8x128xf32>
    %271 = arith.addf %269, %270 : vector<8x128xf32>
    %272 = arith.addf %268, %271 : vector<8x128xf32>
    %273 = vector.extract_strided_slice %204 {offsets = [0, 0], sizes = [8, 128], strides = [1, 1]} : vector<16x128xf32> to vector<8x128xf32>
    %274 = vector.extract_strided_slice %204 {offsets = [8, 0], sizes = [8, 128], strides = [1, 1]} : vector<16x128xf32> to vector<8x128xf32>
    %275 = vector.extract_strided_slice %264 {offsets = [0, 0], sizes = [8, 128], strides = [1, 1]} : vector<16x128xf32> to vector<8x128xf32>
    %276 = vector.extract_strided_slice %264 {offsets = [8, 0], sizes = [8, 128], strides = [1, 1]} : vector<16x128xf32> to vector<8x128xf32>
    %277 = tpu.concatenate %276, %275 in 0 : vector<8x128xf32>, vector<8x128xf32> -> vector<16x128xf32>
    %278 = tpu.concatenate %273, %274 in 0 : vector<8x128xf32>, vector<8x128xf32> -> vector<16x128xf32>
    %279 = vector.extract_strided_slice %3 {offsets = [1024, 0], sizes = [256, 128], strides = [1, 1]} : vector<2048x128xf32> to vector<256x128xf32>
    %280 = vector.extract_strided_slice %3 {offsets = [1280, 0], sizes = [256, 128], strides = [1, 1]} : vector<2048x128xf32> to vector<256x128xf32>
    %c2 = arith.constant 2 : index
    %c0_113 = arith.constant 0 : index
    %c0_114 = arith.constant 0 : index
    %281 = vector.load %arg4[%c2, %c0_113, %c0_114] : memref<4x256x16xf32, #tpu.memory_space<vmem>>, vector<1x256x16xf32>
    %282 = vector.shape_cast %281 : vector<1x256x16xf32> to vector<256x16xf32>
    %cst_115 = arith.constant dense<0.000000e+00> : vector<256x128xf32>
    %283 = tpu.matmul %282, %278, %cst_115 {dimension_numbers = #tpu.dot_dimension_numbers<[1], [0], [0], [1], [0, 0, 1, 1], [], []>} : vector<256x16xf32>, vector<16x128xf32>, vector<256x128xf32> -> vector<256x128xf32>
    %284 = arith.addf %283, %279 : vector<256x128xf32>
    %cst_116 = arith.constant 0.000000e+00 : f32
    %285 = vector.broadcast %cst_116 : f32 to vector<256x128xf32>
    %286 = arith.maximumf %284, %285 : vector<256x128xf32>
    %c2_117 = arith.constant 2 : index
    %c0_118 = arith.constant 0 : index
    %c0_119 = arith.constant 0 : index
    %287 = vector.load %arg5[%c2_117, %c0_118, %c0_119] : memref<4x32x256xf32, #tpu.memory_space<vmem>>, vector<1x32x256xf32>
    %288 = vector.shape_cast %287 : vector<1x32x256xf32> to vector<32x256xf32>
    %cst_120 = arith.constant dense<0.000000e+00> : vector<32x128xf32>
    %289 = tpu.matmul %288, %286, %cst_120 {dimension_numbers = #tpu.dot_dimension_numbers<[1], [0], [0], [1], [0, 0, 1, 1], [], []>} : vector<32x256xf32>, vector<256x128xf32>, vector<32x128xf32> -> vector<32x128xf32>
    %c2_121 = arith.constant 2 : index
    %c0_122 = arith.constant 0 : index
    %c0_123 = arith.constant 0 : index
    %290 = vector.load %arg6[%c2_121, %c0_122, %c0_123] : memref<4x32x1xf32, #tpu.memory_space<vmem>>, vector<1x32x1xf32>
    %291 = vector.shape_cast %290 : vector<1x32x1xf32> to vector<32x1xf32>
    %292 = vector.broadcast %291 : vector<32x1xf32> to vector<32x128xf32>
    %293 = arith.addf %289, %292 : vector<32x128xf32>
    %294 = vector.extract_strided_slice %293 {offsets = [0, 0], sizes = [16, 128], strides = [1, 1]} : vector<32x128xf32> to vector<16x128xf32>
    %295 = math.absf %294 : vector<16x128xf32>
    %cst_124 = arith.constant 2.41421366 : f32
    %296 = vector.broadcast %cst_124 : f32 to vector<16x128xf32>
    %297 = arith.cmpf ogt, %295, %296 : vector<16x128xf32>
    %cst_125 = arith.constant 0.414213568 : f32
    %298 = vector.broadcast %cst_125 : f32 to vector<16x128xf32>
    %299 = arith.cmpf ogt, %295, %298 : vector<16x128xf32>
    %300 = tpu.reciprocal %295 {approx = true} : vector<16x128xf32> -> vector<16x128xf32>
    %cst_126 = arith.constant 1.000000e+00 : f32
    %301 = vector.broadcast %cst_126 : f32 to vector<16x128xf32>
    %302 = arith.addf %295, %301 : vector<16x128xf32>
    %303 = tpu.reciprocal %302 {approx = true} : vector<16x128xf32> -> vector<16x128xf32>
    %cst_127 = arith.constant 0.000000e+00 : f32
    %304 = vector.broadcast %cst_127 : f32 to vector<16x128xf32>
    %305 = arith.subf %304, %300 : vector<16x128xf32>
    %cst_128 = arith.constant 1.000000e+00 : f32
    %306 = vector.broadcast %cst_128 : f32 to vector<16x128xf32>
    %307 = arith.subf %295, %306 : vector<16x128xf32>
    %308 = arith.mulf %307, %303 : vector<16x128xf32>
    %309 = arith.select %299, %308, %295 : vector<16x128xi1>, vector<16x128xf32>
    %310 = arith.select %297, %305, %309 : vector<16x128xi1>, vector<16x128xf32>
    %cst_129 = arith.constant 0.999026477 : f32
    %cst_130 = arith.constant 0.000000e+00 : f32
    %311 = vector.broadcast %cst_129 : f32 to vector<16x128xf32>
    %312 = vector.broadcast %cst_130 : f32 to vector<16x128xf32>
    %313 = arith.select %299, %311, %312 : vector<16x128xi1>, vector<16x128xf32>
    %cst_131 = arith.constant 1.99805295 : f32
    %314 = vector.broadcast %cst_131 : f32 to vector<16x128xf32>
    %315 = arith.select %297, %314, %313 : vector<16x128xi1>, vector<16x128xf32>
    %316 = arith.mulf %310, %310 : vector<16x128xf32>
    %cst_132 = arith.constant 0.102443628 : f32
    %317 = vector.broadcast %cst_132 : f32 to vector<16x128xf32>
    %318 = arith.mulf %317, %316 : vector<16x128xf32>
    %cst_133 = arith.constant 0.176524162 : f32
    %319 = vector.broadcast %cst_133 : f32 to vector<16x128xf32>
    %320 = arith.subf %318, %319 : vector<16x128xf32>
    %321 = arith.mulf %320, %316 : vector<16x128xf32>
    %cst_134 = arith.constant 0.254116476 : f32
    %322 = vector.broadcast %cst_134 : f32 to vector<16x128xf32>
    %323 = arith.addf %321, %322 : vector<16x128xf32>
    %324 = arith.mulf %323, %316 : vector<16x128xf32>
    %cst_135 = arith.constant 0.423995107 : f32
    %325 = vector.broadcast %cst_135 : f32 to vector<16x128xf32>
    %326 = arith.subf %324, %325 : vector<16x128xf32>
    %327 = arith.mulf %316, %326 : vector<16x128xf32>
    %cst_136 = arith.constant 1.272000e+00 : f32
    %328 = vector.broadcast %cst_136 : f32 to vector<16x128xf32>
    %329 = arith.addf %328, %327 : vector<16x128xf32>
    %330 = arith.mulf %310, %329 : vector<16x128xf32>
    %331 = arith.addf %315, %330 : vector<16x128xf32>
    %cst_137 = arith.constant 0.000000e+00 : f32
    %332 = vector.broadcast %cst_137 : f32 to vector<16x128xf32>
    %333 = arith.cmpf olt, %294, %332 : vector<16x128xf32>
    %cst_138 = arith.constant 0.000000e+00 : f32
    %334 = vector.broadcast %cst_138 : f32 to vector<16x128xf32>
    %335 = arith.subf %334, %331 : vector<16x128xf32>
    %336 = arith.select %333, %335, %331 : vector<16x128xi1>, vector<16x128xf32>
    %337 = math.exp %336 : vector<16x128xf32>
    %338 = arith.mulf %337, %277 : vector<16x128xf32>
    %339 = vector.extract_strided_slice %293 {offsets = [16, 0], sizes = [16, 128], strides = [1, 1]} : vector<32x128xf32> to vector<16x128xf32>
    %340 = arith.addf %338, %339 : vector<16x128xf32>
    %c2_139 = arith.constant 2 : index
    %c0_140 = arith.constant 0 : index
    %c0_141 = arith.constant 0 : index
    %341 = vector.load %arg7[%c2_139, %c0_140, %c0_141] : memref<4x256x16xf32, #tpu.memory_space<vmem>>, vector<1x256x16xf32>
    %342 = vector.shape_cast %341 : vector<1x256x16xf32> to vector<256x16xf32>
    %cst_142 = arith.constant dense<0.000000e+00> : vector<256x128xf32>
    %343 = tpu.matmul %342, %340, %cst_142 {dimension_numbers = #tpu.dot_dimension_numbers<[1], [0], [0], [1], [0, 0, 1, 1], [], []>} : vector<256x16xf32>, vector<16x128xf32>, vector<256x128xf32> -> vector<256x128xf32>
    %344 = arith.addf %343, %280 : vector<256x128xf32>
    %cst_143 = arith.constant 0.000000e+00 : f32
    %345 = vector.broadcast %cst_143 : f32 to vector<256x128xf32>
    %346 = arith.maximumf %344, %345 : vector<256x128xf32>
    %c2_144 = arith.constant 2 : index
    %c0_145 = arith.constant 0 : index
    %c0_146 = arith.constant 0 : index
    %347 = vector.load %arg8[%c2_144, %c0_145, %c0_146] : memref<4x32x256xf32, #tpu.memory_space<vmem>>, vector<1x32x256xf32>
    %348 = vector.shape_cast %347 : vector<1x32x256xf32> to vector<32x256xf32>
    %cst_147 = arith.constant dense<0.000000e+00> : vector<32x128xf32>
    %349 = tpu.matmul %348, %346, %cst_147 {dimension_numbers = #tpu.dot_dimension_numbers<[1], [0], [0], [1], [0, 0, 1, 1], [], []>} : vector<32x256xf32>, vector<256x128xf32>, vector<32x128xf32> -> vector<32x128xf32>
    %c2_148 = arith.constant 2 : index
    %c0_149 = arith.constant 0 : index
    %c0_150 = arith.constant 0 : index
    %350 = vector.load %arg9[%c2_148, %c0_149, %c0_150] : memref<4x32x1xf32, #tpu.memory_space<vmem>>, vector<1x32x1xf32>
    %351 = vector.shape_cast %350 : vector<1x32x1xf32> to vector<32x1xf32>
    %352 = vector.broadcast %351 : vector<32x1xf32> to vector<32x128xf32>
    %353 = arith.addf %349, %352 : vector<32x128xf32>
    %354 = vector.extract_strided_slice %353 {offsets = [0, 0], sizes = [16, 128], strides = [1, 1]} : vector<32x128xf32> to vector<16x128xf32>
    %355 = math.absf %354 : vector<16x128xf32>
    %cst_151 = arith.constant 2.41421366 : f32
    %356 = vector.broadcast %cst_151 : f32 to vector<16x128xf32>
    %357 = arith.cmpf ogt, %355, %356 : vector<16x128xf32>
    %cst_152 = arith.constant 0.414213568 : f32
    %358 = vector.broadcast %cst_152 : f32 to vector<16x128xf32>
    %359 = arith.cmpf ogt, %355, %358 : vector<16x128xf32>
    %360 = tpu.reciprocal %355 {approx = true} : vector<16x128xf32> -> vector<16x128xf32>
    %cst_153 = arith.constant 1.000000e+00 : f32
    %361 = vector.broadcast %cst_153 : f32 to vector<16x128xf32>
    %362 = arith.addf %355, %361 : vector<16x128xf32>
    %363 = tpu.reciprocal %362 {approx = true} : vector<16x128xf32> -> vector<16x128xf32>
    %cst_154 = arith.constant 0.000000e+00 : f32
    %364 = vector.broadcast %cst_154 : f32 to vector<16x128xf32>
    %365 = arith.subf %364, %360 : vector<16x128xf32>
    %cst_155 = arith.constant 1.000000e+00 : f32
    %366 = vector.broadcast %cst_155 : f32 to vector<16x128xf32>
    %367 = arith.subf %355, %366 : vector<16x128xf32>
    %368 = arith.mulf %367, %363 : vector<16x128xf32>
    %369 = arith.select %359, %368, %355 : vector<16x128xi1>, vector<16x128xf32>
    %370 = arith.select %357, %365, %369 : vector<16x128xi1>, vector<16x128xf32>
    %cst_156 = arith.constant 0.999026477 : f32
    %cst_157 = arith.constant 0.000000e+00 : f32
    %371 = vector.broadcast %cst_156 : f32 to vector<16x128xf32>
    %372 = vector.broadcast %cst_157 : f32 to vector<16x128xf32>
    %373 = arith.select %359, %371, %372 : vector<16x128xi1>, vector<16x128xf32>
    %cst_158 = arith.constant 1.99805295 : f32
    %374 = vector.broadcast %cst_158 : f32 to vector<16x128xf32>
    %375 = arith.select %357, %374, %373 : vector<16x128xi1>, vector<16x128xf32>
    %376 = arith.mulf %370, %370 : vector<16x128xf32>
    %cst_159 = arith.constant 0.102443628 : f32
    %377 = vector.broadcast %cst_159 : f32 to vector<16x128xf32>
    %378 = arith.mulf %377, %376 : vector<16x128xf32>
    %cst_160 = arith.constant 0.176524162 : f32
    %379 = vector.broadcast %cst_160 : f32 to vector<16x128xf32>
    %380 = arith.subf %378, %379 : vector<16x128xf32>
    %381 = arith.mulf %380, %376 : vector<16x128xf32>
    %cst_161 = arith.constant 0.254116476 : f32
    %382 = vector.broadcast %cst_161 : f32 to vector<16x128xf32>
    %383 = arith.addf %381, %382 : vector<16x128xf32>
    %384 = arith.mulf %383, %376 : vector<16x128xf32>
    %cst_162 = arith.constant 0.423995107 : f32
    %385 = vector.broadcast %cst_162 : f32 to vector<16x128xf32>
    %386 = arith.subf %384, %385 : vector<16x128xf32>
    %387 = arith.mulf %376, %386 : vector<16x128xf32>
    %cst_163 = arith.constant 1.272000e+00 : f32
    %388 = vector.broadcast %cst_163 : f32 to vector<16x128xf32>
    %389 = arith.addf %388, %387 : vector<16x128xf32>
    %390 = arith.mulf %370, %389 : vector<16x128xf32>
    %391 = arith.addf %375, %390 : vector<16x128xf32>
    %cst_164 = arith.constant 0.000000e+00 : f32
    %392 = vector.broadcast %cst_164 : f32 to vector<16x128xf32>
    %393 = arith.cmpf olt, %354, %392 : vector<16x128xf32>
    %cst_165 = arith.constant 0.000000e+00 : f32
    %394 = vector.broadcast %cst_165 : f32 to vector<16x128xf32>
    %395 = arith.subf %394, %391 : vector<16x128xf32>
    %396 = arith.select %393, %395, %391 : vector<16x128xi1>, vector<16x128xf32>
    %397 = math.exp %396 : vector<16x128xf32>
    %398 = arith.mulf %397, %278 : vector<16x128xf32>
    %399 = vector.extract_strided_slice %353 {offsets = [16, 0], sizes = [16, 128], strides = [1, 1]} : vector<32x128xf32> to vector<16x128xf32>
    %400 = arith.addf %398, %399 : vector<16x128xf32>
    %401 = vector.extract_strided_slice %336 {offsets = [0, 0], sizes = [8, 128], strides = [1, 1]} : vector<16x128xf32> to vector<8x128xf32>
    %402 = vector.extract_strided_slice %336 {offsets = [8, 0], sizes = [8, 128], strides = [1, 1]} : vector<16x128xf32> to vector<8x128xf32>
    %403 = arith.addf %401, %402 : vector<8x128xf32>
    %404 = arith.addf %272, %403 : vector<8x128xf32>
    %405 = vector.extract_strided_slice %396 {offsets = [0, 0], sizes = [8, 128], strides = [1, 1]} : vector<16x128xf32> to vector<8x128xf32>
    %406 = vector.extract_strided_slice %396 {offsets = [8, 0], sizes = [8, 128], strides = [1, 1]} : vector<16x128xf32> to vector<8x128xf32>
    %407 = arith.addf %405, %406 : vector<8x128xf32>
    %408 = arith.addf %404, %407 : vector<8x128xf32>
    %409 = vector.extract_strided_slice %340 {offsets = [0, 0], sizes = [8, 128], strides = [1, 1]} : vector<16x128xf32> to vector<8x128xf32>
    %410 = vector.extract_strided_slice %340 {offsets = [8, 0], sizes = [8, 128], strides = [1, 1]} : vector<16x128xf32> to vector<8x128xf32>
    %411 = vector.extract_strided_slice %400 {offsets = [0, 0], sizes = [8, 128], strides = [1, 1]} : vector<16x128xf32> to vector<8x128xf32>
    %412 = vector.extract_strided_slice %400 {offsets = [8, 0], sizes = [8, 128], strides = [1, 1]} : vector<16x128xf32> to vector<8x128xf32>
    %413 = tpu.concatenate %411, %412 in 0 : vector<8x128xf32>, vector<8x128xf32> -> vector<16x128xf32>
    %414 = tpu.concatenate %410, %409 in 0 : vector<8x128xf32>, vector<8x128xf32> -> vector<16x128xf32>
    %415 = vector.extract_strided_slice %3 {offsets = [1536, 0], sizes = [256, 128], strides = [1, 1]} : vector<2048x128xf32> to vector<256x128xf32>
    %416 = vector.extract_strided_slice %3 {offsets = [1792, 0], sizes = [256, 128], strides = [1, 1]} : vector<2048x128xf32> to vector<256x128xf32>
    %c3 = arith.constant 3 : index
    %c0_166 = arith.constant 0 : index
    %c0_167 = arith.constant 0 : index
    %417 = vector.load %arg4[%c3, %c0_166, %c0_167] : memref<4x256x16xf32, #tpu.memory_space<vmem>>, vector<1x256x16xf32>
    %418 = vector.shape_cast %417 : vector<1x256x16xf32> to vector<256x16xf32>
    %cst_168 = arith.constant dense<0.000000e+00> : vector<256x128xf32>
    %419 = tpu.matmul %418, %414, %cst_168 {dimension_numbers = #tpu.dot_dimension_numbers<[1], [0], [0], [1], [0, 0, 1, 1], [], []>} : vector<256x16xf32>, vector<16x128xf32>, vector<256x128xf32> -> vector<256x128xf32>
    %420 = arith.addf %419, %415 : vector<256x128xf32>
    %cst_169 = arith.constant 0.000000e+00 : f32
    %421 = vector.broadcast %cst_169 : f32 to vector<256x128xf32>
    %422 = arith.maximumf %420, %421 : vector<256x128xf32>
    %c3_170 = arith.constant 3 : index
    %c0_171 = arith.constant 0 : index
    %c0_172 = arith.constant 0 : index
    %423 = vector.load %arg5[%c3_170, %c0_171, %c0_172] : memref<4x32x256xf32, #tpu.memory_space<vmem>>, vector<1x32x256xf32>
    %424 = vector.shape_cast %423 : vector<1x32x256xf32> to vector<32x256xf32>
    %cst_173 = arith.constant dense<0.000000e+00> : vector<32x128xf32>
    %425 = tpu.matmul %424, %422, %cst_173 {dimension_numbers = #tpu.dot_dimension_numbers<[1], [0], [0], [1], [0, 0, 1, 1], [], []>} : vector<32x256xf32>, vector<256x128xf32>, vector<32x128xf32> -> vector<32x128xf32>
    %c3_174 = arith.constant 3 : index
    %c0_175 = arith.constant 0 : index
    %c0_176 = arith.constant 0 : index
    %426 = vector.load %arg6[%c3_174, %c0_175, %c0_176] : memref<4x32x1xf32, #tpu.memory_space<vmem>>, vector<1x32x1xf32>
    %427 = vector.shape_cast %426 : vector<1x32x1xf32> to vector<32x1xf32>
    %428 = vector.broadcast %427 : vector<32x1xf32> to vector<32x128xf32>
    %429 = arith.addf %425, %428 : vector<32x128xf32>
    %430 = vector.extract_strided_slice %429 {offsets = [0, 0], sizes = [16, 128], strides = [1, 1]} : vector<32x128xf32> to vector<16x128xf32>
    %431 = math.absf %430 : vector<16x128xf32>
    %cst_177 = arith.constant 2.41421366 : f32
    %432 = vector.broadcast %cst_177 : f32 to vector<16x128xf32>
    %433 = arith.cmpf ogt, %431, %432 : vector<16x128xf32>
    %cst_178 = arith.constant 0.414213568 : f32
    %434 = vector.broadcast %cst_178 : f32 to vector<16x128xf32>
    %435 = arith.cmpf ogt, %431, %434 : vector<16x128xf32>
    %436 = tpu.reciprocal %431 {approx = true} : vector<16x128xf32> -> vector<16x128xf32>
    %cst_179 = arith.constant 1.000000e+00 : f32
    %437 = vector.broadcast %cst_179 : f32 to vector<16x128xf32>
    %438 = arith.addf %431, %437 : vector<16x128xf32>
    %439 = tpu.reciprocal %438 {approx = true} : vector<16x128xf32> -> vector<16x128xf32>
    %cst_180 = arith.constant 0.000000e+00 : f32
    %440 = vector.broadcast %cst_180 : f32 to vector<16x128xf32>
    %441 = arith.subf %440, %436 : vector<16x128xf32>
    %cst_181 = arith.constant 1.000000e+00 : f32
    %442 = vector.broadcast %cst_181 : f32 to vector<16x128xf32>
    %443 = arith.subf %431, %442 : vector<16x128xf32>
    %444 = arith.mulf %443, %439 : vector<16x128xf32>
    %445 = arith.select %435, %444, %431 : vector<16x128xi1>, vector<16x128xf32>
    %446 = arith.select %433, %441, %445 : vector<16x128xi1>, vector<16x128xf32>
    %cst_182 = arith.constant 0.999026477 : f32
    %cst_183 = arith.constant 0.000000e+00 : f32
    %447 = vector.broadcast %cst_182 : f32 to vector<16x128xf32>
    %448 = vector.broadcast %cst_183 : f32 to vector<16x128xf32>
    %449 = arith.select %435, %447, %448 : vector<16x128xi1>, vector<16x128xf32>
    %cst_184 = arith.constant 1.99805295 : f32
    %450 = vector.broadcast %cst_184 : f32 to vector<16x128xf32>
    %451 = arith.select %433, %450, %449 : vector<16x128xi1>, vector<16x128xf32>
    %452 = arith.mulf %446, %446 : vector<16x128xf32>
    %cst_185 = arith.constant 0.102443628 : f32
    %453 = vector.broadcast %cst_185 : f32 to vector<16x128xf32>
    %454 = arith.mulf %453, %452 : vector<16x128xf32>
    %cst_186 = arith.constant 0.176524162 : f32
    %455 = vector.broadcast %cst_186 : f32 to vector<16x128xf32>
    %456 = arith.subf %454, %455 : vector<16x128xf32>
    %457 = arith.mulf %456, %452 : vector<16x128xf32>
    %cst_187 = arith.constant 0.254116476 : f32
    %458 = vector.broadcast %cst_187 : f32 to vector<16x128xf32>
    %459 = arith.addf %457, %458 : vector<16x128xf32>
    %460 = arith.mulf %459, %452 : vector<16x128xf32>
    %cst_188 = arith.constant 0.423995107 : f32
    %461 = vector.broadcast %cst_188 : f32 to vector<16x128xf32>
    %462 = arith.subf %460, %461 : vector<16x128xf32>
    %463 = arith.mulf %452, %462 : vector<16x128xf32>
    %cst_189 = arith.constant 1.272000e+00 : f32
    %464 = vector.broadcast %cst_189 : f32 to vector<16x128xf32>
    %465 = arith.addf %464, %463 : vector<16x128xf32>
    %466 = arith.mulf %446, %465 : vector<16x128xf32>
    %467 = arith.addf %451, %466 : vector<16x128xf32>
    %cst_190 = arith.constant 0.000000e+00 : f32
    %468 = vector.broadcast %cst_190 : f32 to vector<16x128xf32>
    %469 = arith.cmpf olt, %430, %468 : vector<16x128xf32>
    %cst_191 = arith.constant 0.000000e+00 : f32
    %470 = vector.broadcast %cst_191 : f32 to vector<16x128xf32>
    %471 = arith.subf %470, %467 : vector<16x128xf32>
    %472 = arith.select %469, %471, %467 : vector<16x128xi1>, vector<16x128xf32>
    %473 = math.exp %472 : vector<16x128xf32>
    %474 = arith.mulf %473, %413 : vector<16x128xf32>
    %475 = vector.extract_strided_slice %429 {offsets = [16, 0], sizes = [16, 128], strides = [1, 1]} : vector<32x128xf32> to vector<16x128xf32>
    %476 = arith.addf %474, %475 : vector<16x128xf32>
    %c3_192 = arith.constant 3 : index
    %c0_193 = arith.constant 0 : index
    %c0_194 = arith.constant 0 : index
    %477 = vector.load %arg7[%c3_192, %c0_193, %c0_194] : memref<4x256x16xf32, #tpu.memory_space<vmem>>, vector<1x256x16xf32>
    %478 = vector.shape_cast %477 : vector<1x256x16xf32> to vector<256x16xf32>
    %cst_195 = arith.constant dense<0.000000e+00> : vector<256x128xf32>
    %479 = tpu.matmul %478, %476, %cst_195 {dimension_numbers = #tpu.dot_dimension_numbers<[1], [0], [0], [1], [0, 0, 1, 1], [], []>} : vector<256x16xf32>, vector<16x128xf32>, vector<256x128xf32> -> vector<256x128xf32>
    %480 = arith.addf %479, %416 : vector<256x128xf32>
    %cst_196 = arith.constant 0.000000e+00 : f32
    %481 = vector.broadcast %cst_196 : f32 to vector<256x128xf32>
    %482 = arith.maximumf %480, %481 : vector<256x128xf32>
    %c3_197 = arith.constant 3 : index
    %c0_198 = arith.constant 0 : index
    %c0_199 = arith.constant 0 : index
    %483 = vector.load %arg8[%c3_197, %c0_198, %c0_199] : memref<4x32x256xf32, #tpu.memory_space<vmem>>, vector<1x32x256xf32>
    %484 = vector.shape_cast %483 : vector<1x32x256xf32> to vector<32x256xf32>
    %cst_200 = arith.constant dense<0.000000e+00> : vector<32x128xf32>
    %485 = tpu.matmul %484, %482, %cst_200 {dimension_numbers = #tpu.dot_dimension_numbers<[1], [0], [0], [1], [0, 0, 1, 1], [], []>} : vector<32x256xf32>, vector<256x128xf32>, vector<32x128xf32> -> vector<32x128xf32>
    %c3_201 = arith.constant 3 : index
    %c0_202 = arith.constant 0 : index
    %c0_203 = arith.constant 0 : index
    %486 = vector.load %arg9[%c3_201, %c0_202, %c0_203] : memref<4x32x1xf32, #tpu.memory_space<vmem>>, vector<1x32x1xf32>
    %487 = vector.shape_cast %486 : vector<1x32x1xf32> to vector<32x1xf32>
    %488 = vector.broadcast %487 : vector<32x1xf32> to vector<32x128xf32>
    %489 = arith.addf %485, %488 : vector<32x128xf32>
    %490 = vector.extract_strided_slice %489 {offsets = [0, 0], sizes = [16, 128], strides = [1, 1]} : vector<32x128xf32> to vector<16x128xf32>
    %491 = math.absf %490 : vector<16x128xf32>
    %cst_204 = arith.constant 2.41421366 : f32
    %492 = vector.broadcast %cst_204 : f32 to vector<16x128xf32>
    %493 = arith.cmpf ogt, %491, %492 : vector<16x128xf32>
    %cst_205 = arith.constant 0.414213568 : f32
    %494 = vector.broadcast %cst_205 : f32 to vector<16x128xf32>
    %495 = arith.cmpf ogt, %491, %494 : vector<16x128xf32>
    %496 = tpu.reciprocal %491 {approx = true} : vector<16x128xf32> -> vector<16x128xf32>
    %cst_206 = arith.constant 1.000000e+00 : f32
    %497 = vector.broadcast %cst_206 : f32 to vector<16x128xf32>
    %498 = arith.addf %491, %497 : vector<16x128xf32>
    %499 = tpu.reciprocal %498 {approx = true} : vector<16x128xf32> -> vector<16x128xf32>
    %cst_207 = arith.constant 0.000000e+00 : f32
    %500 = vector.broadcast %cst_207 : f32 to vector<16x128xf32>
    %501 = arith.subf %500, %496 : vector<16x128xf32>
    %cst_208 = arith.constant 1.000000e+00 : f32
    %502 = vector.broadcast %cst_208 : f32 to vector<16x128xf32>
    %503 = arith.subf %491, %502 : vector<16x128xf32>
    %504 = arith.mulf %503, %499 : vector<16x128xf32>
    %505 = arith.select %495, %504, %491 : vector<16x128xi1>, vector<16x128xf32>
    %506 = arith.select %493, %501, %505 : vector<16x128xi1>, vector<16x128xf32>
    %cst_209 = arith.constant 0.999026477 : f32
    %cst_210 = arith.constant 0.000000e+00 : f32
    %507 = vector.broadcast %cst_209 : f32 to vector<16x128xf32>
    %508 = vector.broadcast %cst_210 : f32 to vector<16x128xf32>
    %509 = arith.select %495, %507, %508 : vector<16x128xi1>, vector<16x128xf32>
    %cst_211 = arith.constant 1.99805295 : f32
    %510 = vector.broadcast %cst_211 : f32 to vector<16x128xf32>
    %511 = arith.select %493, %510, %509 : vector<16x128xi1>, vector<16x128xf32>
    %512 = arith.mulf %506, %506 : vector<16x128xf32>
    %cst_212 = arith.constant 0.102443628 : f32
    %513 = vector.broadcast %cst_212 : f32 to vector<16x128xf32>
    %514 = arith.mulf %513, %512 : vector<16x128xf32>
    %cst_213 = arith.constant 0.176524162 : f32
    %515 = vector.broadcast %cst_213 : f32 to vector<16x128xf32>
    %516 = arith.subf %514, %515 : vector<16x128xf32>
    %517 = arith.mulf %516, %512 : vector<16x128xf32>
    %cst_214 = arith.constant 0.254116476 : f32
    %518 = vector.broadcast %cst_214 : f32 to vector<16x128xf32>
    %519 = arith.addf %517, %518 : vector<16x128xf32>
    %520 = arith.mulf %519, %512 : vector<16x128xf32>
    %cst_215 = arith.constant 0.423995107 : f32
    %521 = vector.broadcast %cst_215 : f32 to vector<16x128xf32>
    %522 = arith.subf %520, %521 : vector<16x128xf32>
    %523 = arith.mulf %512, %522 : vector<16x128xf32>
    %cst_216 = arith.constant 1.272000e+00 : f32
    %524 = vector.broadcast %cst_216 : f32 to vector<16x128xf32>
    %525 = arith.addf %524, %523 : vector<16x128xf32>
    %526 = arith.mulf %506, %525 : vector<16x128xf32>
    %527 = arith.addf %511, %526 : vector<16x128xf32>
    %cst_217 = arith.constant 0.000000e+00 : f32
    %528 = vector.broadcast %cst_217 : f32 to vector<16x128xf32>
    %529 = arith.cmpf olt, %490, %528 : vector<16x128xf32>
    %cst_218 = arith.constant 0.000000e+00 : f32
    %530 = vector.broadcast %cst_218 : f32 to vector<16x128xf32>
    %531 = arith.subf %530, %527 : vector<16x128xf32>
    %532 = arith.select %529, %531, %527 : vector<16x128xi1>, vector<16x128xf32>
    %533 = math.exp %532 : vector<16x128xf32>
    %534 = arith.mulf %533, %414 : vector<16x128xf32>
    %535 = vector.extract_strided_slice %489 {offsets = [16, 0], sizes = [16, 128], strides = [1, 1]} : vector<32x128xf32> to vector<16x128xf32>
    %536 = arith.addf %534, %535 : vector<16x128xf32>
    %537 = vector.extract_strided_slice %472 {offsets = [0, 0], sizes = [8, 128], strides = [1, 1]} : vector<16x128xf32> to vector<8x128xf32>
    %538 = vector.extract_strided_slice %472 {offsets = [8, 0], sizes = [8, 128], strides = [1, 1]} : vector<16x128xf32> to vector<8x128xf32>
    %539 = arith.addf %537, %538 : vector<8x128xf32>
    %540 = arith.addf %408, %539 : vector<8x128xf32>
    %541 = vector.extract_strided_slice %532 {offsets = [0, 0], sizes = [8, 128], strides = [1, 1]} : vector<16x128xf32> to vector<8x128xf32>
    %542 = vector.extract_strided_slice %532 {offsets = [8, 0], sizes = [8, 128], strides = [1, 1]} : vector<16x128xf32> to vector<8x128xf32>
    %543 = arith.addf %541, %542 : vector<8x128xf32>
    %544 = arith.addf %540, %543 : vector<8x128xf32>
    %545 = vector.extract_strided_slice %476 {offsets = [0, 0], sizes = [8, 128], strides = [1, 1]} : vector<16x128xf32> to vector<8x128xf32>
    %546 = vector.extract_strided_slice %476 {offsets = [8, 0], sizes = [8, 128], strides = [1, 1]} : vector<16x128xf32> to vector<8x128xf32>
    %547 = vector.extract_strided_slice %536 {offsets = [0, 0], sizes = [8, 128], strides = [1, 1]} : vector<16x128xf32> to vector<8x128xf32>
    %548 = vector.extract_strided_slice %536 {offsets = [8, 0], sizes = [8, 128], strides = [1, 1]} : vector<16x128xf32> to vector<8x128xf32>
    %549 = tpu.concatenate %548, %546 in 0 : vector<8x128xf32>, vector<8x128xf32> -> vector<16x128xf32>
    %550 = tpu.concatenate %545, %547 in 0 : vector<8x128xf32>, vector<8x128xf32> -> vector<16x128xf32>
    %551 = tpu.concatenate %549, %550 in 0 : vector<16x128xf32>, vector<16x128xf32> -> vector<32x128xf32>
    %c0_219 = arith.constant 0 : index
    %c0_220 = arith.constant 0 : index
    %552 = vector.load %arg10[%c0_219, %c0_220] : memref<32x128xf32, #tpu.memory_space<vmem>>, vector<32x128xf32>
    tpu.vector_store %arg10[%c0_219, %c0_220], %551 {strides = array<i32>} : memref<32x128xf32, #tpu.memory_space<vmem>>, vector<32x128xf32>,
    %c0_221 = arith.constant 0 : index
    %c0_222 = arith.constant 0 : index
    %553 = vector.load %arg11[%c0_221, %c0_222] : memref<8x128xf32, #tpu.memory_space<vmem>>, vector<8x128xf32>
    tpu.vector_store %arg11[%c0_221, %c0_222], %544 {strides = array<i32>} : memref<8x128xf32, #tpu.memory_space<vmem>>, vector<8x128xf32>,
    return
  }
  func.func @transform_0(%arg0: i32) -> (i32, i32) {
    %c0_i32 = arith.constant 0 : i32
    %c0_i32_0 = arith.constant 0 : i32
    return %c0_i32, %arg0 : i32, i32
  }
  func.func @transform_1(%arg0: i32) -> (i32, i32) {
    %c0_i32 = arith.constant 0 : i32
    %c0_i32_0 = arith.constant 0 : i32
    return %c0_i32, %arg0 : i32, i32
  }
  func.func @transform_2(%arg0: i32) -> (i32, i32) {
    %c0_i32 = arith.constant 0 : i32
    %c0_i32_0 = arith.constant 0 : i32
    %c0_i32_1 = arith.constant 0 : i32
    return %c0_i32, %c0_i32_0 : i32, i32
  }
  func.func @transform_3(%arg0: i32) -> (i32, i32, i32) {
    %c0_i32 = arith.constant 0 : i32
    %c0_i32_0 = arith.constant 0 : i32
    %c0_i32_1 = arith.constant 0 : i32
    %c0_i32_2 = arith.constant 0 : i32
    return %c0_i32, %c0_i32_0, %c0_i32_1 : i32, i32, i32
  }
  func.func @transform_4(%arg0: i32) -> (i32, i32, i32) {
    %c0_i32 = arith.constant 0 : i32
    %c0_i32_0 = arith.constant 0 : i32
    %c0_i32_1 = arith.constant 0 : i32
    %c0_i32_2 = arith.constant 0 : i32
    return %c0_i32, %c0_i32_0, %c0_i32_1 : i32, i32, i32
  }
  func.func @transform_5(%arg0: i32) -> (i32, i32, i32) {
    %c0_i32 = arith.constant 0 : i32
    %c0_i32_0 = arith.constant 0 : i32
    %c0_i32_1 = arith.constant 0 : i32
    %c0_i32_2 = arith.constant 0 : i32
    return %c0_i32, %c0_i32_0, %c0_i32_1 : i32, i32, i32
  }
  func.func @transform_6(%arg0: i32) -> (i32, i32, i32) {
    %c0_i32 = arith.constant 0 : i32
    %c0_i32_0 = arith.constant 0 : i32
    %c0_i32_1 = arith.constant 0 : i32
    %c0_i32_2 = arith.constant 0 : i32
    return %c0_i32, %c0_i32_0, %c0_i32_1 : i32, i32, i32
  }
  func.func @transform_7(%arg0: i32) -> (i32, i32, i32) {
    %c0_i32 = arith.constant 0 : i32
    %c0_i32_0 = arith.constant 0 : i32
    %c0_i32_1 = arith.constant 0 : i32
    %c0_i32_2 = arith.constant 0 : i32
    return %c0_i32, %c0_i32_0, %c0_i32_1 : i32, i32, i32
  }
  func.func @transform_8(%arg0: i32) -> (i32, i32, i32) {
    %c0_i32 = arith.constant 0 : i32
    %c0_i32_0 = arith.constant 0 : i32
    %c0_i32_1 = arith.constant 0 : i32
    %c0_i32_2 = arith.constant 0 : i32
    return %c0_i32, %c0_i32_0, %c0_i32_1 : i32, i32, i32
  }
  func.func @transform_9(%arg0: i32) -> (i32, i32) {
    %c0_i32 = arith.constant 0 : i32
    %c0_i32_0 = arith.constant 0 : i32
    return %c0_i32, %arg0 : i32, i32
  }
  func.func @transform_10(%arg0: i32) -> (i32, i32) {
    %c0_i32 = arith.constant 0 : i32
    %c0_i32_0 = arith.constant 0 : i32
    return %c0_i32, %arg0 : i32, i32
  }
}

</mosaic_0001>

<bundles_post_ra>
// kernel: tpu_custom_call.1
= control target key start
LH: loop header
LB: loop body
LE: loop exit
PB: predicated region body
PF: predicated region fallthrough
CT: control target
= control target key end

     0   :  { %16 = vsyncpa [#allocation3], 0  ;;  %vm301_vm0 = vcmask 269312   ;;  %vm1070_vm1 = vcmask 1040384   ;;  %s13708_s0 = inlined_call_operand.vmem [shape: f32[32,128], index: 0, kind: input, shape index: {}]   ;;  %s13709_s1 = inlined_call_operand.vmem [shape: f32[33,128], index: 1, kind: input, shape index: {}]   ;;  %s13710_s2 = inlined_call_operand.vmem [shape: f32[2048,33], index: 2, kind: input, shape index: {}]   ;;  %s13711_s3 = inlined_call_operand.vmem [shape: f32[4,256,16], index: 3, kind: input, shape index: {}]   ;;  %s13712_s4 = inlined_call_operand.vmem [shape: f32[4,32,256], index: 4, kind: input, shape index: {}]   ;;  %s13713_s5 = inlined_call_operand.vmem [shape: f32[4,32,1], index: 5, kind: input, shape index: {}]   ;;  %s13714_s6 = inlined_call_operand.vmem [shape: f32[4,256,16], index: 6, kind: input, shape index: {}]   ;;  %s13715_s7 = inlined_call_operand.vmem [shape: f32[4,32,256], index: 7, kind: input, shape index: {}]   ;;  %s13716_s8 = inlined_call_operand.vmem [shape: f32[4,32,1], index: 8, kind: input, shape index: {}]   ;;  %s13717_s9 = inlined_call_operand.hbm [shape: f32[32,128], index: 9, kind: output, shape index: {0}]   ;;  %s13718_s10 = inlined_call_operand.hbm [shape: f32[8,128], index: 10, kind: output, shape index: {1}]  }
   0x1   :  { %v40_v0 = vld [vmem:[%s13709_s1] sm:$0xff]  ;;  %v41_v1 = vld [vmem:[%s13709_s1 + $0x8] sm:$0xff]  ;;  %v42_v2 = vld [vmem:[%s13709_s1 + $0x10] sm:$0xff] }
   0x2   :  { %v9521_v3 = vpack.c.bf16 %v41_v1, %v40_v0  ;;  %v43_v4 = vld [vmem:[%s13709_s1 + $0x18] sm:$0xff]  ;;  %v45_v5 = vld [vmem:[%s13710_s2] sm:$0xff]  ;;  %v46_v9 = vld [vmem:[%s13710_s2 + $0x8] sm:$0xff] }
   0x3   :  { %v9525_v6 = vpack.c.bf16 %v43_v4, %v42_v2  ;;  %8721 = vmatprep.mubr.msk.f32.mxu0 %vm301_vm0, %v45_v5  ;;  %v105_v7 = vld [vmem:[%s13710_s2 + $0x1e0] sm:$0xff]  ;;  %v106_v10 = vld [vmem:[%s13710_s2 + $0x1e8] sm:$0xff]  ;;  %v47_v11 = vld [vmem:[%s13710_s2 + $0x10] sm:$0xff] }
   0x4   :  { %9522 = vmatprep.subr.bf16.mxu0 %v9521_v3  ;;  %9817 = vmatprep.subr.bf16.mxu1 %v9521_v3  ;;  %v44_v8 = vld [vmem:[%s13709_s1 + $0x20] sm:$0x1]  ;;  %v107_v12 = vld [vmem:[%s13710_s2 + $0x1f0] sm:$0xff]  ;;  %v48_v13 = vld [vmem:[%s13710_s2 + $0x18] sm:$0xff] }
   0x5   :  { %9524 = vmatpush3.bf16.msra.mxu0 %v9521_v3  ;;  %9820 = vmatpush3.bf16.msra.mxu1 %v9521_v3  ;;  %v108_v14 = vld [vmem:[%s13710_s2 + $0x1f8] sm:$0xff]  ;;  %v49_v15 = vld [vmem:[%s13710_s2 + $0x20] sm:$0xff]  ;;  %v50_v17 = vld [vmem:[%s13710_s2 + $0x28] sm:$0xff] }
   0x6   :  { %9526 = vmatprep.subr.bf16.mxu0 %v9525_v6  ;;  %9818 = vmatprep.subr.bf16.mxu1 %v9525_v6  ;;  %v109_v16 = vld [vmem:[%s13710_s2 + $0x200] sm:$0xff]  ;;  %v110_v18 = vld [vmem:[%s13710_s2 + $0x208] sm:$0xff]  ;;  %v51_v19 = vld [vmem:[%s13710_s2 + $0x30] sm:$0xff] }
   0x7   :  { %8811 = vmatprep.mubr.msk.f32.mxu1 %vm301_vm0, %v105_v7  ;;  %v111_v20 = vld [vmem:[%s13710_s2 + $0x210] sm:$0xff]  ;;  %v52_v21 = vld [vmem:[%s13710_s2 + $0x38] sm:$0xff]  ;;  %v53_v23 = vld [vmem:[%s13710_s2 + $0x40] sm:$0xff] }
   0x8   :  { %v112_v22 = vld [vmem:[%s13710_s2 + $0x218] sm:$0xff]  ;;  %v113_v24 = vld [vmem:[%s13710_s2 + $0x220] sm:$0xff]  ;;  %v54_v25 = vld [vmem:[%s13710_s2 + $0x48] sm:$0xff] }
   0x9   :  { %9528 = vmatpush3.bf16.msra.mxu0 %v9525_v6  ;;  %9821 = vmatpush3.bf16.msra.mxu1 %v9525_v6  ;;  %v114_v26 = vld [vmem:[%s13710_s2 + $0x228] sm:$0xff]  ;;  %v55_v27 = vld [vmem:[%s13710_s2 + $0x50] sm:$0xff]  ;;  %v56_v29 = vld [vmem:[%s13710_s2 + $0x58] sm:$0xff] }
   0xa   :  { %8719 = vmatprep.subr.msk.mxu0 %vm1070_vm1, %v44_v8  ;;  %9819 = vmatprep.subr.msk.mxu1 %vm1070_vm1, %v44_v8  ;;  %v115_v28 = vld [vmem:[%s13710_s2 + $0x230] sm:$0xff]  ;;  %v116_v30 = vld [vmem:[%s13710_s2 + $0x238] sm:$0xff]  ;;  %v57_v31 = vld [vmem:[%s13710_s2 + $0x60] sm:$0xff] }
   0xb   :  { %v117_v32 = vld [vmem:[%s13710_s2 + $0x240] sm:$0xff]  ;;  %v58_v33 = vld [vmem:[%s13710_s2 + $0x68] sm:$0xff]  ;;  %v59_v35 = vld [vmem:[%s13710_s2 + $0x70] sm:$0xff] }
   0xc   :  { %v118_v34 = vld [vmem:[%s13710_s2 + $0x248] sm:$0xff]  ;;  %v119_v36 = vld [vmem:[%s13710_s2 + $0x250] sm:$0xff]  ;;  %v60_v37 = vld [vmem:[%s13710_s2 + $0x78] sm:$0xff] }
   0xd   :  { %8720 = vmatpush3.msk.msra.mxu0 %vm1070_vm1, %v44_v8  ;;  %9822 = vmatpush3.msk.msra.mxu1 %vm1070_vm1, %v44_v8  ;;  %v120_v38 = vld [vmem:[%s13710_s2 + $0x258] sm:$0xff]  ;;  %v61_v39 = vld [vmem:[%s13710_s2 + $0x80] sm:$0xff]  ;;  %v38_v41 = vld [vmem:[%s13708_s0 + $0x10] sm:$0xff] }
   0xe   :  { %8722 = vmatmul.mubr.msk.f32.vlgmr.msra.gmra.mrb[0].mxu0 %vm301_vm0, %v46_v9  ;;  %8812 = vmatmul.mubr.msk.f32.vlgmr.msra.gmra.mrb[0].mxu1 %vm301_vm0, %v106_v10  ;;  %v121_v40 = vld [vmem:[%s13710_s2 + $0x260] sm:$0xff]  ;;  %v39_v42 = vld [vmem:[%s13708_s0 + $0x18] sm:$0xff]  ;;  %v62_v44 = vld [vmem:[%s13710_s2 + $0x88] sm:$0xff] }
   0xf   :  { %8724 = vmatprep.mubr.msk.f32.mxu0 %vm301_vm0, %v47_v11  ;;  %8814 = vmatprep.mubr.msk.f32.mxu1 %vm301_vm0, %v107_v12  ;;  %v9529_v43 = vpack.c.bf16 %v39_v42, %v38_v41  ;;  %v122_v45 = vld [vmem:[%s13710_s2 + $0x268] sm:$0xff]  ;;  %v63_v46 = vld [vmem:[%s13710_s2 + $0x90] sm:$0xff]  ;;  %v64_v48 = vld [vmem:[%s13710_s2 + $0x98] sm:$0xff] }
  0x10   :  { %v123_v47 = vld [vmem:[%s13710_s2 + $0x270] sm:$0xff]  ;;  %v124_v49 = vld [vmem:[%s13710_s2 + $0x278] sm:$0xff]  ;;  %v65_v50 = vld [vmem:[%s13710_s2 + $0xa0] sm:$0xff] }
  0x11   :  { %9530 = vmatprep.subr.bf16.mxu0 %v9529_v43  ;;  %v125_v51 = vld [vmem:[%s13710_s2 + $0x280] sm:$0xff]  ;;  %v66_v52 = vld [vmem:[%s13710_s2 + $0xa8] sm:$0xff]  ;;  %v67_v54 = vld [vmem:[%s13710_s2 + $0xb0] sm:$0xff] }
  0x12   :  { %8725 = vmatmul.mubr.msk.f32.gmra.mrb[2].mxu0 %vm301_vm0, %v48_v13  ;;  %8815 = vmatmul.mubr.msk.f32.gmra.mrb[2].mxu1 %vm301_vm0, %v108_v14  ;;  %v126_v53 = vld [vmem:[%s13710_s2 + $0x288] sm:$0xff]  ;;  %v127_v55 = vld [vmem:[%s13710_s2 + $0x290] sm:$0xff]  ;;  %v68_v56 = vld [vmem:[%s13710_s2 + $0xb8] sm:$0xff] }
  0x13   :  { %8727 = vmatprep.mubr.msk.f32.mxu0 %vm301_vm0, %v49_v15  ;;  %8817 = vmatprep.mubr.msk.f32.mxu1 %vm301_vm0, %v109_v16  ;;  %v128_v57 = vld [vmem:[%s13710_s2 + $0x298] sm:$0xff]  ;;  %v69_v58 = vld [vmem:[%s13710_s2 + $0xc0] sm:$0xff]  ;;  %v70_v60 = vld [vmem:[%s13710_s2 + $0xc8] sm:$0xff] }
  0x14   :  { %9532 = vmatpush3.bf16.msra.mxu0 %v9529_v43  ;;  %v129_v59 = vld [vmem:[%s13710_s2 + $0x2a0] sm:$0xff]  ;;  %v130_v61 = vld [vmem:[%s13710_s2 + $0x2a8] sm:$0xff]  ;;  %v71_v62 = vld [vmem:[%s13710_s2 + $0xd0] sm:$0xff] }
  0x15   :  { %v131_v63 = vld [vmem:[%s13710_s2 + $0x2b0] sm:$0xff] }
  0x16   :  { %8728 = vmatmul.mubr.msk.f32.gmra.mrb[4].mxu0 %vm301_vm0, %v50_v17  ;;  %8818 = vmatmul.mubr.msk.f32.gmra.mrb[4].mxu1 %vm301_vm0, %v110_v18 }
  0x17   :  { %8730 = vmatprep.mubr.msk.f32.mxu0 %vm301_vm0, %v51_v19  ;;  %8820 = vmatprep.mubr.msk.f32.mxu1 %vm301_vm0, %v111_v20 }
  0x1a   :  { %8731 = vmatmul.mubr.msk.f32.gmra.mrb[6].mxu0 %vm301_vm0, %v52_v21  ;;  %8821 = vmatmul.mubr.msk.f32.gmra.mrb[6].mxu1 %vm301_vm0, %v112_v22 }
  0x1b   :  { %8733 = vmatprep.mubr.msk.f32.mxu0 %vm301_vm0, %v53_v23  ;;  %8823 = vmatprep.mubr.msk.f32.mxu1 %vm301_vm0, %v113_v24 }
  0x1e   :  { %8734 = vmatmul.mubr.msk.f32.gmra.mrb[8].mxu0 %vm301_vm0, %v54_v25  ;;  %8824 = vmatmul.mubr.msk.f32.gmra.mrb[8].mxu1 %vm301_vm0, %v114_v26 }
  0x1f   :  { %8736 = vmatprep.mubr.msk.f32.mxu0 %vm301_vm0, %v55_v27  ;;  %8826 = vmatprep.mubr.msk.f32.mxu1 %vm301_vm0, %v115_v28 }
  0x22   :  { %8737 = vmatmul.mubr.msk.f32.gmra.mrb[10].mxu0 %vm301_vm0, %v56_v29  ;;  %8827 = vmatmul.mubr.msk.f32.gmra.mrb[10].mxu1 %vm301_vm0, %v116_v30 }
  0x23   :  { %8739 = vmatprep.mubr.msk.f32.mxu0 %vm301_vm0, %v57_v31  ;;  %8829 = vmatprep.mubr.msk.f32.mxu1 %vm301_vm0, %v117_v32 }
  0x26   :  { %8740 = vmatmul.mubr.msk.f32.gmra.mrb[12].mxu0 %vm301_vm0, %v58_v33  ;;  %8830 = vmatmul.mubr.msk.f32.gmra.mrb[12].mxu1 %vm301_vm0, %v118_v34 }
  0x27   :  { %8742 = vmatprep.mubr.msk.f32.mxu0 %vm301_vm0, %v59_v35  ;;  %8832 = vmatprep.mubr.msk.f32.mxu1 %vm301_vm0, %v119_v36 }
  0x2a   :  { %8743 = vmatmul.mubr.msk.f32.gmra.mrb[14].mxu0 %vm301_vm0, %v60_v37  ;;  %8833 = vmatmul.mubr.msk.f32.gmra.mrb[14].mxu1 %vm301_vm0, %v120_v38 }
  0x2b   :  { %8745 = vmatprep.mubr.msk.f32.mxu0 %vm301_vm0, %v61_v39  ;;  %8835 = vmatprep.mubr.msk.f32.mxu1 %vm301_vm0, %v121_v40 }
  0x2e   :  { %8746 = vmatmul.mubr.msk.f32.gmra.mrb[16].mxu0 %vm301_vm0, %v62_v44  ;;  %8836 = vmatmul.mubr.msk.f32.gmra.mrb[16].mxu1 %vm301_vm0, %v122_v45 }
  0x2f   :  { %8748 = vmatprep.mubr.msk.f32.mxu0 %vm301_vm0, %v63_v46  ;;  %8838 = vmatprep.mubr.msk.f32.mxu1 %vm301_vm0, %v123_v47 }
  0x32   :  { %8749 = vmatmul.mubr.msk.f32.gmra.mrb[18].mxu0 %vm301_vm0, %v64_v48  ;;  %8839 = vmatmul.mubr.msk.f32.gmra.mrb[18].mxu1 %vm301_vm0, %v124_v49 }
  0x33   :  { %8751 = vmatprep.mubr.msk.f32.mxu0 %vm301_vm0, %v65_v50  ;;  %8841 = vmatprep.mubr.msk.f32.mxu1 %vm301_vm0, %v125_v51 }
  0x36   :  { %8752 = vmatmul.mubr.msk.f32.gmra.mrb[20].mxu0 %vm301_vm0, %v66_v52  ;;  %8842 = vmatmul.mubr.msk.f32.gmra.mrb[20].mxu1 %vm301_vm0, %v126_v53 }
  0x37   :  { %8754 = vmatprep.mubr.msk.f32.mxu0 %vm301_vm0, %v67_v54  ;;  %8844 = vmatprep.mubr.msk.f32.mxu1 %vm301_vm0, %v127_v55 }
  0x3a   :  { %8755 = vmatmul.mubr.msk.f32.gmra.mrb[22].mxu0 %vm301_vm0, %v68_v56  ;;  %8845 = vmatmul.mubr.msk.f32.gmra.mrb[22].mxu1 %vm301_vm0, %v128_v57 }
  0x3b   :  { %8757 = vmatprep.mubr.msk.f32.mxu0 %vm301_vm0, %v69_v58  ;;  %8847 = vmatprep.mubr.msk.f32.mxu1 %vm301_vm0, %v129_v59 }
  0x3e   :  { %8758 = vmatmul.mubr.msk.f32.gmra.mrb[24].mxu0 %vm301_vm0, %v70_v60  ;;  %8848 = vmatmul.mubr.msk.f32.gmra.mrb[24].mxu1 %vm301_vm0, %v130_v61 }
  0x3f   :  { %17 = vsyncpa [#allocation5], 0  ;;  %8760 = vmatprep.mubr.msk.f32.mxu0 %vm301_vm0, %v71_v62  ;;  %v72_v0 = vld [vmem:[%s13710_s2 + $0xd8] sm:$0xff]  ;;  %8850 = vmatprep.mubr.msk.f32.mxu1 %vm301_vm0, %v131_v63  ;;  %v73_v2 = vld [vmem:[%s13710_s2 + $0xe0] sm:$0xff]  ;;  %vm2451_vm2 = vcmask 130048  }
  0x40   :  { %v132_v1 = vld [vmem:[%s13710_s2 + $0x2b8] sm:$0xff]  ;;  %v133_v3 = vld [vmem:[%s13710_s2 + $0x2c0] sm:$0xff]  ;;  %v74_v4 = vld [vmem:[%s13710_s2 + $0xe8] sm:$0xff] }
  0x41   :  { %v134_v5 = vld [vmem:[%s13710_s2 + $0x2c8] sm:$0xff]  ;;  %v75_v6 = vld [vmem:[%s13710_s2 + $0xf0] sm:$0xff]  ;;  %v76_v8 = vld [vmem:[%s13710_s2 + $0xf8] sm:$0xff] }
  0x42   :  { %8761 = vmatmul.mubr.msk.f32.gmra.mrb[26].mxu0 %vm301_vm0, %v72_v0  ;;  %8851 = vmatmul.mubr.msk.f32.gmra.mrb[26].mxu1 %vm301_vm0, %v132_v1  ;;  %v135_v7 = vld [vmem:[%s13710_s2 + $0x2d0] sm:$0xff]  ;;  %v136_v9 = vld [vmem:[%s13710_s2 + $0x2d8] sm:$0xff]  ;;  %v77_v10 = vld [vmem:[%s13710_s2 + $0x100] sm:$0xff] }
  0x43   :  { %8763 = vmatprep.mubr.msk.f32.mxu0 %vm301_vm0, %v73_v2  ;;  %8853 = vmatprep.mubr.msk.f32.mxu1 %vm301_vm0, %v133_v3  ;;  %v137_v11 = vld [vmem:[%s13710_s2 + $0x2e0] sm:$0xff]  ;;  %v78_v12 = vld [vmem:[%s13710_s2 + $0x108] sm:$0xff]  ;;  %v79_v14 = vld [vmem:[%s13710_s2 + $0x110] sm:$0xff] }
  0x44   :  { %v138_v13 = vld [vmem:[%s13710_s2 + $0x2e8] sm:$0xff]  ;;  %v139_v15 = vld [vmem:[%s13710_s2 + $0x2f0] sm:$0xff]  ;;  %v80_v16 = vld [vmem:[%s13710_s2 + $0x118] sm:$0xff] }
  0x45   :  { %v140_v17 = vld [vmem:[%s13710_s2 + $0x2f8] sm:$0xff]  ;;  %v81_v18 = vld [vmem:[%s13710_s2 + $0x120] sm:$0xff]  ;;  %v82_v20 = vld [vmem:[%s13710_s2 + $0x128] sm:$0xff] }
  0x46   :  { %8764 = vmatmul.mubr.msk.f32.gmra.mrb[28].mxu0 %vm301_vm0, %v74_v4  ;;  %8854 = vmatmul.mubr.msk.f32.gmra.mrb[28].mxu1 %vm301_vm0, %v134_v5  ;;  %v141_v19 = vld [vmem:[%s13710_s2 + $0x300] sm:$0xff]  ;;  %v142_v21 = vld [vmem:[%s13710_s2 + $0x308] sm:$0xff]  ;;  %v83_v22 = vld [vmem:[%s13710_s2 + $0x130] sm:$0xff] }
  0x47   :  { %8766 = vmatprep.mubr.msk.f32.mxu0 %vm301_vm0, %v75_v6  ;;  %8856 = vmatprep.mubr.msk.f32.mxu1 %vm301_vm0, %v135_v7  ;;  %v143_v23 = vld [vmem:[%s13710_s2 + $0x310] sm:$0xff]  ;;  %v84_v24 = vld [vmem:[%s13710_s2 + $0x138] sm:$0xff]  ;;  %v85_v26 = vld [vmem:[%s13710_s2 + $0x140] sm:$0xff] }
  0x48   :  { %v144_v25 = vld [vmem:[%s13710_s2 + $0x318] sm:$0xff]  ;;  %v145_v27 = vld [vmem:[%s13710_s2 + $0x320] sm:$0xff]  ;;  %v86_v28 = vld [vmem:[%s13710_s2 + $0x148] sm:$0xff] }
  0x49   :  { %v146_v29 = vld [vmem:[%s13710_s2 + $0x328] sm:$0xff]  ;;  %v87_v30 = vld [vmem:[%s13710_s2 + $0x150] sm:$0xff]  ;;  %v88_v32 = vld [vmem:[%s13710_s2 + $0x158] sm:$0xff] }
  0x4a   :  { %8767 = vmatmul.mubr.msk.f32.gmra.mrb[30].mxu0 %vm301_vm0, %v76_v8  ;;  %8857 = vmatmul.mubr.msk.f32.gmra.mrb[30].mxu1 %vm301_vm0, %v136_v9  ;;  %v147_v31 = vld [vmem:[%s13710_s2 + $0x330] sm:$0xff]  ;;  %v148_v33 = vld [vmem:[%s13710_s2 + $0x338] sm:$0xff]  ;;  %v89_v34 = vld [vmem:[%s13710_s2 + $0x160] sm:$0xff] }
  0x4b   :  { %8769 = vmatprep.mubr.msk.f32.mxu0 %vm301_vm0, %v77_v10  ;;  %8859 = vmatprep.mubr.msk.f32.mxu1 %vm301_vm0, %v137_v11  ;;  %v149_v35 = vld [vmem:[%s13710_s2 + $0x340] sm:$0xff]  ;;  %v90_v36 = vld [vmem:[%s13710_s2 + $0x168] sm:$0xff]  ;;  %v91_v38 = vld [vmem:[%s13710_s2 + $0x170] sm:$0xff] }
  0x4c   :  { %v150_v37 = vld [vmem:[%s13710_s2 + $0x348] sm:$0xff]  ;;  %v151_v39 = vld [vmem:[%s13710_s2 + $0x350] sm:$0xff]  ;;  %v92_v40 = vld [vmem:[%s13710_s2 + $0x178] sm:$0xff] }
  0x4d   :  { %v152_v41 = vld [vmem:[%s13710_s2 + $0x358] sm:$0xff]  ;;  %v93_v42 = vld [vmem:[%s13710_s2 + $0x180] sm:$0xff]  ;;  %v94_v44 = vld [vmem:[%s13710_s2 + $0x188] sm:$0xff] }
  0x4e   :  { %8770 = vmatmul.mubr.msk.f32.gmra.mrb[32].mxu0 %vm301_vm0, %v78_v12  ;;  %8860 = vmatmul.mubr.msk.f32.gmra.mrb[32].mxu1 %vm301_vm0, %v138_v13  ;;  %v153_v43 = vld [vmem:[%s13710_s2 + $0x360] sm:$0xff]  ;;  %v154_v45 = vld [vmem:[%s13710_s2 + $0x368] sm:$0xff]  ;;  %v95_v46 = vld [vmem:[%s13710_s2 + $0x190] sm:$0xff] }
  0x4f   :  { %8772 = vmatprep.mubr.msk.f32.mxu0 %vm301_vm0, %v79_v14  ;;  %8862 = vmatprep.mubr.msk.f32.mxu1 %vm301_vm0, %v139_v15  ;;  %v155_v47 = vld [vmem:[%s13710_s2 + $0x370] sm:$0xff]  ;;  %v96_v48 = vld [vmem:[%s13710_s2 + $0x198] sm:$0xff]  ;;  %v97_v50 = vld [vmem:[%s13710_s2 + $0x1a0] sm:$0xff] }
  0x50   :  { %v156_v49 = vld [vmem:[%s13710_s2 + $0x378] sm:$0xff]  ;;  %v157_v51 = vld [vmem:[%s13710_s2 + $0x380] sm:$0xff]  ;;  %v98_v52 = vld [vmem:[%s13710_s2 + $0x1a8] sm:$0xff] }
  0x51   :  { %v158_v53 = vld [vmem:[%s13710_s2 + $0x388] sm:$0xff]  ;;  %v99_v54 = vld [vmem:[%s13710_s2 + $0x1b0] sm:$0xff]  ;;  %v100_v56 = vld [vmem:[%s13710_s2 + $0x1b8] sm:$0xff] }
  0x52   :  { %8773 = vmatmul.mubr.msk.f32.gmra.mrb[34].mxu0 %vm301_vm0, %v80_v16  ;;  %8863 = vmatmul.mubr.msk.f32.gmra.mrb[34].mxu1 %vm301_vm0, %v140_v17  ;;  %v159_v55 = vld [vmem:[%s13710_s2 + $0x390] sm:$0xff]  ;;  %v160_v57 = vld [vmem:[%s13710_s2 + $0x398] sm:$0xff]  ;;  %v101_v58 = vld [vmem:[%s13710_s2 + $0x1c0] sm:$0xff] }
  0x53   :  { %8775 = vmatprep.mubr.msk.f32.mxu0 %vm301_vm0, %v81_v18  ;;  %8865 = vmatprep.mubr.msk.f32.mxu1 %vm301_vm0, %v141_v19  ;;  %v161_v59 = vld [vmem:[%s13710_s2 + $0x3a0] sm:$0xff]  ;;  %v102_v60 = vld [vmem:[%s13710_s2 + $0x1c8] sm:$0xff]  ;;  %v103_v62 = vld [vmem:[%s13710_s2 + $0x1d0] sm:$0xff] }
  0x54   :  { %v162_v61 = vld [vmem:[%s13710_s2 + $0x3a8] sm:$0xff]  ;;  %v163_v63 = vld [vmem:[%s13710_s2 + $0x3b0] sm:$0xff]  ;;  %v104_v0 = vld [vmem:[%s13710_s2 + $0x1d8] sm:$0xff] }
  0x55   :  { %v164_v1 = vld [vmem:[%s13710_s2 + $0x3b8] sm:$0xff]  ;;  %v2419_v2 = vld [vmem:[%s13711_s3] sm:$0xff]  ;;  %v2420_v4 = vld [vmem:[%s13711_s3 + $0x8] sm:$0xff] }
  0x56   :  { %8776 = vmatmul.mubr.msk.f32.gmra.mrb[36].mxu0 %vm301_vm0, %v82_v20  ;;  %8866 = vmatmul.mubr.msk.f32.gmra.mrb[36].mxu1 %vm301_vm0, %v142_v21  ;;  %v165_v3 = vld [vmem:[%s13710_s2 + $0x3c0] sm:$0xff]  ;;  %v166_v5 = vld [vmem:[%s13710_s2 + $0x3c8] sm:$0xff]  ;;  %v2421_v6 = vld [vmem:[%s13711_s3 + $0x10] sm:$0xff] }
  0x57   :  { %8778 = vmatprep.mubr.msk.f32.mxu0 %vm301_vm0, %v83_v22  ;;  %8868 = vmatprep.mubr.msk.f32.mxu1 %vm301_vm0, %v143_v23  ;;  %v167_v7 = vld [vmem:[%s13710_s2 + $0x3d0] sm:$0xff]  ;;  %v2422_v8 = vld [vmem:[%s13711_s3 + $0x18] sm:$0xff]  ;;  %v2423_v10 = vld [vmem:[%s13711_s3 + $0x20] sm:$0xff] }
  0x58   :  { %v168_v9 = vld [vmem:[%s13710_s2 + $0x3d8] sm:$0xff]  ;;  %v169_v11 = vld [vmem:[%s13710_s2 + $0x3e0] sm:$0xff]  ;;  %v2424_v12 = vld [vmem:[%s13711_s3 + $0x28] sm:$0xff] }
  0x59   :  { %v170_v13 = vld [vmem:[%s13710_s2 + $0x3e8] sm:$0xff]  ;;  %v2425_v14 = vld [vmem:[%s13711_s3 + $0x30] sm:$0xff]  ;;  %v2426_v16 = vld [vmem:[%s13711_s3 + $0x38] sm:$0xff] }
  0x5a   :  { %8779 = vmatmul.mubr.msk.f32.gmra.mrb[38].mxu0 %vm301_vm0, %v84_v24  ;;  %8869 = vmatmul.mubr.msk.f32.gmra.mrb[38].mxu1 %vm301_vm0, %v144_v25  ;;  %v171_v15 = vld [vmem:[%s13710_s2 + $0x3f0] sm:$0xff]  ;;  %v172_v17 = vld [vmem:[%s13710_s2 + $0x3f8] sm:$0xff]  ;;  %v2427_v18 = vld [vmem:[%s13711_s3 + $0x40] sm:$0xff] }
  0x5b   :  { %8781 = vmatprep.mubr.msk.f32.mxu0 %vm301_vm0, %v85_v26  ;;  %8871 = vmatprep.mubr.msk.f32.mxu1 %vm301_vm0, %v145_v27  ;;  %v173_v19 = vld [vmem:[%s13710_s2 + $0x400] sm:$0xff]  ;;  %v2428_v20 = vld [vmem:[%s13711_s3 + $0x48] sm:$0xff]  ;;  %v2429_v22 = vld [vmem:[%s13711_s3 + $0x50] sm:$0xff] }
  0x5c   :  { %v174_v21 = vld [vmem:[%s13710_s2 + $0x408] sm:$0xff]  ;;  %v175_v23 = vld [vmem:[%s13710_s2 + $0x410] sm:$0xff]  ;;  %v2430_v24 = vld [vmem:[%s13711_s3 + $0x58] sm:$0xff] }
  0x5d   :  { %v176_v25 = vld [vmem:[%s13710_s2 + $0x418] sm:$0xff]  ;;  %v2431_v26 = vld [vmem:[%s13711_s3 + $0x60] sm:$0xff] }
  0x5e   :  { %8782 = vmatmul.mubr.msk.f32.gmra.mrb[40].mxu0 %vm301_vm0, %v86_v28  ;;  %8872 = vmatmul.mubr.msk.f32.gmra.mrb[40].mxu1 %vm301_vm0, %v146_v29  ;;  %v177_v27 = vld [vmem:[%s13710_s2 + $0x420] sm:$0xff]  ;;  %v2432_v28 = vld [vmem:[%s13711_s3 + $0x68] sm:$0xff] }
  0x5f   :  { %8784 = vmatprep.mubr.msk.f32.mxu0 %vm301_vm0, %v87_v30  ;;  %8874 = vmatprep.mubr.msk.f32.mxu1 %vm301_vm0, %v147_v31  ;;  %v178_v29 = vld [vmem:[%s13710_s2 + $0x428] sm:$0xff]  ;;  %v2433_v30 = vld [vmem:[%s13711_s3 + $0x70] sm:$0xff] }
  0x60   :  { %v179_v31 = vld [vmem:[%s13710_s2 + $0x430] sm:$0xff] }
  0x62   :  { %8785 = vmatmul.mubr.msk.f32.gmra.mrb[42].mxu0 %vm301_vm0, %v88_v32  ;;  %8875 = vmatmul.mubr.msk.f32.gmra.mrb[42].mxu1 %vm301_vm0, %v148_v33  ;;  %v2434_v32 = vld [vmem:[%s13711_s3 + $0x78] sm:$0xff] }
  0x63   :  { %8787 = vmatprep.mubr.msk.f32.mxu0 %vm301_vm0, %v89_v34  ;;  %8877 = vmatprep.mubr.msk.f32.mxu1 %vm301_vm0, %v149_v35  ;;  %v180_v33 = vld [vmem:[%s13710_s2 + $0x438] sm:$0xff]  ;;  %v2435_v34 = vld [vmem:[%s13711_s3 + $0x80] sm:$0xff] }
  0x64   :  { %v181_v35 = vld [vmem:[%s13710_s2 + $0x440] sm:$0xff] }
  0x66   :  { %8788 = vmatmul.mubr.msk.f32.gmra.mrb[44].mxu0 %vm301_vm0, %v90_v36  ;;  %8878 = vmatmul.mubr.msk.f32.gmra.mrb[44].mxu1 %vm301_vm0, %v150_v37  ;;  %v2436_v36 = vld [vmem:[%s13711_s3 + $0x88] sm:$0xff] }
  0x67   :  { %8790 = vmatprep.mubr.msk.f32.mxu0 %vm301_vm0, %v91_v38  ;;  %8880 = vmatprep.mubr.msk.f32.mxu1 %vm301_vm0, %v151_v39  ;;  %v182_v37 = vld [vmem:[%s13710_s2 + $0x448] sm:$0xff]  ;;  %v2437_v38 = vld [vmem:[%s13711_s3 + $0x90] sm:$0xff] }
  0x68   :  { %v183_v39 = vld [vmem:[%s13710_s2 + $0x450] sm:$0xff] }
  0x6a   :  { %8791 = vmatmul.mubr.msk.f32.gmra.mrb[46].mxu0 %vm301_vm0, %v92_v40  ;;  %8881 = vmatmul.mubr.msk.f32.gmra.mrb[46].mxu1 %vm301_vm0, %v152_v41  ;;  %v2438_v40 = vld [vmem:[%s13711_s3 + $0x98] sm:$0xff] }
  0x6b   :  { %8793 = vmatprep.mubr.msk.f32.mxu0 %vm301_vm0, %v93_v42  ;;  %8883 = vmatprep.mubr.msk.f32.mxu1 %vm301_vm0, %v153_v43  ;;  %v184_v41 = vld [vmem:[%s13710_s2 + $0x458] sm:$0xff]  ;;  %v2439_v42 = vld [vmem:[%s13711_s3 + $0xa0] sm:$0xff] }
  0x6c   :  { %v185_v43 = vld [vmem:[%s13710_s2 + $0x460] sm:$0xff] }
  0x6e   :  { %8794 = vmatmul.mubr.msk.f32.gmra.mrb[48].mxu0 %vm301_vm0, %v94_v44  ;;  %8884 = vmatmul.mubr.msk.f32.gmra.mrb[48].mxu1 %vm301_vm0, %v154_v45  ;;  %v2440_v44 = vld [vmem:[%s13711_s3 + $0xa8] sm:$0xff] }
  0x6f   :  { %8796 = vmatprep.mubr.msk.f32.mxu0 %vm301_vm0, %v95_v46  ;;  %8886 = vmatprep.mubr.msk.f32.mxu1 %vm301_vm0, %v155_v47  ;;  %v186_v45 = vld [vmem:[%s13710_s2 + $0x468] sm:$0xff]  ;;  %v2441_v46 = vld [vmem:[%s13711_s3 + $0xb0] sm:$0xff] }
  0x70   :  { %v187_v47 = vld [vmem:[%s13710_s2 + $0x470] sm:$0xff] }
  0x72   :  { %8797 = vmatmul.mubr.msk.f32.gmra.mrb[50].mxu0 %vm301_vm0, %v96_v48  ;;  %8887 = vmatmul.mubr.msk.f32.gmra.mrb[50].mxu1 %vm301_vm0, %v156_v49  ;;  %v2442_v48 = vld [vmem:[%s13711_s3 + $0xb8] sm:$0xff] }
  0x73   :  { %8799 = vmatprep.mubr.msk.f32.mxu0 %vm301_vm0, %v97_v50  ;;  %8889 = vmatprep.mubr.msk.f32.mxu1 %vm301_vm0, %v157_v51  ;;  %v188_v49 = vld [vmem:[%s13710_s2 + $0x478] sm:$0xff]  ;;  %v2443_v50 = vld [vmem:[%s13711_s3 + $0xc0] sm:$0xff] }
  0x74   :  { %v189_v51 = vld [vmem:[%s13710_s2 + $0x480] sm:$0xff] }
  0x76   :  { %8800 = vmatmul.mubr.msk.f32.gmra.mrb[52].mxu0 %vm301_vm0, %v98_v52  ;;  %8890 = vmatmul.mubr.msk.f32.gmra.mrb[52].mxu1 %vm301_vm0, %v158_v53  ;;  %v2444_v52 = vld [vmem:[%s13711_s3 + $0xc8] sm:$0xff] }
  0x77   :  { %8802 = vmatprep.mubr.msk.f32.mxu0 %vm301_vm0, %v99_v54  ;;  %8892 = vmatprep.mubr.msk.f32.mxu1 %vm301_vm0, %v159_v55  ;;  %v190_v53 = vld [vmem:[%s13710_s2 + $0x488] sm:$0xff]  ;;  %v2445_v54 = vld [vmem:[%s13711_s3 + $0xd0] sm:$0xff] }
  0x78   :  { %v191_v55 = vld [vmem:[%s13710_s2 + $0x490] sm:$0xff] }
  0x7a   :  { %8803 = vmatmul.mubr.msk.f32.gmra.mrb[54].mxu0 %vm301_vm0, %v100_v56  ;;  %8893 = vmatmul.mubr.msk.f32.gmra.mrb[54].mxu1 %vm301_vm0, %v160_v57  ;;  %v2446_v56 = vld [vmem:[%s13711_s3 + $0xd8] sm:$0xff] }
  0x7b   :  { %8805 = vmatprep.mubr.msk.f32.mxu0 %vm301_vm0, %v101_v58  ;;  %8895 = vmatprep.mubr.msk.f32.mxu1 %vm301_vm0, %v161_v59  ;;  %v192_v57 = vld [vmem:[%s13710_s2 + $0x498] sm:$0xff]  ;;  %v2447_v58 = vld [vmem:[%s13711_s3 + $0xe0] sm:$0xff] }
  0x7c   :  { %v193_v59 = vld [vmem:[%s13710_s2 + $0x4a0] sm:$0xff] }
  0x7e   :  { %8806 = vmatmul.mubr.msk.f32.gmra.mrb[56].mxu0 %vm301_vm0, %v102_v60  ;;  %8896 = vmatmul.mubr.msk.f32.gmra.mrb[56].mxu1 %vm301_vm0, %v162_v61  ;;  %v2448_v60 = vld [vmem:[%s13711_s3 + $0xe8] sm:$0xff] }
  0x7f   :  { %8808 = vmatprep.mubr.msk.f32.mxu0 %vm301_vm0, %v103_v62  ;;  %8898 = vmatprep.mubr.msk.f32.mxu1 %vm301_vm0, %v163_v63  ;;  %v194_v61 = vld [vmem:[%s13710_s2 + $0x4a8] sm:$0xff]  ;;  %v2449_v62 = vld [vmem:[%s13711_s3 + $0xf0] sm:$0xff] }
  0x80   :  { %v195_v63 = vld [vmem:[%s13710_s2 + $0x4b0] sm:$0xff] }
  0x82   :  { %8809 = vmatmul.mubr.msk.f32.gmra.mrb[58].mxu0 %vm301_vm0, %v104_v0  ;;  %8899 = vmatmul.mubr.msk.f32.gmra.mrb[58].mxu1 %vm301_vm0, %v164_v1  ;;  %v2450_v0 = vld [vmem:[%s13711_s3 + $0xf8] sm:$0xff] }
  0x83   :  { %9109 = vmatprep.mubr.msk.f32.mxu0 %vm2451_vm2, %v2419_v2  ;;  %8901 = vmatprep.mubr.msk.f32.mxu1 %vm301_vm0, %v165_v3  ;;  %v196_v1 = vld [vmem:[%s13710_s2 + $0x4b8] sm:$0xff]  ;;  %v197_v2 = vld [vmem:[%s13710_s2 + $0x4c0] sm:$0xff]  ;;  %v198_v3 = vld [vmem:[%s13710_s2 + $0x4c8] sm:$0xff] }
  0x86   :  { %9110 = vmatmul.mubr.msk.f32.vlgmr.msra.gmra.mrb[0].mxu0 %vm2451_vm2, %v2420_v4  ;;  %8902 = vmatmul.mubr.msk.f32.gmra.mrb[60].mxu1 %vm301_vm0, %v166_v5  ;;  %v199_v4 = vld [vmem:[%s13710_s2 + $0x4d0] sm:$0xff]  ;;  %v200_v5 = vld [vmem:[%s13710_s2 + $0x4d8] sm:$0xff] }
  0x87   :  { %9112 = vmatprep.mubr.msk.f32.mxu0 %vm2451_vm2, %v2421_v6  ;;  %8904 = vmatprep.mubr.msk.f32.mxu1 %vm301_vm0, %v167_v7  ;;  %v201_v6 = vld [vmem:[%s13710_s2 + $0x4e0] sm:$0xff]  ;;  %v202_v7 = vld [vmem:[%s13710_s2 + $0x4e8] sm:$0xff] }
  0x8a   :  { %9113 = vmatmul.mubr.msk.f32.gmra.mrb[2].mxu0 %vm2451_vm2, %v2422_v8  ;;  %8905 = vmatmul.mubr.msk.f32.gmra.mrb[62].mxu1 %vm301_vm0, %v168_v9  ;;  %v203_v8 = vld [vmem:[%s13710_s2 + $0x4f0] sm:$0xff]  ;;  %v204_v9 = vld [vmem:[%s13710_s2 + $0x4f8] sm:$0xff] }
  0x8b   :  { %9115 = vmatprep.mubr.msk.f32.mxu0 %vm2451_vm2, %v2423_v10  ;;  %8907 = vmatprep.mubr.msk.f32.mxu1 %vm301_vm0, %v169_v11  ;;  %v205_v10 = vld [vmem:[%s13710_s2 + $0x500] sm:$0xff]  ;;  %v206_v11 = vld [vmem:[%s13710_s2 + $0x508] sm:$0xff] }
  0x8e   :  { %9116 = vmatmul.mubr.msk.f32.gmra.mrb[4].mxu0 %vm2451_vm2, %v2424_v12  ;;  %8908 = vmatmul.mubr.msk.f32.gmra.mrb[64].mxu1 %vm301_vm0, %v170_v13  ;;  %v207_v12 = vld [vmem:[%s13710_s2 + $0x510] sm:$0xff]  ;;  %v208_v13 = vld [vmem:[%s13710_s2 + $0x518] sm:$0xff] }
  0x8f   :  { %9118 = vmatprep.mubr.msk.f32.mxu0 %vm2451_vm2, %v2425_v14  ;;  %8910 = vmatprep.mubr.msk.f32.mxu1 %vm301_vm0, %v171_v15  ;;  %v209_v14 = vld [vmem:[%s13710_s2 + $0x520] sm:$0xff]  ;;  %v210_v15 = vld [vmem:[%s13710_s2 + $0x528] sm:$0xff] }
  0x92   :  { %9119 = vmatmul.mubr.msk.f32.gmra.mrb[6].mxu0 %vm2451_vm2, %v2426_v16  ;;  %8911 = vmatmul.mubr.msk.f32.gmra.mrb[66].mxu1 %vm301_vm0, %v172_v17  ;;  %v211_v16 = vld [vmem:[%s13710_s2 + $0x530] sm:$0xff]  ;;  %v212_v17 = vld [vmem:[%s13710_s2 + $0x538] sm:$0xff] }
  0x93   :  { %9121 = vmatprep.mubr.msk.f32.mxu0 %vm2451_vm2, %v2427_v18  ;;  %8913 = vmatprep.mubr.msk.f32.mxu1 %vm301_vm0, %v173_v19  ;;  %v213_v18 = vld [vmem:[%s13710_s2 + $0x540] sm:$0xff] }
  0x96   :  { %9122 = vmatmul.mubr.msk.f32.gmra.mrb[8].mxu0 %vm2451_vm2, %v2428_v20  ;;  %8914 = vmatmul.mubr.msk.f32.gmra.mrb[68].mxu1 %vm301_vm0, %v174_v21  ;;  %v214_v21 = vld [vmem:[%s13710_s2 + $0x548] sm:$0xff] }
  0x97   :  { %9124 = vmatprep.mubr.msk.f32.mxu0 %vm2451_vm2, %v2429_v22  ;;  %8916 = vmatprep.mubr.msk.f32.mxu1 %vm301_vm0, %v175_v23  ;;  %v215_v22 = vld [vmem:[%s13710_s2 + $0x550] sm:$0xff] }
  0x9a   :  { %9125 = vmatmul.mubr.msk.f32.gmra.mrb[10].mxu0 %vm2451_vm2, %v2430_v24  ;;  %8917 = vmatmul.mubr.msk.f32.gmra.mrb[70].mxu1 %vm301_vm0, %v176_v25  ;;  %v216_v25 = vld [vmem:[%s13710_s2 + $0x558] sm:$0xff] }
  0x9b   :  { %9127 = vmatprep.mubr.msk.f32.mxu0 %vm2451_vm2, %v2431_v26  ;;  %8919 = vmatprep.mubr.msk.f32.mxu1 %vm301_vm0, %v177_v27  ;;  %v217_v26 = vld [vmem:[%s13710_s2 + $0x560] sm:$0xff] }
  0x9e   :  { %9128 = vmatmul.mubr.msk.f32.gmra.mrb[12].mxu0 %vm2451_vm2, %v2432_v28  ;;  %8920 = vmatmul.mubr.msk.f32.gmra.mrb[72].mxu1 %vm301_vm0, %v178_v29  ;;  %v218_v29 = vld [vmem:[%s13710_s2 + $0x568] sm:$0xff] }
  0x9f   :  { %9130 = vmatprep.mubr.msk.f32.mxu0 %vm2451_vm2, %v2433_v30  ;;  %8922 = vmatprep.mubr.msk.f32.mxu1 %vm301_vm0, %v179_v31  ;;  %v219_v30 = vld [vmem:[%s13710_s2 + $0x570] sm:$0xff] }
  0xa2   :  { %9131 = vmatmul.mubr.msk.f32.gmra.mrb[14].mxu0 %vm2451_vm2, %v2434_v32  ;;  %8923 = vmatmul.mubr.msk.f32.gmra.mrb[74].mxu1 %vm301_vm0, %v180_v33  ;;  %v220_v33 = vld [vmem:[%s13710_s2 + $0x578] sm:$0xff] }
  0xa3   :  { %9133 = vmatprep.mubr.msk.f32.mxu0 %vm2451_vm2, %v2435_v34  ;;  %8925 = vmatprep.mubr.msk.f32.mxu1 %vm301_vm0, %v181_v35  ;;  %v221_v34 = vld [vmem:[%s13710_s2 + $0x580] sm:$0xff] }
  0xa6   :  { %9134 = vmatmul.mubr.msk.f32.gmra.mrb[16].mxu0 %vm2451_vm2, %v2436_v36  ;;  %8926 = vmatmul.mubr.msk.f32.gmra.mrb[76].mxu1 %vm301_vm0, %v182_v37  ;;  %v222_v37 = vld [vmem:[%s13710_s2 + $0x588] sm:$0xff] }
  0xa7   :  { %9136 = vmatprep.mubr.msk.f32.mxu0 %vm2451_vm2, %v2437_v38  ;;  %8928 = vmatprep.mubr.msk.f32.mxu1 %vm301_vm0, %v183_v39  ;;  %v223_v38 = vld [vmem:[%s13710_s2 + $0x590] sm:$0xff] }
  0xaa   :  { %9137 = vmatmul.mubr.msk.f32.gmra.mrb[18].mxu0 %vm2451_vm2, %v2438_v40  ;;  %8929 = vmatmul.mubr.msk.f32.gmra.mrb[78].mxu1 %vm301_vm0, %v184_v41  ;;  %v224_v41 = vld [vmem:[%s13710_s2 + $0x598] sm:$0xff] }
  0xab   :  { %9139 = vmatprep.mubr.msk.f32.mxu0 %vm2451_vm2, %v2439_v42  ;;  %8931 = vmatprep.mubr.msk.f32.mxu1 %vm301_vm0, %v185_v43  ;;  %v225_v42 = vld [vmem:[%s13710_s2 + $0x5a0] sm:$0xff] }
  0xae   :  { %9140 = vmatmul.mubr.msk.f32.gmra.mrb[20].mxu0 %vm2451_vm2, %v2440_v44  ;;  %8932 = vmatmul.mubr.msk.f32.gmra.mrb[80].mxu1 %vm301_vm0, %v186_v45  ;;  %v226_v45 = vld [vmem:[%s13710_s2 + $0x5a8] sm:$0xff] }
  0xaf   :  { %9142 = vmatprep.mubr.msk.f32.mxu0 %vm2451_vm2, %v2441_v46  ;;  %8934 = vmatprep.mubr.msk.f32.mxu1 %vm301_vm0, %v187_v47  ;;  %v227_v46 = vld [vmem:[%s13710_s2 + $0x5b0] sm:$0xff] }
  0xb2   :  { %9143 = vmatmul.mubr.msk.f32.gmra.mrb[22].mxu0 %vm2451_vm2, %v2442_v48  ;;  %8935 = vmatmul.mubr.msk.f32.gmra.mrb[82].mxu1 %vm301_vm0, %v188_v49  ;;  %v228_v49 = vld [vmem:[%s13710_s2 + $0x5b8] sm:$0xff] }
  0xb3   :  { %9145 = vmatprep.mubr.msk.f32.mxu0 %vm2451_vm2, %v2443_v50  ;;  %8937 = vmatprep.mubr.msk.f32.mxu1 %vm301_vm0, %v189_v51  ;;  %v229_v50 = vld [vmem:[%s13710_s2 + $0x5c0] sm:$0xff] }
  0xb6   :  { %9146 = vmatmul.mubr.msk.f32.gmra.mrb[24].mxu0 %vm2451_vm2, %v2444_v52  ;;  %8938 = vmatmul.mubr.msk.f32.gmra.mrb[84].mxu1 %vm301_vm0, %v190_v53  ;;  %v230_v53 = vld [vmem:[%s13710_s2 + $0x5c8] sm:$0xff] }
  0xb7   :  { %9148 = vmatprep.mubr.msk.f32.mxu0 %vm2451_vm2, %v2445_v54  ;;  %8940 = vmatprep.mubr.msk.f32.mxu1 %vm301_vm0, %v191_v55  ;;  %v231_v54 = vld [vmem:[%s13710_s2 + $0x5d0] sm:$0xff] }
  0xba   :  { %9149 = vmatmul.mubr.msk.f32.gmra.mrb[26].mxu0 %vm2451_vm2, %v2446_v56  ;;  %8941 = vmatmul.mubr.msk.f32.gmra.mrb[86].mxu1 %vm301_vm0, %v192_v57  ;;  %v232_v57 = vld [vmem:[%s13710_s2 + $0x5d8] sm:$0xff] }
  0xbb   :  { %9151 = vmatprep.mubr.msk.f32.mxu0 %vm2451_vm2, %v2447_v58  ;;  %8943 = vmatprep.mubr.msk.f32.mxu1 %vm301_vm0, %v193_v59  ;;  %v233_v58 = vld [vmem:[%s13710_s2 + $0x5e0] sm:$0xff] }
  0xbe   :  { %9152 = vmatmul.mubr.msk.f32.gmra.mrb[28].mxu0 %vm2451_vm2, %v2448_v60  ;;  %8944 = vmatmul.mubr.msk.f32.gmra.mrb[88].mxu1 %vm301_vm0, %v194_v61  ;;  %v234_v61 = vld [vmem:[%s13710_s2 + $0x5e8] sm:$0xff] }
  0xbf   :  { %9154 = vmatprep.mubr.msk.f32.mxu0 %vm2451_vm2, %v2449_v62  ;;  %8946 = vmatprep.mubr.msk.f32.mxu1 %vm301_vm0, %v195_v63  ;;  %v235_v62 = vld [vmem:[%s13710_s2 + $0x5f0] sm:$0xff] }
  0xc2   :  { %9155 = vmatmul.mubr.msk.f32.gmra.mrb[30].mxu0 %vm2451_vm2, %v2450_v0  ;;  %8947 = vmatmul.mubr.msk.f32.gmra.mrb[90].mxu1 %vm301_vm0, %v196_v1  ;;  %v236_v1 = vld [vmem:[%s13710_s2 + $0x5f8] sm:$0xff] }
  0xc3   :  { %8949 = vmatprep.mubr.msk.f32.mxu1 %vm301_vm0, %v197_v2  ;;  %v237_v2 = vld [vmem:[%s13710_s2 + $0x600] sm:$0xff] }
  0xc6   :  { %8950 = vmatmul.mubr.msk.f32.gmra.mrb[92].mxu1 %vm301_vm0, %v198_v3 }
  0xc7   :  { %8952 = vmatprep.mubr.msk.f32.mxu1 %vm301_vm0, %v199_v4 }
  0xca   :  { %8953 = vmatmul.mubr.msk.f32.gmra.mrb[94].mxu1 %vm301_vm0, %v200_v5  ;;  %v238_v5 = vld [vmem:[%s13710_s2 + $0x608] sm:$0xff] }
  0xcb   :  { %8955 = vmatprep.mubr.msk.f32.mxu1 %vm301_vm0, %v201_v6  ;;  %v239_v6 = vld [vmem:[%s13710_s2 + $0x610] sm:$0xff] }
  0xce   :  { %8956 = vmatmul.mubr.msk.f32.gmra.mrb[96].mxu1 %vm301_vm0, %v202_v7 }
  0xcf   :  { %8958 = vmatprep.mubr.msk.f32.mxu1 %vm301_vm0, %v203_v8 }
  0xd2   :  { %8959 = vmatmul.mubr.msk.f32.gmra.mrb[98].mxu1 %vm301_vm0, %v204_v9  ;;  %v240_v9 = vld [vmem:[%s13710_s2 + $0x618] sm:$0xff] }
  0xd3   :  { %8961 = vmatprep.mubr.msk.f32.mxu1 %vm301_vm0, %v205_v10  ;;  %v241_v10 = vld [vmem:[%s13710_s2 + $0x620] sm:$0xff] }
  0xd6   :  { %8962 = vmatmul.mubr.msk.f32.gmra.mrb[100].mxu1 %vm301_vm0, %v206_v11 }
  0xd7   :  { %8964 = vmatprep.mubr.msk.f32.mxu1 %vm301_vm0, %v207_v12 }
  0xda   :  { %8965 = vmatmul.mubr.msk.f32.gmra.mrb[102].mxu1 %vm301_vm0, %v208_v13  ;;  %v242_v13 = vld [vmem:[%s13710_s2 + $0x628] sm:$0xff] }
  0xdb   :  { %8967 = vmatprep.mubr.msk.f32.mxu1 %vm301_vm0, %v209_v14  ;;  %v243_v14 = vld [vmem:[%s13710_s2 + $0x630] sm:$0xff] }
  0xde   :  { %8968 = vmatmul.mubr.msk.f32.gmra.mrb[104].mxu1 %vm301_vm0, %v210_v15 }
  0xdf   :  { %8970 = vmatprep.mubr.msk.f32.mxu1 %vm301_vm0, %v211_v16 }
  0xe1   :  { %v11117_v19 = vpop.f32.mrb[0].mxu1 }
  0xe2   :  { %8971 = vmatmul.mubr.msk.f32.gmra.mrb[106].mxu1 %vm301_vm0, %v212_v17  ;;  %v11120_v20 = vpop.f32.mrb[1].mxu1  ;;  %v244_v17 = vld [vmem:[%s13710_s2 + $0x638] sm:$0xff] }
  0xe3   :  { %8973 = vmatprep.mubr.msk.f32.mxu1 %vm301_vm0, %v213_v18  ;;  %v245_v18 = vld [vmem:[%s13710_s2 + $0x640] sm:$0xff] }
  0xe5   :  { %v11129_v23 = vpop.f32.mrb[2].mxu1 }
  0xe6   :  { %8974 = vmatmul.mubr.msk.f32.gmra.mrb[108].mxu1 %vm301_vm0, %v214_v21  ;;  %v11132_v24 = vpop.f32.mrb[3].mxu1 }
  0xe7   :  { %8976 = vmatprep.mubr.msk.f32.mxu1 %vm301_vm0, %v215_v22 }
  0xe9   :  { %v11141_v27 = vpop.f32.mrb[4].mxu1 }
  0xea   :  { %8977 = vmatmul.mubr.msk.f32.gmra.mrb[110].mxu1 %vm301_vm0, %v216_v25  ;;  %v11144_v28 = vpop.f32.mrb[5].mxu1  ;;  %v246_v25 = vld [vmem:[%s13710_s2 + $0x648] sm:$0xff] }
  0xeb   :  { %8979 = vmatprep.mubr.msk.f32.mxu1 %vm301_vm0, %v217_v26  ;;  %v247_v26 = vld [vmem:[%s13710_s2 + $0x650] sm:$0xff] }
  0xed   :  { %v11153_v31 = vpop.f32.mrb[6].mxu1 }
  0xee   :  { %8980 = vmatmul.mubr.msk.f32.gmra.mrb[112].mxu1 %vm301_vm0, %v218_v29  ;;  %v11156_v32 = vpop.f32.mrb[7].mxu1 }
  0xef   :  { %8982 = vmatprep.mubr.msk.f32.mxu1 %vm301_vm0, %v219_v30 }
  0xf1   :  { %v11165_v35 = vpop.f32.mrb[8].mxu1 }
  0xf2   :  { %8983 = vmatmul.mubr.msk.f32.gmra.mrb[114].mxu1 %vm301_vm0, %v220_v33  ;;  %v11168_v36 = vpop.f32.mrb[9].mxu1  ;;  %v248_v33 = vld [vmem:[%s13710_s2 + $0x658] sm:$0xff] }
  0xf3   :  { %8985 = vmatprep.mubr.msk.f32.mxu1 %vm301_vm0, %v221_v34  ;;  %v249_v34 = vld [vmem:[%s13710_s2 + $0x660] sm:$0xff] }
  0xf5   :  { %v11177_v39 = vpop.f32.mrb[10].mxu1 }
  0xf6   :  { %8986 = vmatmul.mubr.msk.f32.gmra.mrb[116].mxu1 %vm301_vm0, %v222_v37  ;;  %v11180_v40 = vpop.f32.mrb[11].mxu1 }
  0xf7   :  { %8988 = vmatprep.mubr.msk.f32.mxu1 %vm301_vm0, %v223_v38 }
  0xf9   :  { %v11189_v43 = vpop.f32.mrb[12].mxu1 }
  0xfa   :  { %8989 = vmatmul.mubr.msk.f32.gmra.mrb[118].mxu1 %vm301_vm0, %v224_v41  ;;  %v11192_v44 = vpop.f32.mrb[13].mxu1  ;;  %v250_v41 = vld [vmem:[%s13710_s2 + $0x668] sm:$0xff] }
  0xfb   :  { %8991 = vmatprep.mubr.msk.f32.mxu1 %vm301_vm0, %v225_v42  ;;  %v2813_v42 = vld [vmem:[%s13713_s5] sm:$0xff] }
  0xfd   :  { %v11201_v47 = vpop.f32.mrb[14].mxu1 }
  0xfe   :  { %8992 = vmatmul.mubr.msk.f32.gmra.mrb[120].mxu1 %vm301_vm0, %v226_v45  ;;  %v11204_v48 = vpop.f32.mrb[15].mxu1  ;;  %v251_v45 = vld [vmem:[%s13710_s2 + $0x670] sm:$0xff] }
  0xff   :  { %8994 = vmatprep.mubr.msk.f32.mxu1 %vm301_vm0, %v227_v46  ;;  %v10233_v46 = vmov 0  }
 0x100   :  { %10085 = vset.pattern.permute.xlu0 %v10233_v46  ;;  %10086 = vset.pattern.permute.xlu1 %v10233_v46  ;;  %v263_v46 = vld [vmem:[%s13710_s2 + $0x6d0] sm:$0xff] }
 0x101   :  { %v11213_v51 = vpop.f32.mrb[16].mxu1  ;;  %2819 = vperm.xlu0 %10085, %v2813_v42   ;;  %v3377_v42 = vld [vmem:[%s13716_s8] sm:$0xff] }
 0x102   :  { %8995 = vmatmul.mubr.msk.f32.gmra.mrb[122].mxu1 %vm301_vm0, %v228_v49  ;;  %v11216_v52 = vpop.f32.mrb[17].mxu1 }
 0x103   :  { %8997 = vmatprep.mubr.msk.f32.mxu1 %vm301_vm0, %v229_v50 }
 0x105   :  { %v11225_v55 = vpop.f32.mrb[18].mxu1 }
 0x106   :  { %8998 = vmatmul.mubr.msk.f32.gmra.mrb[124].mxu1 %vm301_vm0, %v230_v53  ;;  %v11228_v56 = vpop.f32.mrb[19].mxu1  ;;  %v2814_v53 = vld [vmem:[%s13713_s5 + $0x8] sm:$0xff] }
 0x107   :  { %9000 = vmatprep.mubr.msk.f32.mxu1 %vm301_vm0, %v231_v54  ;;  %v252_v54 = vld [vmem:[%s13710_s2 + $0x678] sm:$0xff]  ;;  %2824 = vperm.xlu0 %10085, %v2814_v53  }
 0x109   :  { %v11237_v59 = vpop.f32.mrb[20].mxu1 }
 0x10a   :  { %9001 = vmatmul.mubr.msk.f32.gmra.mrb[126].mxu1 %vm301_vm0, %v232_v57  ;;  %v11240_v60 = vpop.f32.mrb[21].mxu1  ;;  %v253_v57 = vld [vmem:[%s13710_s2 + $0x680] sm:$0xff] }
 0x10b   :  { %9003 = vmatprep.mubr.msk.f32.mxu1 %vm301_vm0, %v233_v58  ;;  %3383 = vperm.xlu0 %10085, %v3377_v42  }
 0x10d   :  { %v11249_v63 = vpop.f32.mrb[22].mxu1 }
 0x10e   :  { %9004 = vmatmul.mubr.msk.f32.gmra.mrb[128].mxu1 %vm301_vm0, %v234_v61  ;;  %v11252_v0 = vpop.f32.mrb[23].mxu1 }
 0x10f   :  { %9006 = vmatprep.mubr.msk.f32.mxu1 %vm301_vm0, %v235_v62  ;;  %v254_v62 = vld [vmem:[%s13710_s2 + $0x688] sm:$0xff] }
 0x111   :  { %v11261_v3 = vpop.f32.mrb[24].mxu1 }
 0x112   :  { %9007 = vmatmul.mubr.msk.f32.gmra.mrb[130].mxu1 %vm301_vm0, %v236_v1  ;;  %v11264_v4 = vpop.f32.mrb[25].mxu1  ;;  %v255_v1 = vld [vmem:[%s13710_s2 + $0x690] sm:$0xff] }
 0x113   :  { %9009 = vmatprep.mubr.msk.f32.mxu1 %vm301_vm0, %v237_v2 }
 0x115   :  { %v11273_v7 = vpop.f32.mrb[26].mxu1 }
 0x116   :  { %9010 = vmatmul.mubr.msk.f32.gmra.mrb[132].mxu1 %vm301_vm0, %v238_v5  ;;  %v11276_v8 = vpop.f32.mrb[27].mxu1 }
 0x117   :  { %9012 = vmatprep.mubr.msk.f32.mxu1 %vm301_vm0, %v239_v6  ;;  %v256_v6 = vld [vmem:[%s13710_s2 + $0x698] sm:$0xff] }
 0x119   :  { %v11285_v11 = vpop.f32.mrb[28].mxu1 }
 0x11a   :  { %9013 = vmatmul.mubr.msk.f32.gmra.mrb[134].mxu1 %vm301_vm0, %v240_v9  ;;  %v11288_v12 = vpop.f32.mrb[29].mxu1  ;;  %v257_v9 = vld [vmem:[%s13710_s2 + $0x6a0] sm:$0xff] }
 0x11b   :  { %9015 = vmatprep.mubr.msk.f32.mxu1 %vm301_vm0, %v241_v10 }
 0x11d   :  { %v11297_v15 = vpop.f32.mrb[30].mxu1 }
 0x11e   :  { %9016 = vmatmul.mubr.msk.f32.gmra.mrb[136].mxu1 %vm301_vm0, %v242_v13  ;;  %v11300_v16 = vpop.f32.mrb[31].mxu1 }
 0x11f   :  { %9018 = vmatprep.mubr.msk.f32.mxu1 %vm301_vm0, %v243_v14  ;;  %v258_v14 = vld [vmem:[%s13710_s2 + $0x6a8] sm:$0xff] }
 0x121   :  { %v11309_v21 = vpop.f32.mrb[32].mxu1 }
 0x122   :  { %9019 = vmatmul.mubr.msk.f32.gmra.mrb[138].mxu1 %vm301_vm0, %v244_v17  ;;  %v11312_v22 = vpop.f32.mrb[33].mxu1  ;;  %v259_v17 = vld [vmem:[%s13710_s2 + $0x6b0] sm:$0xff] }
 0x123   :  { %9021 = vmatprep.mubr.msk.f32.mxu1 %vm301_vm0, %v245_v18 }
 0x125   :  { %v11321_v29 = vpop.f32.mrb[34].mxu1 }
 0x126   :  { %9022 = vmatmul.mubr.msk.f32.gmra.mrb[140].mxu1 %vm301_vm0, %v246_v25  ;;  %v11324_v30 = vpop.f32.mrb[35].mxu1 }
 0x127   :  { %13721 = vst [vmem:[#allocation8_spill] sm:$0xff] %v11324_v30  ;;  %9024 = vmatprep.mubr.msk.f32.mxu1 %vm301_vm0, %v247_v26  ;;  %v260_v26 = vld [vmem:[%s13710_s2 + $0x6b8] sm:$0xff] }
 0x129   :  { %v11333_v37 = vpop.f32.mrb[36].mxu1 }
 0x12a   :  { %13722 = vst [vmem:[#allocation9_spill] sm:$0xff] %v11333_v37  ;;  %9025 = vmatmul.mubr.msk.f32.gmra.mrb[142].mxu1 %vm301_vm0, %v248_v33  ;;  %v11336_v38 = vpop.f32.mrb[37].mxu1  ;;  %v261_v33 = vld [vmem:[%s13710_s2 + $0x6c0] sm:$0xff] }
 0x12b   :  { %13723 = vst [vmem:[#allocation10_spill] sm:$0xff] %v11336_v38  ;;  %9027 = vmatprep.mubr.msk.f32.mxu1 %vm301_vm0, %v249_v34 }
 0x12d   :  { %v11348_v49 = vpop.f32.mrb[38].mxu1 }
 0x12e   :  { %13724 = vst [vmem:[#allocation11_spill] sm:$0xff] %v11348_v49  ;;  %9028 = vmatmul.mubr.msk.f32.gmra.mrb[144].mxu1 %vm301_vm0, %v250_v41  ;;  %v11351_v50 = vpop.f32.mrb[39].mxu1 }
 0x12f   :  { %13725 = vst [vmem:[#allocation12_spill] sm:$0xff] %v11351_v50  ;;  %9030 = vmatprep.mubr.msk.f32.mxu1 %vm301_vm0, %v251_v45  ;;  %v262_v45 = vld [vmem:[%s13710_s2 + $0x6c8] sm:$0xff] }
 0x131   :  { %v11363_v58 = vpop.f32.mrb[40].mxu1 }
 0x132   :  { %13726 = vst [vmem:[#allocation13_spill] sm:$0xff] %v11363_v58  ;;  %9031 = vmatmul.mubr.msk.f32.gmra.mrb[146].mxu1 %vm301_vm0, %v252_v54  ;;  %v11366_v61 = vpop.f32.mrb[41].mxu1 }
 0x133   :  { %13727 = vst [vmem:[#allocation14_spill] sm:$0xff] %v11366_v61  ;;  %9033 = vmatprep.mubr.msk.f32.mxu1 %vm301_vm0, %v253_v57  ;;  %v7406_v57 = vld [vmem:[%s13713_s5 + $0x20] sm:$0xff] }
 0x134   :  { %3954 = vperm.xlu0 %10085, %v7406_v57   ;;  %v269_v57 = vld [vmem:[%s13710_s2 + $0x700] sm:$0xff] }
 0x135   :  { %v11375_v2 = vpop.f32.mrb[42].mxu1 }
 0x136   :  { %13728 = vst [vmem:[#allocation15_spill] sm:$0xff] %v11375_v2  ;;  %9034 = vmatmul.mubr.msk.f32.gmra.mrb[148].mxu1 %vm301_vm0, %v254_v62  ;;  %v11378_v5 = vpop.f32.mrb[43].mxu1  ;;  %v264_v62 = vld [vmem:[%s13710_s2 + $0x6d8] sm:$0xff] }
 0x137   :  { %13729 = vst [vmem:[#allocation16_spill] sm:$0xff] %v11378_v5  ;;  %9036 = vmatprep.mubr.msk.f32.mxu1 %vm301_vm0, %v255_v1  ;;  %v265_v1 = vld [vmem:[%s13710_s2 + $0x6e0] sm:$0xff] }
 0x139   :  { %v11387_v10 = vpop.f32.mrb[44].mxu1 }
 0x13a   :  { %13730 = vst [vmem:[#allocation17_spill] sm:$0xff] %v11387_v10  ;;  %9037 = vmatmul.mubr.msk.f32.gmra.mrb[150].mxu1 %vm301_vm0, %v256_v6  ;;  %v11390_v13 = vpop.f32.mrb[45].mxu1 }
 0x13b   :  { %13731 = vst [vmem:[#allocation18_spill] sm:$0xff] %v11390_v13  ;;  %9039 = vmatprep.mubr.msk.f32.mxu1 %vm301_vm0, %v257_v9 }
 0x13d   :  { %v11399_v18 = vpop.f32.mrb[46].mxu1 }
 0x13e   :  { %13732 = vst [vmem:[#allocation19_spill] sm:$0xff] %v11399_v18  ;;  %9040 = vmatmul.mubr.msk.f32.gmra.mrb[152].mxu1 %vm301_vm0, %v258_v14  ;;  %v11402_v25 = vpop.f32.mrb[47].mxu1  ;;  %v3379_v14 = vld [vmem:[%s13716_s8 + $0x10] sm:$0xff] }
 0x13f   :  { %13733 = vst [vmem:[#allocation20_spill] sm:$0xff] %v11402_v25  ;;  %9042 = vmatprep.mubr.msk.f32.mxu1 %vm301_vm0, %v259_v17  ;;  %v266_v17 = vld [vmem:[%s13710_s2 + $0x6e8] sm:$0xff]  ;;  %3393 = vperm.xlu0 %10085, %v3379_v14   ;;  %v7488_v14 = vld [vmem:[%s13716_s8 + $0x20] sm:$0xff] }
 0x141   :  { %v11411_v34 = vpop.f32.mrb[48].mxu1 }
 0x142   :  { %13734 = vst [vmem:[#allocation21_spill] sm:$0xff] %v11411_v34  ;;  %9043 = vmatmul.mubr.msk.f32.gmra.mrb[154].mxu1 %vm301_vm0, %v260_v26  ;;  %v11414_v41 = vpop.f32.mrb[49].mxu1  ;;  %v267_v26 = vld [vmem:[%s13710_s2 + $0x6f0] sm:$0xff] }
 0x143   :  { %13735 = vst [vmem:[#allocation22_spill] sm:$0xff] %v11414_v41  ;;  %9045 = vmatprep.mubr.msk.f32.mxu1 %vm301_vm0, %v261_v33 }
 0x145   :  { %v11426_v53 = vpop.f32.mrb[50].mxu1 }
 0x146   :  { %13736 = vst [vmem:[#allocation23_spill] sm:$0xff] %v11426_v53  ;;  %9046 = vmatmul.mubr.msk.f32.gmra.mrb[156].mxu1 %vm301_vm0, %v262_v45  ;;  %v11429_v54 = vpop.f32.mrb[51].mxu1  ;;  %v7408_v45 = vld [vmem:[%s13713_s5 + $0x30] sm:$0xff] }
 0x147   :  { %13737 = vst [vmem:[#allocation24_spill] sm:$0xff] %v11429_v54  ;;  %9048 = vmatprep.mubr.msk.f32.mxu1 %vm301_vm0, %v263_v46  ;;  %v268_v46 = vld [vmem:[%s13710_s2 + $0x6f8] sm:$0xff]  ;;  %3964 = vperm.xlu0 %10085, %v7408_v45  }
 0x149   :  { %v11441_v6 = vpop.f32.mrb[52].mxu1 }
 0x14a   :  { %13738 = vst [vmem:[#allocation25_spill] sm:$0xff] %v11441_v6  ;;  %9049 = vmatmul.mubr.msk.f32.gmra.mrb[158].mxu1 %vm301_vm0, %v264_v62  ;;  %v11444_v9 = vpop.f32.mrb[53].mxu1 }
 0x14b   :  { %13739 = vst [vmem:[#allocation26_spill] sm:$0xff] %v11444_v9  ;;  %9051 = vmatprep.mubr.msk.f32.mxu1 %vm301_vm0, %v265_v1  ;;  %4521 = vperm.xlu0 %10085, %v7488_v14   ;;  %v273_v14 = vld [vmem:[%s13710_s2 + $0x720] sm:$0xff] }
 0x14d   :  { %v11456_v33 = vpop.f32.mrb[54].mxu1 }
 0x14e   :  { %13740 = vst [vmem:[#allocation27_spill] sm:$0xff] %v11456_v33  ;;  %9052 = vmatmul.mubr.msk.f32.gmra.mrb[160].mxu1 %vm301_vm0, %v266_v17  ;;  %v11459_v42 = vpop.f32.mrb[55].mxu1  ;;  %v270_v17 = vld [vmem:[%s13710_s2 + $0x708] sm:$0xff] }
 0x14f   :  { %13741 = vst [vmem:[#allocation28_spill] sm:$0xff] %v11459_v42  ;;  %9054 = vmatprep.mubr.msk.f32.mxu1 %vm301_vm0, %v267_v26  ;;  %v271_v26 = vld [vmem:[%s13710_s2 + $0x710] sm:$0xff] }
 0x151   :  { %v11471_v62 = vpop.f32.mrb[56].mxu1 }
 0x152   :  { %13742 = vst [vmem:[#allocation29_spill] sm:$0xff] %v11471_v62  ;;  %9055 = vmatmul.mubr.msk.f32.gmra.mrb[162].mxu1 %vm301_vm0, %v268_v46  ;;  %v11474_v1 = vpop.f32.mrb[57].mxu1 }
 0x153   :  { %13743 = vst [vmem:[#allocation30_spill] sm:$0xff] %v11474_v1  ;;  %9057 = vmatprep.mubr.msk.f32.mxu1 %vm301_vm0, %v269_v57  ;;  %v7570_v1 = vld [vmem:[%s13713_s5 + $0x40] sm:$0xff]  ;;  %v272_v57 = vld [vmem:[%s13710_s2 + $0x718] sm:$0xff] }
 0x154   :  { %5092 = vperm.xlu0 %10085, %v7570_v1   ;;  %v274_v1 = vld [vmem:[%s13710_s2 + $0x728] sm:$0xff] }
 0x155   :  { %v11486_v45 = vpop.f32.mrb[58].mxu1 }
 0x156   :  { %13744 = vst [vmem:[#allocation31_spill] sm:$0xff] %v11486_v45  ;;  %9058 = vmatmul.mubr.msk.f32.gmra.mrb[164].mxu1 %vm301_vm0, %v270_v17  ;;  %v11489_v46 = vpop.f32.mrb[59].mxu1 }
 0x157   :  { %13745 = vst [vmem:[#allocation32_spill] sm:$0xff] %v11489_v46  ;;  %9060 = vmatprep.mubr.msk.f32.mxu1 %vm301_vm0, %v271_v26  ;;  %v7490_v26 = vld [vmem:[%s13716_s8 + $0x30] sm:$0xff] }
 0x158   :  { %4531 = vperm.xlu0 %10085, %v7490_v26  }
 0x159   :  { %v9111_v45 = vpop.f32.mrb[0].mxu0  ;;  %v11501_v62 = vpop.f32.mrb[60].mxu1 }
 0x15a   :  { %13746 = vst [vmem:[#allocation33_spill] sm:$0xff] %v11501_v62  ;;  %v2774_v17 = vmax.f32 %v9111_v45, 0.0  ;;  %v2614_v46 = vpop.f32.mrb[1].mxu0  ;;  %9061 = vmatmul.mubr.msk.f32.gmra.mrb[166].mxu1 %vm301_vm0, %v272_v57  ;;  %v11504_v42 = vpop.f32.mrb[61].mxu1  ;;  %v275_v45 = vld [vmem:[%s13710_s2 + $0x730] sm:$0xff] }
 0x15b   :  { %13747 = vst [vmem:[#allocation34_spill] sm:$0xff] %v11504_v42  ;;  %v2773_v33 = vmax.f32 %v2614_v46, 0.0  ;;  %9063 = vmatprep.mubr.msk.f32.mxu1 %vm301_vm0, %v273_v14  ;;  %v7572_v14 = vld [vmem:[%s13713_s5 + $0x50] sm:$0xff] }
 0x15c   :  { %5102 = vperm.xlu0 %10085, %v7572_v14   ;;  %v7652_v14 = vld [vmem:[%s13716_s8 + $0x40] sm:$0xff] }
 0x15d   :  { %v11516_v62 = vpack.c.bf16 %v2774_v17, %v2773_v33  ;;  %v9114_v57 = vpop.f32.mrb[2].mxu0  ;;  %v11518_v42 = vpop.f32.mrb[62].mxu1  ;;  %v276_v33 = vld [vmem:[%s13710_s2 + $0x738] sm:$0xff]  ;;  %v277_v17 = vld [vmem:[%s13710_s2 + $0x740] sm:$0xff] }
 0x15e   :  { %13748 = vst [vmem:[#allocation35_spill] sm:$0xff] %v11518_v42  ;;  %v2776_v9 = vmax.f32 %v9114_v57, 0.0  ;;  %v2624_v6 = vpop.f32.mrb[3].mxu0  ;;  %9064 = vmatmul.mubr.msk.f32.gmra.mrb[168].mxu1 %vm301_vm0, %v274_v1  ;;  %v11521_v46 = vpop.f32.mrb[63].mxu1 }
 0x15f   :  { %13749 = vst [vmem:[#allocation36_spill] sm:$0xff] %v11521_v46  ;;  %v2775_v26 = vmax.f32 %v2624_v6, 0.0  ;;  %9066 = vmatprep.mubr.msk.f32.mxu1 %vm301_vm0, %v275_v45  ;;  %v2815_v6 = vld [vmem:[%s13713_s5 + $0x10] sm:$0xff] }
 0x160   :  { %2829 = vperm.xlu1 %10086, %v2815_v6   ;;  %5659 = vperm.xlu0 %10085, %v7652_v14  }
 0x161   :  { %v11533_v57 = vpack.c.bf16 %v2776_v9, %v2775_v26  ;;  %v9117_v1 = vpop.f32.mrb[4].mxu0  ;;  %v11535_v46 = vpop.f32.mrb[64].mxu1  ;;  %v278_v26 = vld [vmem:[%s13710_s2 + $0x748] sm:$0xff] }
 0x162   :  { %13750 = vst [vmem:[#allocation37_spill] sm:$0xff] %v11535_v46  ;;  %v2778_v42 = vmax.f32 %v9117_v1, 0.0  ;;  %v2634_v45 = vpop.f32.mrb[5].mxu0  ;;  %9067 = vmatmul.mubr.msk.f32.gmra.mrb[170].mxu1 %vm301_vm0, %v276_v33  ;;  %v11541_v54 = vpop.f32.mrb[65].mxu1  ;;  %v279_v1 = vld [vmem:[%s13710_s2 + $0x750] sm:$0xff] }
 0x163   :  { %13751 = vst [vmem:[#allocation38_spill] sm:$0xff] %v11541_v54  ;;  %v2777_v9 = vmax.f32 %v2634_v45, 0.0  ;;  %9069 = vmatprep.mubr.msk.f32.mxu1 %vm301_vm0, %v277_v17  ;;  %v7734_v17 = vld [vmem:[%s13713_s5 + $0x60] sm:$0xff] }
 0x164   :  { %6230 = vperm.xlu0 %10085, %v7734_v17   ;;  %v7654_v17 = vld [vmem:[%s13716_s8 + $0x50] sm:$0xff] }
 0x165   :  { %v11553_v33 = vpack.c.bf16 %v2778_v42, %v2777_v9  ;;  %v9120_v54 = vpop.f32.mrb[6].mxu0  ;;  %v11555_v6 = vpop.f32.mrb[66].mxu1  ;;  %v280_v42 = vld [vmem:[%s13710_s2 + $0x758] sm:$0xff] }
 0x166   :  { %13752 = vst [vmem:[#allocation39_spill] sm:$0xff] %v11555_v6  ;;  %v2780_v46 = vmax.f32 %v9120_v54, 0.0  ;;  %v2644_v53 = vpop.f32.mrb[7].mxu0  ;;  %9070 = vmatmul.mubr.msk.f32.gmra.mrb[172].mxu1 %vm301_vm0, %v278_v26  ;;  %v11558_v45 = vpop.f32.mrb[67].mxu1  ;;  %v281_v54 = vld [vmem:[%s13710_s2 + $0x760] sm:$0xff] }
 0x167   :  { %13753 = vst [vmem:[#allocation40_spill] sm:$0xff] %v11558_v45  ;;  %v2779_v14 = vmax.f32 %v2644_v53, 0.0  ;;  %9072 = vmatprep.mubr.msk.f32.mxu1 %vm301_vm0, %v279_v1  ;;  %v2816_v53 = vld [vmem:[%s13713_s5 + $0x18] sm:$0xff] }
 0x168   :  { %2834 = vperm.xlu1 %10086, %v2816_v53   ;;  %5669 = vperm.xlu0 %10085, %v7654_v17  }
 0x169   :  { %v11570_v9 = vpack.c.bf16 %v2780_v46, %v2779_v14  ;;  %v9123_v26 = vpop.f32.mrb[8].mxu0  ;;  %v11572_v45 = vpop.f32.mrb[68].mxu1  ;;  %v282_v14 = vld [vmem:[%s13710_s2 + $0x768] sm:$0xff] }
 0x16a   :  { %13754 = vst [vmem:[#allocation41_spill] sm:$0xff] %v11572_v45  ;;  %v2782_v6 = vmax.f32 %v9123_v26, 0.0  ;;  %v2654_v1 = vpop.f32.mrb[9].mxu0  ;;  %9073 = vmatmul.mubr.msk.f32.gmra.mrb[174].mxu1 %vm301_vm0, %v280_v42  ;;  %v11578_v41 = vpop.f32.mrb[69].mxu1  ;;  %v283_v26 = vld [vmem:[%s13710_s2 + $0x770] sm:$0xff] }
 0x16b   :  { %13755 = vst [vmem:[#allocation42_spill] sm:$0xff] %v11578_v41  ;;  %v2781_v46 = vmax.f32 %v2654_v1, 0.0  ;;  %9075 = vmatprep.mubr.msk.f32.mxu1 %vm301_vm0, %v281_v54  ;;  %v7736_v54 = vld [vmem:[%s13713_s5 + $0x70] sm:$0xff] }
 0x16c   :  { %6240 = vperm.xlu0 %10085, %v7736_v54  }
 0x16d   :  { %v11590_v42 = vpack.c.bf16 %v2782_v6, %v2781_v46  ;;  %v9126_v41 = vpop.f32.mrb[10].mxu0  ;;  %v11592_v53 = vpop.f32.mrb[70].mxu1  ;;  %v284_v6 = vld [vmem:[%s13710_s2 + $0x778] sm:$0xff] }
 0x16e   :  { %13756 = vst [vmem:[#allocation43_spill] sm:$0xff] %v11592_v53  ;;  %v2784_v45 = vmax.f32 %v9126_v41, 0.0  ;;  %v2664_v34 = vpop.f32.mrb[11].mxu0  ;;  %9076 = vmatmul.mubr.msk.f32.gmra.mrb[176].mxu1 %vm301_vm0, %v282_v14  ;;  %v11595_v1 = vpop.f32.mrb[71].mxu1  ;;  %v285_v41 = vld [vmem:[%s13710_s2 + $0x780] sm:$0xff] }
 0x16f   :  { %13757 = vst [vmem:[#allocation44_spill] sm:$0xff] %v11595_v1  ;;  %v2783_v17 = vmax.f32 %v2664_v34, 0.0  ;;  %9078 = vmatprep.mubr.msk.f32.mxu1 %vm301_vm0, %v283_v26  ;;  %v7816_v26 = vld [vmem:[%s13716_s8 + $0x60] sm:$0xff] }
 0x170   :  { %6797 = vperm.xlu0 %10085, %v7816_v26  }
 0x171   :  { %v11607_v46 = vpack.c.bf16 %v2784_v45, %v2783_v17  ;;  %v9129_v14 = vpop.f32.mrb[12].mxu0  ;;  %v11609_v1 = vpop.f32.mrb[72].mxu1  ;;  %v286_v45 = vld [vmem:[%s13710_s2 + $0x788] sm:$0xff]  ;;  %v287_v17 = vld [vmem:[%s13710_s2 + $0x790] sm:$0xff] }
 0x172   :  { %13758 = vst [vmem:[#allocation45_spill] sm:$0xff] %v11609_v1  ;;  %v2786_v53 = vmax.f32 %v9129_v14, 0.0  ;;  %v2674_v25 = vpop.f32.mrb[13].mxu0  ;;  %9079 = vmatmul.mubr.msk.f32.gmra.mrb[178].mxu1 %vm301_vm0, %v284_v6  ;;  %v11612_v34 = vpop.f32.mrb[73].mxu1 }
 0x173   :  { %13759 = vst [vmem:[#allocation46_spill] sm:$0xff] %v11612_v34  ;;  %v2785_v54 = vmax.f32 %v2674_v25, 0.0  ;;  %9081 = vmatprep.mubr.msk.f32.mxu1 %vm301_vm0, %v285_v41  ;;  %v7818_v41 = vld [vmem:[%s13716_s8 + $0x70] sm:$0xff] }
 0x174   :  { %6807 = vperm.xlu0 %10085, %v7818_v41   ;;  %v290_v41 = vld [vmem:[%s13710_s2 + $0x7a8] sm:$0xff] }
 0x175   :  { %v11624_v14 = vpack.c.bf16 %v2786_v53, %v2785_v54  ;;  %v9132_v6 = vpop.f32.mrb[14].mxu0  ;;  %v11626_v34 = vpop.f32.mrb[74].mxu1  ;;  %v288_v53 = vld [vmem:[%s13710_s2 + $0x798] sm:$0xff]  ;;  %v289_v54 = vld [vmem:[%s13710_s2 + $0x7a0] sm:$0xff] }
 0x176   :  { %13760 = vst [vmem:[#allocation47_spill] sm:$0xff] %v11626_v34  ;;  %v2788_v1 = vmax.f32 %v9132_v6, 0.0  ;;  %v2684_v18 = vpop.f32.mrb[15].mxu0  ;;  %9082 = vmatmul.mubr.msk.f32.gmra.mrb[180].mxu1 %vm301_vm0, %v286_v45  ;;  %v11629_v25 = vpop.f32.mrb[75].mxu1 }
 0x177   :  { %13761 = vst [vmem:[#allocation48_spill] sm:$0xff] %v11629_v25  ;;  %v2787_v26 = vmax.f32 %v2684_v18, 0.0  ;;  %9084 = vmatprep.mubr.msk.f32.mxu1 %vm301_vm0, %v287_v17 }
 0x179   :  { %v11641_v6 = vpack.c.bf16 %v2788_v1, %v2787_v26  ;;  %v9135_v45 = vpop.f32.mrb[16].mxu0  ;;  %v11643_v25 = vpop.f32.mrb[76].mxu1  ;;  %v291_v1 = vld [vmem:[%s13710_s2 + $0x7b0] sm:$0xff] }
 0x17a   :  { %13762 = vst [vmem:[#allocation49_spill] sm:$0xff] %v11643_v25  ;;  %v2790_v34 = vmax.f32 %v9135_v45, 0.0  ;;  %v2694_v13 = vpop.f32.mrb[17].mxu0  ;;  %9085 = vmatmul.mubr.msk.f32.gmra.mrb[182].mxu1 %vm301_vm0, %v288_v53  ;;  %v11646_v18 = vpop.f32.mrb[77].mxu1  ;;  %v3378_v53 = vld [vmem:[%s13716_s8 + $0x8] sm:$0xff] }
 0x17b   :  { %13763 = vst [vmem:[#allocation50_spill] sm:$0xff] %v11646_v18  ;;  %v2789_v17 = vmax.f32 %v2694_v13, 0.0  ;;  %9087 = vmatprep.mubr.msk.f32.mxu1 %vm301_vm0, %v289_v54  ;;  %3388 = vperm.xlu1 %10086, %v3378_v53  }
 0x17d   :  { %v9533_v26 = vpack.c.bf16 %v2790_v34, %v2789_v17  ;;  %v9138_v10 = vpop.f32.mrb[18].mxu0  ;;  %v11655_v25 = vpop.f32.mrb[78].mxu1  ;;  %v292_v34 = vld [vmem:[%s13710_s2 + $0x7b8] sm:$0xff] }
 0x17e   :  { %13764 = vst [vmem:[#allocation51_spill] sm:$0xff] %v11655_v25  ;;  %v2792_v45 = vmax.f32 %v9138_v10, 0.0  ;;  %v2704_v13 = vpop.f32.mrb[19].mxu0  ;;  %9088 = vmatmul.mubr.msk.f32.gmra.mrb[184].mxu1 %vm301_vm0, %v290_v41  ;;  %v11661_v54 = vpop.f32.mrb[79].mxu1  ;;  %v293_v10 = vld [vmem:[%s13710_s2 + $0x7c0] sm:$0xff] }
 0x17f   :  { %13765 = vst [vmem:[#allocation52_spill] sm:$0xff] %v11661_v54  ;;  %v2791_v18 = vmax.f32 %v2704_v13, 0.0  ;;  %9534 = vmatprep.subr.bf16.mxu1 %v9533_v26  ;;  %9090 = vmatprep.mubr.msk.f32.mxu1 %vm301_vm0, %v291_v1  ;;  %v7407_v26 = vld [vmem:[%s13713_s5 + $0x28] sm:$0xff] }
 0x180   :  { %9536 = vmatpush3.bf16.msra.mxu1 %v11516_v62  ;;  %3959 = vperm.xlu1 %10086, %v7407_v26  }
 0x181   :  { %v9537_v17 = vpack.c.bf16 %v2792_v45, %v2791_v18  ;;  %v9141_v25 = vpop.f32.mrb[20].mxu0  ;;  %v11671_v41 = vpop.f32.mrb[80].mxu1  ;;  %v294_v18 = vld [vmem:[%s13710_s2 + $0x7c8] sm:$0xff] }
 0x182   :  { %13766 = vst [vmem:[#allocation53_spill] sm:$0xff] %v11671_v41  ;;  %v2794_v53 = vmax.f32 %v9141_v25, 0.0  ;;  %v2714_v1 = vpop.f32.mrb[21].mxu0  ;;  %9091 = vmatmul.mubr.msk.f32.gmra.mrb[186].mxu1 %vm301_vm0, %v292_v34  ;;  %v11677_v13 = vpop.f32.mrb[81].mxu1  ;;  %v295_v25 = vld [vmem:[%s13710_s2 + $0x7d0] sm:$0xff] }
 0x183   :  { %13767 = vst [vmem:[#allocation54_spill] sm:$0xff] %v11677_v13  ;;  %v2793_v62 = vmax.f32 %v2714_v1, 0.0  ;;  %9538 = vmatprep.subr.bf16.mxu1 %v9537_v17  ;;  %9093 = vmatprep.mubr.msk.f32.mxu1 %vm301_vm0, %v293_v10  ;;  %v3380_v17 = vld [vmem:[%s13716_s8 + $0x18] sm:$0xff] }
 0x184   :  { %9540 = vmatpush3.bf16.msra.mxu1 %v11533_v57  ;;  %3398 = vperm.xlu1 %10086, %v3380_v17  }
 0x185   :  { %v9541_v45 = vpack.c.bf16 %v2794_v53, %v2793_v62  ;;  %v9144_v41 = vpop.f32.mrb[22].mxu0  ;;  %v11687_v34 = vpop.f32.mrb[82].mxu1  ;;  %v296_v53 = vld [vmem:[%s13710_s2 + $0x7d8] sm:$0xff] }
 0x186   :  { %13768 = vst [vmem:[#allocation55_spill] sm:$0xff] %v11687_v34  ;;  %v2796_v26 = vmax.f32 %v9144_v41, 0.0  ;;  %v2724_v10 = vpop.f32.mrb[23].mxu0  ;;  %9094 = vmatmul.mubr.msk.f32.gmra.mrb[188].mxu1 %vm301_vm0, %v294_v18  ;;  %v11693_v1 = vpop.f32.mrb[83].mxu1  ;;  %v297_v41 = vld [vmem:[%s13710_s2 + $0x7e0] sm:$0xff] }
 0x187   :  { %13769 = vst [vmem:[#allocation56_spill] sm:$0xff] %v11693_v1  ;;  %v2795_v57 = vmax.f32 %v2724_v10, 0.0  ;;  %9542 = vmatprep.subr.bf16.mxu1 %v9541_v45  ;;  %9096 = vmatprep.mubr.msk.f32.mxu1 %vm301_vm0, %v295_v25  ;;  %v7409_v45 = vld [vmem:[%s13713_s5 + $0x38] sm:$0xff] }
 0x188   :  { %9544 = vmatpush3.bf16.msra.mxu1 %v11553_v33  ;;  %3969 = vperm.xlu1 %10086, %v7409_v45  }
 0x189   :  { %v9545_v62 = vpack.c.bf16 %v2796_v26, %v2795_v57  ;;  %v9147_v34 = vpop.f32.mrb[24].mxu0  ;;  %v11703_v18 = vpop.f32.mrb[84].mxu1  ;;  %v298_v26 = vld [vmem:[%s13710_s2 + $0x7e8] sm:$0xff] }
 0x18a   :  { %13770 = vst [vmem:[#allocation57_spill] sm:$0xff] %v11703_v18  ;;  %v2798_v17 = vmax.f32 %v9147_v34, 0.0  ;;  %v2734_v25 = vpop.f32.mrb[25].mxu0  ;;  %9097 = vmatmul.mubr.msk.f32.gmra.mrb[190].mxu1 %vm301_vm0, %v296_v53  ;;  %v11709_v10 = vpop.f32.mrb[85].mxu1  ;;  %v299_v34 = vld [vmem:[%s13710_s2 + $0x7f0] sm:$0xff] }
 0x18b   :  { %13771 = vst [vmem:[#allocation58_spill] sm:$0xff] %v11709_v10  ;;  %v2797_v33 = vmax.f32 %v2734_v25, 0.0  ;;  %9546 = vmatprep.subr.bf16.mxu1 %v9545_v62  ;;  %9099 = vmatprep.mubr.msk.f32.mxu1 %vm301_vm0, %v297_v41  ;;  %v7489_v62 = vld [vmem:[%s13716_s8 + $0x28] sm:$0xff] }
 0x18c   :  { %9548 = vmatpush3.bf16.msra.mxu1 %v11570_v9  ;;  %4526 = vperm.xlu1 %10086, %v7489_v62  }
 0x18d   :  { %v9549_v57 = vpack.c.bf16 %v2798_v17, %v2797_v33  ;;  %v9150_v18 = vpop.f32.mrb[26].mxu0  ;;  %v11719_v53 = vpop.f32.mrb[86].mxu1  ;;  %v300_v17 = vld [vmem:[%s13710_s2 + $0x7f8] sm:$0xff] }
 0x18e   :  { %13772 = vst [vmem:[#allocation59_spill] sm:$0xff] %v11719_v53  ;;  %v2800_v45 = vmax.f32 %v9150_v18, 0.0  ;;  %v2744_v41 = vpop.f32.mrb[27].mxu0  ;;  %9100 = vmatmul.mubr.msk.f32.gmra.mrb[192].mxu1 %vm301_vm0, %v298_v26  ;;  %v11725_v25 = vpop.f32.mrb[87].mxu1  ;;  %v2806_v18 = vld [vmem:[%s13712_s4 + $0x8] sm:$0xff] }
 0x18f   :  { %13773 = vst [vmem:[#allocation60_spill] sm:$0xff] %v11725_v25  ;;  %v2799_v9 = vmax.f32 %v2744_v41, 0.0  ;;  %9550 = vmatprep.subr.bf16.mxu1 %v9549_v57  ;;  %9102 = vmatprep.mubr.msk.f32.mxu1 %vm301_vm0, %v299_v34  ;;  %v7571_v57 = vld [vmem:[%s13713_s5 + $0x48] sm:$0xff] }
 0x190   :  { %9552 = vmatpush3.bf16.msra.mxu1 %v11590_v42  ;;  %5097 = vperm.xlu1 %10086, %v7571_v57  }
 0x191   :  { %v9553_v33 = vpack.c.bf16 %v2800_v45, %v2799_v9  ;;  %v9153_v53 = vpop.f32.mrb[28].mxu0  ;;  %v11735_v26 = vpop.f32.mrb[88].mxu1 }
 0x192   :  { %13774 = vst [vmem:[#allocation61_spill] sm:$0xff] %v11735_v26  ;;  %v2802_v62 = vmax.f32 %v9153_v53, 0.0  ;;  %v2754_v34 = vpop.f32.mrb[29].mxu0  ;;  %9103 = vmatmul.mubr.msk.f32.gmra.mrb[194].mxu1 %vm301_vm0, %v300_v17  ;;  %v11741_v41 = vpop.f32.mrb[89].mxu1  ;;  %v7491_v26 = vld [vmem:[%s13716_s8 + $0x38] sm:$0xff] }
 0x193   :  { %13775 = vst [vmem:[#allocation62_spill] sm:$0xff] %v11741_v41  ;;  %v2801_v42 = vmax.f32 %v2754_v34, 0.0  ;;  %9554 = vmatprep.subr.bf16.mxu1 %v9553_v33  ;;  %2901 = vmatprep.mubr.f32.mxu1 %v2806_v18 }
 0x194   :  { %9556 = vmatpush3.bf16.msra.mxu1 %v11607_v46  ;;  %4536 = vperm.xlu1 %10086, %v7491_v26   ;;  %v7573_v46 = vld [vmem:[%s13713_s5 + $0x58] sm:$0xff] }
 0x195   :  { %v9557_v45 = vpack.c.bf16 %v2802_v62, %v2801_v42  ;;  %v9156_v9 = vpop.f32.mrb[30].mxu0  ;;  %v11744_v25 = vpop.f32.mrb[90].mxu1  ;;  %v7653_v62 = vld [vmem:[%s13716_s8 + $0x48] sm:$0xff] }
 0x196   :  { %13776 = vst [vmem:[#allocation63_spill] sm:$0xff] %v11744_v25  ;;  %v2804_v53 = vmax.f32 %v9156_v9, 0.0  ;;  %v2764_v10 = vpop.f32.mrb[31].mxu0  ;;  %v11749_v1 = vpop.f32.mrb[91].mxu1  ;;  %v2810_v42 = vld [vmem:[%s13712_s4 + $0x28] sm:$0xff] }
 0x197   :  { %13777 = vst [vmem:[#allocation64_spill] sm:$0xff] %v11749_v1  ;;  %v2803_v17 = vmax.f32 %v2764_v10, 0.0  ;;  %9558 = vmatprep.subr.bf16.mxu1 %v9557_v45  ;;  %v2805_v10 = vld [vmem:[%s13712_s4] sm:$0xff]  ;;  %v7735_v9 = vld [vmem:[%s13713_s5 + $0x68] sm:$0xff] }
 0x198   :  { %9560 = vmatpush3.bf16.msra.mxu1 %v11624_v14  ;;  %5107 = vperm.xlu1 %10086, %v7573_v46   ;;  %v2808_v14 = vld [vmem:[%s13712_s4 + $0x18] sm:$0xff] }
 0x199   :  { %v9561_v18 = vpack.c.bf16 %v2804_v53, %v2803_v17  ;;  %v11752_v33 = vpop.f32.mrb[92].mxu1  ;;  %v2809_v17 = vld [vmem:[%s13712_s4 + $0x20] sm:$0xff] }
 0x19a   :  { %13778 = vst [vmem:[#allocation65_spill] sm:$0xff] %v11752_v33  ;;  %v11757_v57 = vpop.f32.mrb[93].mxu1 }
 0x19b   :  { %13779 = vst [vmem:[#allocation66_spill] sm:$0xff] %v11757_v57  ;;  %9562 = vmatprep.subr.bf16.mxu1 %v9561_v18  ;;  %v2812_v18 = vld [vmem:[%s13712_s4 + $0x38] sm:$0xff] }
 0x19c   :  { %9564 = vmatpush3.bf16.msra.mxu1 %v11641_v6  ;;  %5664 = vperm.xlu1 %10086, %v7653_v62   ;;  %v2807_v6 = vld [vmem:[%s13712_s4 + $0x10] sm:$0xff] }
 0x19d   :  { %v11766_v26 = vpop.f32.mrb[94].mxu1  ;;  %v2811_v62 = vld [vmem:[%s13712_s4 + $0x30] sm:$0xff] }
 0x19e   :  { %13780 = vst [vmem:[#allocation67_spill] sm:$0xff] %v11766_v26  ;;  %v11771_v34 = vpop.f32.mrb[95].mxu1 }
 0x19f   :  { %13781 = vst [vmem:[#allocation68_spill] sm:$0xff] %v11771_v34  ;;  %2902 = vmatmul.mubr.f32.vlgmr.msra.gmra.mrb[196].mxu1 %v2805_v10  ;;  %v7655_v10 = vld [vmem:[%s13716_s8 + $0x58] sm:$0xff] }
 0x1a0   :  { %2906 = vmatprep.mubr.f32.mxu1 %v2808_v14  ;;  %6235 = vperm.xlu1 %10086, %v7735_v9  }
 0x1a1   :  { %v11779_v45 = vpop.f32.mrb[96].mxu1 }
 0x1a2   :  { %13782 = vst [vmem:[#allocation69_spill] sm:$0xff] %v11779_v45  ;;  %v11784_v53 = vpop.f32.mrb[97].mxu1 }
 0x1a3   :  { %13783 = vst [vmem:[#allocation70_spill] sm:$0xff] %v11784_v53  ;;  %2907 = vmatmul.mubr.f32.gmra.mrb[198].mxu1 %v2807_v6 }
 0x1a4   :  { %2911 = vmatprep.mubr.f32.mxu1 %v2810_v42  ;;  %5674 = vperm.xlu1 %10086, %v7655_v10   ;;  %v7737_v42 = vld [vmem:[%s13713_s5 + $0x78] sm:$0xff] }
 0x1a5   :  { %v11792_v46 = vpop.f32.mrb[98].mxu1 }
 0x1a6   :  { %13784 = vst [vmem:[#allocation71_spill] sm:$0xff] %v11792_v46  ;;  %v11797_v14 = vpop.f32.mrb[99].mxu1 }
 0x1a7   :  { %13785 = vst [vmem:[#allocation72_spill] sm:$0xff] %v11797_v14  ;;  %2912 = vmatmul.mubr.f32.gmra.mrb[200].mxu1 %v2809_v17  ;;  %v7817_v17 = vld [vmem:[%s13716_s8 + $0x68] sm:$0xff] }
 0x1a8   :  { %2916 = vmatprep.mubr.f32.mxu1 %v2812_v18  ;;  %6245 = vperm.xlu1 %10086, %v7737_v42  }
 0x1a9   :  { %v11802_v6 = vpop.f32.mrb[100].mxu1 }
 0x1aa   :  { %13786 = vst [vmem:[#allocation73_spill] sm:$0xff] %v11802_v6  ;;  %v11807_v9 = vpop.f32.mrb[101].mxu1  ;;  %v7819_v6 = vld [vmem:[%s13716_s8 + $0x78] sm:$0xff] }
 0x1ab   :  { %13787 = vst [vmem:[#allocation74_spill] sm:$0xff] %v11807_v9  ;;  %2917 = vmatmul.mubr.f32.gmra.mrb[202].mxu1 %v2811_v62 }
 0x1ac   :  { %6802 = vperm.xlu1 %10086, %v7817_v17  }
 0x1ad   :  { %v11809_v46 = vpop.f32.mrb[102].mxu1 }
 0x1ae   :  { %13788 = vst [vmem:[#allocation75_spill] sm:$0xff] %v11809_v46  ;;  %v11814_v18 = vpop.f32.mrb[103].mxu1 }
 0x1af   :  { %13789 = vst [vmem:[#allocation76_spill] sm:$0xff] %v11814_v18 }
 0x1b0   :  { %6812 = vperm.xlu1 %10086, %v7819_v6  }
 0x1b1   :  { %v11816_v10 = vpop.f32.mrb[104].mxu1 }
 0x1b2   :  { %13790 = vst [vmem:[#allocation77_spill] sm:$0xff] %v11816_v10  ;;  %v11821_v14 = vpop.f32.mrb[105].mxu1 }
 0x1b3   :  { %13791 = vst [vmem:[#allocation78_spill] sm:$0xff] %v11821_v14 }
 0x1b5   :  { %v11823_v42 = vpop.f32.mrb[106].mxu1 }
 0x1b6   :  { %13792 = vst [vmem:[#allocation79_spill] sm:$0xff] %v11823_v42  ;;  %v11825_v62 = vpop.f32.mrb[107].mxu1 }
 0x1b7   :  { %13793 = vst [vmem:[#allocation80_spill] sm:$0xff] %v11825_v62 }
 0x1b9   :  { %v11827_v46 = vpop.f32.mrb[108].mxu1 }
 0x1ba   :  { %13794 = vst [vmem:[#allocation81_spill] sm:$0xff] %v11827_v46  ;;  %v11829_v9 = vpop.f32.mrb[109].mxu1 }
 0x1bb   :  { %13795 = vst [vmem:[#allocation82_spill] sm:$0xff] %v11829_v9 }
 0x1bd   :  { %v11831_v53 = vpop.f32.mrb[110].mxu1 }
 0x1be   :  { %13796 = vst [vmem:[#allocation83_spill] sm:$0xff] %v11831_v53  ;;  %v11833_v17 = vpop.f32.mrb[111].mxu1 }
 0x1bf   :  { %13797 = vst [vmem:[#allocation84_spill] sm:$0xff] %v11833_v17 }
 0x1c1   :  { %v11835_v10 = vpop.f32.mrb[112].mxu1 }
 0x1c2   :  { %13798 = vst [vmem:[#allocation85_spill] sm:$0xff] %v11835_v10  ;;  %v11837_v18 = vpop.f32.mrb[113].mxu1 }
 0x1c3   :  { %13799 = vst [vmem:[#allocation86_spill] sm:$0xff] %v11837_v18 }
 0x1c5   :  { %v11839_v45 = vpop.f32.mrb[114].mxu1 }
 0x1c6   :  { %13800 = vst [vmem:[#allocation87_spill] sm:$0xff] %v11839_v45  ;;  %v11841_v14 = vpop.f32.mrb[115].mxu1 }
 0x1c7   :  { %13801 = vst [vmem:[#allocation88_spill] sm:$0xff] %v11841_v14 }
 0x1c9   :  { %v11843_v6 = vpop.f32.mrb[116].mxu1 }
 0x1ca   :  { %13802 = vst [vmem:[#allocation89_spill] sm:$0xff] %v11843_v6  ;;  %v11845_v42 = vpop.f32.mrb[117].mxu1 }
 0x1cb   :  { %13803 = vst [vmem:[#allocation90_spill] sm:$0xff] %v11845_v42 }
 0x1cd   :  { %v11847_v62 = vpop.f32.mrb[118].mxu1 }
 0x1ce   :  { %13804 = vst [vmem:[#allocation91_spill] sm:$0xff] %v11847_v62  ;;  %v11849_v46 = vpop.f32.mrb[119].mxu1 }
 0x1cf   :  { %13805 = vst [vmem:[#allocation92_spill] sm:$0xff] %v11849_v46 }
 0x1d1   :  { %v11851_v9 = vpop.f32.mrb[120].mxu1 }
 0x1d2   :  { %13806 = vst [vmem:[#allocation93_spill] sm:$0xff] %v11851_v9  ;;  %v11853_v53 = vpop.f32.mrb[121].mxu1 }
 0x1d3   :  { %13807 = vst [vmem:[#allocation94_spill] sm:$0xff] %v11853_v53 }
 0x1d5   :  { %v11855_v17 = vpop.f32.mrb[122].mxu1 }
 0x1d6   :  { %13808 = vst [vmem:[#allocation95_spill] sm:$0xff] %v11855_v17  ;;  %v11857_v10 = vpop.f32.mrb[123].mxu1 }
 0x1d7   :  { %13809 = vst [vmem:[#allocation96_spill] sm:$0xff] %v11857_v10 }
 0x1d9   :  { %v11859_v18 = vpop.f32.mrb[124].mxu1 }
 0x1da   :  { %13810 = vst [vmem:[#allocation97_spill] sm:$0xff] %v11859_v18  ;;  %v11861_v45 = vpop.f32.mrb[125].mxu1 }
 0x1db   :  { %13811 = vst [vmem:[#allocation98_spill] sm:$0xff] %v11861_v45 }
 0x1dd   :  { %v11863_v14 = vpop.f32.mrb[126].mxu1 }
 0x1de   :  { %13812 = vst [vmem:[#allocation99_spill] sm:$0xff] %v11863_v14  ;;  %v11865_v6 = vpop.f32.mrb[127].mxu1 }
 0x1df   :  { %13813 = vst [vmem:[#allocation100_spill] sm:$0xff] %v11865_v6 }
 0x1e1   :  { %v11867_v42 = vpop.f32.mrb[128].mxu1 }
 0x1e2   :  { %13814 = vst [vmem:[#allocation101_spill] sm:$0xff] %v11867_v42  ;;  %v11869_v62 = vpop.f32.mrb[129].mxu1 }
 0x1e3   :  { %13815 = vst [vmem:[#allocation102_spill] sm:$0xff] %v11869_v62 }
 0x1e5   :  { %v11871_v46 = vpop.f32.mrb[130].mxu1 }
 0x1e6   :  { %13816 = vst [vmem:[#allocation103_spill] sm:$0xff] %v11871_v46  ;;  %v11873_v9 = vpop.f32.mrb[131].mxu1 }
 0x1e7   :  { %13817 = vst [vmem:[#allocation104_spill] sm:$0xff] %v11873_v9 }
 0x1e9   :  { %v11875_v53 = vpop.f32.mrb[132].mxu1 }
 0x1ea   :  { %13818 = vst [vmem:[#allocation105_spill] sm:$0xff] %v11875_v53  ;;  %v11877_v17 = vpop.f32.mrb[133].mxu1 }
 0x1eb   :  { %13819 = vst [vmem:[#allocation106_spill] sm:$0xff] %v11877_v17 }
 0x1ed   :  { %v11879_v10 = vpop.f32.mrb[134].mxu1 }
 0x1ee   :  { %13820 = vst [vmem:[#allocation107_spill] sm:$0xff] %v11879_v10  ;;  %v11881_v18 = vpop.f32.mrb[135].mxu1 }
 0x1ef   :  { %13821 = vst [vmem:[#allocation108_spill] sm:$0xff] %v11881_v18 }
 0x1f1   :  { %v11883_v45 = vpop.f32.mrb[136].mxu1 }
 0x1f2   :  { %13822 = vst [vmem:[#allocation109_spill] sm:$0xff] %v11883_v45  ;;  %v11885_v14 = vpop.f32.mrb[137].mxu1 }
 0x1f3   :  { %13823 = vst [vmem:[#allocation110_spill] sm:$0xff] %v11885_v14 }
 0x1f5   :  { %v11887_v6 = vpop.f32.mrb[138].mxu1 }
 0x1f6   :  { %13824 = vst [vmem:[#allocation111_spill] sm:$0xff] %v11887_v6  ;;  %v11889_v42 = vpop.f32.mrb[139].mxu1 }
 0x1f7   :  { %13825 = vst [vmem:[#allocation112_spill] sm:$0xff] %v11889_v42 }
 0x1f9   :  { %v11891_v62 = vpop.f32.mrb[140].mxu1 }
 0x1fa   :  { %13826 = vst [vmem:[#allocation113_spill] sm:$0xff] %v11891_v62  ;;  %v11893_v46 = vpop.f32.mrb[141].mxu1 }
 0x1fb   :  { %13827 = vst [vmem:[#allocation114_spill] sm:$0xff] %v11893_v46 }
 0x1fd   :  { %v11895_v9 = vpop.f32.mrb[142].mxu1 }
 0x1fe   :  { %13828 = vst [vmem:[#allocation115_spill] sm:$0xff] %v11895_v9  ;;  %v11897_v53 = vpop.f32.mrb[143].mxu1 }
 0x1ff   :  { %13829 = vst [vmem:[#allocation116_spill] sm:$0xff] %v11897_v53 }
 0x201   :  { %v11899_v17 = vpop.f32.mrb[144].mxu1 }
 0x202   :  { %13830 = vst [vmem:[#allocation117_spill] sm:$0xff] %v11899_v17  ;;  %v11901_v10 = vpop.f32.mrb[145].mxu1 }
 0x203   :  { %13831 = vst [vmem:[#allocation118_spill] sm:$0xff] %v11901_v10 }
 0x205   :  { %v11903_v18 = vpop.f32.mrb[146].mxu1 }
 0x206   :  { %13832 = vst [vmem:[#allocation119_spill] sm:$0xff] %v11903_v18  ;;  %v11905_v45 = vpop.f32.mrb[147].mxu1 }
 0x207   :  { %13833 = vst [vmem:[#allocation120_spill] sm:$0xff] %v11905_v45 }
 0x209   :  { %v11907_v14 = vpop.f32.mrb[148].mxu1 }
 0x20a   :  { %13834 = vst [vmem:[#allocation121_spill] sm:$0xff] %v11907_v14  ;;  %v11909_v6 = vpop.f32.mrb[149].mxu1 }
 0x20b   :  { %13835 = vst [vmem:[#allocation122_spill] sm:$0xff] %v11909_v6 }
 0x20d   :  { %v11911_v42 = vpop.f32.mrb[150].mxu1 }
 0x20e   :  { %13836 = vst [vmem:[#allocation123_spill] sm:$0xff] %v11911_v42  ;;  %v11913_v62 = vpop.f32.mrb[151].mxu1 }
 0x20f   :  { %13837 = vst [vmem:[#allocation124_spill] sm:$0xff] %v11913_v62 }
 0x211   :  { %v11915_v46 = vpop.f32.mrb[152].mxu1 }
 0x212   :  { %13838 = vst [vmem:[#allocation125_spill] sm:$0xff] %v11915_v46  ;;  %v11917_v9 = vpop.f32.mrb[153].mxu1 }
 0x213   :  { %13839 = vst [vmem:[#allocation126_spill] sm:$0xff] %v11917_v9 }
 0x215   :  { %v11919_v53 = vpop.f32.mrb[154].mxu1 }
 0x216   :  { %13840 = vst [vmem:[#allocation127_spill] sm:$0xff] %v11919_v53  ;;  %v11921_v17 = vpop.f32.mrb[155].mxu1 }
 0x217   :  { %13841 = vst [vmem:[#allocation128_spill] sm:$0xff] %v11921_v17 }
 0x219   :  { %v11923_v10 = vpop.f32.mrb[156].mxu1 }
 0x21a   :  { %13842 = vst [vmem:[#allocation129_spill] sm:$0xff] %v11923_v10  ;;  %v11925_v18 = vpop.f32.mrb[157].mxu1 }
 0x21b   :  { %13843 = vst [vmem:[#allocation130_spill] sm:$0xff] %v11925_v18 }
 0x21d   :  { %v11927_v45 = vpop.f32.mrb[158].mxu1 }
 0x21e   :  { %13844 = vst [vmem:[#allocation131_spill] sm:$0xff] %v11927_v45  ;;  %v11929_v14 = vpop.f32.mrb[159].mxu1 }
 0x21f   :  { %13845 = vst [vmem:[#allocation132_spill] sm:$0xff] %v11929_v14 }
 0x221   :  { %v11931_v6 = vpop.f32.mrb[160].mxu1 }
 0x222   :  { %13846 = vst [vmem:[#allocation133_spill] sm:$0xff] %v11931_v6  ;;  %v11933_v42 = vpop.f32.mrb[161].mxu1 }
 0x223   :  { %13847 = vst [vmem:[#allocation134_spill] sm:$0xff] %v11933_v42 }
 0x225   :  { %v11935_v62 = vpop.f32.mrb[162].mxu1 }
 0x226   :  { %13848 = vst [vmem:[#allocation135_spill] sm:$0xff] %v11935_v62  ;;  %v11937_v46 = vpop.f32.mrb[163].mxu1 }
 0x227   :  { %13849 = vst [vmem:[#allocation136_spill] sm:$0xff] %v11937_v46 }
 0x229   :  { %v11939_v9 = vpop.f32.mrb[164].mxu1 }
 0x22a   :  { %13850 = vst [vmem:[#allocation137_spill] sm:$0xff] %v11939_v9  ;;  %v11941_v53 = vpop.f32.mrb[165].mxu1 }
 0x22b   :  { %13851 = vst [vmem:[#allocation138_spill] sm:$0xff] %v11941_v53  ;;  %v2984_v53 = vld [vmem:[%s13714_s6] sm:$0xff] }
 0x22c   :  { %9161 = vmatprep.mubr.msk.f32.mxu0 %vm2451_vm2, %v2984_v53 }
 0x22d   :  { %v11943_v17 = vpop.f32.mrb[166].mxu1 }
 0x22e   :  { %13852 = vst [vmem:[#allocation139_spill] sm:$0xff] %v11943_v17  ;;  %v11945_v10 = vpop.f32.mrb[167].mxu1 }
 0x22f   :  { %13853 = vst [vmem:[#allocation140_spill] sm:$0xff] %v11945_v10 }
 0x231   :  { %v11947_v18 = vpop.f32.mrb[168].mxu1 }
 0x232   :  { %13854 = vst [vmem:[#allocation141_spill] sm:$0xff] %v11947_v18  ;;  %v11949_v45 = vpop.f32.mrb[169].mxu1 }
 0x233   :  { %13855 = vst [vmem:[#allocation142_spill] sm:$0xff] %v11949_v45 }
 0x235   :  { %v11951_v14 = vpop.f32.mrb[170].mxu1 }
 0x236   :  { %13856 = vst [vmem:[#allocation143_spill] sm:$0xff] %v11951_v14  ;;  %v11953_v6 = vpop.f32.mrb[171].mxu1 }
 0x237   :  { %13857 = vst [vmem:[#allocation144_spill] sm:$0xff] %v11953_v6 }
 0x239   :  { %v11955_v42 = vpop.f32.mrb[172].mxu1 }
 0x23a   :  { %13858 = vst [vmem:[#allocation145_spill] sm:$0xff] %v11955_v42  ;;  %v11957_v62 = vpop.f32.mrb[173].mxu1 }
 0x23b   :  { %13859 = vst [vmem:[#allocation146_spill] sm:$0xff] %v11957_v62 }
 0x23d   :  { %v11962_v9 = vpop.f32.mrb[174].mxu1 }
 0x23e   :  { %13860 = vst [vmem:[#allocation147_spill] sm:$0xff] %v11962_v9  ;;  %v11965_v10 = vpop.f32.mrb[175].mxu1 }
 0x23f   :  { %13861 = vst [vmem:[#allocation148_spill] sm:$0xff] %v11965_v10 }
 0x241   :  { %v11967_v18 = vpop.f32.mrb[176].mxu1 }
 0x242   :  { %13862 = vst [vmem:[#allocation149_spill] sm:$0xff] %v11967_v18  ;;  %v11969_v45 = vpop.f32.mrb[177].mxu1 }
 0x243   :  { %13863 = vst [vmem:[#allocation150_spill] sm:$0xff] %v11969_v45 }
 0x245   :  { %v11971_v14 = vpop.f32.mrb[178].mxu1 }
 0x246   :  { %13864 = vst [vmem:[#allocation151_spill] sm:$0xff] %v11971_v14  ;;  %v11973_v6 = vpop.f32.mrb[179].mxu1 }
 0x247   :  { %13865 = vst [vmem:[#allocation152_spill] sm:$0xff] %v11973_v6 }
 0x249   :  { %v11975_v42 = vpop.f32.mrb[180].mxu1 }
 0x24a   :  { %13866 = vst [vmem:[#allocation153_spill] sm:$0xff] %v11975_v42  ;;  %v11977_v62 = vpop.f32.mrb[181].mxu1 }
 0x24b   :  { %13867 = vst [vmem:[#allocation154_spill] sm:$0xff] %v11977_v62 }
 0x24d   :  { %v11979_v17 = vpop.f32.mrb[182].mxu1 }
 0x24e   :  { %13868 = vst [vmem:[#allocation155_spill] sm:$0xff] %v11979_v17  ;;  %v11981_v46 = vpop.f32.mrb[183].mxu1 }
 0x24f   :  { %13869 = vst [vmem:[#allocation156_spill] sm:$0xff] %v11981_v46 }
 0x251   :  { %v11983_v9 = vpop.f32.mrb[184].mxu1 }
 0x252   :  { %13870 = vst [vmem:[#allocation157_spill] sm:$0xff] %v11983_v9  ;;  %v11985_v53 = vpop.f32.mrb[185].mxu1 }
 0x253   :  { %13871 = vst [vmem:[#allocation158_spill] sm:$0xff] %v11985_v53 }
 0x255   :  { %v11987_v10 = vpop.f32.mrb[186].mxu1 }
 0x256   :  { %13872 = vst [vmem:[#allocation159_spill] sm:$0xff] %v11987_v10  ;;  %v11989_v18 = vpop.f32.mrb[187].mxu1  ;;  %v2820_v10 = vpop.permute.xlu0 %2819 }
 0x257   :  { %13873 = vst [vmem:[#allocation160_spill] sm:$0xff] %v11989_v18 }
 0x259   :  { %v11991_v45 = vpop.f32.mrb[188].mxu1 }
 0x25a   :  { %13874 = vst [vmem:[#allocation161_spill] sm:$0xff] %v11991_v45  ;;  %v11993_v14 = vpop.f32.mrb[189].mxu1 }
 0x25b   :  { %13875 = vst [vmem:[#allocation162_spill] sm:$0xff] %v11993_v14 }
 0x25d   :  { %v11995_v6 = vpop.f32.mrb[190].mxu1 }
 0x25e   :  { %13876 = vst [vmem:[#allocation163_spill] sm:$0xff] %v11995_v6  ;;  %v11997_v42 = vpop.f32.mrb[191].mxu1 }
 0x25f   :  { %13877 = vst [vmem:[#allocation164_spill] sm:$0xff] %v11997_v42  ;;  %v2825_v42 = vpop.permute.xlu0 %2824 }
 0x261   :  { %v11999_v62 = vpop.f32.mrb[192].mxu1 }
 0x262   :  { %13878 = vst [vmem:[#allocation165_spill] sm:$0xff] %v11999_v62  ;;  %v12001_v17 = vpop.f32.mrb[193].mxu1 }
 0x263   :  { %13879 = vst [vmem:[#allocation166_spill] sm:$0xff] %v12001_v17 }
 0x265   :  { %v12003_v46 = vpop.f32.mrb[194].mxu1 }
 0x266   :  { %13880 = vst [vmem:[#allocation167_spill] sm:$0xff] %v12003_v46  ;;  %v12005_v9 = vpop.f32.mrb[195].mxu1 }
 0x267   :  { %13881 = vst [vmem:[#allocation168_spill] sm:$0xff] %v12005_v9 }
 0x272   :  { %v8153_v53 = vpop.f32.mrb[196].mxu1 }
 0x273   :  { %v8154_v34 = vpop.f32.mrb[197].mxu1 }
 0x274   :  { %v8155_v18 = vadd.f32 %v8154_v34, %v8153_v53 }
 0x276   :  { %v12007_v26 = vadd.f32 %v8155_v18, %v2820_v10  ;;  %v8156_v45 = vpop.f32.mrb[198].mxu1 }
 0x277   :  { %v8157_v14 = vpop.f32.mrb[199].mxu1 }
 0x278   :  { %v2922_v6 = vand.u32 2147483647, %v12007_v26  ;;  %v8158_v57 = vadd.f32 %v8157_v14, %v8156_v45  ;;  %vm2970_vm7 = vcmp.lt.f32.partialorder %v12007_v26, 0.0 }
 0x27a   :  { %v2930_v33 = vadd.f32 1.0, %v2922_v6  ;;  %v12010_v62 = vadd.f32 %v8158_v57, %v2825_v42  ;;  %v8159_v17 = vpop.f32.mrb[200].mxu1  ;;  %10087 = vrcp.f32 %v2922_v6  ;;  %v7290_v14 = vadd.f32 -1.0, %v2922_v6 }
 0x27b   :  { %v8160_v46 = vpop.f32.mrb[201].mxu1  ;;  %vm2926_vm3 = vcmp.gt.f32.partialorder %v2922_v6, 0.41421357  ;;  %vm2924_vm4 = vcmp.gt.f32.partialorder %v2922_v6, 2.4142137 }
 0x27c   :  { %10089 = vrcp.f32 %v2930_v33  ;;  %v2923_v9 = vand.u32 2147483647, %v12010_v62  ;;  %v12013_v1 = vadd.f32 %v8160_v46, %v8159_v17  ;;  %vm2971_vm8 = vcmp.lt.f32.partialorder %v12010_v62, 0.0 }
 0x27e   :  { %v2931_v34 = vadd.f32 1.0, %v2923_v9  ;;  %v8162_v18 = vpop.f32.mrb[202].mxu1  ;;  %10091 = vrcp.f32 %v2923_v9  ;;  %v7291_v33 = vadd.f32 -1.0, %v2923_v9  ;;  %vm2927_vm5 = vcmp.gt.f32.partialorder %v2923_v9, 0.41421357 }
 0x27f   :  { %v8163_v10 = vpop.f32.mrb[203].mxu1  ;;  %vm2925_vm6 = vcmp.gt.f32.partialorder %v2923_v9, 2.4142137 }
 0x280   :  { %10093 = vrcp.f32 %v2931_v34  ;;  %v12015_v53 = vadd.f32 %v8163_v10, %v8162_v18 }
 0x284   :  { %v10088_v45 = vpop.eup %10087 }
 0x285   :  { %v2934_v42 = vsub.f32 0.0, %v10088_v45 }
 0x286   :  { %v10090_v25 = vpop.eup %10089 }
 0x287   :  { %v2938_v57 = vmul.f32 %v10090_v25, %v7290_v14 }
 0x288   :  { %v10092_v41 = vpop.eup %10091 }
 0x289   :  { %v2940_v13 = vsel %vm2926_vm3, %v2938_v57, %v2922_v6  ;;  %v2935_v34 = vsub.f32 0.0, %v10092_v41 }
 0x28a   :  { %v10094_v46 = vpop.eup %10093  ;;  %v2942_v17 = vsel %vm2924_vm4, %v2934_v42, %v2940_v13 }
 0x28b   :  { %v2939_v54 = vmul.f32 %v10094_v46, %v7291_v33  ;;  %v2948_v5 = vmul.f32 %v2942_v17, %v2942_v17  ;;  %v13719_v46 = vmov 0.0  }
 0x28c   :  { %v2944_v41 = vsel %vm2926_vm3, 0.9990265, %v13719_v46 }
 0x28d   :  { %v2941_v18 = vsel %vm2927_vm5, %v2939_v54, %v2923_v9  ;;  %v2950_v10 = vmul.f32 0.10244363, %v2948_v5 }
 0x28e   :  { %v2943_v25 = vsel %vm2925_vm6, %v2935_v34, %v2941_v18  ;;  %v2946_v18 = vsel %vm2924_vm4, 1.998053, %v2944_v41 }
 0x28f   :  { %v2949_v14 = vmul.f32 %v2943_v25, %v2943_v25  ;;  %v7292_v45 = vadd.f32 -0.17652416, %v2950_v10 }
 0x291   :  { %v2951_v2 = vmul.f32 0.10244363, %v2949_v14  ;;  %v2954_v61 = vmul.f32 %v7292_v45, %v2948_v5 }
 0x293   :  { %v7293_v58 = vadd.f32 -0.17652416, %v2951_v2  ;;  %v2956_v50 = vadd.f32 0.25411648, %v2954_v61  ;;  %v2945_v2 = vsel %vm2927_vm5, 0.9990265, %v13719_v46 }
 0x295   :  { %v2955_v57 = vmul.f32 %v7293_v58, %v2949_v14  ;;  %v2958_v49 = vmul.f32 %v2956_v50, %v2948_v5 }
 0x297   :  { %v2957_v38 = vadd.f32 0.25411648, %v2955_v57  ;;  %v7294_v13 = vadd.f32 -0.4239951, %v2958_v49 }
 0x299   :  { %v2959_v42 = vmul.f32 %v2957_v38, %v2949_v14  ;;  %v2962_v33 = vmul.f32 %v7294_v13, %v2948_v5  ;;  %v2947_v38 = vsel %vm2925_vm6, 1.998053, %v2945_v2  ;;  %v37_v13 = vld [vmem:[%s13708_s0 + $0x8] sm:$0xff] }
 0x29a   :  { %v2985_v2 = vld [vmem:[%s13714_s6 + $0x8] sm:$0xff] }
 0x29b   :  { %v7295_v54 = vadd.f32 -0.4239951, %v2959_v42  ;;  %v2964_v37 = vadd.f32 1.272, %v2962_v33 }
 0x29d   :  { %v2963_v30 = vmul.f32 %v7295_v54, %v2949_v14  ;;  %v2966_v34 = vmul.f32 %v2964_v37, %v2942_v17 }
 0x29f   :  { %v2965_v61 = vadd.f32 1.272, %v2963_v30  ;;  %v2968_v58 = vadd.f32 %v2966_v34, %v2946_v18  ;;  %v2830_v30 = vpop.permute.xlu1 %2829 }
 0x2a0   :  { %v2914_v26 = vadd.f32 %v12013_v1, %v2830_v30  ;;  %v2998_v30 = vld [vmem:[%s13714_s6 + $0x70] sm:$0xff] }
 0x2a1   :  { %v2967_v50 = vmul.f32 %v2965_v61, %v2943_v25  ;;  %v2972_v10 = vsub.f32 0.0, %v2968_v58  ;;  %v36_v25 = vld [vmem:[%s13708_s0] sm:$0xff]  ;;  %v2986_v61 = vld [vmem:[%s13714_s6 + $0x10] sm:$0xff] }
 0x2a3   :  { %v2969_v49 = vadd.f32 %v2967_v50, %v2947_v38  ;;  %v2974_v5 = vsel %vm2970_vm7, %v2972_v10, %v2968_v58  ;;  %v2835_v33 = vpop.permute.xlu1 %2834  ;;  %v2988_v58 = vld [vmem:[%s13714_s6 + $0x20] sm:$0xff]  ;;  %v2989_v50 = vld [vmem:[%s13714_s6 + $0x28] sm:$0xff]  ;;  %v2990_v10 = vld [vmem:[%s13714_s6 + $0x30] sm:$0xff] }
 0x2a4   :  { %v2976_v45 = vmul.f32 1.442695, %v2974_v5  ;;  %v2919_v41 = vadd.f32 %v12015_v53, %v2835_v33  ;;  %v2987_v53 = vld [vmem:[%s13714_s6 + $0x18] sm:$0xff]  ;;  %v3005_v33 = vld [vmem:[%s13714_s6 + $0xa8] sm:$0xff] }
 0x2a5   :  { %v2973_v57 = vsub.f32 0.0, %v2969_v49  ;;  %v2991_v38 = vld [vmem:[%s13714_s6 + $0x38] sm:$0xff] }
 0x2a6   :  { %10095 = vpow2.f32 %v2976_v45  ;;  %v2994_v45 = vld [vmem:[%s13714_s6 + $0x50] sm:$0xff] }
 0x2a7   :  { %v2975_v37 = vsel %vm2971_vm8, %v2973_v57, %v2969_v49  ;;  %v2992_v49 = vld [vmem:[%s13714_s6 + $0x40] sm:$0xff]  ;;  %v2995_v57 = vld [vmem:[%s13714_s6 + $0x58] sm:$0xff] }
 0x2a8   :  { %v2978_v6 = vmul.f32 1.442695, %v2975_v37  ;;  %v12029_v17 = vadd.f32 %v2975_v37, %v2974_v5  ;;  %v2993_v5 = vld [vmem:[%s13714_s6 + $0x48] sm:$0xff]  ;;  %v2996_v37 = vld [vmem:[%s13714_s6 + $0x60] sm:$0xff] }
 0x2aa   :  { %10097 = vpow2.f32 %v2978_v6  ;;  %v2997_v6 = vld [vmem:[%s13714_s6 + $0x68] sm:$0xff] }
 0x2b0   :  { %v10096_v9 = vpop.eup %10095 }
 0x2b1   :  { %v2980_v14 = vmul.f32 %v10096_v9, %v36_v25  ;;  %v2999_v25 = vld [vmem:[%s13714_s6 + $0x78] sm:$0xff]  ;;  %v3001_v9 = vld [vmem:[%s13714_s6 + $0x88] sm:$0xff] }
 0x2b3   :  { %v12038_v62 = vadd.f32 %v2980_v14, %v2914_v26  ;;  %v3000_v26 = vld [vmem:[%s13714_s6 + $0x80] sm:$0xff]  ;;  %v3002_v14 = vld [vmem:[%s13714_s6 + $0x90] sm:$0xff] }
 0x2b4   :  { %v10098_v42 = vpop.eup %10097 }
 0x2b5   :  { %v2981_v54 = vmul.f32 %v10098_v42, %v37_v13  ;;  %v3003_v13 = vld [vmem:[%s13714_s6 + $0x98] sm:$0xff]  ;;  %v3004_v42 = vld [vmem:[%s13714_s6 + $0xa0] sm:$0xff] }
 0x2b7   :  { %v12041_v34 = vadd.f32 %v2981_v54, %v2919_v41  ;;  %v3006_v41 = vld [vmem:[%s13714_s6 + $0xb0] sm:$0xff]  ;;  %v3007_v54 = vld [vmem:[%s13714_s6 + $0xb8] sm:$0xff] }
 0x2b9   :  { %v9565_v18 = vpack.c.bf16 %v12041_v34, %v12038_v62  ;;  %v9601_v1 = vpack.c.bf16 %v12038_v62, %v12041_v34 }
 0x2bb   :  { %9566 = vmatprep.subr.bf16.mxu0 %v9565_v18 }
 0x2bc   :  { %9568 = vmatpush3.bf16.msra.mxu0 %v9565_v18  ;;  %v3008_v18 = vld [vmem:[%s13714_s6 + $0xc0] sm:$0xff] }
 0x2bd   :  { %9602 = vmatprep.subr.bf16.mxu0 %v9601_v1 }
 0x2bf   :  { %9162 = vmatmul.mubr.msk.f32.vlgmr.msra.gmra.mrb[32].mxu0 %vm2451_vm2, %v2985_v2  ;;  %v3010_v2 = vld [vmem:[%s13714_s6 + $0xd0] sm:$0xff] }
 0x2c0   :  { %9164 = vmatprep.mubr.msk.f32.mxu0 %vm2451_vm2, %v2986_v61  ;;  %9604 = vmatpush3.bf16.msra.mxu0 %v9601_v1  ;;  %v3009_v1 = vld [vmem:[%s13714_s6 + $0xc8] sm:$0xff]  ;;  %v3011_v61 = vld [vmem:[%s13714_s6 + $0xd8] sm:$0xff] }
 0x2c3   :  { %9165 = vmatmul.mubr.msk.f32.gmra.mrb[34].mxu0 %vm2451_vm2, %v2987_v53  ;;  %v3012_v53 = vld [vmem:[%s13714_s6 + $0xe0] sm:$0xff] }
 0x2c4   :  { %9167 = vmatprep.mubr.msk.f32.mxu0 %vm2451_vm2, %v2988_v58  ;;  %v3013_v58 = vld [vmem:[%s13714_s6 + $0xe8] sm:$0xff] }
 0x2c7   :  { %9168 = vmatmul.mubr.msk.f32.gmra.mrb[36].mxu0 %vm2451_vm2, %v2989_v50  ;;  %v3014_v50 = vld [vmem:[%s13714_s6 + $0xf0] sm:$0xff] }
 0x2c8   :  { %9170 = vmatprep.mubr.msk.f32.mxu0 %vm2451_vm2, %v2990_v10  ;;  %v3015_v10 = vld [vmem:[%s13714_s6 + $0xf8] sm:$0xff] }
 0x2cb   :  { %9171 = vmatmul.mubr.msk.f32.gmra.mrb[38].mxu0 %vm2451_vm2, %v2991_v38  ;;  %v7334_v38 = vld [vmem:[%s13711_s3 + $0x100] sm:$0xff] }
 0x2cc   :  { %9173 = vmatprep.mubr.msk.f32.mxu0 %vm2451_vm2, %v2992_v49  ;;  %v7335_v49 = vld [vmem:[%s13711_s3 + $0x108] sm:$0xff] }
 0x2cf   :  { %9174 = vmatmul.mubr.msk.f32.gmra.mrb[40].mxu0 %vm2451_vm2, %v2993_v5  ;;  %v7336_v5 = vld [vmem:[%s13711_s3 + $0x110] sm:$0xff] }
 0x2d0   :  { %9176 = vmatprep.mubr.msk.f32.mxu0 %vm2451_vm2, %v2994_v45  ;;  %v7337_v45 = vld [vmem:[%s13711_s3 + $0x118] sm:$0xff] }
 0x2d3   :  { %9177 = vmatmul.mubr.msk.f32.gmra.mrb[42].mxu0 %vm2451_vm2, %v2995_v57  ;;  %v7338_v57 = vld [vmem:[%s13711_s3 + $0x120] sm:$0xff] }
 0x2d4   :  { %9179 = vmatprep.mubr.msk.f32.mxu0 %vm2451_vm2, %v2996_v37  ;;  %v7339_v37 = vld [vmem:[%s13711_s3 + $0x128] sm:$0xff] }
 0x2d7   :  { %9180 = vmatmul.mubr.msk.f32.gmra.mrb[44].mxu0 %vm2451_vm2, %v2997_v6  ;;  %v7340_v6 = vld [vmem:[%s13711_s3 + $0x130] sm:$0xff] }
 0x2d8   :  { %9182 = vmatprep.mubr.msk.f32.mxu0 %vm2451_vm2, %v2998_v30  ;;  %v7341_v30 = vld [vmem:[%s13711_s3 + $0x138] sm:$0xff] }
 0x2db   :  { %9183 = vmatmul.mubr.msk.f32.gmra.mrb[46].mxu0 %vm2451_vm2, %v2999_v25  ;;  %v7342_v25 = vld [vmem:[%s13711_s3 + $0x140] sm:$0xff] }
 0x2dc   :  { %9185 = vmatprep.mubr.msk.f32.mxu0 %vm2451_vm2, %v3000_v26  ;;  %v7343_v26 = vld [vmem:[%s13711_s3 + $0x148] sm:$0xff] }
 0x2df   :  { %9186 = vmatmul.mubr.msk.f32.gmra.mrb[48].mxu0 %vm2451_vm2, %v3001_v9  ;;  %v7344_v9 = vld [vmem:[%s13711_s3 + $0x150] sm:$0xff] }
 0x2e0   :  { %9188 = vmatprep.mubr.msk.f32.mxu0 %vm2451_vm2, %v3002_v14  ;;  %v7345_v14 = vld [vmem:[%s13711_s3 + $0x158] sm:$0xff] }
 0x2e3   :  { %9189 = vmatmul.mubr.msk.f32.gmra.mrb[50].mxu0 %vm2451_vm2, %v3003_v13  ;;  %v7346_v13 = vld [vmem:[%s13711_s3 + $0x160] sm:$0xff] }
 0x2e4   :  { %9191 = vmatprep.mubr.msk.f32.mxu0 %vm2451_vm2, %v3004_v42  ;;  %v7347_v42 = vld [vmem:[%s13711_s3 + $0x168] sm:$0xff] }
 0x2e7   :  { %9192 = vmatmul.mubr.msk.f32.gmra.mrb[52].mxu0 %vm2451_vm2, %v3005_v33  ;;  %v7348_v33 = vld [vmem:[%s13711_s3 + $0x170] sm:$0xff] }
 0x2e8   :  { %9194 = vmatprep.mubr.msk.f32.mxu0 %vm2451_vm2, %v3006_v41  ;;  %v7349_v41 = vld [vmem:[%s13711_s3 + $0x178] sm:$0xff] }
 0x2eb   :  { %9195 = vmatmul.mubr.msk.f32.gmra.mrb[54].mxu0 %vm2451_vm2, %v3007_v54  ;;  %v7350_v54 = vld [vmem:[%s13711_s3 + $0x180] sm:$0xff] }
 0x2ec   :  { %9197 = vmatprep.mubr.msk.f32.mxu0 %vm2451_vm2, %v3008_v18  ;;  %v7351_v18 = vld [vmem:[%s13711_s3 + $0x188] sm:$0xff] }
 0x2ef   :  { %9198 = vmatmul.mubr.msk.f32.gmra.mrb[56].mxu0 %vm2451_vm2, %v3009_v1  ;;  %v7352_v1 = vld [vmem:[%s13711_s3 + $0x190] sm:$0xff] }
 0x2f0   :  { %9200 = vmatprep.mubr.msk.f32.mxu0 %vm2451_vm2, %v3010_v2  ;;  %v7353_v2 = vld [vmem:[%s13711_s3 + $0x198] sm:$0xff] }
 0x2f3   :  { %9201 = vmatmul.mubr.msk.f32.gmra.mrb[58].mxu0 %vm2451_vm2, %v3011_v61  ;;  %v7354_v61 = vld [vmem:[%s13711_s3 + $0x1a0] sm:$0xff] }
 0x2f4   :  { %9203 = vmatprep.mubr.msk.f32.mxu0 %vm2451_vm2, %v3012_v53  ;;  %v7355_v53 = vld [vmem:[%s13711_s3 + $0x1a8] sm:$0xff] }
 0x2f7   :  { %9204 = vmatmul.mubr.msk.f32.gmra.mrb[60].mxu0 %vm2451_vm2, %v3013_v58  ;;  %v7356_v58 = vld [vmem:[%s13711_s3 + $0x1b0] sm:$0xff] }
 0x2f8   :  { %9206 = vmatprep.mubr.msk.f32.mxu0 %vm2451_vm2, %v3014_v50  ;;  %v7357_v50 = vld [vmem:[%s13711_s3 + $0x1b8] sm:$0xff] }
 0x2fb   :  { %9207 = vmatmul.mubr.msk.f32.gmra.mrb[62].mxu0 %vm2451_vm2, %v3015_v10  ;;  %v7358_v10 = vld [vmem:[%s13711_s3 + $0x1c0] sm:$0xff] }
 0x2fc   :  { %9213 = vmatprep.mubr.msk.f32.mxu0 %vm2451_vm2, %v7334_v38  ;;  %v7359_v38 = vld [vmem:[%s13711_s3 + $0x1c8] sm:$0xff] }
 0x2ff   :  { %9214 = vmatmul.mubr.msk.f32.vlgmr.msra.gmra.mrb[64].mxu0 %vm2451_vm2, %v7335_v49  ;;  %v7360_v49 = vld [vmem:[%s13711_s3 + $0x1d0] sm:$0xff] }
 0x300   :  { %9216 = vmatprep.mubr.msk.f32.mxu0 %vm2451_vm2, %v7336_v5  ;;  %v7361_v5 = vld [vmem:[%s13711_s3 + $0x1d8] sm:$0xff] }
 0x303   :  { %9217 = vmatmul.mubr.msk.f32.gmra.mrb[66].mxu0 %vm2451_vm2, %v7337_v45  ;;  %v7362_v45 = vld [vmem:[%s13711_s3 + $0x1e0] sm:$0xff] }
 0x304   :  { %9219 = vmatprep.mubr.msk.f32.mxu0 %vm2451_vm2, %v7338_v57  ;;  %v7363_v57 = vld [vmem:[%s13711_s3 + $0x1e8] sm:$0xff] }
 0x307   :  { %9220 = vmatmul.mubr.msk.f32.gmra.mrb[68].mxu0 %vm2451_vm2, %v7339_v37  ;;  %v7364_v37 = vld [vmem:[%s13711_s3 + $0x1f0] sm:$0xff] }
 0x308   :  { %9222 = vmatprep.mubr.msk.f32.mxu0 %vm2451_vm2, %v7340_v6  ;;  %v7365_v6 = vld [vmem:[%s13711_s3 + $0x1f8] sm:$0xff] }
 0x30b   :  { %9223 = vmatmul.mubr.msk.f32.gmra.mrb[70].mxu0 %vm2451_vm2, %v7341_v30  ;;  %v3370_v30 = vld [vmem:[%s13715_s7 + $0x8] sm:$0xff] }
 0x30c   :  { %9225 = vmatprep.mubr.msk.f32.mxu0 %vm2451_vm2, %v7342_v25  ;;  %3465 = vmatprep.mubr.f32.mxu1 %v3370_v30 }
 0x30f   :  { %9226 = vmatmul.mubr.msk.f32.gmra.mrb[72].mxu0 %vm2451_vm2, %v7343_v26 }
 0x310   :  { %9228 = vmatprep.mubr.msk.f32.mxu0 %vm2451_vm2, %v7344_v9 }
 0x313   :  { %9229 = vmatmul.mubr.msk.f32.gmra.mrb[74].mxu0 %vm2451_vm2, %v7345_v14 }
 0x314   :  { %9231 = vmatprep.mubr.msk.f32.mxu0 %vm2451_vm2, %v7346_v13 }
 0x317   :  { %9232 = vmatmul.mubr.msk.f32.gmra.mrb[76].mxu0 %vm2451_vm2, %v7347_v42 }
 0x318   :  { %9234 = vmatprep.mubr.msk.f32.mxu0 %vm2451_vm2, %v7348_v33 }
 0x31b   :  { %9235 = vmatmul.mubr.msk.f32.gmra.mrb[78].mxu0 %vm2451_vm2, %v7349_v41 }
 0x31c   :  { %9237 = vmatprep.mubr.msk.f32.mxu0 %vm2451_vm2, %v7350_v54 }
 0x31f   :  { %9238 = vmatmul.mubr.msk.f32.gmra.mrb[80].mxu0 %vm2451_vm2, %v7351_v18 }
 0x320   :  { %9240 = vmatprep.mubr.msk.f32.mxu0 %vm2451_vm2, %v7352_v1 }
 0x323   :  { %9241 = vmatmul.mubr.msk.f32.gmra.mrb[82].mxu0 %vm2451_vm2, %v7353_v2 }
 0x324   :  { %9243 = vmatprep.mubr.msk.f32.mxu0 %vm2451_vm2, %v7354_v61 }
 0x327   :  { %9244 = vmatmul.mubr.msk.f32.gmra.mrb[84].mxu0 %vm2451_vm2, %v7355_v53 }
 0x328   :  { %9246 = vmatprep.mubr.msk.f32.mxu0 %vm2451_vm2, %v7356_v58 }
 0x32b   :  { %9247 = vmatmul.mubr.msk.f32.gmra.mrb[86].mxu0 %vm2451_vm2, %v7357_v50 }
 0x32c   :  { %9249 = vmatprep.mubr.msk.f32.mxu0 %vm2451_vm2, %v7358_v10 }
 0x32f   :  { %9250 = vmatmul.mubr.msk.f32.gmra.mrb[88].mxu0 %vm2451_vm2, %v7359_v38 }
 0x330   :  { %9252 = vmatprep.mubr.msk.f32.mxu0 %vm2451_vm2, %v7360_v49 }
 0x333   :  { %9253 = vmatmul.mubr.msk.f32.gmra.mrb[90].mxu0 %vm2451_vm2, %v7361_v5 }
 0x334   :  { %9255 = vmatprep.mubr.msk.f32.mxu0 %vm2451_vm2, %v7362_v45 }
 0x337   :  { %9256 = vmatmul.mubr.msk.f32.gmra.mrb[92].mxu0 %vm2451_vm2, %v7363_v57 }
 0x338   :  { %9258 = vmatprep.mubr.msk.f32.mxu0 %vm2451_vm2, %v7364_v37 }
 0x33b   :  { %9259 = vmatmul.mubr.msk.f32.gmra.mrb[94].mxu0 %vm2451_vm2, %v7365_v6 }
 0x392   :  { %v9163_v25 = vpop.f32.mrb[32].mxu0 }
 0x393   :  { %v3338_v26 = vmax.f32 %v9163_v25, 0.0  ;;  %v3178_v9 = vpop.f32.mrb[33].mxu0 }
 0x394   :  { %v3337_v14 = vmax.f32 %v3178_v9, 0.0 }
 0x396   :  { %v9571_v13 = vpack.c.bf16 %v3338_v26, %v3337_v14  ;;  %v9166_v42 = vpop.f32.mrb[34].mxu0 }
 0x397   :  { %v3340_v33 = vmax.f32 %v9166_v42, 0.0  ;;  %v3188_v41 = vpop.f32.mrb[35].mxu0 }
 0x398   :  { %v3339_v54 = vmax.f32 %v3188_v41, 0.0 }
 0x39a   :  { %v9575_v18 = vpack.c.bf16 %v3340_v33, %v3339_v54  ;;  %v9169_v1 = vpop.f32.mrb[36].mxu0 }
 0x39b   :  { %v3342_v2 = vmax.f32 %v9169_v1, 0.0  ;;  %v3198_v61 = vpop.f32.mrb[37].mxu0 }
 0x39c   :  { %v3341_v53 = vmax.f32 %v3198_v61, 0.0 }
 0x39e   :  { %v9579_v58 = vpack.c.bf16 %v3342_v2, %v3341_v53  ;;  %v9172_v50 = vpop.f32.mrb[38].mxu0 }
 0x39f   :  { %v3344_v10 = vmax.f32 %v9172_v50, 0.0  ;;  %v3208_v38 = vpop.f32.mrb[39].mxu0 }
 0x3a0   :  { %v3343_v49 = vmax.f32 %v3208_v38, 0.0 }
 0x3a2   :  { %v9583_v5 = vpack.c.bf16 %v3344_v10, %v3343_v49  ;;  %v9175_v45 = vpop.f32.mrb[40].mxu0 }
 0x3a3   :  { %v3346_v57 = vmax.f32 %v9175_v45, 0.0  ;;  %v3218_v37 = vpop.f32.mrb[41].mxu0 }
 0x3a4   :  { %v3345_v6 = vmax.f32 %v3218_v37, 0.0 }
 0x3a6   :  { %v9587_v30 = vpack.c.bf16 %v3346_v57, %v3345_v6  ;;  %v9178_v25 = vpop.f32.mrb[42].mxu0 }
 0x3a7   :  { %v3348_v26 = vmax.f32 %v9178_v25, 0.0  ;;  %v3228_v9 = vpop.f32.mrb[43].mxu0 }
 0x3a8   :  { %v3347_v14 = vmax.f32 %v3228_v9, 0.0 }
 0x3aa   :  { %v9591_v42 = vpack.c.bf16 %v3348_v26, %v3347_v14  ;;  %v9181_v33 = vpop.f32.mrb[44].mxu0 }
 0x3ab   :  { %v3350_v41 = vmax.f32 %v9181_v33, 0.0  ;;  %v3238_v54 = vpop.f32.mrb[45].mxu0 }
 0x3ac   :  { %v3349_v1 = vmax.f32 %v3238_v54, 0.0 }
 0x3ae   :  { %v12302_v2 = vpack.c.bf16 %v3350_v41, %v3349_v1  ;;  %v9184_v61 = vpop.f32.mrb[46].mxu0 }
 0x3af   :  { %v3352_v53 = vmax.f32 %v9184_v61, 0.0  ;;  %v3248_v50 = vpop.f32.mrb[47].mxu0 }
 0x3b0   :  { %v3351_v10 = vmax.f32 %v3248_v50, 0.0 }
 0x3b2   :  { %v12304_v38 = vpack.c.bf16 %v3352_v53, %v3351_v10  ;;  %v9187_v49 = vpop.f32.mrb[48].mxu0 }
 0x3b3   :  { %v3354_v45 = vmax.f32 %v9187_v49, 0.0  ;;  %v3258_v57 = vpop.f32.mrb[49].mxu0 }
 0x3b4   :  { %v3353_v37 = vmax.f32 %v3258_v57, 0.0 }
 0x3b6   :  { %v9569_v6 = vpack.c.bf16 %v3354_v45, %v3353_v37  ;;  %v9190_v25 = vpop.f32.mrb[50].mxu0 }
 0x3b7   :  { %v3356_v9 = vmax.f32 %v9190_v25, 0.0  ;;  %v3268_v26 = vpop.f32.mrb[51].mxu0 }
 0x3b8   :  { %v3355_v14 = vmax.f32 %v3268_v26, 0.0  ;;  %9570 = vmatprep.subr.bf16.mxu1 %v9569_v6 }
 0x3b9   :  { %9572 = vmatpush3.bf16.msra.mxu1 %v9571_v13 }
 0x3ba   :  { %v9573_v33 = vpack.c.bf16 %v3356_v9, %v3355_v14  ;;  %v9193_v41 = vpop.f32.mrb[52].mxu0 }
 0x3bb   :  { %v3358_v54 = vmax.f32 %v9193_v41, 0.0  ;;  %v3278_v1 = vpop.f32.mrb[53].mxu0 }
 0x3bc   :  { %v3357_v61 = vmax.f32 %v3278_v1, 0.0  ;;  %9574 = vmatprep.subr.bf16.mxu1 %v9573_v33 }
 0x3bd   :  { %9576 = vmatpush3.bf16.msra.mxu1 %v9575_v18 }
 0x3be   :  { %v9577_v53 = vpack.c.bf16 %v3358_v54, %v3357_v61  ;;  %v9196_v50 = vpop.f32.mrb[54].mxu0 }
 0x3bf   :  { %v3360_v10 = vmax.f32 %v9196_v50, 0.0  ;;  %v3288_v49 = vpop.f32.mrb[55].mxu0 }
 0x3c0   :  { %v3359_v46 = vmax.f32 %v3288_v49, 0.0  ;;  %9578 = vmatprep.subr.bf16.mxu1 %v9577_v53 }
 0x3c1   :  { %9580 = vmatpush3.bf16.msra.mxu1 %v9579_v58 }
 0x3c2   :  { %v9581_v45 = vpack.c.bf16 %v3360_v10, %v3359_v46  ;;  %v9199_v57 = vpop.f32.mrb[56].mxu0 }
 0x3c3   :  { %v3362_v37 = vmax.f32 %v9199_v57, 0.0  ;;  %v3298_v25 = vpop.f32.mrb[57].mxu0 }
 0x3c4   :  { %v3361_v6 = vmax.f32 %v3298_v25, 0.0  ;;  %9582 = vmatprep.subr.bf16.mxu1 %v9581_v45 }
 0x3c5   :  { %9584 = vmatpush3.bf16.msra.mxu1 %v9583_v5 }
 0x3c6   :  { %v9585_v13 = vpack.c.bf16 %v3362_v37, %v3361_v6  ;;  %v9202_v9 = vpop.f32.mrb[58].mxu0 }
 0x3c7   :  { %v3364_v26 = vmax.f32 %v9202_v9, 0.0  ;;  %v3308_v14 = vpop.f32.mrb[59].mxu0  ;;  %v3369_v9 = vld [vmem:[%s13715_s7] sm:$0xff] }
 0x3c8   :  { %v3363_v33 = vmax.f32 %v3308_v14, 0.0  ;;  %9586 = vmatprep.subr.bf16.mxu1 %v9585_v13 }
 0x3c9   :  { %9588 = vmatpush3.bf16.msra.mxu1 %v9587_v30 }
 0x3ca   :  { %v9589_v18 = vpack.c.bf16 %v3364_v26, %v3363_v33  ;;  %v9205_v41 = vpop.f32.mrb[60].mxu0 }
 0x3cb   :  { %v3324_v54 = vadd.f32 %v9205_v41, %v11117_v19  ;;  %v3318_v1 = vpop.f32.mrb[61].mxu0 }
 0x3cc   :  { %v3319_v46 = vadd.f32 %v3318_v1, %v11120_v20  ;;  %9590 = vmatprep.subr.bf16.mxu1 %v9589_v18  ;;  %v3371_v18 = vld [vmem:[%s13715_s7 + $0x10] sm:$0xff] }
 0x3cd   :  { %v3366_v58 = vmax.f32 %v3324_v54, 0.0  ;;  %9592 = vmatpush3.bf16.msra.mxu1 %v9591_v42  ;;  %v3374_v54 = vld [vmem:[%s13715_s7 + $0x28] sm:$0xff] }
 0x3ce   :  { %v3365_v61 = vmax.f32 %v3319_v46, 0.0  ;;  %v9208_v53 = vpop.f32.mrb[62].mxu0 }
 0x3cf   :  { %v3334_v5 = vadd.f32 %v9208_v53, %v11129_v23  ;;  %v3328_v50 = vpop.f32.mrb[63].mxu0  ;;  %v3373_v53 = vld [vmem:[%s13715_s7 + $0x20] sm:$0xff] }
 0x3d0   :  { %v9593_v10 = vpack.c.bf16 %v3366_v58, %v3365_v61  ;;  %v3329_v49 = vadd.f32 %v3328_v50, %v11132_v24  ;;  %v3376_v50 = vld [vmem:[%s13715_s7 + $0x38] sm:$0xff] }
 0x3d1   :  { %v3368_v45 = vmax.f32 %v3334_v5, 0.0 }
 0x3d2   :  { %v3367_v30 = vmax.f32 %v3329_v49, 0.0  ;;  %9594 = vmatprep.subr.bf16.mxu1 %v9593_v10  ;;  %v9215_v57 = vpop.f32.mrb[64].mxu0 }
 0x3d3   :  { %v3753_v19 = vadd.f32 %v9215_v57, %v11141_v27  ;;  %9596 = vmatpush3.bf16.msra.mxu1 %v12302_v2  ;;  %v3747_v20 = vpop.f32.mrb[65].mxu0  ;;  %v3375_v57 = vld [vmem:[%s13715_s7 + $0x30] sm:$0xff] }
 0x3d4   :  { %v9597_v37 = vpack.c.bf16 %v3368_v45, %v3367_v30  ;;  %v3748_v42 = vadd.f32 %v3747_v20, %v11144_v28  ;;  %v3372_v28 = vld [vmem:[%s13715_s7 + $0x18] sm:$0xff]  ;;  %v7399_v20 = vld [vmem:[%s13712_s4 + $0x48] sm:$0xff] }
 0x3d5   :  { %v3907_v25 = vmax.f32 %v3753_v19, 0.0 }
 0x3d6   :  { %v3906_v6 = vmax.f32 %v3748_v42, 0.0  ;;  %9598 = vmatprep.subr.bf16.mxu1 %v9597_v37  ;;  %v9218_v23 = vpop.f32.mrb[66].mxu0 }
 0x3d7   :  { %v3763_v13 = vadd.f32 %v9218_v23, %v11153_v31  ;;  %9600 = vmatpush3.bf16.msra.mxu1 %v12304_v38  ;;  %v3757_v24 = vpop.f32.mrb[67].mxu0 }
 0x3d8   :  { %v12318_v27 = vpack.c.bf16 %v3907_v25, %v3906_v6  ;;  %v3758_v2 = vadd.f32 %v3757_v24, %v11156_v32 }
 0x3d9   :  { %v3909_v26 = vmax.f32 %v3763_v13, 0.0 }
 0x3da   :  { %v3908_v14 = vmax.f32 %v3758_v2, 0.0  ;;  %3466 = vmatmul.mubr.f32.vlgmr.msra.gmra.mrb[204].mxu1 %v3369_v9  ;;  %v9221_v33 = vpop.f32.mrb[68].mxu0 }
 0x3db   :  { %v3773_v31 = vadd.f32 %v9221_v33, %v11165_v35  ;;  %v3767_v38 = vpop.f32.mrb[69].mxu0  ;;  %3470 = vmatprep.mubr.f32.mxu1 %v3372_v28 }
 0x3dc   :  { %v12328_v41 = vpack.c.bf16 %v3909_v26, %v3908_v14  ;;  %v3768_v32 = vadd.f32 %v3767_v38, %v11168_v36 }
 0x3dd   :  { %v3911_v1 = vmax.f32 %v3773_v31, 0.0 }
 0x3de   :  { %v3910_v46 = vmax.f32 %v3768_v32, 0.0  ;;  %3471 = vmatmul.mubr.f32.gmra.mrb[206].mxu1 %v3371_v18  ;;  %v9224_v58 = vpop.f32.mrb[70].mxu0 }
 0x3df   :  { %v3783_v35 = vadd.f32 %v9224_v58, %v11177_v39  ;;  %v3777_v61 = vpop.f32.mrb[71].mxu0  ;;  %3475 = vmatprep.mubr.f32.mxu1 %v3374_v54 }
 0x3e0   :  { %v12338_v5 = vpack.c.bf16 %v3911_v1, %v3910_v46  ;;  %v3778_v36 = vadd.f32 %v3777_v61, %v11180_v40 }
 0x3e1   :  { %v3913_v10 = vmax.f32 %v3783_v35, 0.0 }
 0x3e2   :  { %v3912_v49 = vmax.f32 %v3778_v36, 0.0  ;;  %3476 = vmatmul.mubr.f32.gmra.mrb[208].mxu1 %v3373_v53  ;;  %v9227_v45 = vpop.f32.mrb[72].mxu0 }
 0x3e3   :  { %v3793_v39 = vadd.f32 %v9227_v45, %v11189_v43  ;;  %v3787_v30 = vpop.f32.mrb[73].mxu0  ;;  %3480 = vmatprep.mubr.f32.mxu1 %v3376_v50 }
 0x3e4   :  { %v12348_v19 = vpack.c.bf16 %v3913_v10, %v3912_v49  ;;  %v3788_v40 = vadd.f32 %v3787_v30, %v11192_v44 }
 0x3e5   :  { %v3915_v37 = vmax.f32 %v3793_v39, 0.0 }
 0x3e6   :  { %v3914_v42 = vmax.f32 %v3788_v40, 0.0  ;;  %3481 = vmatmul.mubr.f32.gmra.mrb[210].mxu1 %v3375_v57  ;;  %v9230_v25 = vpop.f32.mrb[74].mxu0 }
 0x3e7   :  { %v3803_v43 = vadd.f32 %v9230_v25, %v11201_v47  ;;  %v3797_v6 = vpop.f32.mrb[75].mxu0  ;;  %4036 = vmatprep.mubr.f32.mxu1 %v7399_v20 }
 0x3e8   :  { %v12355_v23 = vpack.c.bf16 %v3915_v37, %v3914_v42  ;;  %v3798_v13 = vadd.f32 %v3797_v6, %v11204_v48 }
 0x3e9   :  { %v3917_v24 = vmax.f32 %v3803_v43, 0.0 }
 0x3ea   :  { %v3916_v9 = vmax.f32 %v3798_v13, 0.0  ;;  %v9233_v2 = vpop.f32.mrb[76].mxu0 }
 0x3eb   :  { %v3813_v44 = vadd.f32 %v9233_v2, %v11213_v51  ;;  %v3807_v28 = vpop.f32.mrb[77].mxu0 }
 0x3ec   :  { %v12359_v26 = vpack.c.bf16 %v3917_v24, %v3916_v9  ;;  %v3808_v14 = vadd.f32 %v3807_v28, %v11216_v52 }
 0x3ed   :  { %v3919_v33 = vmax.f32 %v3813_v44, 0.0 }
 0x3ee   :  { %v3918_v31 = vmax.f32 %v3808_v14, 0.0  ;;  %v9236_v38 = vpop.f32.mrb[78].mxu0 }
 0x3ef   :  { %v3823_v47 = vadd.f32 %v9236_v38, %v11225_v55  ;;  %v3817_v18 = vpop.f32.mrb[79].mxu0 }
 0x3f0   :  { %v12363_v32 = vpack.c.bf16 %v3919_v33, %v3918_v31  ;;  %v3818_v48 = vadd.f32 %v3817_v18, %v11228_v56 }
 0x3f1   :  { %v3921_v54 = vmax.f32 %v3823_v47, 0.0 }
 0x3f2   :  { %v3920_v1 = vmax.f32 %v3818_v48, 0.0  ;;  %v9239_v46 = vpop.f32.mrb[80].mxu0 }
 0x3f3   :  { %v3833_v51 = vadd.f32 %v9239_v46, %v11237_v59  ;;  %v3827_v58 = vpop.f32.mrb[81].mxu0 }
 0x3f4   :  { %v12367_v35 = vpack.c.bf16 %v3921_v54, %v3920_v1  ;;  %v3828_v52 = vadd.f32 %v3827_v58, %v11240_v60  ;;  %v13882_v54 = vld [vmem:[#allocation8_spill] sm:$0xff]  ;;  %v7405_v58 = vld [vmem:[%s13712_s4 + $0x78] sm:$0xff] }
 0x3f5   :  { %v3923_v61 = vmax.f32 %v3833_v51, 0.0  ;;  %v7402_v51 = vld [vmem:[%s13712_s4 + $0x60] sm:$0xff] }
 0x3f6   :  { %v3922_v53 = vmax.f32 %v3828_v52, 0.0  ;;  %v9242_v36 = vpop.f32.mrb[82].mxu0 }
 0x3f7   :  { %v3843_v55 = vadd.f32 %v9242_v36, %v11249_v63  ;;  %v3837_v50 = vpop.f32.mrb[83].mxu0  ;;  %v3384_v36 = vpop.permute.xlu0 %3383 }
 0x3f8   :  { %v9605_v10 = vpack.c.bf16 %v3923_v61, %v3922_v53  ;;  %v3838_v49 = vadd.f32 %v3837_v50, %v11252_v0 }
 0x3f9   :  { %v3925_v56 = vmax.f32 %v3843_v55, 0.0 }
 0x3fa   :  { %v3924_v45 = vmax.f32 %v3838_v49, 0.0  ;;  %v9245_v39 = vpop.f32.mrb[84].mxu0  ;;  %9606 = vmatprep.subr.bf16.mxu1 %v9605_v10 }
 0x3fb   :  { %v3853_v59 = vadd.f32 %v9245_v39, %v11261_v3  ;;  %v3847_v30 = vpop.f32.mrb[85].mxu0  ;;  %9608 = vmatpush3.bf16.msra.mxu1 %v12318_v27 }
 0x3fc   :  { %v9609_v57 = vpack.c.bf16 %v3925_v56, %v3924_v45  ;;  %v3848_v60 = vadd.f32 %v3847_v30, %v11264_v4  ;;  %v3389_v45 = vpop.permute.xlu1 %3388 }
 0x3fd   :  { %v3927_v40 = vmax.f32 %v3853_v59, 0.0 }
 0x3fe   :  { %v3926_v20 = vmax.f32 %v3848_v60, 0.0  ;;  %v9248_v37 = vpop.f32.mrb[86].mxu0  ;;  %9610 = vmatprep.subr.bf16.mxu1 %v9609_v57 }
 0x3ff   :  { %v3863_v63 = vadd.f32 %v9248_v37, %v11273_v7  ;;  %v3857_v42 = vpop.f32.mrb[87].mxu0  ;;  %9612 = vmatpush3.bf16.msra.mxu1 %v12328_v41  ;;  %v7416_v37 = vld [vmem:[%s13714_s6 + $0x100] sm:$0xff] }
 0x400   :  { %v9613_v0 = vpack.c.bf16 %v3927_v40, %v3926_v20  ;;  %v3858_v25 = vadd.f32 %v3857_v42, %v11276_v8  ;;  %9265 = vmatprep.mubr.msk.f32.mxu0 %vm2451_vm2, %v7416_v37 }
 0x401   :  { %v3929_v43 = vmax.f32 %v3863_v63, 0.0 }
 0x402   :  { %v3928_v3 = vmax.f32 %v3858_v25, 0.0  ;;  %v9251_v6 = vpop.f32.mrb[88].mxu0  ;;  %9614 = vmatprep.subr.bf16.mxu1 %v9613_v0 }
 0x403   :  { %v3873_v27 = vadd.f32 %v9251_v6, %v11285_v11  ;;  %v3867_v13 = vpop.f32.mrb[89].mxu0  ;;  %9616 = vmatpush3.bf16.msra.mxu1 %v12338_v5 }
 0x404   :  { %v9617_v4 = vpack.c.bf16 %v3929_v43, %v3928_v3  ;;  %v3868_v24 = vadd.f32 %v3867_v13, %v11288_v12 }
 0x405   :  { %v3931_v9 = vmax.f32 %v3873_v27, 0.0 }
 0x406   :  { %v3930_v7 = vmax.f32 %v3868_v24, 0.0  ;;  %v9254_v2 = vpop.f32.mrb[90].mxu0  ;;  %9618 = vmatprep.subr.bf16.mxu1 %v9617_v4 }
 0x407   :  { %v3883_v41 = vadd.f32 %v9254_v2, %v11297_v15  ;;  %v3877_v44 = vpop.f32.mrb[91].mxu0  ;;  %9620 = vmatpush3.bf16.msra.mxu1 %v12348_v19 }
 0x408   :  { %v9621_v8 = vpack.c.bf16 %v3931_v9, %v3930_v7  ;;  %v3878_v28 = vadd.f32 %v3877_v44, %v11300_v16 }
 0x409   :  { %v3933_v14 = vmax.f32 %v3883_v41, 0.0 }
 0x40a   :  { %v3932_v11 = vmax.f32 %v3878_v28, 0.0  ;;  %v9257_v33 = vpop.f32.mrb[92].mxu0  ;;  %9622 = vmatprep.subr.bf16.mxu1 %v9621_v8 }
 0x40b   :  { %v3893_v5 = vadd.f32 %v9257_v33, %v11309_v21  ;;  %v3887_v31 = vpop.f32.mrb[93].mxu0  ;;  %9624 = vmatpush3.bf16.msra.mxu1 %v12355_v23 }
 0x40c   :  { %v9625_v12 = vpack.c.bf16 %v3933_v14, %v3932_v11  ;;  %v3888_v38 = vadd.f32 %v3887_v31, %v11312_v22  ;;  %v7398_v22 = vld [vmem:[%s13712_s4 + $0x40] sm:$0xff] }
 0x40d   :  { %v3935_v47 = vmax.f32 %v3893_v5, 0.0 }
 0x40e   :  { %v3934_v15 = vmax.f32 %v3888_v38, 0.0  ;;  %v9260_v18 = vpop.f32.mrb[94].mxu0  ;;  %9626 = vmatprep.subr.bf16.mxu1 %v9625_v12 }
 0x40f   :  { %v3903_v19 = vadd.f32 %v9260_v18, %v11321_v29  ;;  %v3897_v48 = vpop.f32.mrb[95].mxu0  ;;  %9628 = vmatpush3.bf16.msra.mxu1 %v12359_v26  ;;  %v7401_v29 = vld [vmem:[%s13712_s4 + $0x58] sm:$0xff]  ;;  %v7400_v26 = vld [vmem:[%s13712_s4 + $0x50] sm:$0xff] }
 0x410   :  { %v9629_v16 = vpack.c.bf16 %v3935_v47, %v3934_v15  ;;  %v3898_v1 = vadd.f32 %v3897_v48, %v13882_v54  ;;  %v13883_v54 = vmov 0.0  }
 0x411   :  { %v3937_v46 = vmax.f32 %v3903_v19, 0.0 }
 0x412   :  { %v3936_v21 = vmax.f32 %v3898_v1, 0.0  ;;  %9630 = vmatprep.subr.bf16.mxu1 %v9629_v16 }
 0x413   :  { %9632 = vmatpush3.bf16.msra.mxu1 %v12363_v32  ;;  %v7403_v32 = vld [vmem:[%s13712_s4 + $0x68] sm:$0xff] }
 0x414   :  { %v9633_v23 = vpack.c.bf16 %v3937_v46, %v3936_v21 }
 0x416   :  { %9634 = vmatprep.subr.bf16.mxu1 %v9633_v23 }
 0x417   :  { %9636 = vmatpush3.bf16.msra.mxu1 %v12367_v35  ;;  %v7404_v35 = vld [vmem:[%s13712_s4 + $0x70] sm:$0xff] }
 0x41a   :  { %4037 = vmatmul.mubr.f32.vlgmr.msra.gmra.mrb[212].mxu1 %v7398_v22 }
 0x41b   :  { %4041 = vmatprep.mubr.f32.mxu1 %v7401_v29 }
 0x41e   :  { %4042 = vmatmul.mubr.f32.gmra.mrb[214].mxu1 %v7400_v26 }
 0x41f   :  { %4046 = vmatprep.mubr.f32.mxu1 %v7403_v32 }
 0x422   :  { %4047 = vmatmul.mubr.f32.gmra.mrb[216].mxu1 %v7402_v51 }
 0x423   :  { %4051 = vmatprep.mubr.f32.mxu1 %v7405_v58 }
 0x426   :  { %4052 = vmatmul.mubr.f32.gmra.mrb[218].mxu1 %v7404_v35 }
 0x4ad   :  { %v8231_v52 = vpop.f32.mrb[204].mxu1 }
 0x4ae   :  { %v8232_v61 = vpop.f32.mrb[205].mxu1 }
 0x4af   :  { %v8233_v53 = vadd.f32 %v8232_v61, %v8231_v52 }
 0x4b1   :  { %v12413_v55 = vadd.f32 %v8233_v53, %v3384_v36  ;;  %v8234_v50 = vpop.f32.mrb[206].mxu1 }
 0x4b2   :  { %v8235_v10 = vpop.f32.mrb[207].mxu1 }
 0x4b3   :  { %v3486_v49 = vand.u32 2147483647, %v12413_v55  ;;  %v8236_v56 = vadd.f32 %v8235_v10, %v8234_v50  ;;  %vm3534_vm13 = vcmp.lt.f32.partialorder %v12413_v55, 0.0 }
 0x4b5   :  { %v3494_v39 = vadd.f32 1.0, %v3486_v49  ;;  %v8237_v59 = vpop.f32.mrb[208].mxu1  ;;  %10099 = vrcp.f32 %v3486_v49  ;;  %v12416_v30 = vadd.f32 %v8236_v56, %v3389_v45  ;;  %v7328_v43 = vadd.f32 -1.0, %v3486_v49  ;;  %v3955_v45 = vpop.permute.xlu0 %3954 }
 0x4b6   :  { %v8238_v57 = vpop.f32.mrb[209].mxu1  ;;  %vm3490_vm9 = vcmp.gt.f32.partialorder %v3486_v49, 0.41421357  ;;  %vm3488_vm10 = vcmp.gt.f32.partialorder %v3486_v49, 2.4142137 }
 0x4b7   :  { %10101 = vrcp.f32 %v3494_v39  ;;  %v12418_v60 = vadd.f32 %v8238_v57, %v8237_v59  ;;  %v3487_v40 = vand.u32 2147483647, %v12416_v30  ;;  %v3508_v1 = vsel %vm3490_vm9, 0.9990265, %v13883_v54  ;;  %v3960_v59 = vpop.permute.xlu1 %3959 }
 0x4b8   :  { %v3510_v22 = vsel %vm3488_vm10, 1.998053, %v3508_v1  ;;  %vm3535_vm14 = vcmp.lt.f32.partialorder %v12416_v30, 0.0 }
 0x4b9   :  { %v8240_v20 = vpop.f32.mrb[210].mxu1  ;;  %v3495_v63 = vadd.f32 1.0, %v3487_v40  ;;  %10103 = vrcp.f32 %v3487_v40  ;;  %v7329_v9 = vadd.f32 -1.0, %v3487_v40  ;;  %vm3491_vm11 = vcmp.gt.f32.partialorder %v3487_v40, 0.41421357  ;;  %v3394_v57 = vpop.permute.xlu0 %3393 }
 0x4ba   :  { %v8241_v42 = vpop.f32.mrb[211].mxu1  ;;  %vm3489_vm12 = vcmp.gt.f32.partialorder %v3487_v40, 2.4142137  ;;  %v3509_v32 = vsel %vm3491_vm11, 0.9990265, %v13883_v54 }
 0x4bb   :  { %v12425_v0 = vadd.f32 %v8241_v42, %v8240_v20  ;;  %10105 = vrcp.f32 %v3495_v63  ;;  %v3511_v61 = vsel %vm3489_vm12, 1.998053, %v3509_v32  ;;  %v10183_v20 = vld [vmem:[%s13708_s0 + $0x10] sm:$0xff] }
 0x4bf   :  { %v10100_v25 = vpop.eup %10099 }
 0x4c0   :  { %v3498_v27 = vsub.f32 0.0, %v10100_v25 }
 0x4c1   :  { %v10102_v3 = vpop.eup %10101 }
 0x4c2   :  { %v3502_v6 = vmul.f32 %v10102_v3, %v7328_v43  ;;  %v3399_v3 = vpop.permute.xlu1 %3398 }
 0x4c3   :  { %v10104_v4 = vpop.eup %10103 }
 0x4c4   :  { %v3504_v13 = vsel %vm3490_vm9, %v3502_v6, %v3486_v49  ;;  %v3499_v8 = vsub.f32 0.0, %v10104_v4  ;;  %v10184_v6 = vld [vmem:[%s13708_s0 + $0x18] sm:$0xff] }
 0x4c5   :  { %v3506_v24 = vsel %vm3488_vm10, %v3498_v27, %v3504_v13  ;;  %v10106_v7 = vpop.eup %10105 }
 0x4c6   :  { %v3512_v2 = vmul.f32 %v3506_v24, %v3506_v24  ;;  %v3503_v41 = vmul.f32 %v10106_v7, %v7329_v9 }
 0x4c8   :  { %v3514_v44 = vmul.f32 0.10244363, %v3512_v2  ;;  %v3505_v28 = vsel %vm3491_vm11, %v3503_v41, %v3487_v40  ;;  %v3478_v40 = vadd.f32 %v12418_v60, %v3394_v57 }
 0x4c9   :  { %v3507_v11 = vsel %vm3489_vm12, %v3499_v8, %v3505_v28 }
 0x4ca   :  { %v7330_v14 = vadd.f32 -0.17652416, %v3514_v44  ;;  %v3513_v33 = vmul.f32 %v3507_v11, %v3507_v11 }
 0x4cc   :  { %v3518_v5 = vmul.f32 %v7330_v14, %v3512_v2  ;;  %v3515_v31 = vmul.f32 0.10244363, %v3513_v33 }
 0x4ce   :  { %v3520_v12 = vadd.f32 0.25411648, %v3518_v5  ;;  %v7331_v38 = vadd.f32 -0.17652416, %v3515_v31 }
 0x4d0   :  { %v3522_v47 = vmul.f32 %v3520_v12, %v3512_v2  ;;  %v3519_v15 = vmul.f32 %v7331_v38, %v3513_v33 }
 0x4d2   :  { %v7332_v18 = vadd.f32 -0.4239951, %v3522_v47  ;;  %v3521_v19 = vadd.f32 0.25411648, %v3519_v15 }
 0x4d4   :  { %v3526_v48 = vmul.f32 %v7332_v18, %v3512_v2  ;;  %v3523_v16 = vmul.f32 %v3521_v19, %v3513_v33 }
 0x4d6   :  { %v3528_v46 = vadd.f32 1.272, %v3526_v48  ;;  %v7333_v21 = vadd.f32 -0.4239951, %v3523_v16 }
 0x4d8   :  { %v3530_v23 = vmul.f32 %v3528_v46, %v3506_v24  ;;  %v3527_v29 = vmul.f32 %v7333_v21, %v3513_v33 }
 0x4da   :  { %v3532_v26 = vadd.f32 %v3530_v23, %v3510_v22  ;;  %v3529_v51 = vadd.f32 1.272, %v3527_v29 }
 0x4dc   :  { %v3536_v58 = vsub.f32 0.0, %v3532_v26  ;;  %v3531_v35 = vmul.f32 %v3529_v51, %v3507_v11 }
 0x4de   :  { %v3538_v52 = vsel %vm3534_vm13, %v3536_v58, %v3532_v26  ;;  %v3533_v36 = vadd.f32 %v3531_v35, %v3511_v61 }
 0x4df   :  { %v3540_v53 = vmul.f32 1.442695, %v3538_v52 }
 0x4e0   :  { %v3537_v50 = vsub.f32 0.0, %v3533_v36 }
 0x4e1   :  { %10107 = vpow2.f32 %v3540_v53 }
 0x4e2   :  { %v3539_v10 = vsel %vm3535_vm14, %v3537_v50, %v3533_v36 }
 0x4e3   :  { %v3542_v49 = vmul.f32 1.442695, %v3539_v10  ;;  %v3550_v56 = vadd.f32 %v3539_v10, %v3538_v52 }
 0x4e5   :  { %10109 = vpow2.f32 %v3542_v49  ;;  %v12440_v39 = vadd.f32 %v3550_v56, %v12029_v17  ;;  %v3483_v17 = vadd.f32 %v12425_v0, %v3399_v3 }
 0x4eb   :  { %v10108_v55 = vpop.eup %10107 }
 0x4ec   :  { %v3544_v37 = vmul.f32 %v10183_v20, %v10108_v55 }
 0x4ed   :  { %v8309_v63 = vpop.f32.mrb[212].mxu1 }
 0x4ee   :  { %v12446_v30 = vadd.f32 %v3544_v37, %v3478_v40  ;;  %v8310_v42 = vpop.f32.mrb[213].mxu1 }
 0x4ef   :  { %v8311_v25 = vadd.f32 %v8310_v42, %v8309_v63  ;;  %v10110_v43 = vpop.eup %10109 }
 0x4f0   :  { %v3545_v27 = vmul.f32 %v10184_v6, %v10110_v43 }
 0x4f1   :  { %v12452_v60 = vadd.f32 %v8311_v25, %v3955_v45  ;;  %v8312_v13 = vpop.f32.mrb[214].mxu1 }
 0x4f2   :  { %v8313_v4 = vpop.f32.mrb[215].mxu1  ;;  %v12454_v24 = vadd.f32 %v3545_v27, %v3483_v17 }
 0x4f3   :  { %v4057_v9 = vand.u32 2147483647, %v12452_v60  ;;  %v8314_v7 = vadd.f32 %v8313_v4, %v8312_v13  ;;  %vm4105_vm4 = vcmp.lt.f32.partialorder %v12452_v60, 0.0 }
 0x4f5   :  { %v4065_v2 = vadd.f32 1.0, %v4057_v9  ;;  %v8315_v41 = vpop.f32.mrb[216].mxu1  ;;  %10111 = vrcp.f32 %v4057_v9  ;;  %v12457_v44 = vadd.f32 %v8314_v7, %v3960_v59  ;;  %v7410_v12 = vadd.f32 -1.0, %v4057_v9 }
 0x4f6   :  { %v8316_v0 = vpop.f32.mrb[217].mxu1  ;;  %vm4061_vm15 = vcmp.gt.f32.partialorder %v4057_v9, 0.41421357  ;;  %vm4059_vm0 = vcmp.gt.f32.partialorder %v4057_v9, 2.4142137 }
 0x4f7   :  { %10113 = vrcp.f32 %v4065_v2  ;;  %v12459_v8 = vadd.f32 %v8316_v0, %v8315_v41  ;;  %v4058_v28 = vand.u32 2147483647, %v12457_v44  ;;  %v4079_v45 = vsel %vm4061_vm15, 0.9990265, %v13883_v54  ;;  %v3965_v0 = vpop.permute.xlu0 %3964 }
 0x4f8   :  { %v4081_v40 = vsel %vm4059_vm0, 1.998053, %v4079_v45  ;;  %vm4106_vm5 = vcmp.lt.f32.partialorder %v12457_v44, 0.0  ;;  %v7447_v45 = vld [vmem:[%s13714_s6 + $0x1f8] sm:$0xff] }
 0x4f9   :  { %v8318_v14 = vpop.f32.mrb[218].mxu1  ;;  %v4066_v11 = vadd.f32 1.0, %v4058_v28  ;;  %10115 = vrcp.f32 %v4058_v28  ;;  %v7411_v16 = vadd.f32 -1.0, %v4058_v28  ;;  %vm4062_vm1 = vcmp.gt.f32.partialorder %v4058_v28, 0.41421357 }
 0x4fa   :  { %v8319_v33 = vpop.f32.mrb[219].mxu1  ;;  %vm4060_vm3 = vcmp.gt.f32.partialorder %v4058_v28, 2.4142137  ;;  %v4080_v63 = vsel %vm4062_vm1, 0.9990265, %v13883_v54  ;;  %v4049_v60 = vadd.f32 %v12459_v8, %v3965_v0  ;;  %v7417_v8 = vld [vmem:[%s13714_s6 + $0x108] sm:$0xff] }
 0x4fb   :  { %v12462_v5 = vadd.f32 %v8319_v33, %v8318_v14  ;;  %10117 = vrcp.f32 %v4066_v11  ;;  %v4082_v17 = vsel %vm4060_vm3, 1.998053, %v4080_v63  ;;  %v3970_v33 = vpop.permute.xlu1 %3969  ;;  %v7504_v63 = vld [vmem:[%s13711_s3 + $0x230] sm:$0xff]  ;;  %v7517_v0 = vld [vmem:[%s13711_s3 + $0x298] sm:$0xff] }
 0x4ff   :  { %v10112_v31 = vpop.eup %10111 }
 0x500   :  { %v4069_v15 = vsub.f32 0.0, %v10112_v31  ;;  %v4054_v31 = vadd.f32 %v12462_v5, %v3970_v33  ;;  %v7420_v5 = vld [vmem:[%s13714_s6 + $0x120] sm:$0xff]  ;;  %v7521_v33 = vld [vmem:[%s13711_s3 + $0x2b8] sm:$0xff] }
 0x501   :  { %v10114_v38 = vpop.eup %10113 }
 0x502   :  { %v4073_v47 = vmul.f32 %v10114_v38, %v7410_v12  ;;  %v7421_v38 = vld [vmem:[%s13714_s6 + $0x128] sm:$0xff] }
 0x503   :  { %v10116_v19 = vpop.eup %10115 }
 0x504   :  { %v4075_v18 = vsel %vm4061_vm15, %v4073_v47, %v4057_v9  ;;  %v4070_v22 = vsub.f32 0.0, %v10116_v19  ;;  %v7422_v47 = vld [vmem:[%s13714_s6 + $0x130] sm:$0xff]  ;;  %v7425_v19 = vld [vmem:[%s13714_s6 + $0x148] sm:$0xff] }
 0x505   :  { %v4077_v48 = vsel %vm4059_vm0, %v4069_v15, %v4075_v18  ;;  %v10118_v1 = vpop.eup %10117  ;;  %v7423_v15 = vld [vmem:[%s13714_s6 + $0x138] sm:$0xff]  ;;  %v7424_v18 = vld [vmem:[%s13714_s6 + $0x140] sm:$0xff] }
 0x506   :  { %v4083_v46 = vmul.f32 %v4077_v48, %v4077_v48  ;;  %v4074_v21 = vmul.f32 %v10118_v1, %v7411_v16  ;;  %v7427_v16 = vld [vmem:[%s13714_s6 + $0x158] sm:$0xff]  ;;  %v7428_v1 = vld [vmem:[%s13714_s6 + $0x160] sm:$0xff] }
 0x508   :  { %v4085_v23 = vmul.f32 0.10244363, %v4083_v46  ;;  %v4076_v29 = vsel %vm4062_vm1, %v4074_v21, %v4058_v28  ;;  %v7430_v21 = vld [vmem:[%s13714_s6 + $0x170] sm:$0xff] }
 0x509   :  { %v4078_v32 = vsel %vm4060_vm3, %v4070_v22, %v4076_v29  ;;  %v7432_v22 = vld [vmem:[%s13714_s6 + $0x180] sm:$0xff]  ;;  %v7433_v29 = vld [vmem:[%s13714_s6 + $0x188] sm:$0xff] }
 0x50a   :  { %v7412_v26 = vadd.f32 -0.17652416, %v4085_v23  ;;  %v4084_v51 = vmul.f32 %v4078_v32, %v4078_v32  ;;  %v7431_v23 = vld [vmem:[%s13714_s6 + $0x178] sm:$0xff] }
 0x50c   :  { %v4089_v58 = vmul.f32 %v7412_v26, %v4083_v46  ;;  %v4086_v35 = vmul.f32 0.10244363, %v4084_v51  ;;  %v7434_v26 = vld [vmem:[%s13714_s6 + $0x190] sm:$0xff] }
 0x50e   :  { %v4091_v52 = vadd.f32 0.25411648, %v4089_v58  ;;  %v7413_v61 = vadd.f32 -0.17652416, %v4086_v35  ;;  %v7437_v58 = vld [vmem:[%s13714_s6 + $0x1a8] sm:$0xff]  ;;  %v7438_v35 = vld [vmem:[%s13714_s6 + $0x1b0] sm:$0xff] }
 0x510   :  { %v4093_v53 = vmul.f32 %v4091_v52, %v4083_v46  ;;  %v4090_v36 = vmul.f32 %v7413_v61, %v4084_v51  ;;  %v7439_v52 = vld [vmem:[%s13714_s6 + $0x1b8] sm:$0xff]  ;;  %v7440_v61 = vld [vmem:[%s13714_s6 + $0x1c0] sm:$0xff] }
 0x512   :  { %v7414_v50 = vadd.f32 -0.4239951, %v4093_v53  ;;  %v4092_v10 = vadd.f32 0.25411648, %v4090_v36  ;;  %v7441_v53 = vld [vmem:[%s13714_s6 + $0x1c8] sm:$0xff]  ;;  %v7442_v36 = vld [vmem:[%s13714_s6 + $0x1d0] sm:$0xff] }
 0x514   :  { %v4097_v49 = vmul.f32 %v7414_v50, %v4083_v46  ;;  %v4094_v56 = vmul.f32 %v4092_v10, %v4084_v51  ;;  %v7429_v46 = vld [vmem:[%s13714_s6 + $0x168] sm:$0xff]  ;;  %v7443_v50 = vld [vmem:[%s13714_s6 + $0x1d8] sm:$0xff]  ;;  %v7444_v10 = vld [vmem:[%s13714_s6 + $0x1e0] sm:$0xff] }
 0x516   :  { %v4099_v59 = vadd.f32 1.272, %v4097_v49  ;;  %v7415_v55 = vadd.f32 -0.4239951, %v4094_v56  ;;  %v7445_v49 = vld [vmem:[%s13714_s6 + $0x1e8] sm:$0xff]  ;;  %v7446_v56 = vld [vmem:[%s13714_s6 + $0x1f0] sm:$0xff] }
 0x518   :  { %v4101_v57 = vmul.f32 %v4099_v59, %v4077_v48  ;;  %v4098_v20 = vmul.f32 %v7415_v55, %v4084_v51  ;;  %v7426_v48 = vld [vmem:[%s13714_s6 + $0x150] sm:$0xff]  ;;  %v7436_v51 = vld [vmem:[%s13714_s6 + $0x1a0] sm:$0xff]  ;;  %v7499_v55 = vld [vmem:[%s13711_s3 + $0x208] sm:$0xff] }
 0x519   :  { %v7498_v59 = vld [vmem:[%s13711_s3 + $0x200] sm:$0xff] }
 0x51a   :  { %v4103_v37 = vadd.f32 %v4101_v57, %v4081_v40  ;;  %v4100_v42 = vadd.f32 1.272, %v4098_v20  ;;  %v7500_v57 = vld [vmem:[%s13711_s3 + $0x210] sm:$0xff]  ;;  %v7501_v40 = vld [vmem:[%s13711_s3 + $0x218] sm:$0xff]  ;;  %v7502_v20 = vld [vmem:[%s13711_s3 + $0x220] sm:$0xff] }
 0x51c   :  { %v4107_v25 = vsub.f32 0.0, %v4103_v37  ;;  %v4102_v43 = vmul.f32 %v4100_v42, %v4078_v32  ;;  %v7435_v32 = vld [vmem:[%s13714_s6 + $0x198] sm:$0xff] }
 0x51d   :  { %v7505_v42 = vld [vmem:[%s13711_s3 + $0x238] sm:$0xff] }
 0x51e   :  { %v4109_v3 = vsel %vm4105_vm4, %v4107_v25, %v4103_v37  ;;  %v4104_v27 = vadd.f32 %v4102_v43, %v4082_v17  ;;  %v7503_v37 = vld [vmem:[%s13711_s3 + $0x228] sm:$0xff]  ;;  %v7506_v25 = vld [vmem:[%s13711_s3 + $0x240] sm:$0xff]  ;;  %v7509_v17 = vld [vmem:[%s13711_s3 + $0x258] sm:$0xff] }
 0x51f   :  { %v4111_v6 = vmul.f32 1.442695, %v4109_v3  ;;  %v7507_v43 = vld [vmem:[%s13711_s3 + $0x248] sm:$0xff] }
 0x520   :  { %v4108_v13 = vsub.f32 0.0, %v4104_v27 }
 0x521   :  { %10119 = vpow2.f32 %v4111_v6  ;;  %v7510_v6 = vld [vmem:[%s13711_s3 + $0x260] sm:$0xff] }
 0x522   :  { %v4110_v4 = vsel %vm4106_vm5, %v4108_v13, %v4104_v27  ;;  %v7511_v27 = vld [vmem:[%s13711_s3 + $0x268] sm:$0xff]  ;;  %v7512_v13 = vld [vmem:[%s13711_s3 + $0x270] sm:$0xff] }
 0x523   :  { %v4113_v9 = vmul.f32 1.442695, %v4110_v4  ;;  %v4686_v7 = vadd.f32 %v4110_v4, %v4109_v3  ;;  %v7508_v3 = vld [vmem:[%s13711_s3 + $0x250] sm:$0xff]  ;;  %v7513_v4 = vld [vmem:[%s13711_s3 + $0x278] sm:$0xff] }
 0x525   :  { %10121 = vpow2.f32 %v4113_v9  ;;  %v12477_v2 = vadd.f32 %v4686_v7, %v12440_v39  ;;  %v7514_v9 = vld [vmem:[%s13711_s3 + $0x280] sm:$0xff]  ;;  %v7515_v7 = vld [vmem:[%s13711_s3 + $0x288] sm:$0xff] }
 0x52b   :  { %v10120_v41 = vpop.eup %10119 }
 0x52c   :  { %v4115_v28 = vmul.f32 %v10120_v41, %v12446_v30  ;;  %v7418_v30 = vld [vmem:[%s13714_s6 + $0x110] sm:$0xff] }
 0x52d   :  { %v7516_v41 = vld [vmem:[%s13711_s3 + $0x290] sm:$0xff] }
 0x52e   :  { %v12481_v14 = vadd.f32 %v4115_v28, %v4049_v60  ;;  %v7518_v60 = vld [vmem:[%s13711_s3 + $0x2a0] sm:$0xff]  ;;  %v7519_v28 = vld [vmem:[%s13711_s3 + $0x2a8] sm:$0xff] }
 0x52f   :  { %v10122_v11 = vpop.eup %10121 }
 0x530   :  { %v4116_v44 = vmul.f32 %v10122_v11, %v12454_v24  ;;  %v7419_v24 = vld [vmem:[%s13714_s6 + $0x118] sm:$0xff]  ;;  %v7520_v11 = vld [vmem:[%s13711_s3 + $0x2b0] sm:$0xff] }
 0x532   :  { %v12485_v12 = vadd.f32 %v4116_v44, %v4054_v31  ;;  %v7522_v31 = vld [vmem:[%s13711_s3 + $0x2c0] sm:$0xff]  ;;  %v7523_v44 = vld [vmem:[%s13711_s3 + $0x2c8] sm:$0xff] }
 0x534   :  { %v9637_v39 = vpack.c.bf16 %v12485_v12, %v12481_v14 }
 0x536   :  { %9638 = vmatprep.subr.bf16.mxu0 %v9637_v39 }
 0x537   :  { %9640 = vmatpush3.bf16.msra.mxu0 %v9637_v39 }
 0x538   :  { %9674 = vmatprep.subr.bf16.mxu0 %v9637_v39 }
 0x53a   :  { %9266 = vmatmul.mubr.msk.f32.vlgmr.msra.gmra.mrb[96].mxu0 %vm2451_vm2, %v7417_v8  ;;  %v7525_v8 = vld [vmem:[%s13711_s3 + $0x2d8] sm:$0xff] }
 0x53b   :  { %9676 = vmatpush3.bf16.msra.mxu0 %v9637_v39  ;;  %9268 = vmatprep.mubr.msk.f32.mxu0 %vm2451_vm2, %v7418_v30  ;;  %v7524_v39 = vld [vmem:[%s13711_s3 + $0x2d0] sm:$0xff]  ;;  %v7526_v30 = vld [vmem:[%s13711_s3 + $0x2e0] sm:$0xff] }
 0x53e   :  { %9269 = vmatmul.mubr.msk.f32.gmra.mrb[98].mxu0 %vm2451_vm2, %v7419_v24  ;;  %v7527_v24 = vld [vmem:[%s13711_s3 + $0x2e8] sm:$0xff] }
 0x53f   :  { %9271 = vmatprep.mubr.msk.f32.mxu0 %vm2451_vm2, %v7420_v5  ;;  %v7528_v5 = vld [vmem:[%s13711_s3 + $0x2f0] sm:$0xff] }
 0x542   :  { %9272 = vmatmul.mubr.msk.f32.gmra.mrb[100].mxu0 %vm2451_vm2, %v7421_v38  ;;  %v7529_v38 = vld [vmem:[%s13711_s3 + $0x2f8] sm:$0xff] }
 0x543   :  { %9274 = vmatprep.mubr.msk.f32.mxu0 %vm2451_vm2, %v7422_v47  ;;  %v7481_v47 = vld [vmem:[%s13715_s7 + $0x48] sm:$0xff] }
 0x544   :  { %4603 = vmatprep.mubr.f32.mxu1 %v7481_v47 }
 0x546   :  { %9275 = vmatmul.mubr.msk.f32.gmra.mrb[102].mxu0 %vm2451_vm2, %v7423_v15 }
 0x547   :  { %9277 = vmatprep.mubr.msk.f32.mxu0 %vm2451_vm2, %v7424_v18  ;;  %v13884_v18 = vld [vmem:[#allocation9_spill] sm:$0xff] }
 0x54a   :  { %9278 = vmatmul.mubr.msk.f32.gmra.mrb[104].mxu0 %vm2451_vm2, %v7425_v19 }
 0x54b   :  { %9280 = vmatprep.mubr.msk.f32.mxu0 %vm2451_vm2, %v7426_v48 }
 0x54e   :  { %9281 = vmatmul.mubr.msk.f32.gmra.mrb[106].mxu0 %vm2451_vm2, %v7427_v16  ;;  %v13885_v16 = vld [vmem:[#allocation10_spill] sm:$0xff] }
 0x54f   :  { %9283 = vmatprep.mubr.msk.f32.mxu0 %vm2451_vm2, %v7428_v1 }
 0x552   :  { %9284 = vmatmul.mubr.msk.f32.gmra.mrb[108].mxu0 %vm2451_vm2, %v7429_v46 }
 0x553   :  { %9286 = vmatprep.mubr.msk.f32.mxu0 %vm2451_vm2, %v7430_v21 }
 0x556   :  { %9287 = vmatmul.mubr.msk.f32.gmra.mrb[110].mxu0 %vm2451_vm2, %v7431_v23 }
 0x557   :  { %9289 = vmatprep.mubr.msk.f32.mxu0 %vm2451_vm2, %v7432_v22  ;;  %v13886_v22 = vld [vmem:[#allocation11_spill] sm:$0xff] }
 0x55a   :  { %9290 = vmatmul.mubr.msk.f32.gmra.mrb[112].mxu0 %vm2451_vm2, %v7433_v29 }
 0x55b   :  { %9292 = vmatprep.mubr.msk.f32.mxu0 %vm2451_vm2, %v7434_v26 }
 0x55e   :  { %9293 = vmatmul.mubr.msk.f32.gmra.mrb[114].mxu0 %vm2451_vm2, %v7435_v32 }
 0x55f   :  { %9295 = vmatprep.mubr.msk.f32.mxu0 %vm2451_vm2, %v7436_v51  ;;  %v13887_v51 = vld [vmem:[#allocation12_spill] sm:$0xff] }
 0x562   :  { %9296 = vmatmul.mubr.msk.f32.gmra.mrb[116].mxu0 %vm2451_vm2, %v7437_v58 }
 0x563   :  { %9298 = vmatprep.mubr.msk.f32.mxu0 %vm2451_vm2, %v7438_v35 }
 0x566   :  { %9299 = vmatmul.mubr.msk.f32.gmra.mrb[118].mxu0 %vm2451_vm2, %v7439_v52 }
 0x567   :  { %9301 = vmatprep.mubr.msk.f32.mxu0 %vm2451_vm2, %v7440_v61 }
 0x56a   :  { %9302 = vmatmul.mubr.msk.f32.gmra.mrb[120].mxu0 %vm2451_vm2, %v7441_v53  ;;  %v13888_v53 = vld [vmem:[#allocation13_spill] sm:$0xff] }
 0x56b   :  { %9304 = vmatprep.mubr.msk.f32.mxu0 %vm2451_vm2, %v7442_v36 }
 0x56e   :  { %9305 = vmatmul.mubr.msk.f32.gmra.mrb[122].mxu0 %vm2451_vm2, %v7443_v50 }
 0x56f   :  { %9307 = vmatprep.mubr.msk.f32.mxu0 %vm2451_vm2, %v7444_v10 }
 0x572   :  { %9308 = vmatmul.mubr.msk.f32.gmra.mrb[124].mxu0 %vm2451_vm2, %v7445_v49  ;;  %v13889_v49 = vld [vmem:[#allocation14_spill] sm:$0xff] }
 0x573   :  { %9310 = vmatprep.mubr.msk.f32.mxu0 %vm2451_vm2, %v7446_v56 }
 0x576   :  { %9311 = vmatmul.mubr.msk.f32.gmra.mrb[126].mxu0 %vm2451_vm2, %v7447_v45 }
 0x577   :  { %9317 = vmatprep.mubr.msk.f32.mxu0 %vm2451_vm2, %v7498_v59 }
 0x57a   :  { %9318 = vmatmul.mubr.msk.f32.vlgmr.msra.gmra.mrb[128].mxu0 %vm2451_vm2, %v7499_v55 }
 0x57b   :  { %9320 = vmatprep.mubr.msk.f32.mxu0 %vm2451_vm2, %v7500_v57  ;;  %v13890_v57 = vld [vmem:[#allocation15_spill] sm:$0xff] }
 0x57e   :  { %9321 = vmatmul.mubr.msk.f32.gmra.mrb[130].mxu0 %vm2451_vm2, %v7501_v40 }
 0x57f   :  { %9323 = vmatprep.mubr.msk.f32.mxu0 %vm2451_vm2, %v7502_v20 }
 0x582   :  { %9324 = vmatmul.mubr.msk.f32.gmra.mrb[132].mxu0 %vm2451_vm2, %v7503_v37 }
 0x583   :  { %9326 = vmatprep.mubr.msk.f32.mxu0 %vm2451_vm2, %v7504_v63  ;;  %v13891_v63 = vld [vmem:[#allocation16_spill] sm:$0xff] }
 0x586   :  { %9327 = vmatmul.mubr.msk.f32.gmra.mrb[134].mxu0 %vm2451_vm2, %v7505_v42 }
 0x587   :  { %9329 = vmatprep.mubr.msk.f32.mxu0 %vm2451_vm2, %v7506_v25 }
 0x58a   :  { %9330 = vmatmul.mubr.msk.f32.gmra.mrb[136].mxu0 %vm2451_vm2, %v7507_v43 }
 0x58b   :  { %9332 = vmatprep.mubr.msk.f32.mxu0 %vm2451_vm2, %v7508_v3 }
 0x58e   :  { %9333 = vmatmul.mubr.msk.f32.gmra.mrb[138].mxu0 %vm2451_vm2, %v7509_v17  ;;  %v13892_v17 = vld [vmem:[#allocation17_spill] sm:$0xff] }
 0x58f   :  { %9335 = vmatprep.mubr.msk.f32.mxu0 %vm2451_vm2, %v7510_v6 }
 0x592   :  { %9336 = vmatmul.mubr.msk.f32.gmra.mrb[140].mxu0 %vm2451_vm2, %v7511_v27 }
 0x593   :  { %9338 = vmatprep.mubr.msk.f32.mxu0 %vm2451_vm2, %v7512_v13 }
 0x596   :  { %9339 = vmatmul.mubr.msk.f32.gmra.mrb[142].mxu0 %vm2451_vm2, %v7513_v4  ;;  %v13893_v4 = vld [vmem:[#allocation18_spill] sm:$0xff] }
 0x597   :  { %9341 = vmatprep.mubr.msk.f32.mxu0 %vm2451_vm2, %v7514_v9 }
 0x59a   :  { %9342 = vmatmul.mubr.msk.f32.gmra.mrb[144].mxu0 %vm2451_vm2, %v7515_v7 }
 0x59b   :  { %9344 = vmatprep.mubr.msk.f32.mxu0 %vm2451_vm2, %v7516_v41 }
 0x59e   :  { %9345 = vmatmul.mubr.msk.f32.gmra.mrb[146].mxu0 %vm2451_vm2, %v7517_v0 }
 0x59f   :  { %9347 = vmatprep.mubr.msk.f32.mxu0 %vm2451_vm2, %v7518_v60  ;;  %v13894_v60 = vld [vmem:[#allocation19_spill] sm:$0xff] }
 0x5a2   :  { %9348 = vmatmul.mubr.msk.f32.gmra.mrb[148].mxu0 %vm2451_vm2, %v7519_v28 }
 0x5a3   :  { %9350 = vmatprep.mubr.msk.f32.mxu0 %vm2451_vm2, %v7520_v11 }
 0x5a6   :  { %9351 = vmatmul.mubr.msk.f32.gmra.mrb[150].mxu0 %vm2451_vm2, %v7521_v33 }
 0x5a7   :  { %9353 = vmatprep.mubr.msk.f32.mxu0 %vm2451_vm2, %v7522_v31  ;;  %v13895_v31 = vld [vmem:[#allocation20_spill] sm:$0xff] }
 0x5aa   :  { %9354 = vmatmul.mubr.msk.f32.gmra.mrb[152].mxu0 %vm2451_vm2, %v7523_v44 }
 0x5ab   :  { %9356 = vmatprep.mubr.msk.f32.mxu0 %vm2451_vm2, %v7524_v39 }
 0x5ae   :  { %9357 = vmatmul.mubr.msk.f32.gmra.mrb[154].mxu0 %vm2451_vm2, %v7525_v8 }
 0x5af   :  { %9359 = vmatprep.mubr.msk.f32.mxu0 %vm2451_vm2, %v7526_v30 }
 0x5b2   :  { %9360 = vmatmul.mubr.msk.f32.gmra.mrb[156].mxu0 %vm2451_vm2, %v7527_v24  ;;  %v13896_v24 = vld [vmem:[#allocation21_spill] sm:$0xff] }
 0x5b3   :  { %9362 = vmatprep.mubr.msk.f32.mxu0 %vm2451_vm2, %v7528_v5 }
 0x5b6   :  { %9363 = vmatmul.mubr.msk.f32.gmra.mrb[158].mxu0 %vm2451_vm2, %v7529_v38 }
 0x60d   :  { %v9267_v15 = vpop.f32.mrb[96].mxu0 }
 0x60e   :  { %v4320_v19 = vadd.f32 %v9267_v15, %v13884_v18  ;;  %v4314_v48 = vpop.f32.mrb[97].mxu0  ;;  %v13897_v15 = vld [vmem:[#allocation22_spill] sm:$0xff] }
 0x60f   :  { %v4315_v1 = vadd.f32 %v4314_v48, %v13885_v16 }
 0x610   :  { %v4474_v46 = vmax.f32 %v4320_v19, 0.0 }
 0x611   :  { %v4473_v21 = vmax.f32 %v4315_v1, 0.0  ;;  %v9270_v23 = vpop.f32.mrb[98].mxu0  ;;  %v13898_v1 = vld [vmem:[#allocation23_spill] sm:$0xff] }
 0x612   :  { %v4330_v29 = vadd.f32 %v9270_v23, %v13886_v22  ;;  %v4324_v26 = vpop.f32.mrb[99].mxu0  ;;  %v13899_v22 = vld [vmem:[#allocation24_spill] sm:$0xff] }
 0x613   :  { %v12747_v32 = vpack.c.bf16 %v4474_v46, %v4473_v21  ;;  %v4325_v58 = vadd.f32 %v4324_v26, %v13887_v51 }
 0x614   :  { %v4476_v35 = vmax.f32 %v4330_v29, 0.0 }
 0x615   :  { %v4475_v52 = vmax.f32 %v4325_v58, 0.0  ;;  %v9273_v61 = vpop.f32.mrb[100].mxu0 }
 0x616   :  { %v4340_v36 = vadd.f32 %v9273_v61, %v13888_v53  ;;  %v4334_v50 = vpop.f32.mrb[101].mxu0 }
 0x617   :  { %v12751_v10 = vpack.c.bf16 %v4476_v35, %v4475_v52  ;;  %v4335_v56 = vadd.f32 %v4334_v50, %v13889_v49  ;;  %v13900_v35 = vld [vmem:[#allocation25_spill] sm:$0xff] }
 0x618   :  { %v4478_v45 = vmax.f32 %v4340_v36, 0.0  ;;  %v13901_v36 = vld [vmem:[#allocation26_spill] sm:$0xff] }
 0x619   :  { %v4477_v59 = vmax.f32 %v4335_v56, 0.0  ;;  %v9276_v55 = vpop.f32.mrb[102].mxu0 }
 0x61a   :  { %v4350_v40 = vadd.f32 %v9276_v55, %v13890_v57  ;;  %v4344_v20 = vpop.f32.mrb[103].mxu0 }
 0x61b   :  { %v12755_v37 = vpack.c.bf16 %v4478_v45, %v4477_v59  ;;  %v4345_v42 = vadd.f32 %v4344_v20, %v13891_v63  ;;  %v13902_v59 = vld [vmem:[#allocation27_spill] sm:$0xff]  ;;  %v13903_v20 = vld [vmem:[#allocation28_spill] sm:$0xff] }
 0x61c   :  { %v4480_v25 = vmax.f32 %v4350_v40, 0.0 }
 0x61d   :  { %v4479_v43 = vmax.f32 %v4345_v42, 0.0  ;;  %v9279_v3 = vpop.f32.mrb[104].mxu0 }
 0x61e   :  { %v4360_v6 = vadd.f32 %v9279_v3, %v13892_v17  ;;  %v4354_v27 = vpop.f32.mrb[105].mxu0  ;;  %v13904_v3 = vld [vmem:[#allocation29_spill] sm:$0xff] }
 0x61f   :  { %v12759_v13 = vpack.c.bf16 %v4480_v25, %v4479_v43  ;;  %v4355_v9 = vadd.f32 %v4354_v27, %v13893_v4  ;;  %v13905_v4 = vld [vmem:[#allocation30_spill] sm:$0xff] }
 0x620   :  { %v4482_v7 = vmax.f32 %v4360_v6, 0.0 }
 0x621   :  { %v4481_v41 = vmax.f32 %v4355_v9, 0.0  ;;  %v9282_v0 = vpop.f32.mrb[106].mxu0 }
 0x622   :  { %v4370_v28 = vadd.f32 %v9282_v0, %v13894_v60  ;;  %v4364_v11 = vpop.f32.mrb[107].mxu0  ;;  %v13906_v60 = vld [vmem:[#allocation31_spill] sm:$0xff] }
 0x623   :  { %v12763_v33 = vpack.c.bf16 %v4482_v7, %v4481_v41  ;;  %v4365_v44 = vadd.f32 %v4364_v11, %v13895_v31 }
 0x624   :  { %v4484_v39 = vmax.f32 %v4370_v28, 0.0 }
 0x625   :  { %v4483_v8 = vmax.f32 %v4365_v44, 0.0  ;;  %v9285_v30 = vpop.f32.mrb[108].mxu0  ;;  %v13907_v44 = vld [vmem:[#allocation32_spill] sm:$0xff] }
 0x626   :  { %v4380_v5 = vadd.f32 %v9285_v30, %v13896_v24  ;;  %v4374_v38 = vpop.f32.mrb[109].mxu0 }
 0x627   :  { %v12767_v47 = vpack.c.bf16 %v4484_v39, %v4483_v8  ;;  %v4375_v18 = vadd.f32 %v4374_v38, %v13897_v15 }
 0x628   :  { %v4486_v19 = vmax.f32 %v4380_v5, 0.0 }
 0x629   :  { %v4485_v48 = vmax.f32 %v4375_v18, 0.0  ;;  %v9288_v16 = vpop.f32.mrb[110].mxu0  ;;  %v13909_v18 = vld [vmem:[#allocation34_spill] sm:$0xff] }
 0x62a   :  { %v4390_v46 = vadd.f32 %v9288_v16, %v13898_v1  ;;  %v4384_v21 = vpop.f32.mrb[111].mxu0 }
 0x62b   :  { %v12771_v23 = vpack.c.bf16 %v4486_v19, %v4485_v48  ;;  %v4385_v29 = vadd.f32 %v4384_v21, %v13899_v22 }
 0x62c   :  { %v4488_v26 = vmax.f32 %v4390_v46, 0.0 }
 0x62d   :  { %v4487_v51 = vmax.f32 %v4385_v29, 0.0  ;;  %v9291_v58 = vpop.f32.mrb[112].mxu0  ;;  %v13911_v29 = vld [vmem:[#allocation36_spill] sm:$0xff] }
 0x62e   :  { %v4400_v52 = vadd.f32 %v9291_v58, %v13900_v35  ;;  %v4394_v61 = vpop.f32.mrb[113].mxu0 }
 0x62f   :  { %v12775_v53 = vpack.c.bf16 %v4488_v26, %v4487_v51  ;;  %v4395_v50 = vadd.f32 %v4394_v61, %v13901_v36 }
 0x630   :  { %v4490_v49 = vmax.f32 %v4400_v52, 0.0 }
 0x631   :  { %v4489_v56 = vmax.f32 %v4395_v50, 0.0  ;;  %v9294_v45 = vpop.f32.mrb[114].mxu0  ;;  %v13913_v50 = vld [vmem:[#allocation38_spill] sm:$0xff] }
 0x632   :  { %v4410_v55 = vadd.f32 %v9294_v45, %v13902_v59  ;;  %v4404_v57 = vpop.f32.mrb[115].mxu0 }
 0x633   :  { %v9641_v40 = vpack.c.bf16 %v4490_v49, %v4489_v56  ;;  %v4405_v63 = vadd.f32 %v4404_v57, %v13903_v20  ;;  %v13915_v20 = vld [vmem:[#allocation40_spill] sm:$0xff] }
 0x634   :  { %v4492_v42 = vmax.f32 %v4410_v55, 0.0 }
 0x635   :  { %v4491_v25 = vmax.f32 %v4405_v63, 0.0  ;;  %v9297_v43 = vpop.f32.mrb[116].mxu0  ;;  %9642 = vmatprep.subr.bf16.mxu1 %v9641_v40 }
 0x636   :  { %v4420_v17 = vadd.f32 %v9297_v43, %v13904_v3  ;;  %v4414_v6 = vpop.f32.mrb[117].mxu0  ;;  %9644 = vmatpush3.bf16.msra.mxu1 %v12747_v32  ;;  %v13908_v32 = vld [vmem:[#allocation33_spill] sm:$0xff] }
 0x637   :  { %v9645_v27 = vpack.c.bf16 %v4492_v42, %v4491_v25  ;;  %v4415_v9 = vadd.f32 %v4414_v6, %v13905_v4 }
 0x638   :  { %v4494_v7 = vmax.f32 %v4420_v17, 0.0 }
 0x639   :  { %v4493_v41 = vmax.f32 %v4415_v9, 0.0  ;;  %v9300_v0 = vpop.f32.mrb[118].mxu0  ;;  %9646 = vmatprep.subr.bf16.mxu1 %v9645_v27  ;;  %v13917_v27 = vld [vmem:[#allocation42_spill] sm:$0xff] }
 0x63a   :  { %v4430_v28 = vadd.f32 %v9300_v0, %v13906_v60  ;;  %v4424_v11 = vpop.f32.mrb[119].mxu0  ;;  %9648 = vmatpush3.bf16.msra.mxu1 %v12751_v10  ;;  %v13910_v10 = vld [vmem:[#allocation35_spill] sm:$0xff] }
 0x63b   :  { %v9649_v31 = vpack.c.bf16 %v4494_v7, %v4493_v41  ;;  %v4425_v39 = vadd.f32 %v4424_v11, %v13907_v44  ;;  %v7483_v44 = vld [vmem:[%s13715_s7 + $0x58] sm:$0xff] }
 0x63c   :  { %v4496_v8 = vmax.f32 %v4430_v28, 0.0  ;;  %v7480_v28 = vld [vmem:[%s13715_s7 + $0x40] sm:$0xff] }
 0x63d   :  { %v4495_v30 = vmax.f32 %v4425_v39, 0.0  ;;  %v9303_v24 = vpop.f32.mrb[120].mxu0  ;;  %9650 = vmatprep.subr.bf16.mxu1 %v9649_v31 }
 0x63e   :  { %v4440_v5 = vadd.f32 %v9303_v24, %v13908_v32  ;;  %v4434_v38 = vpop.f32.mrb[121].mxu0  ;;  %9652 = vmatpush3.bf16.msra.mxu1 %v12755_v37  ;;  %v13912_v37 = vld [vmem:[#allocation37_spill] sm:$0xff] }
 0x63f   :  { %v9653_v15 = vpack.c.bf16 %v4496_v8, %v4495_v30  ;;  %v4435_v19 = vadd.f32 %v4434_v38, %v13909_v18  ;;  %v13920_v24 = vld [vmem:[#allocation45_spill] sm:$0xff] }
 0x640   :  { %v4498_v48 = vmax.f32 %v4440_v5, 0.0  ;;  %v7482_v5 = vld [vmem:[%s13715_s7 + $0x50] sm:$0xff] }
 0x641   :  { %v4497_v16 = vmax.f32 %v4435_v19, 0.0  ;;  %v9306_v1 = vpop.f32.mrb[122].mxu0  ;;  %9654 = vmatprep.subr.bf16.mxu1 %v9653_v15  ;;  %v13921_v15 = vld [vmem:[#allocation46_spill] sm:$0xff]  ;;  %v7485_v19 = vld [vmem:[%s13715_s7 + $0x68] sm:$0xff] }
 0x642   :  { %v4450_v46 = vadd.f32 %v9306_v1, %v13910_v10  ;;  %v4444_v21 = vpop.f32.mrb[123].mxu0  ;;  %9656 = vmatpush3.bf16.msra.mxu1 %v12759_v13  ;;  %v13914_v13 = vld [vmem:[#allocation39_spill] sm:$0xff] }
 0x643   :  { %v9657_v22 = vpack.c.bf16 %v4498_v48, %v4497_v16  ;;  %v4445_v26 = vadd.f32 %v4444_v21, %v13911_v29  ;;  %v13922_v10 = vld [vmem:[#allocation47_spill] sm:$0xff] }
 0x644   :  { %v4500_v51 = vmax.f32 %v4450_v46, 0.0 }
 0x645   :  { %v4499_v58 = vmax.f32 %v4445_v26, 0.0  ;;  %v9309_v35 = vpop.f32.mrb[124].mxu0  ;;  %9658 = vmatprep.subr.bf16.mxu1 %v9657_v22  ;;  %v7484_v22 = vld [vmem:[%s13715_s7 + $0x60] sm:$0xff]  ;;  %v13923_v26 = vld [vmem:[#allocation48_spill] sm:$0xff] }
 0x646   :  { %v4460_v52 = vadd.f32 %v9309_v35, %v13912_v37  ;;  %v4454_v61 = vpop.f32.mrb[125].mxu0  ;;  %9660 = vmatpush3.bf16.msra.mxu1 %v12763_v33  ;;  %v13916_v33 = vld [vmem:[#allocation41_spill] sm:$0xff] }
 0x647   :  { %v9661_v36 = vpack.c.bf16 %v4500_v51, %v4499_v58  ;;  %v4455_v49 = vadd.f32 %v4454_v61, %v13913_v50  ;;  %v7487_v58 = vld [vmem:[%s13715_s7 + $0x78] sm:$0xff]  ;;  %v13924_v61 = vld [vmem:[#allocation49_spill] sm:$0xff] }
 0x648   :  { %v4502_v56 = vmax.f32 %v4460_v52, 0.0 }
 0x649   :  { %v4501_v45 = vmax.f32 %v4455_v49, 0.0  ;;  %v9312_v59 = vpop.f32.mrb[126].mxu0  ;;  %9662 = vmatprep.subr.bf16.mxu1 %v9661_v36  ;;  %v7486_v49 = vld [vmem:[%s13715_s7 + $0x70] sm:$0xff] }
 0x64a   :  { %v4470_v55 = vadd.f32 %v9312_v59, %v13914_v13  ;;  %v4464_v57 = vpop.f32.mrb[127].mxu0  ;;  %9664 = vmatpush3.bf16.msra.mxu1 %v12767_v47  ;;  %v13918_v47 = vld [vmem:[#allocation43_spill] sm:$0xff]  ;;  %v7563_v13 = vld [vmem:[%s13712_s4 + $0x88] sm:$0xff] }
 0x64b   :  { %v9665_v40 = vpack.c.bf16 %v4502_v56, %v4501_v45  ;;  %v4465_v63 = vadd.f32 %v4464_v57, %v13915_v20  ;;  %v13925_v45 = vld [vmem:[#allocation50_spill] sm:$0xff]  ;;  %v13926_v20 = vld [vmem:[#allocation51_spill] sm:$0xff] }
 0x64c   :  { %v4504_v42 = vmax.f32 %v4470_v55, 0.0 }
 0x64d   :  { %v4503_v25 = vmax.f32 %v4465_v63, 0.0  ;;  %9666 = vmatprep.subr.bf16.mxu1 %v9665_v40  ;;  %v9319_v43 = vpop.f32.mrb[128].mxu0 }
 0x64e   :  { %v4891_v3 = vadd.f32 %v9319_v43, %v13916_v33  ;;  %9668 = vmatpush3.bf16.msra.mxu1 %v12771_v23  ;;  %v4885_v17 = vpop.f32.mrb[129].mxu0  ;;  %v13919_v23 = vld [vmem:[#allocation44_spill] sm:$0xff] }
 0x64f   :  { %v9669_v6 = vpack.c.bf16 %v4504_v42, %v4503_v25  ;;  %v4886_v4 = vadd.f32 %v4885_v17, %v13917_v27  ;;  %v13927_v43 = vld [vmem:[#allocation52_spill] sm:$0xff]  ;;  %v13928_v27 = vld [vmem:[#allocation53_spill] sm:$0xff] }
 0x650   :  { %v5045_v9 = vmax.f32 %v4891_v3, 0.0 }
 0x651   :  { %v5044_v7 = vmax.f32 %v4886_v4, 0.0  ;;  %9670 = vmatprep.subr.bf16.mxu1 %v9669_v6  ;;  %v9322_v41 = vpop.f32.mrb[130].mxu0 }
 0x652   :  { %v4901_v0 = vadd.f32 %v9322_v41, %v13918_v47  ;;  %9672 = vmatpush3.bf16.msra.mxu1 %v12775_v53  ;;  %v4895_v60 = vpop.f32.mrb[131].mxu0  ;;  %v13929_v41 = vld [vmem:[#allocation54_spill] sm:$0xff] }
 0x653   :  { %v12806_v11 = vpack.c.bf16 %v5045_v9, %v5044_v7  ;;  %v4896_v31 = vadd.f32 %v4895_v60, %v13919_v23  ;;  %v13930_v23 = vld [vmem:[#allocation55_spill] sm:$0xff] }
 0x654   :  { %v5047_v39 = vmax.f32 %v4901_v0, 0.0 }
 0x655   :  { %v5046_v8 = vmax.f32 %v4896_v31, 0.0  ;;  %4604 = vmatmul.mubr.f32.vlgmr.msra.gmra.mrb[220].mxu1 %v7480_v28  ;;  %v9325_v30 = vpop.f32.mrb[132].mxu0 }
 0x656   :  { %v4911_v32 = vadd.f32 %v9325_v30, %v13920_v24  ;;  %v4905_v53 = vpop.f32.mrb[133].mxu0  ;;  %4608 = vmatprep.mubr.f32.mxu1 %v7483_v44 }
 0x657   :  { %v12816_v38 = vpack.c.bf16 %v5047_v39, %v5046_v8  ;;  %v4906_v18 = vadd.f32 %v4905_v53, %v13921_v15  ;;  %v13931_v8 = vld [vmem:[#allocation56_spill] sm:$0xff] }
 0x658   :  { %v5049_v48 = vmax.f32 %v4911_v32, 0.0 }
 0x659   :  { %v5048_v16 = vmax.f32 %v4906_v18, 0.0  ;;  %4609 = vmatmul.mubr.f32.gmra.mrb[222].mxu1 %v7482_v5  ;;  %v9328_v1 = vpop.f32.mrb[134].mxu0  ;;  %v13932_v5 = vld [vmem:[#allocation57_spill] sm:$0xff] }
 0x65a   :  { %v4921_v46 = vadd.f32 %v9328_v1, %v13922_v10  ;;  %v4915_v21 = vpop.f32.mrb[135].mxu0  ;;  %4613 = vmatprep.mubr.f32.mxu1 %v7485_v19 }
 0x65b   :  { %v12826_v29 = vpack.c.bf16 %v5049_v48, %v5048_v16  ;;  %v4916_v51 = vadd.f32 %v4915_v21, %v13923_v26  ;;  %v13933_v48 = vld [vmem:[#allocation58_spill] sm:$0xff]  ;;  %v13934_v21 = vld [vmem:[#allocation59_spill] sm:$0xff] }
 0x65c   :  { %v5051_v35 = vmax.f32 %v4921_v46, 0.0 }
 0x65d   :  { %v5050_v37 = vmax.f32 %v4916_v51, 0.0  ;;  %4614 = vmatmul.mubr.f32.gmra.mrb[224].mxu1 %v7484_v22  ;;  %v9331_v52 = vpop.f32.mrb[136].mxu0 }
 0x65e   :  { %v4931_v36 = vadd.f32 %v9331_v52, %v13924_v61  ;;  %v4925_v50 = vpop.f32.mrb[137].mxu0  ;;  %4618 = vmatprep.mubr.f32.mxu1 %v7487_v58  ;;  %v13935_v58 = vld [vmem:[#allocation60_spill] sm:$0xff] }
 0x65f   :  { %v12836_v56 = vpack.c.bf16 %v5051_v35, %v5050_v37  ;;  %v4926_v59 = vadd.f32 %v4925_v50, %v13925_v45 }
 0x660   :  { %v5053_v55 = vmax.f32 %v4931_v36, 0.0  ;;  %v13936_v36 = vld [vmem:[#allocation61_spill] sm:$0xff] }
 0x661   :  { %v5052_v57 = vmax.f32 %v4926_v59, 0.0  ;;  %4619 = vmatmul.mubr.f32.gmra.mrb[226].mxu1 %v7486_v49  ;;  %v9334_v40 = vpop.f32.mrb[138].mxu0  ;;  %v13937_v59 = vld [vmem:[#allocation62_spill] sm:$0xff] }
 0x662   :  { %v4941_v63 = vadd.f32 %v9334_v40, %v13926_v20  ;;  %v4935_v42 = vpop.f32.mrb[139].mxu0  ;;  %5174 = vmatprep.mubr.f32.mxu1 %v7563_v13  ;;  %v13938_v20 = vld [vmem:[#allocation63_spill] sm:$0xff] }
 0x663   :  { %v12843_v25 = vpack.c.bf16 %v5053_v55, %v5052_v57  ;;  %v4936_v33 = vadd.f32 %v4935_v42, %v13927_v43 }
 0x664   :  { %v5055_v3 = vmax.f32 %v4941_v63, 0.0 }
 0x665   :  { %v5054_v17 = vmax.f32 %v4936_v33, 0.0  ;;  %v9337_v6 = vpop.f32.mrb[140].mxu0  ;;  %v13939_v33 = vld [vmem:[#allocation64_spill] sm:$0xff] }
 0x666   :  { %v4951_v4 = vadd.f32 %v9337_v6, %v13928_v27  ;;  %v4945_v9 = vpop.f32.mrb[141].mxu0 }
 0x667   :  { %v12847_v7 = vpack.c.bf16 %v5055_v3, %v5054_v17  ;;  %v4946_v47 = vadd.f32 %v4945_v9, %v13929_v41 }
 0x668   :  { %v5057_v0 = vmax.f32 %v4951_v4, 0.0 }
 0x669   :  { %v5056_v60 = vmax.f32 %v4946_v47, 0.0  ;;  %v9340_v28 = vpop.f32.mrb[142].mxu0  ;;  %v13941_v47 = vld [vmem:[#allocation66_spill] sm:$0xff] }
 0x66a   :  { %v4961_v31 = vadd.f32 %v9340_v28, %v13930_v23  ;;  %v4955_v44 = vpop.f32.mrb[143].mxu0 }
 0x66b   :  { %v12851_v39 = vpack.c.bf16 %v5057_v0, %v5056_v60  ;;  %v4956_v30 = vadd.f32 %v4955_v44, %v13931_v8 }
 0x66c   :  { %v5059_v24 = vmax.f32 %v4961_v31, 0.0 }
 0x66d   :  { %v5058_v32 = vmax.f32 %v4956_v30, 0.0  ;;  %v9343_v53 = vpop.f32.mrb[144].mxu0  ;;  %v13943_v30 = vld [vmem:[#allocation68_spill] sm:$0xff] }
 0x66e   :  { %v4971_v15 = vadd.f32 %v9343_v53, %v13932_v5  ;;  %v4965_v18 = vpop.f32.mrb[145].mxu0 }
 0x66f   :  { %v12855_v19 = vpack.c.bf16 %v5059_v24, %v5058_v32  ;;  %v4966_v16 = vadd.f32 %v4965_v18, %v13933_v48 }
 0x670   :  { %v5061_v1 = vmax.f32 %v4971_v15, 0.0 }
 0x671   :  { %v5060_v10 = vmax.f32 %v4966_v16, 0.0  ;;  %v9346_v46 = vpop.f32.mrb[146].mxu0  ;;  %v13945_v16 = vld [vmem:[#allocation70_spill] sm:$0xff] }
 0x672   :  { %v4981_v22 = vadd.f32 %v9346_v46, %v13934_v21  ;;  %v4975_v26 = vpop.f32.mrb[147].mxu0 }
 0x673   :  { %v9677_v51 = vpack.c.bf16 %v5061_v1, %v5060_v10  ;;  %v4976_v35 = vadd.f32 %v4975_v26, %v13935_v58  ;;  %v13947_v58 = vld [vmem:[#allocation72_spill] sm:$0xff] }
 0x674   :  { %v5063_v37 = vmax.f32 %v4981_v22, 0.0 }
 0x675   :  { %v5062_v52 = vmax.f32 %v4976_v35, 0.0  ;;  %v9349_v61 = vpop.f32.mrb[148].mxu0  ;;  %9678 = vmatprep.subr.bf16.mxu1 %v9677_v51 }
 0x676   :  { %v4991_v50 = vadd.f32 %v9349_v61, %v13936_v36  ;;  %v4985_v49 = vpop.f32.mrb[149].mxu0  ;;  %9680 = vmatpush3.bf16.msra.mxu1 %v12806_v11  ;;  %v13940_v11 = vld [vmem:[#allocation65_spill] sm:$0xff]  ;;  %v7562_v61 = vld [vmem:[%s13712_s4 + $0x80] sm:$0xff] }
 0x677   :  { %v9681_v45 = vpack.c.bf16 %v5063_v37, %v5062_v52  ;;  %v4986_v13 = vadd.f32 %v4985_v49, %v13937_v59  ;;  %v7564_v36 = vld [vmem:[%s13712_s4 + $0x90] sm:$0xff] }
 0x678   :  { %v5065_v55 = vmax.f32 %v4991_v50, 0.0  ;;  %v7569_v50 = vld [vmem:[%s13712_s4 + $0xb8] sm:$0xff]  ;;  %v7568_v49 = vld [vmem:[%s13712_s4 + $0xb0] sm:$0xff] }
 0x679   :  { %v5064_v57 = vmax.f32 %v4986_v13, 0.0  ;;  %v9352_v40 = vpop.f32.mrb[150].mxu0  ;;  %9682 = vmatprep.subr.bf16.mxu1 %v9681_v45 }
 0x67a   :  { %v5001_v63 = vadd.f32 %v9352_v40, %v13938_v20  ;;  %v4995_v42 = vpop.f32.mrb[151].mxu0  ;;  %9684 = vmatpush3.bf16.msra.mxu1 %v12816_v38  ;;  %v13942_v38 = vld [vmem:[#allocation67_spill] sm:$0xff] }
 0x67b   :  { %v9685_v43 = vpack.c.bf16 %v5065_v55, %v5064_v57  ;;  %v4996_v3 = vadd.f32 %v4995_v42, %v13939_v33  ;;  %v4522_v55 = vpop.permute.xlu0 %4521 }
 0x67c   :  { %v5067_v17 = vmax.f32 %v5001_v63, 0.0 }
 0x67d   :  { %v5066_v6 = vmax.f32 %v4996_v3, 0.0  ;;  %v9355_v27 = vpop.f32.mrb[152].mxu0  ;;  %9686 = vmatprep.subr.bf16.mxu1 %v9685_v43  ;;  %v4527_v43 = vpop.permute.xlu1 %4526 }
 0x67e   :  { %v5011_v4 = vadd.f32 %v9355_v27, %v13940_v11  ;;  %v5005_v9 = vpop.f32.mrb[153].mxu0  ;;  %9688 = vmatpush3.bf16.msra.mxu1 %v12826_v29  ;;  %v13944_v29 = vld [vmem:[#allocation69_spill] sm:$0xff] }
 0x67f   :  { %v9689_v41 = vpack.c.bf16 %v5067_v17, %v5066_v6  ;;  %v5006_v0 = vadd.f32 %v5005_v9, %v13941_v47  ;;  %v7580_v9 = vld [vmem:[%s13714_s6 + $0x200] sm:$0xff] }
 0x680   :  { %v5069_v60 = vmax.f32 %v5011_v4, 0.0  ;;  %9369 = vmatprep.mubr.msk.f32.mxu0 %vm2451_vm2, %v7580_v9 }
 0x681   :  { %v5068_v28 = vmax.f32 %v5006_v0, 0.0  ;;  %v9358_v23 = vpop.f32.mrb[154].mxu0  ;;  %9690 = vmatprep.subr.bf16.mxu1 %v9689_v41 }
 0x682   :  { %v5021_v31 = vadd.f32 %v9358_v23, %v13942_v38  ;;  %v5015_v44 = vpop.f32.mrb[155].mxu0  ;;  %9692 = vmatpush3.bf16.msra.mxu1 %v12836_v56  ;;  %v13946_v56 = vld [vmem:[#allocation71_spill] sm:$0xff] }
 0x683   :  { %v9693_v8 = vpack.c.bf16 %v5069_v60, %v5068_v28  ;;  %v5016_v24 = vadd.f32 %v5015_v44, %v13943_v30 }
 0x684   :  { %v5071_v32 = vmax.f32 %v5021_v31, 0.0 }
 0x685   :  { %v5070_v53 = vmax.f32 %v5016_v24, 0.0  ;;  %v9361_v5 = vpop.f32.mrb[156].mxu0  ;;  %9694 = vmatprep.subr.bf16.mxu1 %v9693_v8 }
 0x686   :  { %v5031_v15 = vadd.f32 %v9361_v5, %v13944_v29  ;;  %v5025_v18 = vpop.f32.mrb[157].mxu0  ;;  %9696 = vmatpush3.bf16.msra.mxu1 %v12843_v25 }
 0x687   :  { %v9697_v48 = vpack.c.bf16 %v5071_v32, %v5070_v53  ;;  %v5026_v1 = vadd.f32 %v5025_v18, %v13945_v16 }
 0x688   :  { %v5073_v10 = vmax.f32 %v5031_v15, 0.0 }
 0x689   :  { %v5072_v46 = vmax.f32 %v5026_v1, 0.0  ;;  %v9364_v21 = vpop.f32.mrb[158].mxu0  ;;  %9698 = vmatprep.subr.bf16.mxu1 %v9697_v48 }
 0x68a   :  { %v5041_v22 = vadd.f32 %v9364_v21, %v13946_v56  ;;  %v5035_v26 = vpop.f32.mrb[159].mxu0  ;;  %9700 = vmatpush3.bf16.msra.mxu1 %v12847_v7  ;;  %v7565_v7 = vld [vmem:[%s13712_s4 + $0x98] sm:$0xff] }
 0x68b   :  { %v9701_v51 = vpack.c.bf16 %v5073_v10, %v5072_v46  ;;  %v5036_v35 = vadd.f32 %v5035_v26, %v13947_v58 }
 0x68c   :  { %v5075_v37 = vmax.f32 %v5041_v22, 0.0 }
 0x68d   :  { %v5074_v52 = vmax.f32 %v5036_v35, 0.0  ;;  %9702 = vmatprep.subr.bf16.mxu1 %v9701_v51 }
 0x68e   :  { %9704 = vmatpush3.bf16.msra.mxu1 %v12851_v39  ;;  %v7567_v39 = vld [vmem:[%s13712_s4 + $0xa8] sm:$0xff] }
 0x68f   :  { %v9705_v25 = vpack.c.bf16 %v5075_v37, %v5074_v52 }
 0x691   :  { %9706 = vmatprep.subr.bf16.mxu1 %v9705_v25 }
 0x692   :  { %9708 = vmatpush3.bf16.msra.mxu1 %v12855_v19  ;;  %v7566_v19 = vld [vmem:[%s13712_s4 + $0xa0] sm:$0xff] }
 0x695   :  { %5175 = vmatmul.mubr.f32.vlgmr.msra.gmra.mrb[228].mxu1 %v7562_v61 }
 0x696   :  { %5179 = vmatprep.mubr.f32.mxu1 %v7565_v7 }
 0x699   :  { %5180 = vmatmul.mubr.f32.gmra.mrb[230].mxu1 %v7564_v36 }
 0x69a   :  { %5184 = vmatprep.mubr.f32.mxu1 %v7567_v39 }
 0x69d   :  { %5185 = vmatmul.mubr.f32.gmra.mrb[232].mxu1 %v7566_v19 }
 0x69e   :  { %5189 = vmatprep.mubr.f32.mxu1 %v7569_v50 }
 0x6a1   :  { %5190 = vmatmul.mubr.f32.gmra.mrb[234].mxu1 %v7568_v49 }
 0x728   :  { %v8387_v45 = vpop.f32.mrb[220].mxu1 }
 0x729   :  { %v8388_v59 = vpop.f32.mrb[221].mxu1 }
 0x72a   :  { %v8389_v13 = vadd.f32 %v8388_v59, %v8387_v45 }
 0x72c   :  { %v12901_v57 = vadd.f32 %v8389_v13, %v4522_v55  ;;  %v8390_v40 = vpop.f32.mrb[222].mxu1 }
 0x72d   :  { %v8391_v20 = vpop.f32.mrb[223].mxu1 }
 0x72e   :  { %v4624_v63 = vand.u32 2147483647, %v12901_v57  ;;  %v8392_v42 = vadd.f32 %v8391_v20, %v8390_v40  ;;  %vm4672_vm10 = vcmp.lt.f32.partialorder %v12901_v57, 0.0 }
 0x730   :  { %v4632_v33 = vadd.f32 1.0, %v4624_v63  ;;  %v8393_v3 = vpop.f32.mrb[224].mxu1  ;;  %10123 = vrcp.f32 %v4624_v63  ;;  %v12904_v17 = vadd.f32 %v8392_v42, %v4527_v43  ;;  %v7492_v28 = vadd.f32 -1.0, %v4624_v63 }
 0x731   :  { %v8394_v6 = vpop.f32.mrb[225].mxu1  ;;  %vm4628_vm6 = vcmp.gt.f32.partialorder %v4624_v63, 0.41421357  ;;  %vm4626_vm7 = vcmp.gt.f32.partialorder %v4624_v63, 2.4142137 }
 0x732   :  { %10125 = vrcp.f32 %v4632_v33  ;;  %v12906_v27 = vadd.f32 %v8394_v6, %v8393_v3  ;;  %v4625_v11 = vand.u32 2147483647, %v12904_v17  ;;  %v4646_v52 = vsel %vm4628_vm6, 0.9990265, %v13883_v54  ;;  %v5093_v3 = vpop.permute.xlu0 %5092 }
 0x733   :  { %v4648_v36 = vsel %vm4626_vm7, 1.998053, %v4646_v52  ;;  %vm4673_vm11 = vcmp.lt.f32.partialorder %v12904_v17, 0.0 }
 0x734   :  { %v8396_v4 = vpop.f32.mrb[226].mxu1  ;;  %v4633_v41 = vadd.f32 1.0, %v4625_v11  ;;  %10127 = vrcp.f32 %v4625_v11  ;;  %v7493_v24 = vadd.f32 -1.0, %v4625_v11  ;;  %vm4629_vm8 = vcmp.gt.f32.partialorder %v4625_v11, 0.41421357 }
 0x735   :  { %v8397_v47 = vpop.f32.mrb[227].mxu1  ;;  %vm4627_vm9 = vcmp.gt.f32.partialorder %v4625_v11, 2.4142137  ;;  %v4647_v50 = vsel %vm4629_vm8, 0.9990265, %v13883_v54 }
 0x736   :  { %v12913_v0 = vadd.f32 %v8397_v47, %v8396_v4  ;;  %10129 = vrcp.f32 %v4633_v41  ;;  %v4649_v55 = vsel %vm4627_vm9, 1.998053, %v4647_v50  ;;  %v5098_v4 = vpop.permute.xlu1 %5097  ;;  %v4532_v9 = vpop.permute.xlu0 %4531 }
 0x73a   :  { %v10124_v60 = vpop.eup %10123 }
 0x73b   :  { %v4636_v31 = vsub.f32 0.0, %v10124_v60 }
 0x73c   :  { %v10126_v23 = vpop.eup %10125 }
 0x73d   :  { %v4640_v38 = vmul.f32 %v10126_v23, %v7492_v28 }
 0x73e   :  { %v10128_v8 = vpop.eup %10127 }
 0x73f   :  { %v4642_v44 = vsel %vm4628_vm6, %v4640_v38, %v4624_v63  ;;  %v4637_v15 = vsub.f32 0.0, %v10128_v8  ;;  %v4537_v38 = vpop.permute.xlu1 %4536 }
 0x740   :  { %v4644_v30 = vsel %vm4626_vm7, %v4636_v31, %v4642_v44  ;;  %v10130_v32 = vpop.eup %10129  ;;  %v4621_v31 = vadd.f32 %v12913_v0, %v4537_v38 }
 0x741   :  { %v4650_v53 = vmul.f32 %v4644_v30, %v4644_v30  ;;  %v4641_v5 = vmul.f32 %v10130_v32, %v7493_v24 }
 0x743   :  { %v4652_v29 = vmul.f32 0.10244363, %v4650_v53  ;;  %v4643_v18 = vsel %vm4629_vm8, %v4641_v5, %v4625_v11  ;;  %v4616_v11 = vadd.f32 %v12906_v27, %v4532_v9 }
 0x744   :  { %v4645_v16 = vsel %vm4627_vm9, %v4637_v15, %v4643_v18 }
 0x745   :  { %v7494_v48 = vadd.f32 -0.17652416, %v4652_v29  ;;  %v4651_v1 = vmul.f32 %v4645_v16, %v4645_v16 }
 0x747   :  { %v4656_v10 = vmul.f32 %v7494_v48, %v4650_v53  ;;  %v4653_v46 = vmul.f32 0.10244363, %v4651_v1 }
 0x749   :  { %v4658_v21 = vadd.f32 0.25411648, %v4656_v10  ;;  %v7495_v56 = vadd.f32 -0.17652416, %v4653_v46 }
 0x74b   :  { %v4660_v22 = vmul.f32 %v4658_v21, %v4650_v53  ;;  %v4657_v26 = vmul.f32 %v7495_v56, %v4651_v1 }
 0x74d   :  { %v7496_v51 = vadd.f32 -0.4239951, %v4660_v22  ;;  %v4659_v58 = vadd.f32 0.25411648, %v4657_v26 }
 0x74f   :  { %v4664_v35 = vmul.f32 %v7496_v51, %v4650_v53  ;;  %v4661_v37 = vmul.f32 %v4659_v58, %v4651_v1 }
 0x751   :  { %v4666_v25 = vadd.f32 1.272, %v4664_v35  ;;  %v7497_v61 = vadd.f32 -0.4239951, %v4661_v37 }
 0x753   :  { %v4668_v7 = vmul.f32 %v4666_v25, %v4644_v30  ;;  %v4665_v39 = vmul.f32 %v7497_v61, %v4651_v1 }
 0x755   :  { %v4670_v19 = vadd.f32 %v4668_v7, %v4648_v36  ;;  %v4667_v49 = vadd.f32 1.272, %v4665_v39 }
 0x757   :  { %v4674_v45 = vsub.f32 0.0, %v4670_v19  ;;  %v4669_v59 = vmul.f32 %v4667_v49, %v4645_v16 }
 0x759   :  { %v4676_v13 = vsel %vm4672_vm10, %v4674_v45, %v4670_v19  ;;  %v4671_v20 = vadd.f32 %v4669_v59, %v4649_v55 }
 0x75a   :  { %v4678_v40 = vmul.f32 1.442695, %v4676_v13 }
 0x75b   :  { %v4675_v42 = vsub.f32 0.0, %v4671_v20 }
 0x75c   :  { %10131 = vpow2.f32 %v4678_v40 }
 0x75d   :  { %v4677_v63 = vsel %vm4673_vm11, %v4675_v42, %v4671_v20 }
 0x75e   :  { %v4680_v43 = vmul.f32 1.442695, %v4677_v63  ;;  %v4688_v33 = vadd.f32 %v4677_v63, %v4676_v13 }
 0x760   :  { %10133 = vpow2.f32 %v4680_v43  ;;  %v12928_v6 = vadd.f32 %v4688_v33, %v12477_v2 }
 0x766   :  { %v10132_v57 = vpop.eup %10131 }
 0x767   :  { %v4682_v41 = vmul.f32 %v10132_v57, %v12041_v34 }
 0x768   :  { %v8465_v47 = vpop.f32.mrb[228].mxu1 }
 0x769   :  { %v12932_v60 = vadd.f32 %v4682_v41, %v4616_v11  ;;  %v8466_v28 = vpop.f32.mrb[229].mxu1 }
 0x76a   :  { %v8467_v17 = vadd.f32 %v8466_v28, %v8465_v47  ;;  %v10134_v23 = vpop.eup %10133 }
 0x76b   :  { %v4683_v44 = vmul.f32 %v10134_v23, %v12038_v62 }
 0x76c   :  { %v12936_v2 = vadd.f32 %v8467_v17, %v5093_v3  ;;  %v8468_v8 = vpop.f32.mrb[230].mxu1 }
 0x76d   :  { %v8469_v30 = vpop.f32.mrb[231].mxu1  ;;  %v12938_v24 = vadd.f32 %v4683_v44, %v4621_v31 }
 0x76e   :  { %v5195_v27 = vand.u32 2147483647, %v12936_v2  ;;  %v8470_v34 = vadd.f32 %v8469_v30, %v8468_v8  ;;  %vm5243_vm0 = vcmp.lt.f32.partialorder %v12936_v2, 0.0 }
 0x770   :  { %v5203_v32 = vadd.f32 1.0, %v5195_v27  ;;  %v8471_v53 = vpop.f32.mrb[232].mxu1  ;;  %10135 = vrcp.f32 %v5195_v27  ;;  %v12941_v5 = vadd.f32 %v8470_v34, %v5098_v4  ;;  %v7574_v10 = vadd.f32 -1.0, %v5195_v27 }
 0x771   :  { %v8472_v29 = vpop.f32.mrb[233].mxu1  ;;  %vm5199_vm12 = vcmp.gt.f32.partialorder %v5195_v27, 0.41421357  ;;  %vm5197_vm13 = vcmp.gt.f32.partialorder %v5195_v27, 2.4142137 }
 0x772   :  { %10137 = vrcp.f32 %v5203_v32  ;;  %v12943_v15 = vadd.f32 %v8472_v29, %v8471_v53  ;;  %v5196_v62 = vand.u32 2147483647, %v12941_v5  ;;  %v5217_v43 = vsel %vm5199_vm12, 0.9990265, %v13883_v54  ;;  %v5103_v29 = vpop.permute.xlu0 %5102 }
 0x773   :  { %v5219_v57 = vsel %vm5197_vm13, 1.998053, %v5217_v43  ;;  %vm5244_vm1 = vcmp.lt.f32.partialorder %v12941_v5, 0.0  ;;  %v7610_v43 = vld [vmem:[%s13714_s6 + $0x2f0] sm:$0xff] }
 0x774   :  { %v8474_v0 = vpop.f32.mrb[234].mxu1  ;;  %v5204_v18 = vadd.f32 1.0, %v5196_v62  ;;  %10139 = vrcp.f32 %v5196_v62  ;;  %v7575_v58 = vadd.f32 -1.0, %v5196_v62  ;;  %vm5200_vm14 = vcmp.gt.f32.partialorder %v5196_v62, 0.41421357 }
 0x775   :  { %v8475_v48 = vpop.f32.mrb[235].mxu1  ;;  %vm5198_vm15 = vcmp.gt.f32.partialorder %v5196_v62, 2.4142137  ;;  %v5218_v41 = vsel %vm5200_vm14, 0.9990265, %v13883_v54  ;;  %v5187_v2 = vadd.f32 %v12943_v15, %v5103_v29  ;;  %v7582_v15 = vld [vmem:[%s13714_s6 + $0x210] sm:$0xff] }
 0x776   :  { %v12946_v16 = vadd.f32 %v8475_v48, %v8474_v0  ;;  %10141 = vrcp.f32 %v5204_v18  ;;  %v5220_v38 = vsel %vm5198_vm15, 1.998053, %v5218_v41  ;;  %v5108_v48 = vpop.permute.xlu1 %5107  ;;  %v7667_v41 = vld [vmem:[%s13711_s3 + $0x328] sm:$0xff]  ;;  %v7680_v29 = vld [vmem:[%s13711_s3 + $0x390] sm:$0xff] }
 0x77a   :  { %v10136_v1 = vpop.eup %10135 }
 0x77b   :  { %v5207_v56 = vsub.f32 0.0, %v10136_v1  ;;  %v5192_v1 = vadd.f32 %v12946_v16, %v5108_v48  ;;  %v7584_v16 = vld [vmem:[%s13714_s6 + $0x220] sm:$0xff]  ;;  %v7684_v48 = vld [vmem:[%s13711_s3 + $0x3b0] sm:$0xff] }
 0x77c   :  { %v10138_v46 = vpop.eup %10137 }
 0x77d   :  { %v5211_v21 = vmul.f32 %v10138_v46, %v7574_v10 }
 0x77e   :  { %v10140_v26 = vpop.eup %10139 }
 0x77f   :  { %v5213_v22 = vsel %vm5199_vm12, %v5211_v21, %v5195_v27  ;;  %v5208_v61 = vsub.f32 0.0, %v10140_v26  ;;  %v7585_v21 = vld [vmem:[%s13714_s6 + $0x228] sm:$0xff]  ;;  %v7588_v26 = vld [vmem:[%s13714_s6 + $0x240] sm:$0xff] }
 0x780   :  { %v5215_v51 = vsel %vm5197_vm13, %v5207_v56, %v5213_v22  ;;  %v10142_v35 = vpop.eup %10141  ;;  %v7586_v56 = vld [vmem:[%s13714_s6 + $0x230] sm:$0xff]  ;;  %v7587_v22 = vld [vmem:[%s13714_s6 + $0x238] sm:$0xff] }
 0x781   :  { %v5221_v37 = vmul.f32 %v5215_v51, %v5215_v51  ;;  %v5212_v52 = vmul.f32 %v10142_v35, %v7575_v58  ;;  %v7590_v58 = vld [vmem:[%s13714_s6 + $0x250] sm:$0xff]  ;;  %v7591_v35 = vld [vmem:[%s13714_s6 + $0x258] sm:$0xff] }
 0x783   :  { %v5223_v25 = vmul.f32 0.10244363, %v5221_v37  ;;  %v5214_v7 = vsel %vm5200_vm14, %v5212_v52, %v5196_v62  ;;  %v7593_v52 = vld [vmem:[%s13714_s6 + $0x268] sm:$0xff] }
 0x784   :  { %v5216_v39 = vsel %vm5198_vm15, %v5208_v61, %v5214_v7  ;;  %v7595_v61 = vld [vmem:[%s13714_s6 + $0x278] sm:$0xff]  ;;  %v7596_v7 = vld [vmem:[%s13714_s6 + $0x280] sm:$0xff] }
 0x785   :  { %v7576_v36 = vadd.f32 -0.17652416, %v5223_v25  ;;  %v5222_v19 = vmul.f32 %v5216_v39, %v5216_v39  ;;  %v7594_v25 = vld [vmem:[%s13714_s6 + $0x270] sm:$0xff] }
 0x787   :  { %v5227_v50 = vmul.f32 %v7576_v36, %v5221_v37  ;;  %v5224_v49 = vmul.f32 0.10244363, %v5222_v19  ;;  %v7597_v36 = vld [vmem:[%s13714_s6 + $0x288] sm:$0xff] }
 0x789   :  { %v5229_v45 = vadd.f32 0.25411648, %v5227_v50  ;;  %v7577_v59 = vadd.f32 -0.17652416, %v5224_v49  ;;  %v7600_v50 = vld [vmem:[%s13714_s6 + $0x2a0] sm:$0xff]  ;;  %v7601_v49 = vld [vmem:[%s13714_s6 + $0x2a8] sm:$0xff] }
 0x78b   :  { %v5231_v13 = vmul.f32 %v5229_v45, %v5221_v37  ;;  %v5228_v55 = vmul.f32 %v7577_v59, %v5222_v19  ;;  %v7602_v45 = vld [vmem:[%s13714_s6 + $0x2b0] sm:$0xff]  ;;  %v7603_v59 = vld [vmem:[%s13714_s6 + $0x2b8] sm:$0xff] }
 0x78d   :  { %v7578_v40 = vadd.f32 -0.4239951, %v5231_v13  ;;  %v5230_v20 = vadd.f32 0.25411648, %v5228_v55  ;;  %v7604_v13 = vld [vmem:[%s13714_s6 + $0x2c0] sm:$0xff]  ;;  %v7605_v55 = vld [vmem:[%s13714_s6 + $0x2c8] sm:$0xff] }
 0x78f   :  { %v5235_v42 = vmul.f32 %v7578_v40, %v5221_v37  ;;  %v5232_v63 = vmul.f32 %v5230_v20, %v5222_v19  ;;  %v7592_v37 = vld [vmem:[%s13714_s6 + $0x260] sm:$0xff]  ;;  %v7606_v40 = vld [vmem:[%s13714_s6 + $0x2d0] sm:$0xff]  ;;  %v7607_v20 = vld [vmem:[%s13714_s6 + $0x2d8] sm:$0xff] }
 0x791   :  { %v5237_v33 = vadd.f32 1.272, %v5235_v42  ;;  %v7579_v3 = vadd.f32 -0.4239951, %v5232_v63  ;;  %v7608_v42 = vld [vmem:[%s13714_s6 + $0x2e0] sm:$0xff]  ;;  %v7609_v63 = vld [vmem:[%s13714_s6 + $0x2e8] sm:$0xff] }
 0x793   :  { %v5239_v4 = vmul.f32 %v5237_v33, %v5215_v51  ;;  %v5236_v9 = vmul.f32 %v7579_v3, %v5222_v19  ;;  %v7589_v51 = vld [vmem:[%s13714_s6 + $0x248] sm:$0xff]  ;;  %v7599_v19 = vld [vmem:[%s13714_s6 + $0x298] sm:$0xff]  ;;  %v7662_v3 = vld [vmem:[%s13711_s3 + $0x300] sm:$0xff] }
 0x794   :  { %v7611_v33 = vld [vmem:[%s13714_s6 + $0x2f8] sm:$0xff] }
 0x795   :  { %v5241_v11 = vadd.f32 %v5239_v4, %v5219_v57  ;;  %v5238_v47 = vadd.f32 1.272, %v5236_v9  ;;  %v7663_v4 = vld [vmem:[%s13711_s3 + $0x308] sm:$0xff]  ;;  %v7664_v57 = vld [vmem:[%s13711_s3 + $0x310] sm:$0xff]  ;;  %v7665_v9 = vld [vmem:[%s13711_s3 + $0x318] sm:$0xff] }
 0x797   :  { %v5245_v28 = vsub.f32 0.0, %v5241_v11  ;;  %v5240_v17 = vmul.f32 %v5238_v47, %v5216_v39  ;;  %v7598_v39 = vld [vmem:[%s13714_s6 + $0x290] sm:$0xff] }
 0x798   :  { %v7668_v47 = vld [vmem:[%s13711_s3 + $0x330] sm:$0xff] }
 0x799   :  { %v5247_v23 = vsel %vm5243_vm0, %v5245_v28, %v5241_v11  ;;  %v5242_v44 = vadd.f32 %v5240_v17, %v5220_v38  ;;  %v7666_v11 = vld [vmem:[%s13711_s3 + $0x320] sm:$0xff]  ;;  %v7669_v28 = vld [vmem:[%s13711_s3 + $0x338] sm:$0xff]  ;;  %v7672_v38 = vld [vmem:[%s13711_s3 + $0x350] sm:$0xff] }
 0x79a   :  { %v5249_v31 = vmul.f32 1.442695, %v5247_v23  ;;  %v7670_v17 = vld [vmem:[%s13711_s3 + $0x340] sm:$0xff] }
 0x79b   :  { %v5246_v8 = vsub.f32 0.0, %v5242_v44 }
 0x79c   :  { %10143 = vpow2.f32 %v5249_v31  ;;  %v7673_v31 = vld [vmem:[%s13711_s3 + $0x358] sm:$0xff] }
 0x79d   :  { %v5248_v30 = vsel %vm5244_vm1, %v5246_v8, %v5242_v44  ;;  %v7674_v44 = vld [vmem:[%s13711_s3 + $0x360] sm:$0xff]  ;;  %v7675_v8 = vld [vmem:[%s13711_s3 + $0x368] sm:$0xff] }
 0x79e   :  { %v5251_v27 = vmul.f32 1.442695, %v5248_v30  ;;  %v5824_v34 = vadd.f32 %v5248_v30, %v5247_v23  ;;  %v7671_v23 = vld [vmem:[%s13711_s3 + $0x348] sm:$0xff]  ;;  %v7676_v30 = vld [vmem:[%s13711_s3 + $0x370] sm:$0xff] }
 0x7a0   :  { %10145 = vpow2.f32 %v5251_v27  ;;  %v12961_v32 = vadd.f32 %v5824_v34, %v12928_v6  ;;  %v7677_v27 = vld [vmem:[%s13711_s3 + $0x378] sm:$0xff]  ;;  %v7678_v34 = vld [vmem:[%s13711_s3 + $0x380] sm:$0xff] }
 0x7a6   :  { %v10144_v53 = vpop.eup %10143 }
 0x7a7   :  { %v5253_v62 = vmul.f32 %v10144_v53, %v12938_v24  ;;  %v7581_v24 = vld [vmem:[%s13714_s6 + $0x208] sm:$0xff] }
 0x7a8   :  { %v7679_v53 = vld [vmem:[%s13711_s3 + $0x388] sm:$0xff] }
 0x7a9   :  { %v12965_v0 = vadd.f32 %v5253_v62, %v5187_v2  ;;  %v7681_v2 = vld [vmem:[%s13711_s3 + $0x398] sm:$0xff]  ;;  %v7682_v62 = vld [vmem:[%s13711_s3 + $0x3a0] sm:$0xff] }
 0x7aa   :  { %v10146_v18 = vpop.eup %10145 }
 0x7ab   :  { %v5254_v5 = vmul.f32 %v10146_v18, %v12932_v60  ;;  %v7583_v60 = vld [vmem:[%s13714_s6 + $0x218] sm:$0xff]  ;;  %v7683_v18 = vld [vmem:[%s13711_s3 + $0x3a8] sm:$0xff] }
 0x7ad   :  { %v12969_v10 = vadd.f32 %v5254_v5, %v5192_v1  ;;  %v7685_v1 = vld [vmem:[%s13711_s3 + $0x3b8] sm:$0xff]  ;;  %v7686_v5 = vld [vmem:[%s13711_s3 + $0x3c0] sm:$0xff] }
 0x7af   :  { %v9709_v6 = vpack.c.bf16 %v12969_v10, %v12965_v0  ;;  %v9745_v46 = vpack.c.bf16 %v12965_v0, %v12969_v10 }
 0x7b1   :  { %9710 = vmatprep.subr.bf16.mxu0 %v9709_v6 }
 0x7b2   :  { %9712 = vmatpush3.bf16.msra.mxu0 %v9709_v6  ;;  %v7687_v6 = vld [vmem:[%s13711_s3 + $0x3c8] sm:$0xff] }
 0x7b3   :  { %9746 = vmatprep.subr.bf16.mxu0 %v9745_v46 }
 0x7b5   :  { %9370 = vmatmul.mubr.msk.f32.vlgmr.msra.gmra.mrb[160].mxu0 %vm2451_vm2, %v7581_v24  ;;  %v7689_v24 = vld [vmem:[%s13711_s3 + $0x3d8] sm:$0xff] }
 0x7b6   :  { %9748 = vmatpush3.bf16.msra.mxu0 %v9745_v46  ;;  %9372 = vmatprep.mubr.msk.f32.mxu0 %vm2451_vm2, %v7582_v15  ;;  %v7688_v46 = vld [vmem:[%s13711_s3 + $0x3d0] sm:$0xff]  ;;  %v7690_v15 = vld [vmem:[%s13711_s3 + $0x3e0] sm:$0xff] }
 0x7b9   :  { %9373 = vmatmul.mubr.msk.f32.gmra.mrb[162].mxu0 %vm2451_vm2, %v7583_v60  ;;  %v7691_v60 = vld [vmem:[%s13711_s3 + $0x3e8] sm:$0xff] }
 0x7ba   :  { %9375 = vmatprep.mubr.msk.f32.mxu0 %vm2451_vm2, %v7584_v16  ;;  %v7692_v16 = vld [vmem:[%s13711_s3 + $0x3f0] sm:$0xff] }
 0x7bd   :  { %9376 = vmatmul.mubr.msk.f32.gmra.mrb[164].mxu0 %vm2451_vm2, %v7585_v21  ;;  %v7693_v21 = vld [vmem:[%s13711_s3 + $0x3f8] sm:$0xff] }
 0x7be   :  { %9378 = vmatprep.mubr.msk.f32.mxu0 %vm2451_vm2, %v7586_v56  ;;  %v7645_v56 = vld [vmem:[%s13715_s7 + $0x88] sm:$0xff] }
 0x7bf   :  { %5741 = vmatprep.mubr.f32.mxu1 %v7645_v56 }
 0x7c1   :  { %9379 = vmatmul.mubr.msk.f32.gmra.mrb[166].mxu0 %vm2451_vm2, %v7587_v22 }
 0x7c2   :  { %9381 = vmatprep.mubr.msk.f32.mxu0 %vm2451_vm2, %v7588_v26  ;;  %v13948_v26 = vld [vmem:[#allocation73_spill] sm:$0xff] }
 0x7c5   :  { %9382 = vmatmul.mubr.msk.f32.gmra.mrb[168].mxu0 %vm2451_vm2, %v7589_v51 }
 0x7c6   :  { %9384 = vmatprep.mubr.msk.f32.mxu0 %vm2451_vm2, %v7590_v58 }
 0x7c9   :  { %9385 = vmatmul.mubr.msk.f32.gmra.mrb[170].mxu0 %vm2451_vm2, %v7591_v35  ;;  %v13949_v35 = vld [vmem:[#allocation74_spill] sm:$0xff] }
 0x7ca   :  { %9387 = vmatprep.mubr.msk.f32.mxu0 %vm2451_vm2, %v7592_v37 }
 0x7cd   :  { %9388 = vmatmul.mubr.msk.f32.gmra.mrb[172].mxu0 %vm2451_vm2, %v7593_v52 }
 0x7ce   :  { %9390 = vmatprep.mubr.msk.f32.mxu0 %vm2451_vm2, %v7594_v25 }
 0x7d1   :  { %9391 = vmatmul.mubr.msk.f32.gmra.mrb[174].mxu0 %vm2451_vm2, %v7595_v61 }
 0x7d2   :  { %9393 = vmatprep.mubr.msk.f32.mxu0 %vm2451_vm2, %v7596_v7  ;;  %v13950_v7 = vld [vmem:[#allocation75_spill] sm:$0xff] }
 0x7d5   :  { %9394 = vmatmul.mubr.msk.f32.gmra.mrb[176].mxu0 %vm2451_vm2, %v7597_v36 }
 0x7d6   :  { %9396 = vmatprep.mubr.msk.f32.mxu0 %vm2451_vm2, %v7598_v39 }
 0x7d9   :  { %9397 = vmatmul.mubr.msk.f32.gmra.mrb[178].mxu0 %vm2451_vm2, %v7599_v19 }
 0x7da   :  { %9399 = vmatprep.mubr.msk.f32.mxu0 %vm2451_vm2, %v7600_v50  ;;  %v13951_v50 = vld [vmem:[#allocation76_spill] sm:$0xff] }
 0x7dd   :  { %9400 = vmatmul.mubr.msk.f32.gmra.mrb[180].mxu0 %vm2451_vm2, %v7601_v49 }
 0x7de   :  { %9402 = vmatprep.mubr.msk.f32.mxu0 %vm2451_vm2, %v7602_v45 }
 0x7e1   :  { %9403 = vmatmul.mubr.msk.f32.gmra.mrb[182].mxu0 %vm2451_vm2, %v7603_v59 }
 0x7e2   :  { %9405 = vmatprep.mubr.msk.f32.mxu0 %vm2451_vm2, %v7604_v13 }
 0x7e5   :  { %9406 = vmatmul.mubr.msk.f32.gmra.mrb[184].mxu0 %vm2451_vm2, %v7605_v55  ;;  %v13952_v55 = vld [vmem:[#allocation77_spill] sm:$0xff] }
 0x7e6   :  { %9408 = vmatprep.mubr.msk.f32.mxu0 %vm2451_vm2, %v7606_v40 }
 0x7e9   :  { %9409 = vmatmul.mubr.msk.f32.gmra.mrb[186].mxu0 %vm2451_vm2, %v7607_v20 }
 0x7ea   :  { %9411 = vmatprep.mubr.msk.f32.mxu0 %vm2451_vm2, %v7608_v42 }
 0x7ed   :  { %9412 = vmatmul.mubr.msk.f32.gmra.mrb[188].mxu0 %vm2451_vm2, %v7609_v63  ;;  %v13953_v63 = vld [vmem:[#allocation78_spill] sm:$0xff] }
 0x7ee   :  { %9414 = vmatprep.mubr.msk.f32.mxu0 %vm2451_vm2, %v7610_v43 }
 0x7f1   :  { %9415 = vmatmul.mubr.msk.f32.gmra.mrb[190].mxu0 %vm2451_vm2, %v7611_v33 }
 0x7f2   :  { %9421 = vmatprep.mubr.msk.f32.mxu0 %vm2451_vm2, %v7662_v3 }
 0x7f5   :  { %9422 = vmatmul.mubr.msk.f32.vlgmr.msra.gmra.mrb[192].mxu0 %vm2451_vm2, %v7663_v4 }
 0x7f6   :  { %9424 = vmatprep.mubr.msk.f32.mxu0 %vm2451_vm2, %v7664_v57  ;;  %v13954_v57 = vld [vmem:[#allocation79_spill] sm:$0xff] }
 0x7f9   :  { %9425 = vmatmul.mubr.msk.f32.gmra.mrb[194].mxu0 %vm2451_vm2, %v7665_v9 }
 0x7fa   :  { %9427 = vmatprep.mubr.msk.f32.mxu0 %vm2451_vm2, %v7666_v11 }
 0x7fd   :  { %9428 = vmatmul.mubr.msk.f32.gmra.mrb[196].mxu0 %vm2451_vm2, %v7667_v41 }
 0x7fe   :  { %9430 = vmatprep.mubr.msk.f32.mxu0 %vm2451_vm2, %v7668_v47  ;;  %v13955_v47 = vld [vmem:[#allocation80_spill] sm:$0xff] }
 0x801   :  { %9431 = vmatmul.mubr.msk.f32.gmra.mrb[198].mxu0 %vm2451_vm2, %v7669_v28 }
 0x802   :  { %9433 = vmatprep.mubr.msk.f32.mxu0 %vm2451_vm2, %v7670_v17 }
 0x805   :  { %9434 = vmatmul.mubr.msk.f32.gmra.mrb[200].mxu0 %vm2451_vm2, %v7671_v23 }
 0x806   :  { %9436 = vmatprep.mubr.msk.f32.mxu0 %vm2451_vm2, %v7672_v38 }
 0x809   :  { %9437 = vmatmul.mubr.msk.f32.gmra.mrb[202].mxu0 %vm2451_vm2, %v7673_v31  ;;  %v13956_v31 = vld [vmem:[#allocation81_spill] sm:$0xff] }
 0x80a   :  { %9439 = vmatprep.mubr.msk.f32.mxu0 %vm2451_vm2, %v7674_v44 }
 0x80d   :  { %9440 = vmatmul.mubr.msk.f32.gmra.mrb[204].mxu0 %vm2451_vm2, %v7675_v8 }
 0x80e   :  { %9442 = vmatprep.mubr.msk.f32.mxu0 %vm2451_vm2, %v7676_v30 }
 0x811   :  { %9443 = vmatmul.mubr.msk.f32.gmra.mrb[206].mxu0 %vm2451_vm2, %v7677_v27  ;;  %v13957_v27 = vld [vmem:[#allocation82_spill] sm:$0xff] }
 0x812   :  { %9445 = vmatprep.mubr.msk.f32.mxu0 %vm2451_vm2, %v7678_v34 }
 0x815   :  { %9446 = vmatmul.mubr.msk.f32.gmra.mrb[208].mxu0 %vm2451_vm2, %v7679_v53 }
 0x816   :  { %9448 = vmatprep.mubr.msk.f32.mxu0 %vm2451_vm2, %v7680_v29 }
 0x819   :  { %9449 = vmatmul.mubr.msk.f32.gmra.mrb[210].mxu0 %vm2451_vm2, %v7681_v2 }
 0x81a   :  { %9451 = vmatprep.mubr.msk.f32.mxu0 %vm2451_vm2, %v7682_v62  ;;  %v13958_v62 = vld [vmem:[#allocation83_spill] sm:$0xff] }
 0x81d   :  { %9452 = vmatmul.mubr.msk.f32.gmra.mrb[212].mxu0 %vm2451_vm2, %v7683_v18 }
 0x81e   :  { %9454 = vmatprep.mubr.msk.f32.mxu0 %vm2451_vm2, %v7684_v48 }
 0x821   :  { %9455 = vmatmul.mubr.msk.f32.gmra.mrb[214].mxu0 %vm2451_vm2, %v7685_v1 }
 0x822   :  { %9457 = vmatprep.mubr.msk.f32.mxu0 %vm2451_vm2, %v7686_v5  ;;  %v13959_v5 = vld [vmem:[#allocation84_spill] sm:$0xff] }
 0x825   :  { %9458 = vmatmul.mubr.msk.f32.gmra.mrb[216].mxu0 %vm2451_vm2, %v7687_v6 }
 0x826   :  { %9460 = vmatprep.mubr.msk.f32.mxu0 %vm2451_vm2, %v7688_v46 }
 0x829   :  { %9461 = vmatmul.mubr.msk.f32.gmra.mrb[218].mxu0 %vm2451_vm2, %v7689_v24 }
 0x82a   :  { %9463 = vmatprep.mubr.msk.f32.mxu0 %vm2451_vm2, %v7690_v15 }
 0x82d   :  { %9464 = vmatmul.mubr.msk.f32.gmra.mrb[220].mxu0 %vm2451_vm2, %v7691_v60  ;;  %v13960_v60 = vld [vmem:[#allocation85_spill] sm:$0xff] }
 0x82e   :  { %9466 = vmatprep.mubr.msk.f32.mxu0 %vm2451_vm2, %v7692_v16 }
 0x831   :  { %9467 = vmatmul.mubr.msk.f32.gmra.mrb[222].mxu0 %vm2451_vm2, %v7693_v21 }
 0x888   :  { %v9371_v22 = vpop.f32.mrb[160].mxu0 }
 0x889   :  { %v5458_v51 = vadd.f32 %v9371_v22, %v13948_v26  ;;  %v5452_v58 = vpop.f32.mrb[161].mxu0  ;;  %v13961_v22 = vld [vmem:[#allocation86_spill] sm:$0xff] }
 0x88a   :  { %v5453_v37 = vadd.f32 %v5452_v58, %v13949_v35 }
 0x88b   :  { %v5612_v52 = vmax.f32 %v5458_v51, 0.0 }
 0x88c   :  { %v5611_v25 = vmax.f32 %v5453_v37, 0.0  ;;  %v9374_v61 = vpop.f32.mrb[162].mxu0  ;;  %v13962_v37 = vld [vmem:[#allocation87_spill] sm:$0xff] }
 0x88d   :  { %v5468_v36 = vadd.f32 %v9374_v61, %v13950_v7  ;;  %v5462_v39 = vpop.f32.mrb[163].mxu0  ;;  %v13963_v7 = vld [vmem:[#allocation88_spill] sm:$0xff] }
 0x88e   :  { %v13233_v19 = vpack.c.bf16 %v5612_v52, %v5611_v25  ;;  %v5463_v49 = vadd.f32 %v5462_v39, %v13951_v50 }
 0x88f   :  { %v5614_v45 = vmax.f32 %v5468_v36, 0.0 }
 0x890   :  { %v5613_v59 = vmax.f32 %v5463_v49, 0.0  ;;  %v9377_v13 = vpop.f32.mrb[164].mxu0 }
 0x891   :  { %v5478_v40 = vadd.f32 %v9377_v13, %v13952_v55  ;;  %v5472_v20 = vpop.f32.mrb[165].mxu0 }
 0x892   :  { %v13237_v42 = vpack.c.bf16 %v5614_v45, %v5613_v59  ;;  %v5473_v43 = vadd.f32 %v5472_v20, %v13953_v63  ;;  %v13964_v45 = vld [vmem:[#allocation89_spill] sm:$0xff] }
 0x893   :  { %v5616_v33 = vmax.f32 %v5478_v40, 0.0  ;;  %v13965_v40 = vld [vmem:[#allocation90_spill] sm:$0xff] }
 0x894   :  { %v5615_v3 = vmax.f32 %v5473_v43, 0.0  ;;  %v9380_v4 = vpop.f32.mrb[166].mxu0 }
 0x895   :  { %v5488_v9 = vadd.f32 %v9380_v4, %v13954_v57  ;;  %v5482_v11 = vpop.f32.mrb[167].mxu0 }
 0x896   :  { %v13241_v41 = vpack.c.bf16 %v5616_v33, %v5615_v3  ;;  %v5483_v28 = vadd.f32 %v5482_v11, %v13955_v47  ;;  %v13966_v3 = vld [vmem:[#allocation91_spill] sm:$0xff]  ;;  %v13967_v11 = vld [vmem:[#allocation92_spill] sm:$0xff] }
 0x897   :  { %v5618_v17 = vmax.f32 %v5488_v9, 0.0 }
 0x898   :  { %v5617_v23 = vmax.f32 %v5483_v28, 0.0  ;;  %v9383_v38 = vpop.f32.mrb[168].mxu0 }
 0x899   :  { %v5498_v44 = vadd.f32 %v9383_v38, %v13956_v31  ;;  %v5492_v8 = vpop.f32.mrb[169].mxu0  ;;  %v13968_v38 = vld [vmem:[#allocation93_spill] sm:$0xff] }
 0x89a   :  { %v13245_v30 = vpack.c.bf16 %v5618_v17, %v5617_v23  ;;  %v5493_v34 = vadd.f32 %v5492_v8, %v13957_v27  ;;  %v13969_v27 = vld [vmem:[#allocation94_spill] sm:$0xff] }
 0x89b   :  { %v5620_v53 = vmax.f32 %v5498_v44, 0.0 }
 0x89c   :  { %v5619_v29 = vmax.f32 %v5493_v34, 0.0  ;;  %v9386_v2 = vpop.f32.mrb[170].mxu0 }
 0x89d   :  { %v5508_v18 = vadd.f32 %v9386_v2, %v13958_v62  ;;  %v5502_v48 = vpop.f32.mrb[171].mxu0  ;;  %v13970_v62 = vld [vmem:[#allocation95_spill] sm:$0xff] }
 0x89e   :  { %v13249_v1 = vpack.c.bf16 %v5620_v53, %v5619_v29  ;;  %v5503_v6 = vadd.f32 %v5502_v48, %v13959_v5 }
 0x89f   :  { %v5622_v46 = vmax.f32 %v5508_v18, 0.0 }
 0x8a0   :  { %v5621_v24 = vmax.f32 %v5503_v6, 0.0  ;;  %v9389_v15 = vpop.f32.mrb[172].mxu0  ;;  %v13971_v6 = vld [vmem:[#allocation96_spill] sm:$0xff] }
 0x8a1   :  { %v5518_v16 = vadd.f32 %v9389_v15, %v13960_v60  ;;  %v5512_v21 = vpop.f32.mrb[173].mxu0 }
 0x8a2   :  { %v13253_v56 = vpack.c.bf16 %v5622_v46, %v5621_v24  ;;  %v5513_v26 = vadd.f32 %v5512_v21, %v13961_v22 }
 0x8a3   :  { %v5624_v51 = vmax.f32 %v5518_v16, 0.0 }
 0x8a4   :  { %v5623_v58 = vmax.f32 %v5513_v26, 0.0  ;;  %v9392_v35 = vpop.f32.mrb[174].mxu0  ;;  %v13973_v26 = vld [vmem:[#allocation98_spill] sm:$0xff] }
 0x8a5   :  { %v5528_v52 = vadd.f32 %v9392_v35, %v13962_v37  ;;  %v5522_v25 = vpop.f32.mrb[175].mxu0 }
 0x8a6   :  { %v13257_v61 = vpack.c.bf16 %v5624_v51, %v5623_v58  ;;  %v5523_v36 = vadd.f32 %v5522_v25, %v13963_v7 }
 0x8a7   :  { %v5626_v39 = vmax.f32 %v5528_v52, 0.0 }
 0x8a8   :  { %v5625_v50 = vmax.f32 %v5523_v36, 0.0  ;;  %v9395_v49 = vpop.f32.mrb[176].mxu0  ;;  %v13975_v36 = vld [vmem:[#allocation100_spill] sm:$0xff] }
 0x8a9   :  { %v5538_v59 = vadd.f32 %v9395_v49, %v13964_v45  ;;  %v5532_v13 = vpop.f32.mrb[177].mxu0 }
 0x8aa   :  { %v13261_v55 = vpack.c.bf16 %v5626_v39, %v5625_v50  ;;  %v5533_v20 = vadd.f32 %v5532_v13, %v13965_v40 }
 0x8ab   :  { %v5628_v63 = vmax.f32 %v5538_v59, 0.0 }
 0x8ac   :  { %v5627_v43 = vmax.f32 %v5533_v20, 0.0  ;;  %v9398_v33 = vpop.f32.mrb[178].mxu0  ;;  %v13977_v20 = vld [vmem:[#allocation102_spill] sm:$0xff] }
 0x8ad   :  { %v5548_v4 = vadd.f32 %v9398_v33, %v13966_v3  ;;  %v5542_v57 = vpop.f32.mrb[179].mxu0 }
 0x8ae   :  { %v9713_v9 = vpack.c.bf16 %v5628_v63, %v5627_v43  ;;  %v5543_v47 = vadd.f32 %v5542_v57, %v13967_v11  ;;  %v13979_v11 = vld [vmem:[#allocation104_spill] sm:$0xff] }
 0x8af   :  { %v5630_v28 = vmax.f32 %v5548_v4, 0.0 }
 0x8b0   :  { %v5629_v17 = vmax.f32 %v5543_v47, 0.0  ;;  %v9401_v23 = vpop.f32.mrb[180].mxu0  ;;  %9714 = vmatprep.subr.bf16.mxu1 %v9713_v9 }
 0x8b1   :  { %v5558_v31 = vadd.f32 %v9401_v23, %v13968_v38  ;;  %v5552_v44 = vpop.f32.mrb[181].mxu0  ;;  %9716 = vmatpush3.bf16.msra.mxu1 %v13233_v19  ;;  %v13972_v19 = vld [vmem:[#allocation97_spill] sm:$0xff] }
 0x8b2   :  { %v9717_v8 = vpack.c.bf16 %v5630_v28, %v5629_v17  ;;  %v5553_v34 = vadd.f32 %v5552_v44, %v13969_v27 }
 0x8b3   :  { %v5632_v53 = vmax.f32 %v5558_v31, 0.0 }
 0x8b4   :  { %v5631_v29 = vmax.f32 %v5553_v34, 0.0  ;;  %v9404_v2 = vpop.f32.mrb[182].mxu0  ;;  %9718 = vmatprep.subr.bf16.mxu1 %v9717_v8  ;;  %v13981_v8 = vld [vmem:[#allocation106_spill] sm:$0xff] }
 0x8b5   :  { %v5568_v18 = vadd.f32 %v9404_v2, %v13970_v62  ;;  %v5562_v48 = vpop.f32.mrb[183].mxu0  ;;  %9720 = vmatpush3.bf16.msra.mxu1 %v13237_v42  ;;  %v13974_v42 = vld [vmem:[#allocation99_spill] sm:$0xff] }
 0x8b6   :  { %v9721_v5 = vpack.c.bf16 %v5632_v53, %v5631_v29  ;;  %v5563_v46 = vadd.f32 %v5562_v48, %v13971_v6  ;;  %v7647_v6 = vld [vmem:[%s13715_s7 + $0x98] sm:$0xff] }
 0x8b7   :  { %v5634_v24 = vmax.f32 %v5568_v18, 0.0  ;;  %v7644_v18 = vld [vmem:[%s13715_s7 + $0x80] sm:$0xff] }
 0x8b8   :  { %v5633_v15 = vmax.f32 %v5563_v46, 0.0  ;;  %v9407_v60 = vpop.f32.mrb[184].mxu0  ;;  %9722 = vmatprep.subr.bf16.mxu1 %v9721_v5 }
 0x8b9   :  { %v5578_v16 = vadd.f32 %v9407_v60, %v13972_v19  ;;  %v5572_v21 = vpop.f32.mrb[185].mxu0  ;;  %9724 = vmatpush3.bf16.msra.mxu1 %v13241_v41  ;;  %v13976_v41 = vld [vmem:[#allocation101_spill] sm:$0xff] }
 0x8ba   :  { %v9725_v22 = vpack.c.bf16 %v5634_v24, %v5633_v15  ;;  %v5573_v51 = vadd.f32 %v5572_v21, %v13973_v26  ;;  %v13984_v60 = vld [vmem:[#allocation109_spill] sm:$0xff] }
 0x8bb   :  { %v5636_v58 = vmax.f32 %v5578_v16, 0.0  ;;  %v7646_v16 = vld [vmem:[%s13715_s7 + $0x90] sm:$0xff] }
 0x8bc   :  { %v5635_v35 = vmax.f32 %v5573_v51, 0.0  ;;  %v9410_v37 = vpop.f32.mrb[186].mxu0  ;;  %9726 = vmatprep.subr.bf16.mxu1 %v9725_v22  ;;  %v13985_v22 = vld [vmem:[#allocation110_spill] sm:$0xff]  ;;  %v7649_v51 = vld [vmem:[%s13715_s7 + $0xa8] sm:$0xff] }
 0x8bd   :  { %v5588_v52 = vadd.f32 %v9410_v37, %v13974_v42  ;;  %v5582_v25 = vpop.f32.mrb[187].mxu0  ;;  %9728 = vmatpush3.bf16.msra.mxu1 %v13245_v30  ;;  %v13978_v30 = vld [vmem:[#allocation103_spill] sm:$0xff] }
 0x8be   :  { %v9729_v7 = vpack.c.bf16 %v5636_v58, %v5635_v35  ;;  %v5583_v39 = vadd.f32 %v5582_v25, %v13975_v36  ;;  %v13986_v42 = vld [vmem:[#allocation111_spill] sm:$0xff] }
 0x8bf   :  { %v5638_v50 = vmax.f32 %v5588_v52, 0.0 }
 0x8c0   :  { %v5637_v49 = vmax.f32 %v5583_v39, 0.0  ;;  %v9413_v45 = vpop.f32.mrb[188].mxu0  ;;  %9730 = vmatprep.subr.bf16.mxu1 %v9729_v7  ;;  %v7648_v7 = vld [vmem:[%s13715_s7 + $0xa0] sm:$0xff]  ;;  %v13987_v39 = vld [vmem:[#allocation112_spill] sm:$0xff] }
 0x8c1   :  { %v5598_v59 = vadd.f32 %v9413_v45, %v13976_v41  ;;  %v5592_v13 = vpop.f32.mrb[189].mxu0  ;;  %9732 = vmatpush3.bf16.msra.mxu1 %v13249_v1  ;;  %v13980_v1 = vld [vmem:[#allocation105_spill] sm:$0xff] }
 0x8c2   :  { %v9733_v40 = vpack.c.bf16 %v5638_v50, %v5637_v49  ;;  %v5593_v63 = vadd.f32 %v5592_v13, %v13977_v20  ;;  %v7651_v49 = vld [vmem:[%s13715_s7 + $0xb8] sm:$0xff]  ;;  %v13988_v13 = vld [vmem:[#allocation113_spill] sm:$0xff] }
 0x8c3   :  { %v5640_v43 = vmax.f32 %v5598_v59, 0.0 }
 0x8c4   :  { %v5639_v33 = vmax.f32 %v5593_v63, 0.0  ;;  %v9416_v3 = vpop.f32.mrb[190].mxu0  ;;  %9734 = vmatprep.subr.bf16.mxu1 %v9733_v40  ;;  %v7650_v63 = vld [vmem:[%s13715_s7 + $0xb0] sm:$0xff] }
 0x8c5   :  { %v5608_v4 = vadd.f32 %v9416_v3, %v13978_v30  ;;  %v5602_v57 = vpop.f32.mrb[191].mxu0  ;;  %9736 = vmatpush3.bf16.msra.mxu1 %v13253_v56  ;;  %v13982_v56 = vld [vmem:[#allocation107_spill] sm:$0xff]  ;;  %v7727_v30 = vld [vmem:[%s13712_s4 + $0xc8] sm:$0xff] }
 0x8c6   :  { %v9737_v9 = vpack.c.bf16 %v5640_v43, %v5639_v33  ;;  %v5603_v47 = vadd.f32 %v5602_v57, %v13979_v11  ;;  %v13989_v33 = vld [vmem:[#allocation114_spill] sm:$0xff]  ;;  %v13990_v11 = vld [vmem:[#allocation115_spill] sm:$0xff] }
 0x8c7   :  { %v5642_v28 = vmax.f32 %v5608_v4, 0.0 }
 0x8c8   :  { %v5641_v17 = vmax.f32 %v5603_v47, 0.0  ;;  %9738 = vmatprep.subr.bf16.mxu1 %v9737_v9  ;;  %v9423_v23 = vpop.f32.mrb[192].mxu0 }
 0x8c9   :  { %v6029_v38 = vadd.f32 %v9423_v23, %v13980_v1  ;;  %9740 = vmatpush3.bf16.msra.mxu1 %v13257_v61  ;;  %v6023_v31 = vpop.f32.mrb[193].mxu0  ;;  %v13983_v61 = vld [vmem:[#allocation108_spill] sm:$0xff] }
 0x8ca   :  { %v9741_v44 = vpack.c.bf16 %v5642_v28, %v5641_v17  ;;  %v6024_v27 = vadd.f32 %v6023_v31, %v13981_v8  ;;  %v13991_v23 = vld [vmem:[#allocation116_spill] sm:$0xff]  ;;  %v13992_v8 = vld [vmem:[#allocation117_spill] sm:$0xff] }
 0x8cb   :  { %v6183_v34 = vmax.f32 %v6029_v38, 0.0 }
 0x8cc   :  { %v6182_v53 = vmax.f32 %v6024_v27, 0.0  ;;  %9742 = vmatprep.subr.bf16.mxu1 %v9741_v44  ;;  %v9426_v29 = vpop.f32.mrb[194].mxu0 }
 0x8cd   :  { %v6039_v2 = vadd.f32 %v9426_v29, %v13982_v56  ;;  %9744 = vmatpush3.bf16.msra.mxu1 %v13261_v55  ;;  %v6033_v62 = vpop.f32.mrb[195].mxu0  ;;  %v13993_v29 = vld [vmem:[#allocation118_spill] sm:$0xff] }
 0x8ce   :  { %v13292_v48 = vpack.c.bf16 %v6183_v34, %v6182_v53  ;;  %v6034_v5 = vadd.f32 %v6033_v62, %v13983_v61  ;;  %v13994_v61 = vld [vmem:[#allocation119_spill] sm:$0xff] }
 0x8cf   :  { %v6185_v46 = vmax.f32 %v6039_v2, 0.0 }
 0x8d0   :  { %v6184_v24 = vmax.f32 %v6034_v5, 0.0  ;;  %5742 = vmatmul.mubr.f32.vlgmr.msra.gmra.mrb[236].mxu1 %v7644_v18  ;;  %v9429_v15 = vpop.f32.mrb[196].mxu0 }
 0x8d1   :  { %v6049_v19 = vadd.f32 %v9429_v15, %v13984_v60  ;;  %v6043_v55 = vpop.f32.mrb[197].mxu0  ;;  %5746 = vmatprep.mubr.f32.mxu1 %v7647_v6 }
 0x8d2   :  { %v13302_v21 = vpack.c.bf16 %v6185_v46, %v6184_v24  ;;  %v6044_v26 = vadd.f32 %v6043_v55, %v13985_v22  ;;  %v13995_v24 = vld [vmem:[#allocation120_spill] sm:$0xff] }
 0x8d3   :  { %v6187_v58 = vmax.f32 %v6049_v19, 0.0 }
 0x8d4   :  { %v6186_v35 = vmax.f32 %v6044_v26, 0.0  ;;  %5747 = vmatmul.mubr.f32.gmra.mrb[238].mxu1 %v7646_v16  ;;  %v9432_v37 = vpop.f32.mrb[198].mxu0  ;;  %v13996_v16 = vld [vmem:[#allocation121_spill] sm:$0xff] }
 0x8d5   :  { %v6059_v52 = vadd.f32 %v9432_v37, %v13986_v42  ;;  %v6053_v25 = vpop.f32.mrb[199].mxu0  ;;  %5751 = vmatprep.mubr.f32.mxu1 %v7649_v51 }
 0x8d6   :  { %v13312_v36 = vpack.c.bf16 %v6187_v58, %v6186_v35  ;;  %v6054_v50 = vadd.f32 %v6053_v25, %v13987_v39  ;;  %v13997_v58 = vld [vmem:[#allocation122_spill] sm:$0xff]  ;;  %v13998_v25 = vld [vmem:[#allocation123_spill] sm:$0xff] }
 0x8d7   :  { %v6189_v45 = vmax.f32 %v6059_v52, 0.0 }
 0x8d8   :  { %v6188_v41 = vmax.f32 %v6054_v50, 0.0  ;;  %5752 = vmatmul.mubr.f32.gmra.mrb[240].mxu1 %v7648_v7  ;;  %v9435_v59 = vpop.f32.mrb[200].mxu0 }
 0x8d9   :  { %v6069_v40 = vadd.f32 %v9435_v59, %v13988_v13  ;;  %v6063_v20 = vpop.f32.mrb[201].mxu0  ;;  %5756 = vmatprep.mubr.f32.mxu1 %v7651_v49  ;;  %v13999_v49 = vld [vmem:[#allocation124_spill] sm:$0xff] }
 0x8da   :  { %v13322_v43 = vpack.c.bf16 %v6189_v45, %v6188_v41  ;;  %v6064_v3 = vadd.f32 %v6063_v20, %v13989_v33 }
 0x8db   :  { %v6191_v4 = vmax.f32 %v6069_v40, 0.0  ;;  %v14000_v40 = vld [vmem:[#allocation125_spill] sm:$0xff] }
 0x8dc   :  { %v6190_v57 = vmax.f32 %v6064_v3, 0.0  ;;  %5757 = vmatmul.mubr.f32.gmra.mrb[242].mxu1 %v7650_v63  ;;  %v9438_v9 = vpop.f32.mrb[202].mxu0  ;;  %v14001_v3 = vld [vmem:[#allocation126_spill] sm:$0xff] }
 0x8dd   :  { %v6079_v47 = vadd.f32 %v9438_v9, %v13990_v11  ;;  %v6073_v28 = vpop.f32.mrb[203].mxu0  ;;  %6312 = vmatprep.mubr.f32.mxu1 %v7727_v30  ;;  %v14002_v11 = vld [vmem:[#allocation127_spill] sm:$0xff] }
 0x8de   :  { %v13329_v17 = vpack.c.bf16 %v6191_v4, %v6190_v57  ;;  %v6074_v1 = vadd.f32 %v6073_v28, %v13991_v23 }
 0x8df   :  { %v6193_v38 = vmax.f32 %v6079_v47, 0.0 }
 0x8e0   :  { %v6192_v31 = vmax.f32 %v6074_v1, 0.0  ;;  %v9441_v44 = vpop.f32.mrb[204].mxu0  ;;  %v14003_v1 = vld [vmem:[#allocation128_spill] sm:$0xff] }
 0x8e1   :  { %v6089_v27 = vadd.f32 %v9441_v44, %v13992_v8  ;;  %v6083_v34 = vpop.f32.mrb[205].mxu0 }
 0x8e2   :  { %v13333_v53 = vpack.c.bf16 %v6193_v38, %v6192_v31  ;;  %v6084_v56 = vadd.f32 %v6083_v34, %v13993_v29 }
 0x8e3   :  { %v6195_v2 = vmax.f32 %v6089_v27, 0.0 }
 0x8e4   :  { %v6194_v62 = vmax.f32 %v6084_v56, 0.0  ;;  %v9444_v18 = vpop.f32.mrb[206].mxu0  ;;  %v14005_v56 = vld [vmem:[#allocation130_spill] sm:$0xff] }
 0x8e5   :  { %v6099_v5 = vadd.f32 %v9444_v18, %v13994_v61  ;;  %v6093_v6 = vpop.f32.mrb[207].mxu0 }
 0x8e6   :  { %v13337_v46 = vpack.c.bf16 %v6195_v2, %v6194_v62  ;;  %v6094_v15 = vadd.f32 %v6093_v6, %v13995_v24 }
 0x8e7   :  { %v6197_v60 = vmax.f32 %v6099_v5, 0.0 }
 0x8e8   :  { %v6196_v19 = vmax.f32 %v6094_v15, 0.0  ;;  %v9447_v55 = vpop.f32.mrb[208].mxu0  ;;  %v14007_v15 = vld [vmem:[#allocation132_spill] sm:$0xff] }
 0x8e9   :  { %v6109_v22 = vadd.f32 %v9447_v55, %v13996_v16  ;;  %v6103_v26 = vpop.f32.mrb[209].mxu0 }
 0x8ea   :  { %v13341_v51 = vpack.c.bf16 %v6197_v60, %v6196_v19  ;;  %v6104_v35 = vadd.f32 %v6103_v26, %v13997_v58 }
 0x8eb   :  { %v6199_v37 = vmax.f32 %v6109_v22, 0.0 }
 0x8ec   :  { %v6198_v42 = vmax.f32 %v6104_v35, 0.0  ;;  %v9450_v52 = vpop.f32.mrb[210].mxu0  ;;  %v14009_v35 = vld [vmem:[#allocation134_spill] sm:$0xff] }
 0x8ed   :  { %v6119_v7 = vadd.f32 %v9450_v52, %v13998_v25  ;;  %v6113_v39 = vpop.f32.mrb[211].mxu0 }
 0x8ee   :  { %v9749_v50 = vpack.c.bf16 %v6199_v37, %v6198_v42  ;;  %v6114_v45 = vadd.f32 %v6113_v39, %v13999_v49  ;;  %v14011_v49 = vld [vmem:[#allocation136_spill] sm:$0xff] }
 0x8ef   :  { %v6201_v41 = vmax.f32 %v6119_v7, 0.0 }
 0x8f0   :  { %v6200_v59 = vmax.f32 %v6114_v45, 0.0  ;;  %v9453_v13 = vpop.f32.mrb[212].mxu0  ;;  %9750 = vmatprep.subr.bf16.mxu1 %v9749_v50 }
 0x8f1   :  { %v6129_v20 = vadd.f32 %v9453_v13, %v14000_v40  ;;  %v6123_v63 = vpop.f32.mrb[213].mxu0  ;;  %9752 = vmatpush3.bf16.msra.mxu1 %v13292_v48  ;;  %v14004_v48 = vld [vmem:[#allocation129_spill] sm:$0xff]  ;;  %v7726_v13 = vld [vmem:[%s13712_s4 + $0xc0] sm:$0xff] }
 0x8f2   :  { %v9753_v33 = vpack.c.bf16 %v6201_v41, %v6200_v59  ;;  %v6124_v30 = vadd.f32 %v6123_v63, %v14001_v3  ;;  %v7728_v40 = vld [vmem:[%s13712_s4 + $0xd0] sm:$0xff] }
 0x8f3   :  { %v6203_v4 = vmax.f32 %v6129_v20, 0.0  ;;  %v7733_v20 = vld [vmem:[%s13712_s4 + $0xf8] sm:$0xff]  ;;  %v7732_v63 = vld [vmem:[%s13712_s4 + $0xf0] sm:$0xff] }
 0x8f4   :  { %v6202_v57 = vmax.f32 %v6124_v30, 0.0  ;;  %v9456_v9 = vpop.f32.mrb[214].mxu0  ;;  %9754 = vmatprep.subr.bf16.mxu1 %v9753_v33 }
 0x8f5   :  { %v6139_v47 = vadd.f32 %v9456_v9, %v14002_v11  ;;  %v6133_v28 = vpop.f32.mrb[215].mxu0  ;;  %9756 = vmatpush3.bf16.msra.mxu1 %v13302_v21  ;;  %v14006_v21 = vld [vmem:[#allocation131_spill] sm:$0xff] }
 0x8f6   :  { %v9757_v23 = vpack.c.bf16 %v6203_v4, %v6202_v57  ;;  %v6134_v38 = vadd.f32 %v6133_v28, %v14003_v1  ;;  %v5660_v4 = vpop.permute.xlu0 %5659 }
 0x8f7   :  { %v6205_v31 = vmax.f32 %v6139_v47, 0.0 }
 0x8f8   :  { %v6204_v44 = vmax.f32 %v6134_v38, 0.0  ;;  %v9459_v8 = vpop.f32.mrb[216].mxu0  ;;  %9758 = vmatprep.subr.bf16.mxu1 %v9757_v23  ;;  %v5665_v23 = vpop.permute.xlu1 %5664 }
 0x8f9   :  { %v6149_v27 = vadd.f32 %v9459_v8, %v14004_v48  ;;  %v6143_v34 = vpop.f32.mrb[217].mxu0  ;;  %9760 = vmatpush3.bf16.msra.mxu1 %v13312_v36  ;;  %v14008_v36 = vld [vmem:[#allocation133_spill] sm:$0xff] }
 0x8fa   :  { %v9761_v29 = vpack.c.bf16 %v6205_v31, %v6204_v44  ;;  %v6144_v2 = vadd.f32 %v6143_v34, %v14005_v56 }
 0x8fb   :  { %v6207_v62 = vmax.f32 %v6149_v27, 0.0  ;;  %v7744_v27 = vld [vmem:[%s13714_s6 + $0x300] sm:$0xff] }
 0x8fc   :  { %v6206_v18 = vmax.f32 %v6144_v2, 0.0  ;;  %v9462_v61 = vpop.f32.mrb[218].mxu0  ;;  %9762 = vmatprep.subr.bf16.mxu1 %v9761_v29  ;;  %9473 = vmatprep.mubr.msk.f32.mxu0 %vm2451_vm2, %v7744_v27  ;;  %v6236_v27 = vpop.permute.xlu1 %6235 }
 0x8fd   :  { %v6159_v5 = vadd.f32 %v9462_v61, %v14006_v21  ;;  %v6153_v6 = vpop.f32.mrb[219].mxu0  ;;  %9764 = vmatpush3.bf16.msra.mxu1 %v13322_v43  ;;  %v14010_v43 = vld [vmem:[#allocation135_spill] sm:$0xff] }
 0x8fe   :  { %v9765_v24 = vpack.c.bf16 %v6207_v62, %v6206_v18  ;;  %v6154_v60 = vadd.f32 %v6153_v6, %v14007_v15 }
 0x8ff   :  { %v6209_v19 = vmax.f32 %v6159_v5, 0.0 }
 0x900   :  { %v6208_v55 = vmax.f32 %v6154_v60, 0.0  ;;  %v9465_v16 = vpop.f32.mrb[220].mxu0  ;;  %9766 = vmatprep.subr.bf16.mxu1 %v9765_v24 }
 0x901   :  { %v6169_v22 = vadd.f32 %v9465_v16, %v14008_v36  ;;  %v6163_v26 = vpop.f32.mrb[221].mxu0  ;;  %9768 = vmatpush3.bf16.msra.mxu1 %v13329_v17 }
 0x902   :  { %v9769_v58 = vpack.c.bf16 %v6209_v19, %v6208_v55  ;;  %v6164_v37 = vadd.f32 %v6163_v26, %v14009_v35 }
 0x903   :  { %v6211_v42 = vmax.f32 %v6169_v22, 0.0 }
 0x904   :  { %v6210_v52 = vmax.f32 %v6164_v37, 0.0  ;;  %v9468_v25 = vpop.f32.mrb[222].mxu0  ;;  %9770 = vmatprep.subr.bf16.mxu1 %v9769_v58 }
 0x905   :  { %v6179_v7 = vadd.f32 %v9468_v25, %v14010_v43  ;;  %v6173_v39 = vpop.f32.mrb[223].mxu0  ;;  %9772 = vmatpush3.bf16.msra.mxu1 %v13333_v53  ;;  %v7729_v53 = vld [vmem:[%s13712_s4 + $0xd8] sm:$0xff] }
 0x906   :  { %v9773_v50 = vpack.c.bf16 %v6211_v42, %v6210_v52  ;;  %v6174_v45 = vadd.f32 %v6173_v39, %v14011_v49 }
 0x907   :  { %v6213_v41 = vmax.f32 %v6179_v7, 0.0 }
 0x908   :  { %v6212_v59 = vmax.f32 %v6174_v45, 0.0  ;;  %9774 = vmatprep.subr.bf16.mxu1 %v9773_v50 }
 0x909   :  { %9776 = vmatpush3.bf16.msra.mxu1 %v13337_v46  ;;  %v7731_v46 = vld [vmem:[%s13712_s4 + $0xe8] sm:$0xff] }
 0x90a   :  { %v9777_v17 = vpack.c.bf16 %v6213_v41, %v6212_v59 }
 0x90c   :  { %9778 = vmatprep.subr.bf16.mxu1 %v9777_v17 }
 0x90d   :  { %9780 = vmatpush3.bf16.msra.mxu1 %v13341_v51  ;;  %v7730_v51 = vld [vmem:[%s13712_s4 + $0xe0] sm:$0xff] }
 0x910   :  { %6313 = vmatmul.mubr.f32.vlgmr.msra.gmra.mrb[244].mxu1 %v7726_v13 }
 0x911   :  { %6317 = vmatprep.mubr.f32.mxu1 %v7729_v53 }
 0x914   :  { %6318 = vmatmul.mubr.f32.gmra.mrb[246].mxu1 %v7728_v40 }
 0x915   :  { %6322 = vmatprep.mubr.f32.mxu1 %v7731_v46 }
 0x918   :  { %6323 = vmatmul.mubr.f32.gmra.mrb[248].mxu1 %v7730_v51 }
 0x919   :  { %6327 = vmatprep.mubr.f32.mxu1 %v7733_v20 }
 0x91c   :  { %6328 = vmatmul.mubr.f32.gmra.mrb[250].mxu1 %v7732_v63 }
 0x9a3   :  { %v8543_v33 = vpop.f32.mrb[236].mxu1 }
 0x9a4   :  { %v8544_v3 = vpop.f32.mrb[237].mxu1 }
 0x9a5   :  { %v8545_v30 = vadd.f32 %v8544_v3, %v8543_v33 }
 0x9a7   :  { %v13387_v57 = vadd.f32 %v8545_v30, %v5660_v4  ;;  %v8546_v9 = vpop.f32.mrb[238].mxu1 }
 0x9a8   :  { %v8547_v11 = vpop.f32.mrb[239].mxu1 }
 0x9a9   :  { %v5762_v47 = vand.u32 2147483647, %v13387_v57  ;;  %v8548_v28 = vadd.f32 %v8547_v11, %v8546_v9  ;;  %vm5810_vm7 = vcmp.lt.f32.partialorder %v13387_v57, 0.0 }
 0x9ab   :  { %v5770_v1 = vadd.f32 1.0, %v5762_v47  ;;  %v8549_v38 = vpop.f32.mrb[240].mxu1  ;;  %10147 = vrcp.f32 %v5762_v47  ;;  %v13390_v31 = vadd.f32 %v8548_v28, %v5665_v23  ;;  %v7656_v18 = vadd.f32 -1.0, %v5762_v47 }
 0x9ac   :  { %v8550_v44 = vpop.f32.mrb[241].mxu1  ;;  %vm5766_vm3 = vcmp.gt.f32.partialorder %v5762_v47, 0.41421357  ;;  %vm5764_vm4 = vcmp.gt.f32.partialorder %v5762_v47, 2.4142137 }
 0x9ad   :  { %10149 = vrcp.f32 %v5770_v1  ;;  %v13392_v8 = vadd.f32 %v8550_v44, %v8549_v38  ;;  %v5763_v48 = vand.u32 2147483647, %v13390_v31  ;;  %v5784_v59 = vsel %vm5766_vm3, 0.9990265, %v13883_v54  ;;  %v6231_v38 = vpop.permute.xlu0 %6230 }
 0x9ae   :  { %v5786_v40 = vsel %vm5764_vm4, 1.998053, %v5784_v59  ;;  %vm5811_vm8 = vcmp.lt.f32.partialorder %v13390_v31, 0.0 }
 0x9af   :  { %v8552_v34 = vpop.f32.mrb[242].mxu1  ;;  %v5771_v29 = vadd.f32 1.0, %v5763_v48  ;;  %10151 = vrcp.f32 %v5763_v48  ;;  %v7657_v60 = vadd.f32 -1.0, %v5763_v48  ;;  %vm5767_vm5 = vcmp.gt.f32.partialorder %v5763_v48, 0.41421357 }
 0x9b0   :  { %v8553_v56 = vpop.f32.mrb[243].mxu1  ;;  %vm5765_vm6 = vcmp.gt.f32.partialorder %v5763_v48, 2.4142137  ;;  %v5785_v20 = vsel %vm5767_vm5, 0.9990265, %v13883_v54 }
 0x9b1   :  { %v13399_v2 = vadd.f32 %v8553_v56, %v8552_v34  ;;  %10153 = vrcp.f32 %v5771_v29  ;;  %v5787_v4 = vsel %vm5765_vm6, 1.998053, %v5785_v20  ;;  %v5670_v34 = vpop.permute.xlu0 %5669 }
 0x9b5   :  { %v10148_v62 = vpop.eup %10147 }
 0x9b6   :  { %v5774_v5 = vsub.f32 0.0, %v10148_v62 }
 0x9b7   :  { %v10150_v61 = vpop.eup %10149 }
 0x9b8   :  { %v5778_v21 = vmul.f32 %v10150_v61, %v7656_v18 }
 0x9b9   :  { %v10152_v24 = vpop.eup %10151 }
 0x9ba   :  { %v5780_v6 = vsel %vm5766_vm3, %v5778_v21, %v5762_v47  ;;  %v5775_v22 = vsub.f32 0.0, %v10152_v24  ;;  %v5675_v21 = vpop.permute.xlu1 %5674 }
 0x9bb   :  { %v5782_v15 = vsel %vm5764_vm4, %v5774_v5, %v5780_v6  ;;  %v10154_v19 = vpop.eup %10153  ;;  %v5759_v5 = vadd.f32 %v13399_v2, %v5675_v21 }
 0x9bc   :  { %v5788_v55 = vmul.f32 %v5782_v15, %v5782_v15  ;;  %v5779_v16 = vmul.f32 %v10154_v19, %v7657_v60 }
 0x9be   :  { %v5790_v36 = vmul.f32 0.10244363, %v5788_v55  ;;  %v5781_v26 = vsel %vm5767_vm5, %v5779_v16, %v5763_v48  ;;  %v5754_v48 = vadd.f32 %v13392_v8, %v5670_v34 }
 0x9bf   :  { %v5783_v35 = vsel %vm5765_vm6, %v5775_v22, %v5781_v26 }
 0x9c0   :  { %v7658_v58 = vadd.f32 -0.17652416, %v5790_v36  ;;  %v5789_v37 = vmul.f32 %v5783_v35, %v5783_v35 }
 0x9c2   :  { %v5794_v42 = vmul.f32 %v7658_v58, %v5788_v55  ;;  %v5791_v52 = vmul.f32 0.10244363, %v5789_v37 }
 0x9c4   :  { %v5796_v25 = vadd.f32 0.25411648, %v5794_v42  ;;  %v7659_v43 = vadd.f32 -0.17652416, %v5791_v52 }
 0x9c6   :  { %v5798_v7 = vmul.f32 %v5796_v25, %v5788_v55  ;;  %v5795_v39 = vmul.f32 %v7659_v43, %v5789_v37 }
 0x9c8   :  { %v7660_v50 = vadd.f32 -0.4239951, %v5798_v7  ;;  %v5797_v49 = vadd.f32 0.25411648, %v5795_v39 }
 0x9ca   :  { %v5802_v45 = vmul.f32 %v7660_v50, %v5788_v55  ;;  %v5799_v41 = vmul.f32 %v5797_v49, %v5789_v37 }
 0x9cc   :  { %v5804_v17 = vadd.f32 1.272, %v5802_v45  ;;  %v7661_v13 = vadd.f32 -0.4239951, %v5799_v41 }
 0x9ce   :  { %v5806_v53 = vmul.f32 %v5804_v17, %v5782_v15  ;;  %v5803_v46 = vmul.f32 %v7661_v13, %v5789_v37 }
 0x9d0   :  { %v5808_v51 = vadd.f32 %v5806_v53, %v5786_v40  ;;  %v5805_v63 = vadd.f32 1.272, %v5803_v46 }
 0x9d2   :  { %v5812_v33 = vsub.f32 0.0, %v5808_v51  ;;  %v5807_v3 = vmul.f32 %v5805_v63, %v5783_v35 }
 0x9d4   :  { %v5814_v30 = vsel %vm5810_vm7, %v5812_v33, %v5808_v51  ;;  %v5809_v11 = vadd.f32 %v5807_v3, %v5787_v4 }
 0x9d5   :  { %v5816_v9 = vmul.f32 1.442695, %v5814_v30 }
 0x9d6   :  { %v5813_v28 = vsub.f32 0.0, %v5809_v11 }
 0x9d7   :  { %10155 = vpow2.f32 %v5816_v9 }
 0x9d8   :  { %v5815_v47 = vsel %vm5811_vm8, %v5813_v28, %v5809_v11 }
 0x9d9   :  { %v5818_v23 = vmul.f32 1.442695, %v5815_v47  ;;  %v5826_v1 = vadd.f32 %v5815_v47, %v5814_v30 }
 0x9db   :  { %10157 = vpow2.f32 %v5818_v23  ;;  %v13414_v44 = vadd.f32 %v5826_v1, %v12961_v32 }
 0x9e1   :  { %v10156_v57 = vpop.eup %10155 }
 0x9e2   :  { %v5820_v29 = vmul.f32 %v10156_v57, %v12481_v14 }
 0x9e3   :  { %v8621_v56 = vpop.f32.mrb[244].mxu1 }
 0x9e4   :  { %v13418_v62 = vadd.f32 %v5820_v29, %v5754_v48  ;;  %v8622_v18 = vpop.f32.mrb[245].mxu1 }
 0x9e5   :  { %v8623_v31 = vadd.f32 %v8622_v18, %v8621_v56  ;;  %v10158_v61 = vpop.eup %10157 }
 0x9e6   :  { %v5821_v6 = vmul.f32 %v10158_v61, %v12485_v12 }
 0x9e7   :  { %v13422_v32 = vadd.f32 %v8623_v31, %v6231_v38  ;;  %v8624_v24 = vpop.f32.mrb[246].mxu1 }
 0x9e8   :  { %v8625_v15 = vpop.f32.mrb[247].mxu1  ;;  %v13424_v60 = vadd.f32 %v5821_v6, %v5759_v5 }
 0x9e9   :  { %v6333_v8 = vand.u32 2147483647, %v13422_v32  ;;  %v8626_v14 = vadd.f32 %v8625_v15, %v8624_v24  ;;  %vm6381_vm13 = vcmp.lt.f32.partialorder %v13422_v32, 0.0 }
 0x9eb   :  { %v6341_v19 = vadd.f32 1.0, %v6333_v8  ;;  %v8627_v55 = vpop.f32.mrb[248].mxu1  ;;  %10159 = vrcp.f32 %v6333_v8  ;;  %v13427_v16 = vadd.f32 %v8626_v14, %v6236_v27  ;;  %v7738_v42 = vadd.f32 -1.0, %v6333_v8 }
 0x9ec   :  { %v8628_v36 = vpop.f32.mrb[249].mxu1  ;;  %vm6337_vm9 = vcmp.gt.f32.partialorder %v6333_v8, 0.41421357  ;;  %vm6335_vm10 = vcmp.gt.f32.partialorder %v6333_v8, 2.4142137 }
 0x9ed   :  { %10161 = vrcp.f32 %v6341_v19  ;;  %v13429_v22 = vadd.f32 %v8628_v36, %v8627_v55  ;;  %v6334_v12 = vand.u32 2147483647, %v13427_v16  ;;  %v6355_v23 = vsel %vm6337_vm9, 0.9990265, %v13883_v54  ;;  %v6241_v36 = vpop.permute.xlu0 %6240 }
 0x9ee   :  { %v6357_v57 = vsel %vm6335_vm10, 1.998053, %v6355_v23  ;;  %vm6382_vm14 = vcmp.lt.f32.partialorder %v13427_v16, 0.0  ;;  %v7775_v23 = vld [vmem:[%s13714_s6 + $0x3f8] sm:$0xff] }
 0x9ef   :  { %v8630_v2 = vpop.f32.mrb[250].mxu1  ;;  %v6342_v26 = vadd.f32 1.0, %v6334_v12  ;;  %10163 = vrcp.f32 %v6334_v12  ;;  %v7739_v49 = vadd.f32 -1.0, %v6334_v12  ;;  %vm6338_vm11 = vcmp.gt.f32.partialorder %v6334_v12, 0.41421357 }
 0x9f0   :  { %v8631_v58 = vpop.f32.mrb[251].mxu1  ;;  %vm6336_vm12 = vcmp.gt.f32.partialorder %v6334_v12, 2.4142137  ;;  %v6356_v29 = vsel %vm6338_vm11, 0.9990265, %v13883_v54  ;;  %v6325_v32 = vadd.f32 %v13429_v22, %v6241_v36  ;;  %v7748_v22 = vld [vmem:[%s13714_s6 + $0x320] sm:$0xff] }
 0x9f1   :  { %v13432_v35 = vadd.f32 %v8631_v58, %v8630_v2  ;;  %10165 = vrcp.f32 %v6342_v26  ;;  %v6358_v21 = vsel %vm6336_vm12, 1.998053, %v6356_v29  ;;  %v6246_v58 = vpop.permute.xlu1 %6245  ;;  %v14016_v36 = vld [vmem:[#allocation141_spill] sm:$0xff] }
 0x9f5   :  { %v10160_v37 = vpop.eup %10159 }
 0x9f6   :  { %v6345_v43 = vsub.f32 0.0, %v10160_v37  ;;  %v6330_v37 = vadd.f32 %v13432_v35, %v6246_v58  ;;  %v7749_v35 = vld [vmem:[%s13714_s6 + $0x328] sm:$0xff] }
 0x9f7   :  { %v10162_v52 = vpop.eup %10161 }
 0x9f8   :  { %v6349_v25 = vmul.f32 %v10162_v52, %v7738_v42 }
 0x9f9   :  { %v10164_v39 = vpop.eup %10163 }
 0x9fa   :  { %v6351_v7 = vsel %vm6337_vm9, %v6349_v25, %v6333_v8  ;;  %v6346_v13 = vsub.f32 0.0, %v10164_v39  ;;  %v7750_v25 = vld [vmem:[%s13714_s6 + $0x330] sm:$0xff]  ;;  %v7753_v39 = vld [vmem:[%s13714_s6 + $0x348] sm:$0xff] }
 0x9fb   :  { %v6353_v50 = vsel %vm6335_vm10, %v6345_v43, %v6351_v7  ;;  %v10166_v45 = vpop.eup %10165  ;;  %v7751_v43 = vld [vmem:[%s13714_s6 + $0x338] sm:$0xff]  ;;  %v7752_v7 = vld [vmem:[%s13714_s6 + $0x340] sm:$0xff] }
 0x9fc   :  { %v6359_v41 = vmul.f32 %v6353_v50, %v6353_v50  ;;  %v6350_v59 = vmul.f32 %v10166_v45, %v7739_v49  ;;  %v7755_v49 = vld [vmem:[%s13714_s6 + $0x358] sm:$0xff]  ;;  %v7756_v45 = vld [vmem:[%s13714_s6 + $0x360] sm:$0xff] }
 0x9fe   :  { %v6361_v17 = vmul.f32 0.10244363, %v6359_v41  ;;  %v6352_v53 = vsel %vm6338_vm11, %v6350_v59, %v6334_v12  ;;  %v7758_v59 = vld [vmem:[%s13714_s6 + $0x370] sm:$0xff] }
 0x9ff   :  { %v6354_v46 = vsel %vm6336_vm12, %v6346_v13, %v6352_v53  ;;  %v7760_v13 = vld [vmem:[%s13714_s6 + $0x380] sm:$0xff]  ;;  %v7761_v53 = vld [vmem:[%s13714_s6 + $0x388] sm:$0xff] }
 0xa00   :  { %v7740_v40 = vadd.f32 -0.17652416, %v6361_v17  ;;  %v6360_v51 = vmul.f32 %v6354_v46, %v6354_v46  ;;  %v7759_v17 = vld [vmem:[%s13714_s6 + $0x378] sm:$0xff] }
 0xa02   :  { %v6365_v20 = vmul.f32 %v7740_v40, %v6359_v41  ;;  %v6362_v63 = vmul.f32 0.10244363, %v6360_v51  ;;  %v7762_v40 = vld [vmem:[%s13714_s6 + $0x390] sm:$0xff] }
 0xa04   :  { %v6367_v33 = vadd.f32 0.25411648, %v6365_v20  ;;  %v7741_v3 = vadd.f32 -0.17652416, %v6362_v63  ;;  %v7765_v20 = vld [vmem:[%s13714_s6 + $0x3a8] sm:$0xff]  ;;  %v7766_v63 = vld [vmem:[%s13714_s6 + $0x3b0] sm:$0xff] }
 0xa06   :  { %v6369_v30 = vmul.f32 %v6367_v33, %v6359_v41  ;;  %v6366_v4 = vmul.f32 %v7741_v3, %v6360_v51  ;;  %v7767_v33 = vld [vmem:[%s13714_s6 + $0x3b8] sm:$0xff]  ;;  %v7768_v3 = vld [vmem:[%s13714_s6 + $0x3c0] sm:$0xff] }
 0xa08   :  { %v7742_v9 = vadd.f32 -0.4239951, %v6369_v30  ;;  %v6368_v11 = vadd.f32 0.25411648, %v6366_v4  ;;  %v7769_v30 = vld [vmem:[%s13714_s6 + $0x3c8] sm:$0xff]  ;;  %v7770_v4 = vld [vmem:[%s13714_s6 + $0x3d0] sm:$0xff] }
 0xa0a   :  { %v6373_v28 = vmul.f32 %v7742_v9, %v6359_v41  ;;  %v6370_v47 = vmul.f32 %v6368_v11, %v6360_v51  ;;  %v7757_v41 = vld [vmem:[%s13714_s6 + $0x368] sm:$0xff]  ;;  %v7771_v9 = vld [vmem:[%s13714_s6 + $0x3d8] sm:$0xff]  ;;  %v7772_v11 = vld [vmem:[%s13714_s6 + $0x3e0] sm:$0xff] }
 0xa0c   :  { %v6375_v1 = vadd.f32 1.272, %v6373_v28  ;;  %v7743_v38 = vadd.f32 -0.4239951, %v6370_v47  ;;  %v7773_v28 = vld [vmem:[%s13714_s6 + $0x3e8] sm:$0xff]  ;;  %v7774_v47 = vld [vmem:[%s13714_s6 + $0x3f0] sm:$0xff] }
 0xa0e   :  { %v6377_v27 = vmul.f32 %v6375_v1, %v6353_v50  ;;  %v6374_v34 = vmul.f32 %v7743_v38, %v6360_v51  ;;  %v7754_v50 = vld [vmem:[%s13714_s6 + $0x350] sm:$0xff]  ;;  %v7764_v51 = vld [vmem:[%s13714_s6 + $0x3a0] sm:$0xff]  ;;  %v7809_v1 = vld [vmem:[%s13715_s7 + $0xc8] sm:$0xff] }
 0xa0f   :  { %6879 = vmatprep.mubr.f32.mxu1 %v7809_v1 }
 0xa10   :  { %v6379_v48 = vadd.f32 %v6377_v27, %v6357_v57  ;;  %v6376_v56 = vadd.f32 1.272, %v6374_v34  ;;  %v14012_v27 = vld [vmem:[#allocation137_spill] sm:$0xff] }
 0xa12   :  { %v6383_v18 = vsub.f32 0.0, %v6379_v48  ;;  %v6378_v31 = vmul.f32 %v6376_v56, %v6354_v46  ;;  %v7763_v46 = vld [vmem:[%s13714_s6 + $0x398] sm:$0xff] }
 0xa14   :  { %v6385_v61 = vsel %vm6381_vm13, %v6383_v18, %v6379_v48  ;;  %v6380_v6 = vadd.f32 %v6378_v31, %v6358_v21  ;;  %v14013_v48 = vld [vmem:[#allocation138_spill] sm:$0xff] }
 0xa15   :  { %v6387_v5 = vmul.f32 1.442695, %v6385_v61 }
 0xa16   :  { %v6384_v24 = vsub.f32 0.0, %v6380_v6 }
 0xa17   :  { %10167 = vpow2.f32 %v6387_v5 }
 0xa18   :  { %v6386_v15 = vsel %vm6382_vm14, %v6384_v24, %v6380_v6  ;;  %v14015_v24 = vld [vmem:[#allocation140_spill] sm:$0xff] }
 0xa19   :  { %v6389_v8 = vmul.f32 1.442695, %v6386_v15  ;;  %v6962_v14 = vadd.f32 %v6386_v15, %v6385_v61  ;;  %v14014_v61 = vld [vmem:[#allocation139_spill] sm:$0xff] }
 0xa1b   :  { %10169 = vpow2.f32 %v6389_v8  ;;  %v13447_v19 = vadd.f32 %v6962_v14, %v13414_v44  ;;  %v7745_v44 = vld [vmem:[%s13714_s6 + $0x308] sm:$0xff] }
 0xa21   :  { %v10168_v55 = vpop.eup %10167 }
 0xa22   :  { %v6391_v12 = vmul.f32 %v10168_v55, %v13418_v62  ;;  %v7746_v62 = vld [vmem:[%s13714_s6 + $0x310] sm:$0xff] }
 0xa24   :  { %v6393_v2 = vadd.f32 %v6391_v12, %v6325_v32 }
 0xa25   :  { %v10170_v26 = vpop.eup %10169 }
 0xa26   :  { %6968 = vst [vmem:[#allocation2 + $0x10] sm:$0xff] %v6393_v2  ;;  %v6392_v16 = vmul.f32 %v10170_v26, %v13424_v60  ;;  %v7747_v60 = vld [vmem:[%s13714_s6 + $0x318] sm:$0xff] }
 0xa27   :  { %v14017_v26 = vld [vmem:[#allocation142_spill] sm:$0xff] }
 0xa28   :  { %v6394_v42 = vadd.f32 %v6392_v16, %v6330_v37 }
 0xa2a   :  { %6967 = vst [vmem:[#allocation2 + $0x8] sm:$0xff] %v6394_v42  ;;  %v9781_v52 = vpack.c.bf16 %v6394_v42, %v6393_v2 }
 0xa2c   :  { %9782 = vmatprep.subr.bf16.mxu0 %v9781_v52 }
 0xa2d   :  { %9784 = vmatpush3.bf16.msra.mxu0 %v9781_v52  ;;  %v14018_v52 = vld [vmem:[#allocation143_spill] sm:$0xff] }
 0xa30   :  { %9474 = vmatmul.mubr.msk.f32.vlgmr.msra.gmra.mrb[224].mxu0 %vm2451_vm2, %v7745_v44 }
 0xa31   :  { %9476 = vmatprep.mubr.msk.f32.mxu0 %vm2451_vm2, %v7746_v62 }
 0xa34   :  { %9477 = vmatmul.mubr.msk.f32.gmra.mrb[226].mxu0 %vm2451_vm2, %v7747_v60 }
 0xa35   :  { %9479 = vmatprep.mubr.msk.f32.mxu0 %vm2451_vm2, %v7748_v22  ;;  %v14019_v22 = vld [vmem:[#allocation144_spill] sm:$0xff] }
 0xa38   :  { %9480 = vmatmul.mubr.msk.f32.gmra.mrb[228].mxu0 %vm2451_vm2, %v7749_v35 }
 0xa39   :  { %9482 = vmatprep.mubr.msk.f32.mxu0 %vm2451_vm2, %v7750_v25 }
 0xa3c   :  { %9483 = vmatmul.mubr.msk.f32.gmra.mrb[230].mxu0 %vm2451_vm2, %v7751_v43 }
 0xa3d   :  { %9485 = vmatprep.mubr.msk.f32.mxu0 %vm2451_vm2, %v7752_v7 }
 0xa40   :  { %9486 = vmatmul.mubr.msk.f32.gmra.mrb[232].mxu0 %vm2451_vm2, %v7753_v39  ;;  %v14020_v39 = vld [vmem:[#allocation145_spill] sm:$0xff] }
 0xa41   :  { %9488 = vmatprep.mubr.msk.f32.mxu0 %vm2451_vm2, %v7754_v50 }
 0xa44   :  { %9489 = vmatmul.mubr.msk.f32.gmra.mrb[234].mxu0 %vm2451_vm2, %v7755_v49 }
 0xa45   :  { %9491 = vmatprep.mubr.msk.f32.mxu0 %vm2451_vm2, %v7756_v45 }
 0xa48   :  { %9492 = vmatmul.mubr.msk.f32.gmra.mrb[236].mxu0 %vm2451_vm2, %v7757_v41  ;;  %v14021_v41 = vld [vmem:[#allocation146_spill] sm:$0xff] }
 0xa49   :  { %9494 = vmatprep.mubr.msk.f32.mxu0 %vm2451_vm2, %v7758_v59 }
 0xa4c   :  { %9495 = vmatmul.mubr.msk.f32.gmra.mrb[238].mxu0 %vm2451_vm2, %v7759_v17 }
 0xa4d   :  { %9497 = vmatprep.mubr.msk.f32.mxu0 %vm2451_vm2, %v7760_v13 }
 0xa50   :  { %9498 = vmatmul.mubr.msk.f32.gmra.mrb[240].mxu0 %vm2451_vm2, %v7761_v53 }
 0xa51   :  { %9500 = vmatprep.mubr.msk.f32.mxu0 %vm2451_vm2, %v7762_v40  ;;  %v14022_v40 = vld [vmem:[#allocation147_spill] sm:$0xff] }
 0xa54   :  { %9501 = vmatmul.mubr.msk.f32.gmra.mrb[242].mxu0 %vm2451_vm2, %v7763_v46 }
 0xa55   :  { %9503 = vmatprep.mubr.msk.f32.mxu0 %vm2451_vm2, %v7764_v51 }
 0xa58   :  { %9504 = vmatmul.mubr.msk.f32.gmra.mrb[244].mxu0 %vm2451_vm2, %v7765_v20 }
 0xa59   :  { %9506 = vmatprep.mubr.msk.f32.mxu0 %vm2451_vm2, %v7766_v63  ;;  %v14023_v63 = vld [vmem:[#allocation148_spill] sm:$0xff] }
 0xa5c   :  { %9507 = vmatmul.mubr.msk.f32.gmra.mrb[246].mxu0 %vm2451_vm2, %v7767_v33 }
 0xa5d   :  { %9509 = vmatprep.mubr.msk.f32.mxu0 %vm2451_vm2, %v7768_v3 }
 0xa60   :  { %9510 = vmatmul.mubr.msk.f32.gmra.mrb[248].mxu0 %vm2451_vm2, %v7769_v30 }
 0xa61   :  { %9512 = vmatprep.mubr.msk.f32.mxu0 %vm2451_vm2, %v7770_v4 }
 0xa64   :  { %9513 = vmatmul.mubr.msk.f32.gmra.mrb[250].mxu0 %vm2451_vm2, %v7771_v9  ;;  %v14024_v9 = vld [vmem:[#allocation149_spill] sm:$0xff] }
 0xa65   :  { %9515 = vmatprep.mubr.msk.f32.mxu0 %vm2451_vm2, %v7772_v11 }
 0xa68   :  { %9516 = vmatmul.mubr.msk.f32.gmra.mrb[252].mxu0 %vm2451_vm2, %v7773_v28 }
 0xa69   :  { %9518 = vmatprep.mubr.msk.f32.mxu0 %vm2451_vm2, %v7774_v47 }
 0xa6c   :  { %9519 = vmatmul.mubr.msk.f32.gmra.mrb[254].mxu0 %vm2451_vm2, %v7775_v23  ;;  %v14025_v23 = vld [vmem:[#allocation150_spill] sm:$0xff] }
 0xb03   :  { %v9475_v38 = vpop.f32.mrb[224].mxu0 }
 0xb04   :  { %v6596_v57 = vadd.f32 %v9475_v38, %v14012_v27  ;;  %v6590_v34 = vpop.f32.mrb[225].mxu0 }
 0xb05   :  { %v6591_v29 = vadd.f32 %v6590_v34, %v14013_v48  ;;  %v14026_v34 = vld [vmem:[#allocation151_spill] sm:$0xff] }
 0xb06   :  { %v6750_v56 = vmax.f32 %v6596_v57, 0.0 }
 0xb07   :  { %v6749_v18 = vmax.f32 %v6591_v29, 0.0  ;;  %v9478_v31 = vpop.f32.mrb[226].mxu0 }
 0xb08   :  { %v6606_v21 = vadd.f32 %v9478_v31, %v14014_v61  ;;  %v6600_v5 = vpop.f32.mrb[227].mxu0 }
 0xb09   :  { %v13583_v6 = vpack.c.bf16 %v6750_v56, %v6749_v18  ;;  %v6601_v15 = vadd.f32 %v6600_v5, %v14015_v24  ;;  %v14027_v18 = vld [vmem:[#allocation152_spill] sm:$0xff]  ;;  %v14028_v24 = vld [vmem:[#allocation153_spill] sm:$0xff] }
 0xb0a   :  { %v6752_v8 = vmax.f32 %v6606_v21, 0.0 }
 0xb0b   :  { %v6751_v14 = vmax.f32 %v6601_v15, 0.0  ;;  %v9481_v55 = vpop.f32.mrb[228].mxu0 }
 0xb0c   :  { %v6616_v32 = vadd.f32 %v9481_v55, %v14016_v36  ;;  %v6610_v12 = vpop.f32.mrb[229].mxu0  ;;  %v14029_v55 = vld [vmem:[#allocation154_spill] sm:$0xff] }
 0xb0d   :  { %v13587_v2 = vpack.c.bf16 %v6752_v8, %v6751_v14  ;;  %v6611_v58 = vadd.f32 %v6610_v12, %v14017_v26 }
 0xb0e   :  { %v6754_v37 = vmax.f32 %v6616_v32, 0.0 }
 0xb0f   :  { %v6753_v16 = vmax.f32 %v6611_v58, 0.0  ;;  %v9484_v42 = vpop.f32.mrb[230].mxu0  ;;  %v14030_v58 = vld [vmem:[#allocation155_spill] sm:$0xff] }
 0xb10   :  { %v6626_v44 = vadd.f32 %v9484_v42, %v14018_v52  ;;  %v6620_v62 = vpop.f32.mrb[231].mxu0  ;;  %v14031_v52 = vld [vmem:[#allocation156_spill] sm:$0xff] }
 0xb11   :  { %v13591_v60 = vpack.c.bf16 %v6754_v37, %v6753_v16  ;;  %v6621_v35 = vadd.f32 %v6620_v62, %v14019_v22 }
 0xb12   :  { %v6756_v25 = vmax.f32 %v6626_v44, 0.0 }
 0xb13   :  { %v6755_v43 = vmax.f32 %v6621_v35, 0.0  ;;  %v9487_v7 = vpop.f32.mrb[232].mxu0 }
 0xb14   :  { %v6636_v50 = vadd.f32 %v9487_v7, %v14020_v39  ;;  %v6630_v49 = vpop.f32.mrb[233].mxu0 }
 0xb15   :  { %v13595_v45 = vpack.c.bf16 %v6756_v25, %v6755_v43  ;;  %v6631_v59 = vadd.f32 %v6630_v49, %v14021_v41  ;;  %v14032_v25 = vld [vmem:[#allocation157_spill] sm:$0xff] }
 0xb16   :  { %v6758_v17 = vmax.f32 %v6636_v50, 0.0  ;;  %v14033_v50 = vld [vmem:[#allocation158_spill] sm:$0xff] }
 0xb17   :  { %v6757_v13 = vmax.f32 %v6631_v59, 0.0  ;;  %v9490_v53 = vpop.f32.mrb[234].mxu0 }
 0xb18   :  { %v6646_v46 = vadd.f32 %v9490_v53, %v14022_v40  ;;  %v6640_v51 = vpop.f32.mrb[235].mxu0 }
 0xb19   :  { %v13599_v20 = vpack.c.bf16 %v6758_v17, %v6757_v13  ;;  %v6641_v33 = vadd.f32 %v6640_v51, %v14023_v63  ;;  %v14034_v13 = vld [vmem:[#allocation159_spill] sm:$0xff]  ;;  %v14035_v51 = vld [vmem:[#allocation160_spill] sm:$0xff] }
 0xb1a   :  { %v6760_v3 = vmax.f32 %v6646_v46, 0.0 }
 0xb1b   :  { %v6759_v30 = vmax.f32 %v6641_v33, 0.0  ;;  %v9493_v4 = vpop.f32.mrb[236].mxu0 }
 0xb1c   :  { %v6656_v11 = vadd.f32 %v9493_v4, %v14024_v9  ;;  %v6650_v28 = vpop.f32.mrb[237].mxu0 }
 0xb1d   :  { %v13603_v47 = vpack.c.bf16 %v6760_v3, %v6759_v30  ;;  %v6651_v1 = vadd.f32 %v6650_v28, %v14025_v23  ;;  %v14037_v28 = vld [vmem:[#allocation162_spill] sm:$0xff] }
 0xb1e   :  { %v6762_v38 = vmax.f32 %v6656_v11, 0.0 }
 0xb1f   :  { %v6761_v27 = vmax.f32 %v6651_v1, 0.0  ;;  %v9496_v57 = vpop.f32.mrb[238].mxu0 }
 0xb20   :  { %v6666_v48 = vadd.f32 %v9496_v57, %v14026_v34  ;;  %v6660_v29 = vpop.f32.mrb[239].mxu0 }
 0xb21   :  { %v13607_v56 = vpack.c.bf16 %v6762_v38, %v6761_v27  ;;  %v6661_v31 = vadd.f32 %v6660_v29, %v14027_v18  ;;  %v14039_v29 = vld [vmem:[#allocation164_spill] sm:$0xff] }
 0xb22   :  { %v6764_v61 = vmax.f32 %v6666_v48, 0.0 }
 0xb23   :  { %v6763_v21 = vmax.f32 %v6661_v31, 0.0  ;;  %v9499_v5 = vpop.f32.mrb[240].mxu0 }
 0xb24   :  { %v6676_v15 = vadd.f32 %v9499_v5, %v14028_v24  ;;  %v6670_v8 = vpop.f32.mrb[241].mxu0 }
 0xb25   :  { %v13611_v14 = vpack.c.bf16 %v6764_v61, %v6763_v21  ;;  %v6671_v36 = vadd.f32 %v6670_v8, %v14029_v55  ;;  %v14041_v8 = vld [vmem:[#allocation166_spill] sm:$0xff] }
 0xb26   :  { %v6766_v32 = vmax.f32 %v6676_v15, 0.0 }
 0xb27   :  { %v6765_v12 = vmax.f32 %v6671_v36, 0.0  ;;  %v9502_v26 = vpop.f32.mrb[242].mxu0 }
 0xb28   :  { %v6686_v37 = vadd.f32 %v9502_v26, %v14030_v58  ;;  %v6680_v16 = vpop.f32.mrb[243].mxu0 }
 0xb29   :  { %v9785_v42 = vpack.c.bf16 %v6766_v32, %v6765_v12  ;;  %v6681_v44 = vadd.f32 %v6680_v16, %v14031_v52  ;;  %v14043_v16 = vld [vmem:[#allocation168_spill] sm:$0xff] }
 0xb2a   :  { %v6768_v62 = vmax.f32 %v6686_v37, 0.0 }
 0xb2b   :  { %v6767_v22 = vmax.f32 %v6681_v44, 0.0  ;;  %v9505_v35 = vpop.f32.mrb[244].mxu0  ;;  %9786 = vmatprep.subr.bf16.mxu1 %v9785_v42 }
 0xb2c   :  { %v6696_v43 = vadd.f32 %v9505_v35, %v14032_v25  ;;  %v6690_v7 = vpop.f32.mrb[245].mxu0  ;;  %9788 = vmatpush3.bf16.msra.mxu1 %v13583_v6  ;;  %v14036_v6 = vld [vmem:[#allocation161_spill] sm:$0xff]  ;;  %v7815_v35 = vld [vmem:[%s13715_s7 + $0xf8] sm:$0xff] }
 0xb2d   :  { %v9789_v39 = vpack.c.bf16 %v6768_v62, %v6767_v22  ;;  %v6691_v49 = vadd.f32 %v6690_v7, %v14033_v50  ;;  %v7808_v62 = vld [vmem:[%s13715_s7 + $0xc0] sm:$0xff]  ;;  %v7810_v22 = vld [vmem:[%s13715_s7 + $0xd0] sm:$0xff]  ;;  %v6798_v50 = vpop.permute.xlu0 %6797 }
 0xb2e   :  { %v6770_v41 = vmax.f32 %v6696_v43, 0.0  ;;  %v7814_v25 = vld [vmem:[%s13715_s7 + $0xf0] sm:$0xff] }
 0xb2f   :  { %v6769_v59 = vmax.f32 %v6691_v49, 0.0  ;;  %v9508_v17 = vpop.f32.mrb[246].mxu0  ;;  %9790 = vmatprep.subr.bf16.mxu1 %v9789_v39 }
 0xb30   :  { %v6706_v53 = vadd.f32 %v9508_v17, %v14034_v13  ;;  %v6700_v40 = vpop.f32.mrb[247].mxu0  ;;  %9792 = vmatpush3.bf16.msra.mxu1 %v13587_v2  ;;  %v14038_v2 = vld [vmem:[#allocation163_spill] sm:$0xff] }
 0xb31   :  { %v9793_v46 = vpack.c.bf16 %v6770_v41, %v6769_v59  ;;  %v6701_v63 = vadd.f32 %v6700_v40, %v14035_v51 }
 0xb32   :  { %v6772_v33 = vmax.f32 %v6706_v53, 0.0  ;;  %v6803_v53 = vpop.permute.xlu1 %6802 }
 0xb33   :  { %v6771_v3 = vmax.f32 %v6701_v63, 0.0  ;;  %v9511_v30 = vpop.f32.mrb[248].mxu0  ;;  %9794 = vmatprep.subr.bf16.mxu1 %v9793_v46 }
 0xb34   :  { %v6716_v4 = vadd.f32 %v9511_v30, %v14036_v6  ;;  %v6710_v9 = vpop.f32.mrb[249].mxu0  ;;  %9796 = vmatpush3.bf16.msra.mxu1 %v13591_v60  ;;  %v14040_v60 = vld [vmem:[#allocation165_spill] sm:$0xff] }
 0xb35   :  { %v9797_v11 = vpack.c.bf16 %v6772_v33, %v6771_v3  ;;  %v6711_v23 = vadd.f32 %v6710_v9, %v14037_v28 }
 0xb36   :  { %v6774_v1 = vmax.f32 %v6716_v4, 0.0 }
 0xb37   :  { %v6773_v38 = vmax.f32 %v6711_v23, 0.0  ;;  %v9514_v27 = vpop.f32.mrb[250].mxu0  ;;  %9798 = vmatprep.subr.bf16.mxu1 %v9797_v11 }
 0xb38   :  { %v6726_v57 = vadd.f32 %v9514_v27, %v14038_v2  ;;  %v6720_v34 = vpop.f32.mrb[251].mxu0  ;;  %9800 = vmatpush3.bf16.msra.mxu1 %v13595_v45  ;;  %v14042_v45 = vld [vmem:[#allocation167_spill] sm:$0xff] }
 0xb39   :  { %v9801_v48 = vpack.c.bf16 %v6774_v1, %v6773_v38  ;;  %v6721_v18 = vadd.f32 %v6720_v34, %v14039_v29 }
 0xb3a   :  { %v6776_v31 = vmax.f32 %v6726_v57, 0.0 }
 0xb3b   :  { %v6775_v61 = vmax.f32 %v6721_v18, 0.0  ;;  %v9517_v21 = vpop.f32.mrb[252].mxu0  ;;  %9802 = vmatprep.subr.bf16.mxu1 %v9801_v48 }
 0xb3c   :  { %v6736_v5 = vadd.f32 %v9517_v21, %v14040_v60  ;;  %v6730_v24 = vpop.f32.mrb[253].mxu0  ;;  %9804 = vmatpush3.bf16.msra.mxu1 %v13599_v20 }
 0xb3d   :  { %v9805_v15 = vpack.c.bf16 %v6776_v31, %v6775_v61  ;;  %v6731_v55 = vadd.f32 %v6730_v24, %v14041_v8 }
 0xb3e   :  { %v6778_v36 = vmax.f32 %v6736_v5, 0.0 }
 0xb3f   :  { %v6777_v32 = vmax.f32 %v6731_v55, 0.0  ;;  %v9520_v12 = vpop.f32.mrb[254].mxu0  ;;  %9806 = vmatprep.subr.bf16.mxu1 %v9805_v15 }
 0xb40   :  { %v6746_v26 = vadd.f32 %v9520_v12, %v14042_v45  ;;  %v6740_v58 = vpop.f32.mrb[255].mxu0  ;;  %9808 = vmatpush3.bf16.msra.mxu1 %v13603_v47  ;;  %v7811_v47 = vld [vmem:[%s13715_s7 + $0xd8] sm:$0xff] }
 0xb41   :  { %v9809_v37 = vpack.c.bf16 %v6778_v36, %v6777_v32  ;;  %v6741_v42 = vadd.f32 %v6740_v58, %v14043_v16 }
 0xb42   :  { %v6780_v52 = vmax.f32 %v6746_v26, 0.0 }
 0xb43   :  { %v6779_v44 = vmax.f32 %v6741_v42, 0.0  ;;  %9810 = vmatprep.subr.bf16.mxu1 %v9809_v37 }
 0xb44   :  { %9812 = vmatpush3.bf16.msra.mxu1 %v13607_v56  ;;  %v7813_v56 = vld [vmem:[%s13715_s7 + $0xe8] sm:$0xff] }
 0xb45   :  { %v9813_v20 = vpack.c.bf16 %v6780_v52, %v6779_v44 }
 0xb47   :  { %9814 = vmatprep.subr.bf16.mxu1 %v9813_v20 }
 0xb48   :  { %9816 = vmatpush3.bf16.msra.mxu1 %v13611_v14  ;;  %v7812_v14 = vld [vmem:[%s13715_s7 + $0xe0] sm:$0xff]  ;;  %s10235_s7 = smov [#allocation4]  }
 0xb49   :  { %s6989_s22 = sshll.u32 %s10235_s7, 4  ;;  %s6990_s22 = int_to_ptr.vmem [resolvable:$true] %s6989_s22 }
 0xb4a   :  { %s10185_s2 = scalar_lea.vmem %s6990_s22, 128  ;;  %p10190_p1 = scmp.lt.s32.totalorder %s6990_s22, %s6990_s22 }
 0xb4b   :  { %6880 = vmatmul.mubr.f32.vlgmr.msra.gmra.mrb[252].mxu1 %v7808_v62  ;;  %p10186_p0 = scmp.ne.s32.totalorder %s6990_s22, %s10185_s2  ;;  %p10191_p2 = scmp.lt.s32.totalorder %s10185_s2, %s10185_s2 }
 0xb4c   :  { %6884 = vmatprep.mubr.f32.mxu1 %v7811_v47 }
 0xb4d   :  { %p10192_p3 = por %p10191_p2, %p10190_p1 }
 0xb4f   :  { %6885 = vmatmul.mubr.f32.gmra.mrb[254].mxu1 %v7810_v22  ;;  %p10193_p4 = pnand %p10192_p3, %p10186_p0 }
 0xb50   :  { %6889 = vmatprep.mubr.f32.mxu1 %v7813_v56 }
 0xb53   :  { %6890 = vmatmul.mubr.f32.gmra.mrb[0].mxu1 %v7812_v14 }
 0xb54   :  { %6894 = vmatprep.mubr.f32.mxu1 %v7815_v35 }
 0xb57   :  { %6895 = vmatmul.mubr.f32.gmra.mrb[2].mxu1 %v7814_v25 }
 0xc1e   :  { %v8699_v43 = vpop.f32.mrb[252].mxu1 }
 0xc1f   :  { %v8700_v7 = vpop.f32.mrb[253].mxu1 }
 0xc20   :  { %v8701_v39 = vadd.f32 %v8700_v7, %v8699_v43 }
 0xc22   :  { %v13657_v49 = vadd.f32 %v8701_v39, %v6798_v50  ;;  %v8702_v41 = vpop.f32.mrb[254].mxu1 }
 0xc23   :  { %v8703_v59 = vpop.f32.mrb[255].mxu1 }
 0xc24   :  { %v6900_v17 = vand.u32 2147483647, %v13657_v49  ;;  %v8704_v13 = vadd.f32 %v8703_v59, %v8702_v41  ;;  %vm6948_vm3 = vcmp.lt.f32.partialorder %v13657_v49, 0.0 }
 0xc26   :  { %v6908_v40 = vadd.f32 1.0, %v6900_v17  ;;  %v8705_v46 = vpop.f32.mrb[0].mxu1  ;;  %10171 = vrcp.f32 %v6900_v17  ;;  %v13660_v51 = vadd.f32 %v8704_v13, %v6803_v53  ;;  %v7820_v28 = vadd.f32 -1.0, %v6900_v17 }
 0xc27   :  { %v8706_v63 = vpop.f32.mrb[1].mxu1  ;;  %vm6904_vm2 = vcmp.gt.f32.partialorder %v6900_v17, 0.41421357  ;;  %vm6902_vm15 = vcmp.gt.f32.partialorder %v6900_v17, 2.4142137 }
 0xc28   :  { %10173 = vrcp.f32 %v6908_v40  ;;  %v13662_v33 = vadd.f32 %v8706_v63, %v8705_v46  ;;  %v6901_v3 = vand.u32 2147483647, %v13660_v51  ;;  %v6922_v16 = vsel %vm6904_vm2, 0.9990265, %v13883_v54 }
 0xc29   :  { %v6924_v20 = vsel %vm6902_vm15, 1.998053, %v6922_v16  ;;  %vm6949_vm4 = vcmp.lt.f32.partialorder %v13660_v51, 0.0 }
 0xc2a   :  { %v8708_v30 = vpop.f32.mrb[2].mxu1  ;;  %v6909_v6 = vadd.f32 1.0, %v6901_v3  ;;  %10175 = vrcp.f32 %v6901_v3  ;;  %v7821_v34 = vadd.f32 -1.0, %v6901_v3  ;;  %vm6905_vm0 = vcmp.gt.f32.partialorder %v6901_v3, 0.41421357 }
 0xc2b   :  { %v8709_v4 = vpop.f32.mrb[3].mxu1  ;;  %vm6903_vm1 = vcmp.gt.f32.partialorder %v6901_v3, 2.4142137  ;;  %v6923_v22 = vsel %vm6905_vm0, 0.9990265, %v13883_v54 }
 0xc2c   :  { %v13665_v9 = vadd.f32 %v8709_v4, %v8708_v30  ;;  %10177 = vrcp.f32 %v6909_v6  ;;  %v6925_v43 = vsel %vm6903_vm1, 1.998053, %v6923_v22 }
 0xc30   :  { %v10172_v11 = vpop.eup %10171 }
 0xc31   :  { %v6912_v38 = vsub.f32 0.0, %v10172_v11 }
 0xc32   :  { %v10174_v23 = vpop.eup %10173 }
 0xc33   :  { %v6916_v1 = vmul.f32 %v10174_v23, %v7820_v28 }
 0xc34   :  { %v10176_v2 = vpop.eup %10175 }
 0xc35   :  { %v6918_v27 = vsel %vm6904_vm2, %v6916_v1, %v6900_v17  ;;  %v6913_v61 = vsub.f32 0.0, %v10176_v2 }
 0xc36   :  { %v6920_v57 = vsel %vm6902_vm15, %v6912_v38, %v6918_v27  ;;  %v10178_v48 = vpop.eup %10177 }
 0xc37   :  { %v6926_v29 = vmul.f32 %v6920_v57, %v6920_v57  ;;  %v6917_v18 = vmul.f32 %v10178_v48, %v7821_v34 }
 0xc39   :  { %v6928_v31 = vmul.f32 0.10244363, %v6926_v29  ;;  %v6919_v21 = vsel %vm6905_vm0, %v6917_v18, %v6901_v3 }
 0xc3a   :  { %v6921_v5 = vsel %vm6903_vm1, %v6913_v61, %v6919_v21 }
 0xc3b   :  { %v7822_v60 = vadd.f32 -0.17652416, %v6928_v31  ;;  %v6927_v24 = vmul.f32 %v6921_v5, %v6921_v5 }
 0xc3d   :  { %v6932_v15 = vmul.f32 %v7822_v60, %v6926_v29  ;;  %v6929_v8 = vmul.f32 0.10244363, %v6927_v24 }
 0xc3f   :  { %v6934_v55 = vadd.f32 0.25411648, %v6932_v15  ;;  %v7823_v36 = vadd.f32 -0.17652416, %v6929_v8 }
 0xc41   :  { %v6936_v32 = vmul.f32 %v6934_v55, %v6926_v29  ;;  %v6933_v12 = vmul.f32 %v7823_v36, %v6927_v24 }
 0xc43   :  { %v7824_v45 = vadd.f32 -0.4239951, %v6936_v32  ;;  %v6935_v26 = vadd.f32 0.25411648, %v6933_v12 }
 0xc45   :  { %v6940_v58 = vmul.f32 %v7824_v45, %v6926_v29  ;;  %v6937_v37 = vmul.f32 %v6935_v26, %v6927_v24 }
 0xc47   :  { %v6942_v42 = vadd.f32 1.272, %v6940_v58  ;;  %v7825_v52 = vadd.f32 -0.4239951, %v6937_v37 }
 0xc49   :  { %v6944_v44 = vmul.f32 %v6942_v42, %v6920_v57  ;;  %v6941_v62 = vmul.f32 %v7825_v52, %v6927_v24 }
 0xc4b   :  { %v6946_v47 = vadd.f32 %v6944_v44, %v6924_v20  ;;  %v6943_v56 = vadd.f32 1.272, %v6941_v62 }
 0xc4d   :  { %v6950_v14 = vsub.f32 0.0, %v6946_v47  ;;  %v6945_v35 = vmul.f32 %v6943_v56, %v6921_v5 }
 0xc4f   :  { %v6952_v25 = vsel %vm6948_vm3, %v6950_v14, %v6946_v47  ;;  %v6947_v39 = vadd.f32 %v6945_v35, %v6925_v43 }
 0xc50   :  { %v6954_v7 = vmul.f32 1.442695, %v6952_v25 }
 0xc51   :  { %v6951_v50 = vsub.f32 0.0, %v6947_v39 }
 0xc52   :  { %10179 = vpow2.f32 %v6954_v7 }
 0xc53   :  { %v6953_v41 = vsel %vm6949_vm4, %v6951_v50, %v6947_v39 }
 0xc54   :  { %v6956_v59 = vmul.f32 1.442695, %v6953_v41  ;;  %v6964_v17 = vadd.f32 %v6953_v41, %v6952_v25 }
 0xc56   :  { %10181 = vpow2.f32 %v6956_v59  ;;  %v6965_v54 = vadd.f32 %v6964_v17, %v13447_v19 }
 0xc58   :  { %6970 = vst [vmem:[#allocation4] sm:$0xff] %v6965_v54 }
 0xc59   :  { %10196 = shalt.err (!%p10193_p4)
}
 0xc5a   :  { %s10197_s24 = scalar_lea.hbm %s13718_s10, 128 }
 0xc5b   :  { %p10198_p5 = scmp.ne.s32.totalorder %s13718_s10, %s10197_s24  ;;  %p10201_p6 = scmp.lt.u32.totalorder %s10197_s24, %s13718_s10 }
 0xc5d   :  { %p10203_p7 = pnand %p10201_p6, %p10198_p5 }
 0xc5f   :  { %10206 = shalt.err (!%p10203_p7)
}
 0xc60   :  { %6992 = dma.vmem_to_hbm [thread:$0]  %s6990_s22, 128, %s13718_s10, [#allocation5]   ;;  %v10180_v19 = vpop.eup %10179  ;;  %v6808_v49 = vpop.permute.xlu0 %6807 }
 0xc61   :  { %v6892_v13 = vadd.f32 %v13662_v33, %v6808_v49  ;;  %v6958_v53 = vmul.f32 %v10180_v19, %v12969_v10  ;;  %v10182_v46 = vpop.eup %10181  ;;  %v6813_v51 = vpop.permute.xlu1 %6812  ;;  %s10236_s8 = smov [#allocation2]  }
 0xc62   :  { %s6976_s0 = sshll.u32 %s10236_s8, 4  ;;  %v6897_v63 = vadd.f32 %v13665_v9, %v6813_v51  ;;  %v6959_v3 = vmul.f32 %v10182_v46, %v12965_v0  ;;  %s6977_s0 = int_to_ptr.vmem [resolvable:$true] %s6976_s0 }
 0xc63   :  { %v6960_v40 = vadd.f32 %v6958_v53, %v6892_v13  ;;  %s10207_s10 = scalar_lea.vmem %s6977_s0, 512  ;;  %p10212_p9 = scmp.lt.s32.totalorder %s6977_s0, %s6977_s0 }
 0xc64   :  { %v6961_v30 = vadd.f32 %v6959_v3, %v6897_v63  ;;  %p10208_p8 = scmp.ne.s32.totalorder %s6977_s0, %s10207_s10  ;;  %p10213_p10 = scmp.lt.s32.totalorder %s10207_s10, %s10207_s10 }
 0xc65   :  { %6969 = vst [vmem:[#allocation2 + $0x18] sm:$0xff] %v6960_v40 }
 0xc66   :  { %6966 = vst [vmem:[#allocation2] sm:$0xff] %v6961_v30  ;;  %p10214_p11 = por %p10213_p10, %p10212_p9 }
 0xc68   :  { %p10215_p12 = pnand %p10214_p11, %p10208_p8 }
 0xc6a   :  { %10218 = shalt.err (!%p10215_p12)
}
 0xc6b   :  { %s10219_s11 = scalar_lea.hbm %s13717_s9, 512 }
 0xc6c   :  { %p10220_p13 = scmp.ne.s32.totalorder %s13717_s9, %s10219_s11  ;;  %p10223_p0 = scmp.lt.u32.totalorder %s10219_s11, %s13717_s9 }
 0xc6e   :  { %p10225_p1 = pnand %p10223_p0, %p10220_p13 }
 0xc70   :  { %10228 = shalt.err (!%p10225_p1)
}
 0xc71   :  { %s10237_s15 = smov 128   ;;  %s10238_s16 = smov 8  }
 0xc72   :  { %6982 = dma.vmem_to_hbm [thread:$0]  %s6977_s0, 512, %s13717_s9, [#allocation3], %s10237_s15, %s10237_s15, %s10238_s16  }
 0xc73   :  { %10229 = dma.done.wait [#allocation3], 512  }
 0xc74   :  { %10230 = vsyncadd [#allocation3], 4294966784 }
 0xc75   :  { %10231 = dma.done.wait [#allocation5], 128  }
 0xc76   :  { %10232 = vsyncadd [#allocation5], 4294967168 }
 0xc77   :  { %6999 = vsyncpa [#allocation3], 1 }
 0xc78   :  { %7000 = vsyncpa [#allocation5], 1 }

</bundles_post_ra>
